<compile_context>
chip_gen: v6e
topology: v6e:2x2x1
jax: 0.10.0
libtpu: 0.0.40
codegen_flags: <defaults>
</compile_context>

<pallas_src>
import functools

import jax
import jax.numpy as jnp
from jax.experimental import pallas as pl
from jax.experimental.pallas import tpu as pltpu


def _round_up(a, b):
    return (a + b - 1) // b * b


def _make_kernel(D, H, W, DH_pad, W_pad):
    def kernel(params_ref, pts_ref, vol_ref, out_ref):
        # params (SMEM): [lo_x, lo_y, lo_z, inv_x, inv_y, inv_z, thresh, 0]
        lo_x = params_ref[0]
        lo_y = params_ref[1]
        lo_z = params_ref[2]
        inv_x = params_ref[3]
        inv_y = params_ref[4]
        inv_z = params_ref[5]
        thresh = params_ref[6]

        x = pts_ref[0:1, :]               # (1, T) lane-dense
        y = pts_ref[1:2, :]
        z = pts_ref[2:3, :]
        vmask = pts_ref[3:4, :]           # validity (0.0 / 1.0)
        T = x.shape[1]

        # normalize_coord: (xyz - aabb[0]) * invgridSize - 1
        gx = (x - lo_x) * inv_x - 1.0
        gy = (y - lo_y) * inv_y - 1.0
        gz = (z - lo_z) * inv_z - 1.0

        # grid_sample(align_corners=True): unnormalize to voxel coordinates
        ix = (gx + 1.0) * (0.5 * (W - 1))
        iy = (gy + 1.0) * (0.5 * (H - 1))
        iz = (gz + 1.0) * (0.5 * (D - 1))

        ix0f = jnp.floor(ix)
        iy0f = jnp.floor(iy)
        iz0f = jnp.floor(iz)
        fx = ix - ix0f
        fy = iy - iy0f
        fz = iz - iz0f

        def corner(i0f, f, n):
            i0 = i0f.astype(jnp.int32)
            i1 = i0 + 1
            # padding_mode='zeros': out-of-bounds corners get zero weight,
            # indices are clamped so every read stays inside the volume.
            w0 = jnp.where((i0 >= 0) & (i0 < n), 1.0 - f, 0.0)
            w1 = jnp.where((i1 >= 0) & (i1 < n), f, 0.0)
            c0 = jnp.clip(i0, 0, n - 1)
            c1 = jnp.clip(i1, 0, n - 1)
            return w0, w1, c0, c1

        wx0, wx1, x0, x1 = corner(ix0f, fx, W)
        wy0, wy1, y0, y1 = corner(iy0f, fy, H)
        wz0, wz1, z0, z1 = corner(iz0f, fz, D)

        # Stage 1: merged weighted one-hot over the (z, y) row axis: all 4
        # (z, y) corner pairs folded into one selector -> one MXU matmul.
        row_iota = jax.lax.broadcasted_iota(jnp.int32, (DH_pad, T), 0)
        S = (jnp.where(row_iota == z0 * H + y0, wz0 * wy0, 0.0)
             + jnp.where(row_iota == z0 * H + y1, wz0 * wy1, 0.0)
             + jnp.where(row_iota == z1 * H + y0, wz1 * wy0, 0.0)
             + jnp.where(row_iota == z1 * H + y1, wz1 * wy1, 0.0))

        vol = vol_ref[...]                               # (W_pad, DH_pad)
        g = jnp.dot(vol, S.astype(vol.dtype),
                    preferred_element_type=jnp.float32)  # (W_pad, T)

        # Stage 2: x interpolation = weighted one-hot over W + one reduction
        # (small sublane reduce on the XLU).
        x_iota = jax.lax.broadcasted_iota(jnp.int32, (W_pad, T), 0)
        xsel = (jnp.where(x_iota == x0, wx0, 0.0)
                + jnp.where(x_iota == x1, wx1, 0.0))
        alpha = jnp.sum(g * xsel, axis=0, keepdims=True)  # (1, T)

        valid = (alpha > thresh) & (vmask > 0.5)
        # TODO(synk): an int8 / bit-packed output would cut HBM writeback 4-32x.
        out_ref[...] = valid.astype(jnp.int32)

    return kernel


@functools.lru_cache(maxsize=None)
def _build_forward(D, H, W, DH_pad, W_pad, tile, n_tiles, vol_dtype_name,
                   single_buffer_vol):
    vol_dtype = jnp.dtype(vol_dtype_name)
    Npad = tile * n_tiles
    kernel = _make_kernel(D, H, W, DH_pad, W_pad)

    vol_spec_kwargs = {}
    if single_buffer_vol:
        # grid-invariant block: one VMEM buffer instead of the default two
        vol_spec_kwargs["pipeline_mode"] = pl.Buffered(1)

    vol_bytes = W_pad * DH_pad * vol_dtype.itemsize
    # selector + its build temporaries + g/xsel + pipelined point/out blocks
    per_step = 4 * tile * (3 * DH_pad + 4 * W_pad + 16)
    vmem_limit = int(min(max(vol_bytes * (1 if single_buffer_vol else 2)
                             + 2 * per_step + (4 << 20), 16 << 20), 48 << 20))

    call = pl.pallas_call(
        kernel,
        out_shape=jax.ShapeDtypeStruct((1, Npad), jnp.int32),
        grid=(n_tiles,),
        in_specs=[
            pl.BlockSpec(memory_space=pltpu.MemorySpace.SMEM),      # params
            pl.BlockSpec((4, tile), lambda i: (0, i)),              # xyz+mask
            pl.BlockSpec((W_pad, DH_pad), lambda i: (0, 0),         # volume
                         **vol_spec_kwargs),
        ],
        out_specs=pl.BlockSpec((1, tile), lambda i: (0, i)),        # lane-dense
        compiler_params=pltpu.CompilerParams(
            dimension_semantics=("parallel",),
            vmem_limit_bytes=vmem_limit,
        ),
    )
    return jax.jit(call)


_SINGLE_BUFFER_OK = {"value": None}   # None = not yet probed on this install


def _run(params, pts_p, volT, *, D, H, W, DH_pad, W_pad, tile, n_tiles):
    vol_dtype_name = jnp.dtype(volT.dtype).name
    if _SINGLE_BUFFER_OK["value"] is not False:
        try:
            fn = _build_forward(D, H, W, DH_pad, W_pad, tile, n_tiles,
                                vol_dtype_name, True)
            out = fn(params, pts_p, volT)
            _SINGLE_BUFFER_OK["value"] = True
            return out
        except Exception:
            # pipeline_mode=pl.Buffered(1) unsupported here -> fall back to the
            # default (double-buffered) pipeline; everything else is identical.
            _SINGLE_BUFFER_OK["value"] = False
    fn = _build_forward(D, H, W, DH_pad, W_pad, tile, n_tiles,
                        vol_dtype_name, False)
    return fn(params, pts_p, volT)


def _default_tile(DH_pad):
    # keep the (DH_pad, tile) selector around <= 8 MiB of VMEM; tile in
    # [128, 1024] and a multiple of 128 (full lanes).
    t = (8 << 20) // (DH_pad * 4)
    return max(128, min(1024, (t // 128) * 128))


def alpha_grid_mask_forward(xyz, alpha_volume, aabb, filter_thresh,
                            mask=None, tile=None, vol_dtype=jnp.float32):
    """AlphaGridMask.forward: returns mask_valid as a bool (N,) array.

    vol_dtype=jnp.bfloat16 halves the volume's VMEM/HBM footprint (recommended
    on v5e / v7x); only points whose alpha sits within ~1e-3 of filter_thresh
    may flip relative to the f32 reference.
    """
    xyz = jnp.asarray(xyz, jnp.float32)
    aabb = jnp.asarray(aabb, jnp.float32)
    alpha_volume = jnp.asarray(alpha_volume)

    N = xyz.shape[0]
    D, H, W = alpha_volume.shape[-3:]
    if D * H * W >= 2 ** 31:
        raise ValueError("alpha volume too large for int32 flat indexing")
    alpha_volume = alpha_volume.reshape(D, H, W)

    DH = D * H
    DH_pad = _round_up(DH, 128)      # lane axis of the (W_pad, DH_pad) volume
    W_pad = _round_up(W, 8)          # sublane axis
    if tile is None:
        tile = _default_tile(DH_pad)
    Npad = _round_up(max(N, 1), tile)
    n_tiles = Npad // tile

    # lane-dense point layout: rows 0-2 = xyz, row 3 = validity mask
    pts_p = jnp.zeros((4, Npad), jnp.float32)
    pts_p = pts_p.at[:3, :N].set(xyz.T)
    if mask is None:
        pts_p = pts_p.at[3, :N].set(1.0)
    else:
        pts_p = pts_p.at[3, :N].set(jnp.asarray(mask).astype(jnp.float32))

    # volume as (W, D*H), zero-padded, so the point axis stays on lanes
    vol2 = alpha_volume.astype(vol_dtype).reshape(DH, W)
    volT = jnp.zeros((W_pad, DH_pad), vol_dtype).at[:W, :DH].set(vol2.T)

    lo = aabb[0]
    inv = 2.0 / (aabb[1] - aabb[0])                    # invgridSize
    thresh = jnp.asarray(filter_thresh, jnp.float32).reshape(1)
    params = jnp.concatenate(
        [lo, inv, thresh, jnp.zeros((1,), jnp.float32)]).astype(jnp.float32)

    out = _run(params, pts_p, volT, D=D, H=H, W=W,
               DH_pad=DH_pad, W_pad=W_pad, tile=tile, n_tiles=n_tiles)
    return out[0, :N].astype(bool)


# ---------------- pure-JAX reference (for correctness check) ----------------
def _ref_forward(xyz, alpha_volume, aabb, thresh, mask=None):
    D, H, W = alpha_volume.shape
    lo = aabb[0]
    inv = 2.0 / (aabb[1] - aabb[0])
    g = (xyz - lo) * inv - 1.0
    ix = (g[:, 0] + 1.0) * (0.5 * (W - 1))
    iy = (g[:, 1] + 1.0) * (0.5 * (H - 1))
    iz = (g[:, 2] + 1.0) * (0.5 * (D - 1))
    ix0 = jnp.floor(ix).astype(jnp.int32)
    iy0 = jnp.floor(iy).astype(jnp.int32)
    iz0 = jnp.floor(iz).astype(jnp.int32)
    fx = ix - ix0.astype(jnp.float32)
    fy = iy - iy0.astype(jnp.float32)
    fz = iz - iz0.astype(jnp.float32)
    alpha = jnp.zeros_like(ix)
    for cz in (0, 1):
        for cy in (0, 1):
            for cx in (0, 1):
                xi, yi, zi = ix0 + cx, iy0 + cy, iz0 + cz
                wx = fx if cx else 1.0 - fx
                wy = fy if cy else 1.0 - fy
                wz = fz if cz else 1.0 - fz
                w = wx * wy * wz
                inb = ((xi >= 0) & (xi < W) & (yi >= 0) & (yi < H) &
                       (zi >= 0) & (zi < D))
                val = alpha_volume[jnp.clip(zi, 0, D - 1),
                                   jnp.clip(yi, 0, H - 1),
                                   jnp.clip(xi, 0, W - 1)]
                alpha = alpha + jnp.where(inb, w, 0.0) * val
    am = alpha > thresh
    if mask is not None:
        am = am & mask
    return am, alpha


if __name__ == "__main__":
    key = jax.random.PRNGKey(0)
    k1, k2, k3 = jax.random.split(key, 3)

    D, H, W = 8, 8, 8
    N = 200
    aabb = jnp.array([[-1.5, -1.0, -0.5],
                      [1.5, 1.0, 0.5]], jnp.float32)
    alpha_volume = jax.random.uniform(k1, (D, H, W), jnp.float32)

    center = 0.5 * (aabb[0] + aabb[1])
    half = 0.5 * (aabb[1] - aabb[0])
    u = jax.random.uniform(k2, (N, 3), jnp.float32, -1.1, 1.1)  # some OOB pts
    xyz = center + u * half
    mask = jax.random.bernoulli(k3, 0.7, (N,))
    filter_thresh = 0.5

    def check(out, mask_arg):
        ref_mask, ref_alpha = _ref_forward(xyz, alpha_volume, aabb,
                                           filter_thresh, mask_arg)
        mismatch = out != ref_mask
        # The MXU may evaluate the f32 matmul with bf16 passes; tolerate flips
        # only for points whose alpha is numerically at the threshold.
        near = jnp.abs(ref_alpha - filter_thresh) < 2e-2
        assert bool(jnp.all(~mismatch | near)), "mismatch vs reference"

    out_nomask = alpha_grid_mask_forward(xyz, alpha_volume, aabb, filter_thresh)
    jax.block_until_ready(out_nomask)
    check(out_nomask, None)

    out_mask = alpha_grid_mask_forward(xyz, alpha_volume, aabb, filter_thresh,
                                       mask=mask)
    jax.block_until_ready(out_mask)
    check(out_mask, mask)

    print("KERNEL_OK")
</pallas_src>

<mosaic_0001>
module attributes {stable_mosaic.version = 11 : i64} {
  func.func @kernel(%arg0: i32, %arg1: memref<8xf32, #tpu.memory_space<smem>>, %arg2: memref<4x1024xf32, #tpu.memory_space<vmem>>, %arg3: memref<8x128xf32, #tpu.memory_space<vmem>>, %arg4: memref<1x1024xi32, #tpu.memory_space<vmem>>) attributes {dimension_semantics = [#tpu.dimension_semantics<parallel>], iteration_bounds = array<i64: 1>, scalar_prefetch = 0 : i64, scratch_operands = 0 : i64, tpu.core_type = #tpu.core_type<tc>, window_params = [{transform_indices = @transform_0, window_bounds = array<i64: 8>}, {transform_indices = @transform_1, window_bounds = array<i64: 4, 1024>}, {pipeline_mode = #tpu.pipeline_mode<synchronous>, transform_indices = @transform_2, window_bounds = array<i64: 8, 128>}, {transform_indices = @transform_3, window_bounds = array<i64: 1, 1024>}]} {
    %c0 = arith.constant 0 : index
    %0 = memref.load %arg1[%c0] : memref<8xf32, #tpu.memory_space<smem>>
    %c1 = arith.constant 1 : index
    %1 = memref.load %arg1[%c1] : memref<8xf32, #tpu.memory_space<smem>>
    %c2 = arith.constant 2 : index
    %2 = memref.load %arg1[%c2] : memref<8xf32, #tpu.memory_space<smem>>
    %c3 = arith.constant 3 : index
    %3 = memref.load %arg1[%c3] : memref<8xf32, #tpu.memory_space<smem>>
    %c4 = arith.constant 4 : index
    %4 = memref.load %arg1[%c4] : memref<8xf32, #tpu.memory_space<smem>>
    %c5 = arith.constant 5 : index
    %5 = memref.load %arg1[%c5] : memref<8xf32, #tpu.memory_space<smem>>
    %c6 = arith.constant 6 : index
    %6 = memref.load %arg1[%c6] : memref<8xf32, #tpu.memory_space<smem>>
    %c0_0 = arith.constant 0 : index
    %c0_1 = arith.constant 0 : index
    %7 = vector.load %arg2[%c0_0, %c0_1] : memref<4x1024xf32, #tpu.memory_space<vmem>>, vector<1x1024xf32>
    %c1_2 = arith.constant 1 : index
    %c0_3 = arith.constant 0 : index
    %8 = vector.load %arg2[%c1_2, %c0_3] : memref<4x1024xf32, #tpu.memory_space<vmem>>, vector<1x1024xf32>
    %c2_4 = arith.constant 2 : index
    %c0_5 = arith.constant 0 : index
    %9 = vector.load %arg2[%c2_4, %c0_5] : memref<4x1024xf32, #tpu.memory_space<vmem>>, vector<1x1024xf32>
    %c3_6 = arith.constant 3 : index
    %c0_7 = arith.constant 0 : index
    %10 = vector.load %arg2[%c3_6, %c0_7] : memref<4x1024xf32, #tpu.memory_space<vmem>>, vector<1x1024xf32>
    %11 = vector.broadcast %0 : f32 to vector<1x1024xf32>
    %12 = arith.subf %7, %11 : vector<1x1024xf32>
    %13 = vector.broadcast %3 : f32 to vector<1x1024xf32>
    %14 = arith.mulf %12, %13 : vector<1x1024xf32>
    %cst = arith.constant 1.000000e+00 : f32
    %15 = vector.broadcast %cst : f32 to vector<1x1024xf32>
    %16 = arith.subf %14, %15 : vector<1x1024xf32>
    %17 = vector.broadcast %1 : f32 to vector<1x1024xf32>
    %18 = arith.subf %8, %17 : vector<1x1024xf32>
    %19 = vector.broadcast %4 : f32 to vector<1x1024xf32>
    %20 = arith.mulf %18, %19 : vector<1x1024xf32>
    %cst_8 = arith.constant 1.000000e+00 : f32
    %21 = vector.broadcast %cst_8 : f32 to vector<1x1024xf32>
    %22 = arith.subf %20, %21 : vector<1x1024xf32>
    %23 = vector.broadcast %2 : f32 to vector<1x1024xf32>
    %24 = arith.subf %9, %23 : vector<1x1024xf32>
    %25 = vector.broadcast %5 : f32 to vector<1x1024xf32>
    %26 = arith.mulf %24, %25 : vector<1x1024xf32>
    %cst_9 = arith.constant 1.000000e+00 : f32
    %27 = vector.broadcast %cst_9 : f32 to vector<1x1024xf32>
    %28 = arith.subf %26, %27 : vector<1x1024xf32>
    %cst_10 = arith.constant 1.000000e+00 : f32
    %29 = vector.broadcast %cst_10 : f32 to vector<1x1024xf32>
    %30 = arith.addf %16, %29 : vector<1x1024xf32>
    %cst_11 = arith.constant 3.500000e+00 : f32
    %31 = vector.broadcast %cst_11 : f32 to vector<1x1024xf32>
    %32 = arith.mulf %30, %31 : vector<1x1024xf32>
    %cst_12 = arith.constant 1.000000e+00 : f32
    %33 = vector.broadcast %cst_12 : f32 to vector<1x1024xf32>
    %34 = arith.addf %22, %33 : vector<1x1024xf32>
    %cst_13 = arith.constant 3.500000e+00 : f32
    %35 = vector.broadcast %cst_13 : f32 to vector<1x1024xf32>
    %36 = arith.mulf %34, %35 : vector<1x1024xf32>
    %cst_14 = arith.constant 1.000000e+00 : f32
    %37 = vector.broadcast %cst_14 : f32 to vector<1x1024xf32>
    %38 = arith.addf %28, %37 : vector<1x1024xf32>
    %cst_15 = arith.constant 3.500000e+00 : f32
    %39 = vector.broadcast %cst_15 : f32 to vector<1x1024xf32>
    %40 = arith.mulf %38, %39 : vector<1x1024xf32>
    %41 = math.floor %32 : vector<1x1024xf32>
    %42 = math.floor %36 : vector<1x1024xf32>
    %43 = math.floor %40 : vector<1x1024xf32>
    %44 = arith.subf %32, %41 : vector<1x1024xf32>
    %45 = arith.subf %36, %42 : vector<1x1024xf32>
    %46 = arith.subf %40, %43 : vector<1x1024xf32>
    %47 = arith.fptosi %41 : vector<1x1024xf32> to vector<1x1024xi32>
    %c1_i32 = arith.constant 1 : i32
    %48 = vector.broadcast %c1_i32 : i32 to vector<1x1024xi32>
    %49 = arith.addi %47, %48 : vector<1x1024xi32>
    %c0_i32 = arith.constant 0 : i32
    %50 = vector.broadcast %c0_i32 : i32 to vector<1x1024xi32>
    %51 = arith.cmpi sge, %47, %50 : vector<1x1024xi32>
    %c8_i32 = arith.constant 8 : i32
    %52 = vector.broadcast %c8_i32 : i32 to vector<1x1024xi32>
    %53 = arith.cmpi slt, %47, %52 : vector<1x1024xi32>
    %54 = arith.andi %51, %53 : vector<1x1024xi1>
    %cst_16 = arith.constant 1.000000e+00 : f32
    %55 = vector.broadcast %cst_16 : f32 to vector<1x1024xf32>
    %56 = arith.subf %55, %44 : vector<1x1024xf32>
    %cst_17 = arith.constant 0.000000e+00 : f32
    %57 = vector.broadcast %cst_17 : f32 to vector<1x1024xf32>
    %58 = arith.select %54, %56, %57 : vector<1x1024xi1>, vector<1x1024xf32>
    %c0_i32_18 = arith.constant 0 : i32
    %59 = vector.broadcast %c0_i32_18 : i32 to vector<1x1024xi32>
    %60 = arith.cmpi sge, %49, %59 : vector<1x1024xi32>
    %c8_i32_19 = arith.constant 8 : i32
    %61 = vector.broadcast %c8_i32_19 : i32 to vector<1x1024xi32>
    %62 = arith.cmpi slt, %49, %61 : vector<1x1024xi32>
    %63 = arith.andi %60, %62 : vector<1x1024xi1>
    %cst_20 = arith.constant 0.000000e+00 : f32
    %64 = vector.broadcast %cst_20 : f32 to vector<1x1024xf32>
    %65 = arith.select %63, %44, %64 : vector<1x1024xi1>, vector<1x1024xf32>
    %c0_i32_21 = arith.constant 0 : i32
    %c7_i32 = arith.constant 7 : i32
    %66 = vector.broadcast %c0_i32_21 : i32 to vector<1x1024xi32>
    %67 = arith.maxsi %66, %47 : vector<1x1024xi32>
    %68 = vector.broadcast %c7_i32 : i32 to vector<1x1024xi32>
    %69 = arith.minsi %68, %67 : vector<1x1024xi32>
    %c0_i32_22 = arith.constant 0 : i32
    %c7_i32_23 = arith.constant 7 : i32
    %70 = vector.broadcast %c0_i32_22 : i32 to vector<1x1024xi32>
    %71 = arith.maxsi %70, %49 : vector<1x1024xi32>
    %72 = vector.broadcast %c7_i32_23 : i32 to vector<1x1024xi32>
    %73 = arith.minsi %72, %71 : vector<1x1024xi32>
    %74 = arith.fptosi %42 : vector<1x1024xf32> to vector<1x1024xi32>
    %c1_i32_24 = arith.constant 1 : i32
    %75 = vector.broadcast %c1_i32_24 : i32 to vector<1x1024xi32>
    %76 = arith.addi %74, %75 : vector<1x1024xi32>
    %c0_i32_25 = arith.constant 0 : i32
    %77 = vector.broadcast %c0_i32_25 : i32 to vector<1x1024xi32>
    %78 = arith.cmpi sge, %74, %77 : vector<1x1024xi32>
    %c8_i32_26 = arith.constant 8 : i32
    %79 = vector.broadcast %c8_i32_26 : i32 to vector<1x1024xi32>
    %80 = arith.cmpi slt, %74, %79 : vector<1x1024xi32>
    %81 = arith.andi %78, %80 : vector<1x1024xi1>
    %cst_27 = arith.constant 1.000000e+00 : f32
    %82 = vector.broadcast %cst_27 : f32 to vector<1x1024xf32>
    %83 = arith.subf %82, %45 : vector<1x1024xf32>
    %cst_28 = arith.constant 0.000000e+00 : f32
    %84 = vector.broadcast %cst_28 : f32 to vector<1x1024xf32>
    %85 = arith.select %81, %83, %84 : vector<1x1024xi1>, vector<1x1024xf32>
    %c0_i32_29 = arith.constant 0 : i32
    %86 = vector.broadcast %c0_i32_29 : i32 to vector<1x1024xi32>
    %87 = arith.cmpi sge, %76, %86 : vector<1x1024xi32>
    %c8_i32_30 = arith.constant 8 : i32
    %88 = vector.broadcast %c8_i32_30 : i32 to vector<1x1024xi32>
    %89 = arith.cmpi slt, %76, %88 : vector<1x1024xi32>
    %90 = arith.andi %87, %89 : vector<1x1024xi1>
    %cst_31 = arith.constant 0.000000e+00 : f32
    %91 = vector.broadcast %cst_31 : f32 to vector<1x1024xf32>
    %92 = arith.select %90, %45, %91 : vector<1x1024xi1>, vector<1x1024xf32>
    %c0_i32_32 = arith.constant 0 : i32
    %c7_i32_33 = arith.constant 7 : i32
    %93 = vector.broadcast %c0_i32_32 : i32 to vector<1x1024xi32>
    %94 = arith.maxsi %93, %74 : vector<1x1024xi32>
    %95 = vector.broadcast %c7_i32_33 : i32 to vector<1x1024xi32>
    %96 = arith.minsi %95, %94 : vector<1x1024xi32>
    %c0_i32_34 = arith.constant 0 : i32
    %c7_i32_35 = arith.constant 7 : i32
    %97 = vector.broadcast %c0_i32_34 : i32 to vector<1x1024xi32>
    %98 = arith.maxsi %97, %76 : vector<1x1024xi32>
    %99 = vector.broadcast %c7_i32_35 : i32 to vector<1x1024xi32>
    %100 = arith.minsi %99, %98 : vector<1x1024xi32>
    %101 = arith.fptosi %43 : vector<1x1024xf32> to vector<1x1024xi32>
    %c1_i32_36 = arith.constant 1 : i32
    %102 = vector.broadcast %c1_i32_36 : i32 to vector<1x1024xi32>
    %103 = arith.addi %101, %102 : vector<1x1024xi32>
    %c0_i32_37 = arith.constant 0 : i32
    %104 = vector.broadcast %c0_i32_37 : i32 to vector<1x1024xi32>
    %105 = arith.cmpi sge, %101, %104 : vector<1x1024xi32>
    %c8_i32_38 = arith.constant 8 : i32
    %106 = vector.broadcast %c8_i32_38 : i32 to vector<1x1024xi32>
    %107 = arith.cmpi slt, %101, %106 : vector<1x1024xi32>
    %108 = arith.andi %105, %107 : vector<1x1024xi1>
    %cst_39 = arith.constant 1.000000e+00 : f32
    %109 = vector.broadcast %cst_39 : f32 to vector<1x1024xf32>
    %110 = arith.subf %109, %46 : vector<1x1024xf32>
    %cst_40 = arith.constant 0.000000e+00 : f32
    %111 = vector.broadcast %cst_40 : f32 to vector<1x1024xf32>
    %112 = arith.select %108, %110, %111 : vector<1x1024xi1>, vector<1x1024xf32>
    %c0_i32_41 = arith.constant 0 : i32
    %113 = vector.broadcast %c0_i32_41 : i32 to vector<1x1024xi32>
    %114 = arith.cmpi sge, %103, %113 : vector<1x1024xi32>
    %c8_i32_42 = arith.constant 8 : i32
    %115 = vector.broadcast %c8_i32_42 : i32 to vector<1x1024xi32>
    %116 = arith.cmpi slt, %103, %115 : vector<1x1024xi32>
    %117 = arith.andi %114, %116 : vector<1x1024xi1>
    %cst_43 = arith.constant 0.000000e+00 : f32
    %118 = vector.broadcast %cst_43 : f32 to vector<1x1024xf32>
    %119 = arith.select %117, %46, %118 : vector<1x1024xi1>, vector<1x1024xf32>
    %c0_i32_44 = arith.constant 0 : i32
    %c7_i32_45 = arith.constant 7 : i32
    %120 = vector.broadcast %c0_i32_44 : i32 to vector<1x1024xi32>
    %121 = arith.maxsi %120, %101 : vector<1x1024xi32>
    %122 = vector.broadcast %c7_i32_45 : i32 to vector<1x1024xi32>
    %123 = arith.minsi %122, %121 : vector<1x1024xi32>
    %c0_i32_46 = arith.constant 0 : i32
    %c7_i32_47 = arith.constant 7 : i32
    %124 = vector.broadcast %c0_i32_46 : i32 to vector<1x1024xi32>
    %125 = arith.maxsi %124, %103 : vector<1x1024xi32>
    %126 = vector.broadcast %c7_i32_47 : i32 to vector<1x1024xi32>
    %127 = arith.minsi %126, %125 : vector<1x1024xi32>
    %128 = tpu.iota {dimensions = array<i32: 0>} : vector<128x1024xi32>
    %c8_i32_48 = arith.constant 8 : i32
    %129 = vector.broadcast %c8_i32_48 : i32 to vector<1x1024xi32>
    %130 = arith.muli %123, %129 : vector<1x1024xi32>
    %131 = arith.addi %130, %96 : vector<1x1024xi32>
    %132 = vector.broadcast %131 : vector<1x1024xi32> to vector<128x1024xi32>
    %133 = arith.cmpi eq, %128, %132 : vector<128x1024xi32>
    %134 = arith.mulf %112, %85 : vector<1x1024xf32>
    %cst_49 = arith.constant 0.000000e+00 : f32
    %135 = vector.shape_cast %134 : vector<1x1024xf32> to vector<1x1024xf32>
    %136 = vector.broadcast %135 : vector<1x1024xf32> to vector<128x1024xf32>
    %137 = vector.broadcast %cst_49 : f32 to vector<128x1024xf32>
    %138 = arith.select %133, %136, %137 : vector<128x1024xi1>, vector<128x1024xf32>
    %c8_i32_50 = arith.constant 8 : i32
    %139 = vector.broadcast %c8_i32_50 : i32 to vector<1x1024xi32>
    %140 = arith.muli %123, %139 : vector<1x1024xi32>
    %141 = arith.addi %140, %100 : vector<1x1024xi32>
    %142 = vector.broadcast %141 : vector<1x1024xi32> to vector<128x1024xi32>
    %143 = arith.cmpi eq, %128, %142 : vector<128x1024xi32>
    %144 = arith.mulf %112, %92 : vector<1x1024xf32>
    %cst_51 = arith.constant 0.000000e+00 : f32
    %145 = vector.shape_cast %144 : vector<1x1024xf32> to vector<1x1024xf32>
    %146 = vector.broadcast %145 : vector<1x1024xf32> to vector<128x1024xf32>
    %147 = vector.broadcast %cst_51 : f32 to vector<128x1024xf32>
    %148 = arith.select %143, %146, %147 : vector<128x1024xi1>, vector<128x1024xf32>
    %149 = arith.addf %138, %148 : vector<128x1024xf32>
    %c8_i32_52 = arith.constant 8 : i32
    %150 = vector.broadcast %c8_i32_52 : i32 to vector<1x1024xi32>
    %151 = arith.muli %127, %150 : vector<1x1024xi32>
    %152 = arith.addi %151, %96 : vector<1x1024xi32>
    %153 = vector.broadcast %152 : vector<1x1024xi32> to vector<128x1024xi32>
    %154 = arith.cmpi eq, %128, %153 : vector<128x1024xi32>
    %155 = arith.mulf %119, %85 : vector<1x1024xf32>
    %cst_53 = arith.constant 0.000000e+00 : f32
    %156 = vector.shape_cast %155 : vector<1x1024xf32> to vector<1x1024xf32>
    %157 = vector.broadcast %156 : vector<1x1024xf32> to vector<128x1024xf32>
    %158 = vector.broadcast %cst_53 : f32 to vector<128x1024xf32>
    %159 = arith.select %154, %157, %158 : vector<128x1024xi1>, vector<128x1024xf32>
    %160 = arith.addf %149, %159 : vector<128x1024xf32>
    %c8_i32_54 = arith.constant 8 : i32
    %161 = vector.broadcast %c8_i32_54 : i32 to vector<1x1024xi32>
    %162 = arith.muli %127, %161 : vector<1x1024xi32>
    %163 = arith.addi %162, %100 : vector<1x1024xi32>
    %164 = vector.broadcast %163 : vector<1x1024xi32> to vector<128x1024xi32>
    %165 = arith.cmpi eq, %128, %164 : vector<128x1024xi32>
    %166 = arith.mulf %119, %92 : vector<1x1024xf32>
    %cst_55 = arith.constant 0.000000e+00 : f32
    %167 = vector.shape_cast %166 : vector<1x1024xf32> to vector<1x1024xf32>
    %168 = vector.broadcast %167 : vector<1x1024xf32> to vector<128x1024xf32>
    %169 = vector.broadcast %cst_55 : f32 to vector<128x1024xf32>
    %170 = arith.select %165, %168, %169 : vector<128x1024xi1>, vector<128x1024xf32>
    %171 = arith.addf %160, %170 : vector<128x1024xf32>
    %c0_56 = arith.constant 0 : index
    %c0_57 = arith.constant 0 : index
    %172 = vector.load %arg3[%c0_56, %c0_57] : memref<8x128xf32, #tpu.memory_space<vmem>>, vector<8x128xf32>
    %cst_58 = arith.constant dense<0.000000e+00> : vector<8x1024xf32>
    %173 = tpu.matmul %172, %171, %cst_58 {dimension_numbers = #tpu.dot_dimension_numbers<[1], [0], [0], [1], [0, 0, 1, 1], [], []>} : vector<8x128xf32>, vector<128x1024xf32>, vector<8x1024xf32> -> vector<8x1024xf32>
    %174 = tpu.iota {dimensions = array<i32: 0>} : vector<8x1024xi32>
    %175 = vector.broadcast %69 : vector<1x1024xi32> to vector<8x1024xi32>
    %176 = arith.cmpi eq, %174, %175 : vector<8x1024xi32>
    %cst_59 = arith.constant 0.000000e+00 : f32
    %177 = vector.shape_cast %58 : vector<1x1024xf32> to vector<1x1024xf32>
    %178 = vector.broadcast %177 : vector<1x1024xf32> to vector<8x1024xf32>
    %179 = vector.broadcast %cst_59 : f32 to vector<8x1024xf32>
    %180 = arith.select %176, %178, %179 : vector<8x1024xi1>, vector<8x1024xf32>
    %181 = vector.broadcast %73 : vector<1x1024xi32> to vector<8x1024xi32>
    %182 = arith.cmpi eq, %174, %181 : vector<8x1024xi32>
    %cst_60 = arith.constant 0.000000e+00 : f32
    %183 = vector.shape_cast %65 : vector<1x1024xf32> to vector<1x1024xf32>
    %184 = vector.broadcast %183 : vector<1x1024xf32> to vector<8x1024xf32>
    %185 = vector.broadcast %cst_60 : f32 to vector<8x1024xf32>
    %186 = arith.select %182, %184, %185 : vector<8x1024xi1>, vector<8x1024xf32>
    %187 = arith.addf %180, %186 : vector<8x1024xf32>
    %188 = arith.mulf %173, %187 : vector<8x1024xf32>
    %cst_61 = arith.constant dense<0.000000e+00> : vector<1024xf32>
    %189 = vector.multi_reduction <add>, %188, %cst_61 [0] : vector<8x1024xf32> to vector<1024xf32>
    %190 = vector.shape_cast %189 : vector<1024xf32> to vector<1x1024xf32>
    %191 = vector.broadcast %6 : f32 to vector<1x1024xf32>
    %192 = arith.cmpf ogt, %190, %191 : vector<1x1024xf32>
    %cst_62 = arith.constant 5.000000e-01 : f32
    %193 = vector.broadcast %cst_62 : f32 to vector<1x1024xf32>
    %194 = arith.cmpf ogt, %10, %193 : vector<1x1024xf32>
    %195 = arith.andi %192, %194 : vector<1x1024xi1>
    %196 = arith.extui %195 : vector<1x1024xi1> to vector<1x1024xi32>
    %c0_63 = arith.constant 0 : index
    %c0_64 = arith.constant 0 : index
    %197 = vector.load %arg4[%c0_63, %c0_64] : memref<1x1024xi32, #tpu.memory_space<vmem>>, vector<1x1024xi32>
    tpu.vector_store %arg4[%c0_63, %c0_64], %196 {strides = array<i32>} : memref<1x1024xi32, #tpu.memory_space<vmem>>, vector<1x1024xi32>,
    return
  }
  func.func @transform_0(%arg0: i32) -> i32 {
    %c0_i32 = arith.constant 0 : i32
    %c0_i32_0 = arith.constant 0 : i32
    return %c0_i32 : i32
  }
  func.func @transform_1(%arg0: i32) -> (i32, i32) {
    %c0_i32 = arith.constant 0 : i32
    %c0_i32_0 = arith.constant 0 : i32
    return %c0_i32, %arg0 : i32, i32
  }
  func.func @transform_2(%arg0: i32) -> (i32, i32) {
    %c0_i32 = arith.constant 0 : i32
    %c0_i32_0 = arith.constant 0 : i32
    %c0_i32_1 = arith.constant 0 : i32
    return %c0_i32, %c0_i32_0 : i32, i32
  }
  func.func @transform_3(%arg0: i32) -> (i32, i32) {
    %c0_i32 = arith.constant 0 : i32
    %c0_i32_0 = arith.constant 0 : i32
    return %c0_i32, %arg0 : i32, i32
  }
}

module attributes {stable_mosaic.version = 11 : i64} {
  func.func @kernel(%arg0: i32, %arg1: memref<8xf32, #tpu.memory_space<smem>>, %arg2: memref<4x1024xf32, #tpu.memory_space<vmem>>, %arg3: memref<8x128xf32, #tpu.memory_space<vmem>>, %arg4: memref<1x1024xi32, #tpu.memory_space<vmem>>) attributes {dimension_semantics = [#tpu.dimension_semantics<parallel>], iteration_bounds = array<i64: 1>, scalar_prefetch = 0 : i64, scratch_operands = 0 : i64, tpu.core_type = #tpu.core_type<tc>, window_params = [{transform_indices = @transform_0, window_bounds = array<i64: 8>}, {transform_indices = @transform_1, window_bounds = array<i64: 4, 1024>}, {pipeline_mode = #tpu.pipeline_mode<synchronous>, transform_indices = @transform_2, window_bounds = array<i64: 8, 128>}, {transform_indices = @transform_3, window_bounds = array<i64: 1, 1024>}]} {
    %c0 = arith.constant 0 : index
    %0 = memref.load %arg1[%c0] : memref<8xf32, #tpu.memory_space<smem>>
    %c1 = arith.constant 1 : index
    %1 = memref.load %arg1[%c1] : memref<8xf32, #tpu.memory_space<smem>>
    %c2 = arith.constant 2 : index
    %2 = memref.load %arg1[%c2] : memref<8xf32, #tpu.memory_space<smem>>
    %c3 = arith.constant 3 : index
    %3 = memref.load %arg1[%c3] : memref<8xf32, #tpu.memory_space<smem>>
    %c4 = arith.constant 4 : index
    %4 = memref.load %arg1[%c4] : memref<8xf32, #tpu.memory_space<smem>>
    %c5 = arith.constant 5 : index
    %5 = memref.load %arg1[%c5] : memref<8xf32, #tpu.memory_space<smem>>
    %c6 = arith.constant 6 : index
    %6 = memref.load %arg1[%c6] : memref<8xf32, #tpu.memory_space<smem>>
    %c0_0 = arith.constant 0 : index
    %c0_1 = arith.constant 0 : index
    %7 = vector.load %arg2[%c0_0, %c0_1] : memref<4x1024xf32, #tpu.memory_space<vmem>>, vector<1x1024xf32>
    %c1_2 = arith.constant 1 : index
    %c0_3 = arith.constant 0 : index
    %8 = vector.load %arg2[%c1_2, %c0_3] : memref<4x1024xf32, #tpu.memory_space<vmem>>, vector<1x1024xf32>
    %c2_4 = arith.constant 2 : index
    %c0_5 = arith.constant 0 : index
    %9 = vector.load %arg2[%c2_4, %c0_5] : memref<4x1024xf32, #tpu.memory_space<vmem>>, vector<1x1024xf32>
    %c3_6 = arith.constant 3 : index
    %c0_7 = arith.constant 0 : index
    %10 = vector.load %arg2[%c3_6, %c0_7] : memref<4x1024xf32, #tpu.memory_space<vmem>>, vector<1x1024xf32>
    %11 = vector.broadcast %0 : f32 to vector<1x1024xf32>
    %12 = arith.subf %7, %11 : vector<1x1024xf32>
    %13 = vector.broadcast %3 : f32 to vector<1x1024xf32>
    %14 = arith.mulf %12, %13 : vector<1x1024xf32>
    %cst = arith.constant 1.000000e+00 : f32
    %15 = vector.broadcast %cst : f32 to vector<1x1024xf32>
    %16 = arith.subf %14, %15 : vector<1x1024xf32>
    %17 = vector.broadcast %1 : f32 to vector<1x1024xf32>
    %18 = arith.subf %8, %17 : vector<1x1024xf32>
    %19 = vector.broadcast %4 : f32 to vector<1x1024xf32>
    %20 = arith.mulf %18, %19 : vector<1x1024xf32>
    %cst_8 = arith.constant 1.000000e+00 : f32
    %21 = vector.broadcast %cst_8 : f32 to vector<1x1024xf32>
    %22 = arith.subf %20, %21 : vector<1x1024xf32>
    %23 = vector.broadcast %2 : f32 to vector<1x1024xf32>
    %24 = arith.subf %9, %23 : vector<1x1024xf32>
    %25 = vector.broadcast %5 : f32 to vector<1x1024xf32>
    %26 = arith.mulf %24, %25 : vector<1x1024xf32>
    %cst_9 = arith.constant 1.000000e+00 : f32
    %27 = vector.broadcast %cst_9 : f32 to vector<1x1024xf32>
    %28 = arith.subf %26, %27 : vector<1x1024xf32>
    %cst_10 = arith.constant 1.000000e+00 : f32
    %29 = vector.broadcast %cst_10 : f32 to vector<1x1024xf32>
    %30 = arith.addf %16, %29 : vector<1x1024xf32>
    %cst_11 = arith.constant 3.500000e+00 : f32
    %31 = vector.broadcast %cst_11 : f32 to vector<1x1024xf32>
    %32 = arith.mulf %30, %31 : vector<1x1024xf32>
    %cst_12 = arith.constant 1.000000e+00 : f32
    %33 = vector.broadcast %cst_12 : f32 to vector<1x1024xf32>
    %34 = arith.addf %22, %33 : vector<1x1024xf32>
    %cst_13 = arith.constant 3.500000e+00 : f32
    %35 = vector.broadcast %cst_13 : f32 to vector<1x1024xf32>
    %36 = arith.mulf %34, %35 : vector<1x1024xf32>
    %cst_14 = arith.constant 1.000000e+00 : f32
    %37 = vector.broadcast %cst_14 : f32 to vector<1x1024xf32>
    %38 = arith.addf %28, %37 : vector<1x1024xf32>
    %cst_15 = arith.constant 3.500000e+00 : f32
    %39 = vector.broadcast %cst_15 : f32 to vector<1x1024xf32>
    %40 = arith.mulf %38, %39 : vector<1x1024xf32>
    %41 = math.floor %32 : vector<1x1024xf32>
    %42 = math.floor %36 : vector<1x1024xf32>
    %43 = math.floor %40 : vector<1x1024xf32>
    %44 = arith.subf %32, %41 : vector<1x1024xf32>
    %45 = arith.subf %36, %42 : vector<1x1024xf32>
    %46 = arith.subf %40, %43 : vector<1x1024xf32>
    %47 = arith.fptosi %41 : vector<1x1024xf32> to vector<1x1024xi32>
    %c1_i32 = arith.constant 1 : i32
    %48 = vector.broadcast %c1_i32 : i32 to vector<1x1024xi32>
    %49 = arith.addi %47, %48 : vector<1x1024xi32>
    %c0_i32 = arith.constant 0 : i32
    %50 = vector.broadcast %c0_i32 : i32 to vector<1x1024xi32>
    %51 = arith.cmpi sge, %47, %50 : vector<1x1024xi32>
    %c8_i32 = arith.constant 8 : i32
    %52 = vector.broadcast %c8_i32 : i32 to vector<1x1024xi32>
    %53 = arith.cmpi slt, %47, %52 : vector<1x1024xi32>
    %54 = arith.andi %51, %53 : vector<1x1024xi1>
    %cst_16 = arith.constant 1.000000e+00 : f32
    %55 = vector.broadcast %cst_16 : f32 to vector<1x1024xf32>
    %56 = arith.subf %55, %44 : vector<1x1024xf32>
    %cst_17 = arith.constant 0.000000e+00 : f32
    %57 = vector.broadcast %cst_17 : f32 to vector<1x1024xf32>
    %58 = arith.select %54, %56, %57 : vector<1x1024xi1>, vector<1x1024xf32>
    %c0_i32_18 = arith.constant 0 : i32
    %59 = vector.broadcast %c0_i32_18 : i32 to vector<1x1024xi32>
    %60 = arith.cmpi sge, %49, %59 : vector<1x1024xi32>
    %c8_i32_19 = arith.constant 8 : i32
    %61 = vector.broadcast %c8_i32_19 : i32 to vector<1x1024xi32>
    %62 = arith.cmpi slt, %49, %61 : vector<1x1024xi32>
    %63 = arith.andi %60, %62 : vector<1x1024xi1>
    %cst_20 = arith.constant 0.000000e+00 : f32
    %64 = vector.broadcast %cst_20 : f32 to vector<1x1024xf32>
    %65 = arith.select %63, %44, %64 : vector<1x1024xi1>, vector<1x1024xf32>
    %c0_i32_21 = arith.constant 0 : i32
    %c7_i32 = arith.constant 7 : i32
    %66 = vector.broadcast %c0_i32_21 : i32 to vector<1x1024xi32>
    %67 = arith.maxsi %66, %47 : vector<1x1024xi32>
    %68 = vector.broadcast %c7_i32 : i32 to vector<1x1024xi32>
    %69 = arith.minsi %68, %67 : vector<1x1024xi32>
    %c0_i32_22 = arith.constant 0 : i32
    %c7_i32_23 = arith.constant 7 : i32
    %70 = vector.broadcast %c0_i32_22 : i32 to vector<1x1024xi32>
    %71 = arith.maxsi %70, %49 : vector<1x1024xi32>
    %72 = vector.broadcast %c7_i32_23 : i32 to vector<1x1024xi32>
    %73 = arith.minsi %72, %71 : vector<1x1024xi32>
    %74 = arith.fptosi %42 : vector<1x1024xf32> to vector<1x1024xi32>
    %c1_i32_24 = arith.constant 1 : i32
    %75 = vector.broadcast %c1_i32_24 : i32 to vector<1x1024xi32>
    %76 = arith.addi %74, %75 : vector<1x1024xi32>
    %c0_i32_25 = arith.constant 0 : i32
    %77 = vector.broadcast %c0_i32_25 : i32 to vector<1x1024xi32>
    %78 = arith.cmpi sge, %74, %77 : vector<1x1024xi32>
    %c8_i32_26 = arith.constant 8 : i32
    %79 = vector.broadcast %c8_i32_26 : i32 to vector<1x1024xi32>
    %80 = arith.cmpi slt, %74, %79 : vector<1x1024xi32>
    %81 = arith.andi %78, %80 : vector<1x1024xi1>
    %cst_27 = arith.constant 1.000000e+00 : f32
    %82 = vector.broadcast %cst_27 : f32 to vector<1x1024xf32>
    %83 = arith.subf %82, %45 : vector<1x1024xf32>
    %cst_28 = arith.constant 0.000000e+00 : f32
    %84 = vector.broadcast %cst_28 : f32 to vector<1x1024xf32>
    %85 = arith.select %81, %83, %84 : vector<1x1024xi1>, vector<1x1024xf32>
    %c0_i32_29 = arith.constant 0 : i32
    %86 = vector.broadcast %c0_i32_29 : i32 to vector<1x1024xi32>
    %87 = arith.cmpi sge, %76, %86 : vector<1x1024xi32>
    %c8_i32_30 = arith.constant 8 : i32
    %88 = vector.broadcast %c8_i32_30 : i32 to vector<1x1024xi32>
    %89 = arith.cmpi slt, %76, %88 : vector<1x1024xi32>
    %90 = arith.andi %87, %89 : vector<1x1024xi1>
    %cst_31 = arith.constant 0.000000e+00 : f32
    %91 = vector.broadcast %cst_31 : f32 to vector<1x1024xf32>
    %92 = arith.select %90, %45, %91 : vector<1x1024xi1>, vector<1x1024xf32>
    %c0_i32_32 = arith.constant 0 : i32
    %c7_i32_33 = arith.constant 7 : i32
    %93 = vector.broadcast %c0_i32_32 : i32 to vector<1x1024xi32>
    %94 = arith.maxsi %93, %74 : vector<1x1024xi32>
    %95 = vector.broadcast %c7_i32_33 : i32 to vector<1x1024xi32>
    %96 = arith.minsi %95, %94 : vector<1x1024xi32>
    %c0_i32_34 = arith.constant 0 : i32
    %c7_i32_35 = arith.constant 7 : i32
    %97 = vector.broadcast %c0_i32_34 : i32 to vector<1x1024xi32>
    %98 = arith.maxsi %97, %76 : vector<1x1024xi32>
    %99 = vector.broadcast %c7_i32_35 : i32 to vector<1x1024xi32>
    %100 = arith.minsi %99, %98 : vector<1x1024xi32>
    %101 = arith.fptosi %43 : vector<1x1024xf32> to vector<1x1024xi32>
    %c1_i32_36 = arith.constant 1 : i32
    %102 = vector.broadcast %c1_i32_36 : i32 to vector<1x1024xi32>
    %103 = arith.addi %101, %102 : vector<1x1024xi32>
    %c0_i32_37 = arith.constant 0 : i32
    %104 = vector.broadcast %c0_i32_37 : i32 to vector<1x1024xi32>
    %105 = arith.cmpi sge, %101, %104 : vector<1x1024xi32>
    %c8_i32_38 = arith.constant 8 : i32
    %106 = vector.broadcast %c8_i32_38 : i32 to vector<1x1024xi32>
    %107 = arith.cmpi slt, %101, %106 : vector<1x1024xi32>
    %108 = arith.andi %105, %107 : vector<1x1024xi1>
    %cst_39 = arith.constant 1.000000e+00 : f32
    %109 = vector.broadcast %cst_39 : f32 to vector<1x1024xf32>
    %110 = arith.subf %109, %46 : vector<1x1024xf32>
    %cst_40 = arith.constant 0.000000e+00 : f32
    %111 = vector.broadcast %cst_40 : f32 to vector<1x1024xf32>
    %112 = arith.select %108, %110, %111 : vector<1x1024xi1>, vector<1x1024xf32>
    %c0_i32_41 = arith.constant 0 : i32
    %113 = vector.broadcast %c0_i32_41 : i32 to vector<1x1024xi32>
    %114 = arith.cmpi sge, %103, %113 : vector<1x1024xi32>
    %c8_i32_42 = arith.constant 8 : i32
    %115 = vector.broadcast %c8_i32_42 : i32 to vector<1x1024xi32>
    %116 = arith.cmpi slt, %103, %115 : vector<1x1024xi32>
    %117 = arith.andi %114, %116 : vector<1x1024xi1>
    %cst_43 = arith.constant 0.000000e+00 : f32
    %118 = vector.broadcast %cst_43 : f32 to vector<1x1024xf32>
    %119 = arith.select %117, %46, %118 : vector<1x1024xi1>, vector<1x1024xf32>
    %c0_i32_44 = arith.constant 0 : i32
    %c7_i32_45 = arith.constant 7 : i32
    %120 = vector.broadcast %c0_i32_44 : i32 to vector<1x1024xi32>
    %121 = arith.maxsi %120, %101 : vector<1x1024xi32>
    %122 = vector.broadcast %c7_i32_45 : i32 to vector<1x1024xi32>
    %123 = arith.minsi %122, %121 : vector<1x1024xi32>
    %c0_i32_46 = arith.constant 0 : i32
    %c7_i32_47 = arith.constant 7 : i32
    %124 = vector.broadcast %c0_i32_46 : i32 to vector<1x1024xi32>
    %125 = arith.maxsi %124, %103 : vector<1x1024xi32>
    %126 = vector.broadcast %c7_i32_47 : i32 to vector<1x1024xi32>
    %127 = arith.minsi %126, %125 : vector<1x1024xi32>
    %128 = tpu.iota {dimensions = array<i32: 0>} : vector<128x1024xi32>
    %c8_i32_48 = arith.constant 8 : i32
    %129 = vector.broadcast %c8_i32_48 : i32 to vector<1x1024xi32>
    %130 = arith.muli %123, %129 : vector<1x1024xi32>
    %131 = arith.addi %130, %96 : vector<1x1024xi32>
    %132 = vector.broadcast %131 : vector<1x1024xi32> to vector<128x1024xi32>
    %133 = arith.cmpi eq, %128, %132 : vector<128x1024xi32>
    %134 = arith.mulf %112, %85 : vector<1x1024xf32>
    %cst_49 = arith.constant 0.000000e+00 : f32
    %135 = vector.shape_cast %134 : vector<1x1024xf32> to vector<1x1024xf32>
    %136 = vector.broadcast %135 : vector<1x1024xf32> to vector<128x1024xf32>
    %137 = vector.broadcast %cst_49 : f32 to vector<128x1024xf32>
    %138 = arith.select %133, %136, %137 : vector<128x1024xi1>, vector<128x1024xf32>
    %c8_i32_50 = arith.constant 8 : i32
    %139 = vector.broadcast %c8_i32_50 : i32 to vector<1x1024xi32>
    %140 = arith.muli %123, %139 : vector<1x1024xi32>
    %141 = arith.addi %140, %100 : vector<1x1024xi32>
    %142 = vector.broadcast %141 : vector<1x1024xi32> to vector<128x1024xi32>
    %143 = arith.cmpi eq, %128, %142 : vector<128x1024xi32>
    %144 = arith.mulf %112, %92 : vector<1x1024xf32>
    %cst_51 = arith.constant 0.000000e+00 : f32
    %145 = vector.shape_cast %144 : vector<1x1024xf32> to vector<1x1024xf32>
    %146 = vector.broadcast %145 : vector<1x1024xf32> to vector<128x1024xf32>
    %147 = vector.broadcast %cst_51 : f32 to vector<128x1024xf32>
    %148 = arith.select %143, %146, %147 : vector<128x1024xi1>, vector<128x1024xf32>
    %149 = arith.addf %138, %148 : vector<128x1024xf32>
    %c8_i32_52 = arith.constant 8 : i32
    %150 = vector.broadcast %c8_i32_52 : i32 to vector<1x1024xi32>
    %151 = arith.muli %127, %150 : vector<1x1024xi32>
    %152 = arith.addi %151, %96 : vector<1x1024xi32>
    %153 = vector.broadcast %152 : vector<1x1024xi32> to vector<128x1024xi32>
    %154 = arith.cmpi eq, %128, %153 : vector<128x1024xi32>
    %155 = arith.mulf %119, %85 : vector<1x1024xf32>
    %cst_53 = arith.constant 0.000000e+00 : f32
    %156 = vector.shape_cast %155 : vector<1x1024xf32> to vector<1x1024xf32>
    %157 = vector.broadcast %156 : vector<1x1024xf32> to vector<128x1024xf32>
    %158 = vector.broadcast %cst_53 : f32 to vector<128x1024xf32>
    %159 = arith.select %154, %157, %158 : vector<128x1024xi1>, vector<128x1024xf32>
    %160 = arith.addf %149, %159 : vector<128x1024xf32>
    %c8_i32_54 = arith.constant 8 : i32
    %161 = vector.broadcast %c8_i32_54 : i32 to vector<1x1024xi32>
    %162 = arith.muli %127, %161 : vector<1x1024xi32>
    %163 = arith.addi %162, %100 : vector<1x1024xi32>
    %164 = vector.broadcast %163 : vector<1x1024xi32> to vector<128x1024xi32>
    %165 = arith.cmpi eq, %128, %164 : vector<128x1024xi32>
    %166 = arith.mulf %119, %92 : vector<1x1024xf32>
    %cst_55 = arith.constant 0.000000e+00 : f32
    %167 = vector.shape_cast %166 : vector<1x1024xf32> to vector<1x1024xf32>
    %168 = vector.broadcast %167 : vector<1x1024xf32> to vector<128x1024xf32>
    %169 = vector.broadcast %cst_55 : f32 to vector<128x1024xf32>
    %170 = arith.select %165, %168, %169 : vector<128x1024xi1>, vector<128x1024xf32>
    %171 = arith.addf %160, %170 : vector<128x1024xf32>
    %c0_56 = arith.constant 0 : index
    %c0_57 = arith.constant 0 : index
    %172 = vector.load %arg3[%c0_56, %c0_57] : memref<8x128xf32, #tpu.memory_space<vmem>>, vector<8x128xf32>
    %cst_58 = arith.constant dense<0.000000e+00> : vector<8x1024xf32>
    %173 = tpu.matmul %172, %171, %cst_58 {dimension_numbers = #tpu.dot_dimension_numbers<[1], [0], [0], [1], [0, 0, 1, 1], [], []>} : vector<8x128xf32>, vector<128x1024xf32>, vector<8x1024xf32> -> vector<8x1024xf32>
    %174 = tpu.iota {dimensions = array<i32: 0>} : vector<8x1024xi32>
    %175 = vector.broadcast %69 : vector<1x1024xi32> to vector<8x1024xi32>
    %176 = arith.cmpi eq, %174, %175 : vector<8x1024xi32>
    %cst_59 = arith.constant 0.000000e+00 : f32
    %177 = vector.shape_cast %58 : vector<1x1024xf32> to vector<1x1024xf32>
    %178 = vector.broadcast %177 : vector<1x1024xf32> to vector<8x1024xf32>
    %179 = vector.broadcast %cst_59 : f32 to vector<8x1024xf32>
    %180 = arith.select %176, %178, %179 : vector<8x1024xi1>, vector<8x1024xf32>
    %181 = vector.broadcast %73 : vector<1x1024xi32> to vector<8x1024xi32>
    %182 = arith.cmpi eq, %174, %181 : vector<8x1024xi32>
    %cst_60 = arith.constant 0.000000e+00 : f32
    %183 = vector.shape_cast %65 : vector<1x1024xf32> to vector<1x1024xf32>
    %184 = vector.broadcast %183 : vector<1x1024xf32> to vector<8x1024xf32>
    %185 = vector.broadcast %cst_60 : f32 to vector<8x1024xf32>
    %186 = arith.select %182, %184, %185 : vector<8x1024xi1>, vector<8x1024xf32>
    %187 = arith.addf %180, %186 : vector<8x1024xf32>
    %188 = arith.mulf %173, %187 : vector<8x1024xf32>
    %cst_61 = arith.constant dense<0.000000e+00> : vector<1024xf32>
    %189 = vector.multi_reduction <add>, %188, %cst_61 [0] : vector<8x1024xf32> to vector<1024xf32>
    %190 = vector.shape_cast %189 : vector<1024xf32> to vector<1x1024xf32>
    %191 = vector.broadcast %6 : f32 to vector<1x1024xf32>
    %192 = arith.cmpf ogt, %190, %191 : vector<1x1024xf32>
    %cst_62 = arith.constant 5.000000e-01 : f32
    %193 = vector.broadcast %cst_62 : f32 to vector<1x1024xf32>
    %194 = arith.cmpf ogt, %10, %193 : vector<1x1024xf32>
    %195 = arith.andi %192, %194 : vector<1x1024xi1>
    %196 = arith.extui %195 : vector<1x1024xi1> to vector<1x1024xi32>
    %c0_63 = arith.constant 0 : index
    %c0_64 = arith.constant 0 : index
    %197 = vector.load %arg4[%c0_63, %c0_64] : memref<1x1024xi32, #tpu.memory_space<vmem>>, vector<1x1024xi32>
    tpu.vector_store %arg4[%c0_63, %c0_64], %196 {strides = array<i32>} : memref<1x1024xi32, #tpu.memory_space<vmem>>, vector<1x1024xi32>,
    return
  }
  func.func @transform_0(%arg0: i32) -> i32 {
    %c0_i32 = arith.constant 0 : i32
    %c0_i32_0 = arith.constant 0 : i32
    return %c0_i32 : i32
  }
  func.func @transform_1(%arg0: i32) -> (i32, i32) {
    %c0_i32 = arith.constant 0 : i32
    %c0_i32_0 = arith.constant 0 : i32
    return %c0_i32, %arg0 : i32, i32
  }
  func.func @transform_2(%arg0: i32) -> (i32, i32) {
    %c0_i32 = arith.constant 0 : i32
    %c0_i32_0 = arith.constant 0 : i32
    %c0_i32_1 = arith.constant 0 : i32
    return %c0_i32, %c0_i32_0 : i32, i32
  }
  func.func @transform_3(%arg0: i32) -> (i32, i32) {
    %c0_i32 = arith.constant 0 : i32
    %c0_i32_0 = arith.constant 0 : i32
    return %c0_i32, %arg0 : i32, i32
  }
}

</mosaic_0001>

<bundles_post_ra>
// kernel: tpu_custom_call.1
= control target key start
LH: loop header
LB: loop body
LE: loop exit
PB: predicated region body
PF: predicated region fallthrough
CT: control target
= control target key end

     0   :  { %8 = vsyncpa [#allocation5], 0  ;;  %s4726_s0 = inlined_call_operand.hbm [shape: f32[8], index: 0, kind: input, shape index: {}]   ;;  %s4727_s1 = inlined_call_operand.hbm [shape: f32[4,1024], index: 1, kind: input, shape index: {}]   ;;  %s4728_s2 = inlined_call_operand.hbm [shape: f32[8,128], index: 2, kind: input, shape index: {}]   ;;  %s4729_s3 = inlined_call_operand.hbm [shape: s32[1,1024], index: 3, kind: output, shape index: {}]  }
   0x1   :  { %9 = vsyncpa [#allocation3], 0 }
   0x2   :  { %10 = vsyncpa [#allocation8], 0 }
   0x3   :  { %11 = vsyncpa [#allocation4], 0  ;;  %s2635_s12 = smov [#allocation2]   ;;  %s2636_s15 = smov [#allocation6]  }
   0x4   :  { %19 = dma.hbm_to_smem %s4726_s0, 16, %s2635_s12, [#allocation5]  }
   0x5   :  { %s26_s16 = sshll.u32 %s2636_s15, 4  ;;  %s2637_s17 = smov [#allocation7]   ;;  %s27_s16 = int_to_ptr.vmem [resolvable:$true] %s26_s16 }
   0x6   :  { %s36_s18 = sshll.u32 %s2637_s17, 4  ;;  %s2575_s19 = scalar_lea.vmem %s27_s16, 512  ;;  %s37_s18 = int_to_ptr.vmem [resolvable:$true] %s36_s18 }
   0x7   :  { %p2576_p0 = scmp.ne.s32.totalorder %s27_s16, %s2575_s19  ;;  %p2580_p1 = scmp.lt.s32.totalorder %s27_s16, %s27_s16 }
   0x8   :  { %p2581_p2 = scmp.lt.s32.totalorder %s2575_s19, %s2575_s19 }
   0xa   :  { %p2582_p3 = por %p2581_p2, %p2580_p1 }
   0xc   :  { %p2583_p4 = pnand %p2582_p3, %p2576_p0 }
   0xe   :  { %2586 = shalt.err (!%p2583_p4)
}
   0xf   :  { %29 = dma.hbm_to_vmem [thread:$0]  %s4727_s1, 512, %s27_s16, [#allocation3]  }
  0x10   :  { %s2595_s22 = scalar_lea.vmem %s37_s18, 128  ;;  %p2600_p6 = scmp.lt.s32.totalorder %s37_s18, %s37_s18 }
  0x11   :  { %p2596_p5 = scmp.ne.s32.totalorder %s37_s18, %s2595_s22  ;;  %p2601_p7 = scmp.lt.s32.totalorder %s2595_s22, %s2595_s22 }
  0x13   :  { %p2602_p8 = por %p2601_p7, %p2600_p6 }
  0x15   :  { %p2603_p9 = pnand %p2602_p8, %p2596_p5 }
  0x17   :  { %2606 = shalt.err (!%p2603_p9)
}
  0x18   :  { %39 = dma.hbm_to_vmem [thread:$0]  %s4728_s2, 128, %s37_s18, [#allocation8]  }
  0x19   :  { %2627 = dma.done.wait [#allocation5], 16  }
  0x1a   :  { %2628 = vsyncadd [#allocation5], 4294967280 }
  0x1b   :  { %2629 = dma.done.wait [#allocation3], 512  }
  0x1c   :  { %2630 = vsyncadd [#allocation3], 4294966784 }
  0x1d   :  { %2631 = dma.done.wait [#allocation8], 128  }
  0x1e   :  { %2632 = vsyncadd [#allocation8], 4294967168 }
  0x1f   :  { %49 = sfence }
  0x20   :  { %s2536_s1 = sld [smem:[#allocation2 + $0x1]]  ;;  %v59_v0 = vld [vmem:[#allocation6 + $0x1] ss:$4 sm:$0xff]  ;;  %v61_v1 = vld [vmem:[#allocation6 + $0x2] ss:$4 sm:$0xff]  ;;  %v148_v9 = vlaneseq  ;;  %s2641_s29 = smov [#allocation9]  }
  0x21   :  { %s2537_s24 = sld [smem:[#allocation2 + $0x2]]  ;;  %s2525_s30 = sshll.u32 %s2641_s29, 4  ;;  %s2526_s30 = int_to_ptr.vmem [resolvable:$true] %s2525_s30 }
  0x22   :  { %s2539_s25 = sld [smem:[#allocation2 + $0x4]]  ;;  %v2671_v14 = vshrl.u32 %v148_v9, 7  ;;  %s2607_s4 = scalar_lea.vmem %s2526_s30, 128 }
  0x23   :  { %s2540_s26 = sld [smem:[#allocation2 + $0x5]]  ;;  %p2608_p10 = scmp.ne.s32.totalorder %s2526_s30, %s2607_s4 }
  0x24   :  { %v2674_v18 = vadd.s32 120, %v2671_v14  ;;  %v2677_v20 = vsub.s32 1, %v2671_v14  ;;  %v2680_v21 = vsub.s32 3, %v2671_v14  ;;  %v2683_v22 = vsub.s32 0, %v2671_v14  ;;  %s50_s2 = sld [smem:[#allocation2]]  ;;  %p2612_p11 = scmp.lt.s32.totalorder %s2526_s30, %s2526_s30 }
  0x25   :  { %v2686_v24 = vsub.s32 2, %v2671_v14  ;;  %v2689_v25 = vadd.s32 112, %v2671_v14  ;;  %v2692_v26 = vadd.s32 104, %v2671_v14  ;;  %v2695_v29 = vadd.s32 96, %v2671_v14  ;;  %s2538_s27 = sld [smem:[#allocation2 + $0x3]]  ;;  %p2613_p12 = scmp.lt.s32.totalorder %s2607_s4, %s2607_s4 }
  0x26   :  { %v69_v2 = vstv %s2536_s1  ;;  %4750 = vst [vmem:[#allocation14_spill] sm:$0xff] %v2674_v18  ;;  %4751 = vst [vmem:[#allocation15_spill] sm:$0xff] %v2677_v20  ;;  %v2698_v30 = vadd.s32 88, %v2671_v14  ;;  %v2701_v33 = vadd.s32 80, %v2671_v14  ;;  %v2704_v34 = vadd.s32 72, %v2671_v14  ;;  %s2541_s28 = sld [smem:[#allocation2 + $0x6]] }
  0x27   :  { %v70_v3 = vsub.f32 %v59_v0, %v69_v2  ;;  %v74_v4 = vstv %s2537_s24  ;;  %4752 = vst [vmem:[#allocation16_spill] sm:$0xff] %v2680_v21  ;;  %4753 = vst [vmem:[#allocation17_spill] sm:$0xff] %v2683_v22  ;;  %v2707_v37 = vadd.s32 64, %v2671_v14  ;;  %v2710_v38 = vadd.s32 56, %v2671_v14  ;;  %p2614_p13 = por %p2613_p12, %p2612_p11 }
  0x28   :  { %v71_v5 = vstv %s2539_s25  ;;  %v75_v6 = vsub.f32 %v61_v1, %v74_v4  ;;  %4754 = vst [vmem:[#allocation18_spill] sm:$0xff] %v2686_v24  ;;  %v2713_v41 = vadd.s32 48, %v2671_v14  ;;  %v2716_v42 = vadd.s32 40, %v2671_v14 }
  0x29   :  { %v72_v7 = vmul.f32 %v71_v5, %v70_v3  ;;  %v76_v8 = vstv %s2540_s26  ;;  %4755 = vst [vmem:[#allocation19_spill] sm:$0xff] %v2707_v37  ;;  %4756 = vst [vmem:[#allocation20_spill] sm:$0xff] %v2710_v38  ;;  %p2615_p0 = pnand %p2614_p13, %p2608_p10 }
  0x2a   :  { %v77_v10 = vmul.f32 %v76_v8, %v75_v6  ;;  %4757 = vst [vmem:[#allocation21_spill] sm:$0xff] %v2713_v41  ;;  %4758 = vst [vmem:[#allocation22_spill] sm:$0xff] %v2716_v42 }
  0x2b   :  { %v2543_v11 = vadd.f32 -1.0, %v72_v7 }
  0x2c   :  { %v2544_v12 = vadd.f32 -1.0, %v77_v10 }
  0x2d   :  { %v81_v13 = vadd.f32 1.0, %v2543_v11 }
  0x2e   :  { %v83_v15 = vadd.f32 1.0, %v2544_v12 }
  0x2f   :  { %v82_v16 = vmul.f32 3.5, %v81_v13 }
  0x30   :  { %v84_v17 = vmul.f32 3.5, %v83_v15 }
  0x31   :  { %v86_v19 = vfloor.f32 %v82_v16 }
  0x32   :  { %v87_v23 = vfloor.f32 %v84_v17 }
  0x33   :  { %v89_v27 = vsub.f32 %v82_v16, %v86_v19  ;;  %v2547_v28 = vtrunc.f32 %v86_v19 }
  0x34   :  { %v90_v31 = vsub.f32 %v84_v17, %v87_v23  ;;  %v2549_v32 = vtrunc.f32 %v87_v23 }
  0x35   :  { %v2548_v35 = vcvt.f32.s32 %v2547_v28  ;;  %v115_v36 = vsub.f32 1.0, %v89_v27 }
  0x36   :  { %v2550_v39 = vcvt.f32.s32 %v2549_v32  ;;  %v134_v40 = vsub.f32 1.0, %v90_v31 }
  0x37   :  { %v111_v43 = vadd.s32 1, %v2548_v35  ;;  %vm112_vm0 = vcmp.ge.s32.totalorder %v2548_v35, 0  ;;  %vm113_vm1 = vcmp.lt.s32.totalorder %v2548_v35, 8  ;;  %vm121_vm2 = vcmp.gt.s32.totalorder %v2548_v35, 0 }
  0x38   :  { %vm114_vm3 = vmand %vm112_vm0, %vm113_vm1  ;;  %v122_v44 = vsel %vm121_vm2, %v2548_v35, 0  ;;  %v130_v45 = vadd.s32 1, %v2550_v39  ;;  %vm131_vm4 = vcmp.ge.s32.totalorder %v2550_v39, 0  ;;  %vm132_vm5 = vcmp.lt.s32.totalorder %v2550_v39, 8 }
  0x39   :  { %v116_v46 = vsel %vm114_vm3, %v115_v36, 0.0  ;;  %vm117_vm6 = vcmp.ge.s32.totalorder %v111_v43, 0  ;;  %vm118_vm7 = vcmp.lt.s32.totalorder %v111_v43, 8  ;;  %vm123_vm8 = vcmp.lt.s32.totalorder %v122_v44, 7  ;;  %vm133_vm9 = vmand %vm131_vm4, %vm132_vm5 }
  0x3a   :  { %vm119_vm10 = vmand %vm117_vm6, %vm118_vm7  ;;  %v124_v47 = vsel %vm123_vm8, %v122_v44, 7  ;;  %vm125_vm11 = vcmp.gt.s32.totalorder %v111_v43, 0  ;;  %v135_v48 = vsel %vm133_vm9, %v134_v40, 0.0  ;;  %vm136_vm12 = vcmp.ge.s32.totalorder %v130_v45, 0 }
  0x3b   :  { %v120_v49 = vsel %vm119_vm10, %v89_v27, 0.0  ;;  %v126_v50 = vsel %vm125_vm11, %v111_v43, 0  ;;  %vm137_vm13 = vcmp.lt.s32.totalorder %v130_v45, 8  ;;  %vm140_vm14 = vcmp.gt.s32.totalorder %v2550_v39, 0 }
  0x3c   :  { %vm127_vm15 = vcmp.lt.s32.totalorder %v126_v50, 7  ;;  %vm138_vm0 = vmand %vm136_vm12, %vm137_vm13  ;;  %v141_v51 = vsel %vm140_vm14, %v2550_v39, 0  ;;  %vm144_vm1 = vcmp.gt.s32.totalorder %v130_v45, 0  ;;  %v2718_v52 = vmul.f32 %v135_v48, %v116_v46 }
  0x3d   :  { %v128_v53 = vsel %vm127_vm15, %v126_v50, 7  ;;  %v139_v54 = vsel %vm138_vm0, %v90_v31, 0.0  ;;  %vm142_vm2 = vcmp.lt.s32.totalorder %v141_v51, 7  ;;  %v145_v55 = vsel %vm144_vm1, %v130_v45, 0 }
  0x3e   :  { %v143_v56 = vsel %vm142_vm2, %v141_v51, 7  ;;  %vm146_vm3 = vcmp.lt.s32.totalorder %v145_v55, 7  ;;  %v2722_v57 = vrot.slane %v2718_v52, %v2677_v20  ;;  %v2724_v58 = vmul.f32 %v135_v48, %v120_v49 }
  0x3f   :  { %v147_v59 = vsel %vm146_vm3, %v145_v55, 7  ;;  %v165_v60 = vmul.u32 8, %v143_v56  ;;  %v2726_v61 = vmul.f32 %v139_v54, %v116_v46  ;;  %v2728_v62 = vmul.f32 %v139_v54, %v120_v49 }
  0x40   :  { %v2732_v63 = vrot.slane %v2724_v58, %v2677_v20  ;;  %v956_v0 = vmul.u32 8, %v147_v59  ;;  %v2736_v1 = vrot.slane %v2718_v52, %v2680_v21  ;;  %v2740_v2 = vrot.slane %v2724_v58, %v2680_v21 }
  0x41   :  { %4759 = vst [vmem:[#allocation23_spill] sm:$0xff] %v2728_v62  ;;  %v2742_v3 = vadd.s32 %v165_v60, %v124_v47  ;;  %v2744_v4 = vadd.s32 %v165_v60, %v128_v53  ;;  %v2748_v5 = vrot.slane %v2726_v61, %v2677_v20  ;;  %v2752_v6 = vrot.slane %v2728_v62, %v2677_v20 }
  0x42   :  { %v2754_v7 = vadd.s32 %v956_v0, %v124_v47  ;;  %v2756_v8 = vadd.s32 %v956_v0, %v128_v53  ;;  %v2760_v9 = vrot.slane %v2726_v61, %v2680_v21  ;;  %v2764_v10 = vrot.slane %v2728_v62, %v2680_v21 }
  0x43   :  { %v2768_v11 = vrot.slane %v2742_v3, %v2677_v20  ;;  %v2772_v12 = vrot.slane %v2744_v4, %v2677_v20  ;;  %v2776_v13 = vrot.slane %v2742_v3, %v2680_v21  ;;  %v2780_v15 = vrot.slane %v2744_v4, %v2680_v21 }
  0x44   :  { %v2784_v16 = vrot.slane %v2754_v7, %v2677_v20  ;;  %v2788_v17 = vrot.slane %v2756_v8, %v2677_v20  ;;  %v2792_v19 = vrot.slane %v2754_v7, %v2680_v21  ;;  %v2796_v23 = vrot.slane %v2756_v8, %v2680_v21 }
  0x45   :  { %vm320_vm4 = vcmp.eq.s32.totalorder %v2674_v18, %v2768_v11  ;;  %vm651_vm5 = vcmp.eq.s32.totalorder %v2674_v18, %v2772_v12  ;;  %vm322_vm6 = vcmp.eq.s32.totalorder %v2674_v18, %v2776_v13  ;;  %vm653_vm7 = vcmp.eq.s32.totalorder %v2674_v18, %v2780_v15 }
  0x46   :  { %v490_v27 = vsel %vm320_vm4, %v2722_v57, 0.0  ;;  %v821_v28 = vsel %vm651_vm5, %v2732_v63, 0.0  ;;  %vm1111_vm8 = vcmp.eq.s32.totalorder %v2674_v18, %v2784_v16  ;;  %vm1570_vm9 = vcmp.eq.s32.totalorder %v2674_v18, %v2788_v17 }
  0x47   :  { %v949_v31 = vadd.f32 %v821_v28, %v490_v27  ;;  %v1281_v32 = vsel %vm1111_vm8, %v2748_v5, 0.0  ;;  %v1740_v35 = vsel %vm1570_vm9, %v2752_v6, 0.0  ;;  %v492_v36 = vsel %vm322_vm6, %v2736_v1, 0.0 }
  0x48   :  { %v823_v39 = vsel %vm653_vm7, %v2740_v2, 0.0  ;;  %vm1113_vm10 = vcmp.eq.s32.totalorder %v2674_v18, %v2792_v19  ;;  %vm1572_vm11 = vcmp.eq.s32.totalorder %v2674_v18, %v2796_v23  ;;  %v2822_v40 = vrot.slane %v2742_v3, %v2683_v22 }
  0x49   :  { %v1409_v43 = vadd.f32 %v1281_v32, %v949_v31  ;;  %v951_v44 = vadd.f32 %v823_v39, %v492_v36  ;;  %v1283_v45 = vsel %vm1113_vm10, %v2760_v9, 0.0  ;;  %v1742_v46 = vsel %vm1572_vm11, %v2764_v10, 0.0 }
  0x4a   :  { %vm319_vm12 = vcmp.eq.s32.totalorder %v2674_v18, %v2822_v40  ;;  %v2830_v47 = vrot.slane %v2718_v52, %v2683_v22  ;;  %v2834_v48 = vrot.slane %v2744_v4, %v2683_v22  ;;  %v2838_v49 = vrot.slane %v2724_v58, %v2683_v22 }
  0x4b   :  { %v1868_v50 = vadd.f32 %v1740_v35, %v1409_v43  ;;  %v1411_v51 = vadd.f32 %v1283_v45, %v951_v44  ;;  %v2842_v53 = vrot.slane %v2754_v7, %v2683_v22  ;;  %v2846_v54 = vrot.slane %v2726_v61, %v2683_v22 }
  0x4c   :  { %v489_v55 = vsel %vm319_vm12, %v2830_v47, 0.0  ;;  %vm650_vm13 = vcmp.eq.s32.totalorder %v2674_v18, %v2834_v48  ;;  %v2853_v56 = vrot.slane %v2756_v8, %v2683_v22  ;;  %v2857_v59 = vrot.slane %v2728_v62, %v2683_v22 }
  0x4d   :  { %1876 = vmatprep.subr.mxu0 %v1868_v50  ;;  %v1870_v60 = vadd.f32 %v1742_v46, %v1411_v51  ;;  %v820_v0 = vsel %vm650_vm13, %v2838_v49, 0.0  ;;  %vm1110_vm14 = vcmp.eq.s32.totalorder %v2674_v18, %v2842_v53  ;;  %v2864_v27 = vrot.slane %v2742_v3, %v2686_v24 }
  0x4e   :  { %v948_v28 = vadd.f32 %v820_v0, %v489_v55  ;;  %v1280_v31 = vsel %vm1110_vm14, %v2846_v54, 0.0  ;;  %vm1569_vm15 = vcmp.eq.s32.totalorder %v2674_v18, %v2853_v56  ;;  %v2871_v32 = vrot.slane %v2718_v52, %v2686_v24 }
  0x4f   :  { %1947 = vmatprep.subr.mxu1 %v1870_v60  ;;  %v1739_v35 = vsel %vm1569_vm15, %v2857_v59, 0.0  ;;  %vm321_vm0 = vcmp.eq.s32.totalorder %v2674_v18, %v2864_v27  ;;  %v2878_v36 = vrot.slane %v2744_v4, %v2686_v24  ;;  %v2882_v39 = vrot.slane %v2724_v58, %v2686_v24 }
  0x50   :  { %v1408_v43 = vadd.f32 %v1280_v31, %v948_v28  ;;  %v491_v44 = vsel %vm321_vm0, %v2871_v32, 0.0  ;;  %v2887_v45 = vrot.slane %v2754_v7, %v2686_v24  ;;  %v2891_v46 = vrot.slane %v2726_v61, %v2686_v24 }
  0x51   :  { %vm652_vm1 = vcmp.eq.s32.totalorder %v2674_v18, %v2878_v36  ;;  %v2897_v50 = vrot.slane %v2756_v8, %v2686_v24  ;;  %v2901_v51 = vrot.slane %v2728_v62, %v2686_v24  ;;  %vm312_vm2 = vcmp.eq.s32.totalorder %v2689_v25, %v2768_v11 }
  0x52   :  { %v1867_v55 = vadd.f32 %v1739_v35, %v1408_v43  ;;  %v822_v60 = vsel %vm652_vm1, %v2882_v39, 0.0  ;;  %vm1112_vm3 = vcmp.eq.s32.totalorder %v2674_v18, %v2887_v45  ;;  %v482_v0 = vsel %vm312_vm2, %v2722_v57, 0.0 }
  0x53   :  { %v950_v28 = vadd.f32 %v822_v60, %v491_v44  ;;  %v1282_v31 = vsel %vm1112_vm3, %v2891_v46, 0.0  ;;  %vm1571_vm4 = vcmp.eq.s32.totalorder %v2674_v18, %v2897_v50  ;;  %vm643_vm5 = vcmp.eq.s32.totalorder %v2689_v25, %v2772_v12 }
  0x54   :  { %1877 = vmatpush1.msra.mxu0 %v1867_v55  ;;  %v1741_v21 = vsel %vm1571_vm4, %v2901_v51, 0.0  ;;  %v813_v35 = vsel %vm643_vm5, %v2732_v63, 0.0  ;;  %vm1103_vm6 = vcmp.eq.s32.totalorder %v2689_v25, %v2784_v16  ;;  %vm1562_vm7 = vcmp.eq.s32.totalorder %v2689_v25, %v2788_v17 }
  0x55   :  { %v1410_v43 = vadd.f32 %v1282_v31, %v950_v28  ;;  %v941_v44 = vadd.f32 %v813_v35, %v482_v0  ;;  %v1273_v60 = vsel %vm1103_vm6, %v2748_v5, 0.0  ;;  %v1732_v20 = vsel %vm1562_vm7, %v2752_v6, 0.0 }
  0x56   :  { %vm314_vm8 = vcmp.eq.s32.totalorder %v2689_v25, %v2776_v13  ;;  %vm645_vm9 = vcmp.eq.s32.totalorder %v2689_v25, %v2780_v15  ;;  %vm1105_vm10 = vcmp.eq.s32.totalorder %v2689_v25, %v2792_v19  ;;  %vm1564_vm11 = vcmp.eq.s32.totalorder %v2689_v25, %v2796_v23 }
  0x57   :  { %v1869_v55 = vadd.f32 %v1741_v21, %v1410_v43  ;;  %v1401_v24 = vadd.f32 %v1273_v60, %v941_v44  ;;  %v484_v0 = vsel %vm314_vm8, %v2736_v1, 0.0  ;;  %v815_v28 = vsel %vm645_vm9, %v2740_v2, 0.0 }
  0x58   :  { %v943_v31 = vadd.f32 %v815_v28, %v484_v0  ;;  %v1275_v35 = vsel %vm1105_vm10, %v2760_v9, 0.0  ;;  %v1734_v22 = vsel %vm1564_vm11, %v2764_v10, 0.0  ;;  %vm311_vm12 = vcmp.eq.s32.totalorder %v2689_v25, %v2822_v40 }
  0x59   :  { %1948 = vmatpush1.msra.mxu1 %v1869_v55  ;;  %v1860_v62 = vadd.f32 %v1732_v20, %v1401_v24  ;;  %v481_v18 = vsel %vm311_vm12, %v2830_v47, 0.0  ;;  %vm642_vm13 = vcmp.eq.s32.totalorder %v2689_v25, %v2834_v48  ;;  %vm1102_vm14 = vcmp.eq.s32.totalorder %v2689_v25, %v2842_v53 }
  0x5a   :  { %v1403_v21 = vadd.f32 %v1275_v35, %v943_v31  ;;  %v812_v43 = vsel %vm642_vm13, %v2838_v49, 0.0  ;;  %v1272_v44 = vsel %vm1102_vm14, %v2846_v54, 0.0  ;;  %vm1561_vm15 = vcmp.eq.s32.totalorder %v2689_v25, %v2853_v56 }
  0x5b   :  { %1878 = vmatprep.subr.mxu0 %v1860_v62  ;;  %v940_v60 = vadd.f32 %v812_v43, %v481_v18  ;;  %v1731_v20 = vsel %vm1561_vm15, %v2857_v59, 0.0  ;;  %vm313_vm0 = vcmp.eq.s32.totalorder %v2689_v25, %v2864_v27  ;;  %vm644_vm1 = vcmp.eq.s32.totalorder %v2689_v25, %v2878_v36 }
  0x5c   :  { %v1862_v24 = vadd.f32 %v1734_v22, %v1403_v21  ;;  %v483_v55 = vsel %vm313_vm0, %v2871_v32, 0.0  ;;  %v814_v0 = vsel %vm644_vm1, %v2882_v39, 0.0  ;;  %vm1104_vm2 = vcmp.eq.s32.totalorder %v2689_v25, %v2887_v45 }
  0x5d   :  { %v1400_v28 = vadd.f32 %v1272_v44, %v940_v60  ;;  %v942_v31 = vadd.f32 %v814_v0, %v483_v55  ;;  %v1274_v18 = vsel %vm1104_vm2, %v2891_v46, 0.0  ;;  %vm1563_vm3 = vcmp.eq.s32.totalorder %v2689_v25, %v2897_v50 }
  0x5e   :  { %1949 = vmatprep.subr.mxu1 %v1862_v24  ;;  %v1733_v62 = vsel %vm1563_vm3, %v2901_v51, 0.0  ;;  %vm304_vm4 = vcmp.eq.s32.totalorder %v2692_v26, %v2768_v11  ;;  %vm635_vm5 = vcmp.eq.s32.totalorder %v2692_v26, %v2772_v12  ;;  %vm1095_vm6 = vcmp.eq.s32.totalorder %v2692_v26, %v2784_v16 }
  0x5f   :  { %v1859_v22 = vadd.f32 %v1731_v20, %v1400_v28  ;;  %v1402_v35 = vadd.f32 %v1274_v18, %v942_v31  ;;  %v474_v21 = vsel %vm304_vm4, %v2722_v57, 0.0  ;;  %v805_v43 = vsel %vm635_vm5, %v2732_v63, 0.0 }
  0x60   :  { %v933_v44 = vadd.f32 %v805_v43, %v474_v21  ;;  %v1265_v60 = vsel %vm1095_vm6, %v2748_v5, 0.0  ;;  %vm1554_vm7 = vcmp.eq.s32.totalorder %v2692_v26, %v2788_v17  ;;  %vm306_vm8 = vcmp.eq.s32.totalorder %v2692_v26, %v2776_v13 }
  0x61   :  { %1879 = vmatpush1.msra.mxu0 %v1859_v22  ;;  %v1861_v24 = vadd.f32 %v1733_v62, %v1402_v35  ;;  %v1724_v55 = vsel %vm1554_vm7, %v2752_v6, 0.0  ;;  %v476_v20 = vsel %vm306_vm8, %v2736_v1, 0.0  ;;  %vm637_vm9 = vcmp.eq.s32.totalorder %v2692_v26, %v2780_v15 }
  0x62   :  { %v1393_v0 = vadd.f32 %v1265_v60, %v933_v44  ;;  %v807_v28 = vsel %vm637_vm9, %v2740_v2, 0.0  ;;  %vm1097_vm10 = vcmp.eq.s32.totalorder %v2692_v26, %v2792_v19  ;;  %vm1556_vm11 = vcmp.eq.s32.totalorder %v2692_v26, %v2796_v23 }
  0x63   :  { %1950 = vmatpush1.msra.mxu1 %v1861_v24  ;;  %v935_v31 = vadd.f32 %v807_v28, %v476_v20  ;;  %v1267_v18 = vsel %vm1097_vm10, %v2760_v9, 0.0  ;;  %v1726_v62 = vsel %vm1556_vm11, %v2764_v10, 0.0  ;;  %vm303_vm12 = vcmp.eq.s32.totalorder %v2692_v26, %v2822_v40 }
  0x64   :  { %v1852_v22 = vadd.f32 %v1724_v55, %v1393_v0  ;;  %v473_v35 = vsel %vm303_vm12, %v2830_v47, 0.0  ;;  %vm634_vm13 = vcmp.eq.s32.totalorder %v2692_v26, %v2834_v48  ;;  %vm1094_vm14 = vcmp.eq.s32.totalorder %v2692_v26, %v2842_v53 }
  0x65   :  { %v1395_v21 = vadd.f32 %v1267_v18, %v935_v31  ;;  %v804_v43 = vsel %vm634_vm13, %v2838_v49, 0.0  ;;  %v1264_v44 = vsel %vm1094_vm14, %v2846_v54, 0.0  ;;  %vm1553_vm15 = vcmp.eq.s32.totalorder %v2692_v26, %v2853_v56 }
  0x66   :  { %1880 = vmatprep.subr.mxu0 %v1852_v22  ;;  %v932_v60 = vadd.f32 %v804_v43, %v473_v35  ;;  %v1723_v24 = vsel %vm1553_vm15, %v2857_v59, 0.0  ;;  %vm305_vm0 = vcmp.eq.s32.totalorder %v2692_v26, %v2864_v27  ;;  %vm636_vm1 = vcmp.eq.s32.totalorder %v2692_v26, %v2878_v36 }
  0x67   :  { %v1854_v55 = vadd.f32 %v1726_v62, %v1395_v21  ;;  %v475_v20 = vsel %vm305_vm0, %v2871_v32, 0.0  ;;  %v806_v0 = vsel %vm636_vm1, %v2882_v39, 0.0  ;;  %vm1096_vm2 = vcmp.eq.s32.totalorder %v2692_v26, %v2887_v45 }
  0x68   :  { %v1392_v28 = vadd.f32 %v1264_v44, %v932_v60  ;;  %v934_v31 = vadd.f32 %v806_v0, %v475_v20  ;;  %v1266_v18 = vsel %vm1096_vm2, %v2891_v46, 0.0  ;;  %vm1555_vm3 = vcmp.eq.s32.totalorder %v2692_v26, %v2897_v50 }
  0x69   :  { %1951 = vmatprep.subr.mxu1 %v1854_v55  ;;  %v1725_v22 = vsel %vm1555_vm3, %v2901_v51, 0.0  ;;  %vm296_vm4 = vcmp.eq.s32.totalorder %v2695_v29, %v2768_v11  ;;  %vm627_vm5 = vcmp.eq.s32.totalorder %v2695_v29, %v2772_v12  ;;  %vm1087_vm6 = vcmp.eq.s32.totalorder %v2695_v29, %v2784_v16 }
  0x6a   :  { %v1851_v62 = vadd.f32 %v1723_v24, %v1392_v28  ;;  %v1394_v35 = vadd.f32 %v1266_v18, %v934_v31  ;;  %v466_v21 = vsel %vm296_vm4, %v2722_v57, 0.0  ;;  %v797_v43 = vsel %vm627_vm5, %v2732_v63, 0.0 }
  0x6b   :  { %v925_v44 = vadd.f32 %v797_v43, %v466_v21  ;;  %v1257_v60 = vsel %vm1087_vm6, %v2748_v5, 0.0  ;;  %vm1546_vm7 = vcmp.eq.s32.totalorder %v2695_v29, %v2788_v17  ;;  %vm298_vm8 = vcmp.eq.s32.totalorder %v2695_v29, %v2776_v13 }
  0x6c   :  { %1881 = vmatpush1.msra.mxu0 %v1851_v62  ;;  %v1853_v55 = vadd.f32 %v1725_v22, %v1394_v35  ;;  %v1716_v20 = vsel %vm1546_vm7, %v2752_v6, 0.0  ;;  %v468_v24 = vsel %vm298_vm8, %v2736_v1, 0.0  ;;  %vm629_vm9 = vcmp.eq.s32.totalorder %v2695_v29, %v2780_v15 }
  0x6d   :  { %v1385_v0 = vadd.f32 %v1257_v60, %v925_v44  ;;  %v799_v28 = vsel %vm629_vm9, %v2740_v2, 0.0  ;;  %vm1089_vm10 = vcmp.eq.s32.totalorder %v2695_v29, %v2792_v19  ;;  %vm1548_vm11 = vcmp.eq.s32.totalorder %v2695_v29, %v2796_v23 }
  0x6e   :  { %1952 = vmatpush1.msra.mxu1 %v1853_v55  ;;  %v927_v31 = vadd.f32 %v799_v28, %v468_v24  ;;  %v1259_v18 = vsel %vm1089_vm10, %v2760_v9, 0.0  ;;  %v1718_v22 = vsel %vm1548_vm11, %v2764_v10, 0.0  ;;  %vm295_vm12 = vcmp.eq.s32.totalorder %v2695_v29, %v2822_v40 }
  0x6f   :  { %v1844_v62 = vadd.f32 %v1716_v20, %v1385_v0  ;;  %v465_v35 = vsel %vm295_vm12, %v2830_v47, 0.0  ;;  %vm626_vm13 = vcmp.eq.s32.totalorder %v2695_v29, %v2834_v48  ;;  %vm1086_vm14 = vcmp.eq.s32.totalorder %v2695_v29, %v2842_v53 }
  0x70   :  { %v1387_v21 = vadd.f32 %v1259_v18, %v927_v31  ;;  %v796_v43 = vsel %vm626_vm13, %v2838_v49, 0.0  ;;  %v1256_v44 = vsel %vm1086_vm14, %v2846_v54, 0.0  ;;  %vm1545_vm15 = vcmp.eq.s32.totalorder %v2695_v29, %v2853_v56 }
  0x71   :  { %1882 = vmatprep.subr.mxu0 %v1844_v62  ;;  %v924_v60 = vadd.f32 %v796_v43, %v465_v35  ;;  %v1715_v55 = vsel %vm1545_vm15, %v2857_v59, 0.0  ;;  %vm297_vm0 = vcmp.eq.s32.totalorder %v2695_v29, %v2864_v27  ;;  %vm628_vm1 = vcmp.eq.s32.totalorder %v2695_v29, %v2878_v36 }
  0x72   :  { %v1846_v20 = vadd.f32 %v1718_v22, %v1387_v21  ;;  %v467_v24 = vsel %vm297_vm0, %v2871_v32, 0.0  ;;  %v798_v0 = vsel %vm628_vm1, %v2882_v39, 0.0  ;;  %vm1088_vm2 = vcmp.eq.s32.totalorder %v2695_v29, %v2887_v45 }
  0x73   :  { %v1384_v28 = vadd.f32 %v1256_v44, %v924_v60  ;;  %v926_v31 = vadd.f32 %v798_v0, %v467_v24  ;;  %v1258_v18 = vsel %vm1088_vm2, %v2891_v46, 0.0  ;;  %vm1547_vm3 = vcmp.eq.s32.totalorder %v2695_v29, %v2897_v50 }
  0x74   :  { %1953 = vmatprep.subr.mxu1 %v1846_v20  ;;  %v1717_v62 = vsel %vm1547_vm3, %v2901_v51, 0.0  ;;  %vm288_vm4 = vcmp.eq.s32.totalorder %v2698_v30, %v2768_v11  ;;  %vm619_vm5 = vcmp.eq.s32.totalorder %v2698_v30, %v2772_v12  ;;  %vm1079_vm6 = vcmp.eq.s32.totalorder %v2698_v30, %v2784_v16 }
  0x75   :  { %v1843_v22 = vadd.f32 %v1715_v55, %v1384_v28  ;;  %v1386_v35 = vadd.f32 %v1258_v18, %v926_v31  ;;  %v458_v21 = vsel %vm288_vm4, %v2722_v57, 0.0  ;;  %v789_v43 = vsel %vm619_vm5, %v2732_v63, 0.0 }
  0x76   :  { %v917_v44 = vadd.f32 %v789_v43, %v458_v21  ;;  %v1249_v60 = vsel %vm1079_vm6, %v2748_v5, 0.0  ;;  %vm1538_vm7 = vcmp.eq.s32.totalorder %v2698_v30, %v2788_v17  ;;  %vm290_vm8 = vcmp.eq.s32.totalorder %v2698_v30, %v2776_v13 }
  0x77   :  { %1883 = vmatpush1.msra.mxu0 %v1843_v22  ;;  %v1845_v20 = vadd.f32 %v1717_v62, %v1386_v35  ;;  %v1708_v24 = vsel %vm1538_vm7, %v2752_v6, 0.0  ;;  %v460_v55 = vsel %vm290_vm8, %v2736_v1, 0.0  ;;  %vm621_vm9 = vcmp.eq.s32.totalorder %v2698_v30, %v2780_v15 }
  0x78   :  { %v1377_v0 = vadd.f32 %v1249_v60, %v917_v44  ;;  %v791_v28 = vsel %vm621_vm9, %v2740_v2, 0.0  ;;  %vm1081_vm10 = vcmp.eq.s32.totalorder %v2698_v30, %v2792_v19  ;;  %vm1540_vm11 = vcmp.eq.s32.totalorder %v2698_v30, %v2796_v23 }
  0x79   :  { %1954 = vmatpush1.msra.mxu1 %v1845_v20  ;;  %v919_v31 = vadd.f32 %v791_v28, %v460_v55  ;;  %v1251_v18 = vsel %vm1081_vm10, %v2760_v9, 0.0  ;;  %v1710_v62 = vsel %vm1540_vm11, %v2764_v10, 0.0  ;;  %vm287_vm12 = vcmp.eq.s32.totalorder %v2698_v30, %v2822_v40 }
  0x7a   :  { %v1836_v22 = vadd.f32 %v1708_v24, %v1377_v0  ;;  %v457_v35 = vsel %vm287_vm12, %v2830_v47, 0.0  ;;  %vm618_vm13 = vcmp.eq.s32.totalorder %v2698_v30, %v2834_v48  ;;  %vm1078_vm14 = vcmp.eq.s32.totalorder %v2698_v30, %v2842_v53 }
  0x7b   :  { %v1379_v21 = vadd.f32 %v1251_v18, %v919_v31  ;;  %v788_v43 = vsel %vm618_vm13, %v2838_v49, 0.0  ;;  %v1248_v44 = vsel %vm1078_vm14, %v2846_v54, 0.0  ;;  %vm1537_vm15 = vcmp.eq.s32.totalorder %v2698_v30, %v2853_v56 }
  0x7c   :  { %1884 = vmatprep.subr.mxu0 %v1836_v22  ;;  %v916_v60 = vadd.f32 %v788_v43, %v457_v35  ;;  %v1707_v20 = vsel %vm1537_vm15, %v2857_v59, 0.0  ;;  %vm289_vm0 = vcmp.eq.s32.totalorder %v2698_v30, %v2864_v27  ;;  %vm620_vm1 = vcmp.eq.s32.totalorder %v2698_v30, %v2878_v36 }
  0x7d   :  { %v1838_v24 = vadd.f32 %v1710_v62, %v1379_v21  ;;  %v459_v55 = vsel %vm289_vm0, %v2871_v32, 0.0  ;;  %v790_v0 = vsel %vm620_vm1, %v2882_v39, 0.0  ;;  %vm1080_vm2 = vcmp.eq.s32.totalorder %v2698_v30, %v2887_v45 }
  0x7e   :  { %v1376_v28 = vadd.f32 %v1248_v44, %v916_v60  ;;  %v918_v31 = vadd.f32 %v790_v0, %v459_v55  ;;  %v1250_v18 = vsel %vm1080_vm2, %v2891_v46, 0.0  ;;  %vm1539_vm3 = vcmp.eq.s32.totalorder %v2698_v30, %v2897_v50 }
  0x7f   :  { %1955 = vmatprep.subr.mxu1 %v1838_v24  ;;  %v1709_v22 = vsel %vm1539_vm3, %v2901_v51, 0.0  ;;  %vm280_vm4 = vcmp.eq.s32.totalorder %v2701_v33, %v2768_v11  ;;  %vm611_vm5 = vcmp.eq.s32.totalorder %v2701_v33, %v2772_v12  ;;  %vm1071_vm6 = vcmp.eq.s32.totalorder %v2701_v33, %v2784_v16 }
  0x80   :  { %v1835_v62 = vadd.f32 %v1707_v20, %v1376_v28  ;;  %v1378_v35 = vadd.f32 %v1250_v18, %v918_v31  ;;  %v450_v21 = vsel %vm280_vm4, %v2722_v57, 0.0  ;;  %v781_v43 = vsel %vm611_vm5, %v2732_v63, 0.0 }
  0x81   :  { %v909_v44 = vadd.f32 %v781_v43, %v450_v21  ;;  %v1241_v60 = vsel %vm1071_vm6, %v2748_v5, 0.0  ;;  %vm1530_vm7 = vcmp.eq.s32.totalorder %v2701_v33, %v2788_v17  ;;  %vm282_vm8 = vcmp.eq.s32.totalorder %v2701_v33, %v2776_v13 }
  0x82   :  { %1885 = vmatpush1.msra.mxu0 %v1835_v62  ;;  %v1837_v24 = vadd.f32 %v1709_v22, %v1378_v35  ;;  %v1700_v55 = vsel %vm1530_vm7, %v2752_v6, 0.0  ;;  %v452_v20 = vsel %vm282_vm8, %v2736_v1, 0.0  ;;  %vm613_vm9 = vcmp.eq.s32.totalorder %v2701_v33, %v2780_v15 }
  0x83   :  { %v1369_v0 = vadd.f32 %v1241_v60, %v909_v44  ;;  %v783_v28 = vsel %vm613_vm9, %v2740_v2, 0.0  ;;  %vm1073_vm10 = vcmp.eq.s32.totalorder %v2701_v33, %v2792_v19  ;;  %vm1532_vm11 = vcmp.eq.s32.totalorder %v2701_v33, %v2796_v23 }
  0x84   :  { %1956 = vmatpush1.msra.mxu1 %v1837_v24  ;;  %v911_v31 = vadd.f32 %v783_v28, %v452_v20  ;;  %v1243_v18 = vsel %vm1073_vm10, %v2760_v9, 0.0  ;;  %v1702_v22 = vsel %vm1532_vm11, %v2764_v10, 0.0  ;;  %vm279_vm12 = vcmp.eq.s32.totalorder %v2701_v33, %v2822_v40 }
  0x85   :  { %v1828_v62 = vadd.f32 %v1700_v55, %v1369_v0  ;;  %v449_v35 = vsel %vm279_vm12, %v2830_v47, 0.0  ;;  %vm610_vm13 = vcmp.eq.s32.totalorder %v2701_v33, %v2834_v48  ;;  %vm1070_vm14 = vcmp.eq.s32.totalorder %v2701_v33, %v2842_v53 }
  0x86   :  { %v1371_v21 = vadd.f32 %v1243_v18, %v911_v31  ;;  %v780_v43 = vsel %vm610_vm13, %v2838_v49, 0.0  ;;  %v1240_v44 = vsel %vm1070_vm14, %v2846_v54, 0.0  ;;  %vm1529_vm15 = vcmp.eq.s32.totalorder %v2701_v33, %v2853_v56 }
  0x87   :  { %1886 = vmatprep.subr.mxu0 %v1828_v62  ;;  %v908_v60 = vadd.f32 %v780_v43, %v449_v35  ;;  %v1699_v24 = vsel %vm1529_vm15, %v2857_v59, 0.0  ;;  %vm281_vm0 = vcmp.eq.s32.totalorder %v2701_v33, %v2864_v27  ;;  %vm612_vm1 = vcmp.eq.s32.totalorder %v2701_v33, %v2878_v36 }
  0x88   :  { %v1830_v55 = vadd.f32 %v1702_v22, %v1371_v21  ;;  %v451_v20 = vsel %vm281_vm0, %v2871_v32, 0.0  ;;  %v782_v0 = vsel %vm612_vm1, %v2882_v39, 0.0  ;;  %vm1072_vm2 = vcmp.eq.s32.totalorder %v2701_v33, %v2887_v45 }
  0x89   :  { %v1368_v28 = vadd.f32 %v1240_v44, %v908_v60  ;;  %v910_v31 = vadd.f32 %v782_v0, %v451_v20  ;;  %v1242_v18 = vsel %vm1072_vm2, %v2891_v46, 0.0  ;;  %vm1531_vm3 = vcmp.eq.s32.totalorder %v2701_v33, %v2897_v50 }
  0x8a   :  { %1957 = vmatprep.subr.mxu1 %v1830_v55  ;;  %v1701_v62 = vsel %vm1531_vm3, %v2901_v51, 0.0  ;;  %vm272_vm4 = vcmp.eq.s32.totalorder %v2704_v34, %v2768_v11  ;;  %vm603_vm5 = vcmp.eq.s32.totalorder %v2704_v34, %v2772_v12  ;;  %vm1063_vm6 = vcmp.eq.s32.totalorder %v2704_v34, %v2784_v16 }
  0x8b   :  { %v1827_v22 = vadd.f32 %v1699_v24, %v1368_v28  ;;  %v1370_v35 = vadd.f32 %v1242_v18, %v910_v31  ;;  %v442_v21 = vsel %vm272_vm4, %v2722_v57, 0.0  ;;  %v773_v43 = vsel %vm603_vm5, %v2732_v63, 0.0 }
  0x8c   :  { %v901_v44 = vadd.f32 %v773_v43, %v442_v21  ;;  %v1233_v60 = vsel %vm1063_vm6, %v2748_v5, 0.0  ;;  %vm1522_vm7 = vcmp.eq.s32.totalorder %v2704_v34, %v2788_v17  ;;  %vm274_vm8 = vcmp.eq.s32.totalorder %v2704_v34, %v2776_v13 }
  0x8d   :  { %1887 = vmatpush1.msra.mxu0 %v1827_v22  ;;  %v1829_v55 = vadd.f32 %v1701_v62, %v1370_v35  ;;  %v1692_v20 = vsel %vm1522_vm7, %v2752_v6, 0.0  ;;  %v444_v24 = vsel %vm274_vm8, %v2736_v1, 0.0  ;;  %vm605_vm9 = vcmp.eq.s32.totalorder %v2704_v34, %v2780_v15 }
  0x8e   :  { %v1361_v0 = vadd.f32 %v1233_v60, %v901_v44  ;;  %v775_v28 = vsel %vm605_vm9, %v2740_v2, 0.0  ;;  %vm1065_vm10 = vcmp.eq.s32.totalorder %v2704_v34, %v2792_v19  ;;  %vm1524_vm11 = vcmp.eq.s32.totalorder %v2704_v34, %v2796_v23 }
  0x8f   :  { %1958 = vmatpush1.msra.mxu1 %v1829_v55  ;;  %v903_v31 = vadd.f32 %v775_v28, %v444_v24  ;;  %v1235_v18 = vsel %vm1065_vm10, %v2760_v9, 0.0  ;;  %v1694_v62 = vsel %vm1524_vm11, %v2764_v10, 0.0  ;;  %vm271_vm12 = vcmp.eq.s32.totalorder %v2704_v34, %v2822_v40 }
  0x90   :  { %v1820_v22 = vadd.f32 %v1692_v20, %v1361_v0  ;;  %v441_v35 = vsel %vm271_vm12, %v2830_v47, 0.0  ;;  %vm602_vm13 = vcmp.eq.s32.totalorder %v2704_v34, %v2834_v48  ;;  %vm1062_vm14 = vcmp.eq.s32.totalorder %v2704_v34, %v2842_v53 }
  0x91   :  { %v1363_v21 = vadd.f32 %v1235_v18, %v903_v31  ;;  %v772_v43 = vsel %vm602_vm13, %v2838_v49, 0.0  ;;  %v1232_v44 = vsel %vm1062_vm14, %v2846_v54, 0.0  ;;  %vm1521_vm15 = vcmp.eq.s32.totalorder %v2704_v34, %v2853_v56 }
  0x92   :  { %1888 = vmatprep.subr.mxu0 %v1820_v22  ;;  %v900_v60 = vadd.f32 %v772_v43, %v441_v35  ;;  %v1691_v55 = vsel %vm1521_vm15, %v2857_v59, 0.0  ;;  %vm273_vm0 = vcmp.eq.s32.totalorder %v2704_v34, %v2864_v27  ;;  %vm604_vm1 = vcmp.eq.s32.totalorder %v2704_v34, %v2878_v36 }
  0x93   :  { %v1822_v20 = vadd.f32 %v1694_v62, %v1363_v21  ;;  %v443_v24 = vsel %vm273_vm0, %v2871_v32, 0.0  ;;  %v774_v0 = vsel %vm604_vm1, %v2882_v39, 0.0  ;;  %vm1064_vm2 = vcmp.eq.s32.totalorder %v2704_v34, %v2887_v45 }
  0x94   :  { %v1360_v28 = vadd.f32 %v1232_v44, %v900_v60  ;;  %v902_v31 = vadd.f32 %v774_v0, %v443_v24  ;;  %v1234_v18 = vsel %vm1064_vm2, %v2891_v46, 0.0  ;;  %vm1523_vm3 = vcmp.eq.s32.totalorder %v2704_v34, %v2897_v50 }
  0x95   :  { %1959 = vmatprep.subr.mxu1 %v1822_v20  ;;  %v1693_v22 = vsel %vm1523_vm3, %v2901_v51, 0.0  ;;  %vm264_vm4 = vcmp.eq.s32.totalorder %v2707_v37, %v2768_v11  ;;  %vm595_vm5 = vcmp.eq.s32.totalorder %v2707_v37, %v2772_v12  ;;  %vm1055_vm6 = vcmp.eq.s32.totalorder %v2707_v37, %v2784_v16 }
  0x96   :  { %v1819_v62 = vadd.f32 %v1691_v55, %v1360_v28  ;;  %v1362_v35 = vadd.f32 %v1234_v18, %v902_v31  ;;  %v434_v21 = vsel %vm264_vm4, %v2722_v57, 0.0  ;;  %v765_v43 = vsel %vm595_vm5, %v2732_v63, 0.0 }
  0x97   :  { %v893_v44 = vadd.f32 %v765_v43, %v434_v21  ;;  %v1225_v60 = vsel %vm1055_vm6, %v2748_v5, 0.0  ;;  %vm1514_vm7 = vcmp.eq.s32.totalorder %v2707_v37, %v2788_v17  ;;  %vm266_vm8 = vcmp.eq.s32.totalorder %v2707_v37, %v2776_v13 }
  0x98   :  { %1889 = vmatpush1.msra.mxu0 %v1819_v62  ;;  %v1821_v20 = vadd.f32 %v1693_v22, %v1362_v35  ;;  %v1684_v24 = vsel %vm1514_vm7, %v2752_v6, 0.0  ;;  %v436_v55 = vsel %vm266_vm8, %v2736_v1, 0.0  ;;  %vm597_vm9 = vcmp.eq.s32.totalorder %v2707_v37, %v2780_v15 }
  0x99   :  { %v1353_v0 = vadd.f32 %v1225_v60, %v893_v44  ;;  %v767_v28 = vsel %vm597_vm9, %v2740_v2, 0.0  ;;  %vm1057_vm10 = vcmp.eq.s32.totalorder %v2707_v37, %v2792_v19  ;;  %vm1516_vm11 = vcmp.eq.s32.totalorder %v2707_v37, %v2796_v23 }
  0x9a   :  { %1960 = vmatpush1.msra.mxu1 %v1821_v20  ;;  %v895_v31 = vadd.f32 %v767_v28, %v436_v55  ;;  %v1227_v18 = vsel %vm1057_vm10, %v2760_v9, 0.0  ;;  %v1686_v22 = vsel %vm1516_vm11, %v2764_v10, 0.0  ;;  %vm263_vm12 = vcmp.eq.s32.totalorder %v2707_v37, %v2822_v40 }
  0x9b   :  { %v1812_v62 = vadd.f32 %v1684_v24, %v1353_v0  ;;  %v433_v35 = vsel %vm263_vm12, %v2830_v47, 0.0  ;;  %vm594_vm13 = vcmp.eq.s32.totalorder %v2707_v37, %v2834_v48  ;;  %vm1054_vm14 = vcmp.eq.s32.totalorder %v2707_v37, %v2842_v53 }
  0x9c   :  { %v1355_v21 = vadd.f32 %v1227_v18, %v895_v31  ;;  %v764_v43 = vsel %vm594_vm13, %v2838_v49, 0.0  ;;  %v1224_v44 = vsel %vm1054_vm14, %v2846_v54, 0.0  ;;  %vm1513_vm15 = vcmp.eq.s32.totalorder %v2707_v37, %v2853_v56 }
  0x9d   :  { %1890 = vmatprep.subr.mxu0 %v1812_v62  ;;  %v892_v60 = vadd.f32 %v764_v43, %v433_v35  ;;  %v1683_v20 = vsel %vm1513_vm15, %v2857_v59, 0.0  ;;  %vm265_vm0 = vcmp.eq.s32.totalorder %v2707_v37, %v2864_v27  ;;  %vm596_vm1 = vcmp.eq.s32.totalorder %v2707_v37, %v2878_v36 }
  0x9e   :  { %v1814_v24 = vadd.f32 %v1686_v22, %v1355_v21  ;;  %v435_v55 = vsel %vm265_vm0, %v2871_v32, 0.0  ;;  %v766_v0 = vsel %vm596_vm1, %v2882_v39, 0.0  ;;  %vm1056_vm2 = vcmp.eq.s32.totalorder %v2707_v37, %v2887_v45 }
  0x9f   :  { %v1352_v28 = vadd.f32 %v1224_v44, %v892_v60  ;;  %v894_v31 = vadd.f32 %v766_v0, %v435_v55  ;;  %v1226_v18 = vsel %vm1056_vm2, %v2891_v46, 0.0  ;;  %vm1515_vm3 = vcmp.eq.s32.totalorder %v2707_v37, %v2897_v50 }
  0xa0   :  { %1961 = vmatprep.subr.mxu1 %v1814_v24  ;;  %v1685_v62 = vsel %vm1515_vm3, %v2901_v51, 0.0  ;;  %vm256_vm4 = vcmp.eq.s32.totalorder %v2710_v38, %v2768_v11  ;;  %vm587_vm5 = vcmp.eq.s32.totalorder %v2710_v38, %v2772_v12  ;;  %vm1047_vm6 = vcmp.eq.s32.totalorder %v2710_v38, %v2784_v16 }
  0xa1   :  { %v1811_v22 = vadd.f32 %v1683_v20, %v1352_v28  ;;  %v1354_v35 = vadd.f32 %v1226_v18, %v894_v31  ;;  %v426_v21 = vsel %vm256_vm4, %v2722_v57, 0.0  ;;  %v757_v43 = vsel %vm587_vm5, %v2732_v63, 0.0 }
  0xa2   :  { %v885_v44 = vadd.f32 %v757_v43, %v426_v21  ;;  %v1217_v60 = vsel %vm1047_vm6, %v2748_v5, 0.0  ;;  %vm1506_vm7 = vcmp.eq.s32.totalorder %v2710_v38, %v2788_v17  ;;  %vm258_vm8 = vcmp.eq.s32.totalorder %v2710_v38, %v2776_v13 }
  0xa3   :  { %1891 = vmatpush1.msra.mxu0 %v1811_v22  ;;  %v1813_v24 = vadd.f32 %v1685_v62, %v1354_v35  ;;  %v1676_v55 = vsel %vm1506_vm7, %v2752_v6, 0.0  ;;  %v428_v20 = vsel %vm258_vm8, %v2736_v1, 0.0  ;;  %vm589_vm9 = vcmp.eq.s32.totalorder %v2710_v38, %v2780_v15 }
  0xa4   :  { %v1345_v0 = vadd.f32 %v1217_v60, %v885_v44  ;;  %v759_v28 = vsel %vm589_vm9, %v2740_v2, 0.0  ;;  %vm1049_vm10 = vcmp.eq.s32.totalorder %v2710_v38, %v2792_v19  ;;  %vm1508_vm11 = vcmp.eq.s32.totalorder %v2710_v38, %v2796_v23 }
  0xa5   :  { %1962 = vmatpush1.msra.mxu1 %v1813_v24  ;;  %v887_v31 = vadd.f32 %v759_v28, %v428_v20  ;;  %v1219_v18 = vsel %vm1049_vm10, %v2760_v9, 0.0  ;;  %v1678_v62 = vsel %vm1508_vm11, %v2764_v10, 0.0  ;;  %vm255_vm12 = vcmp.eq.s32.totalorder %v2710_v38, %v2822_v40 }
  0xa6   :  { %v1804_v22 = vadd.f32 %v1676_v55, %v1345_v0  ;;  %v425_v35 = vsel %vm255_vm12, %v2830_v47, 0.0  ;;  %vm586_vm13 = vcmp.eq.s32.totalorder %v2710_v38, %v2834_v48  ;;  %vm1046_vm14 = vcmp.eq.s32.totalorder %v2710_v38, %v2842_v53 }
  0xa7   :  { %v1347_v21 = vadd.f32 %v1219_v18, %v887_v31  ;;  %v756_v43 = vsel %vm586_vm13, %v2838_v49, 0.0  ;;  %v1216_v44 = vsel %vm1046_vm14, %v2846_v54, 0.0  ;;  %vm1505_vm15 = vcmp.eq.s32.totalorder %v2710_v38, %v2853_v56 }
  0xa8   :  { %1892 = vmatprep.subr.mxu0 %v1804_v22  ;;  %v884_v60 = vadd.f32 %v756_v43, %v425_v35  ;;  %v1675_v24 = vsel %vm1505_vm15, %v2857_v59, 0.0  ;;  %vm257_vm0 = vcmp.eq.s32.totalorder %v2710_v38, %v2864_v27  ;;  %vm588_vm1 = vcmp.eq.s32.totalorder %v2710_v38, %v2878_v36 }
  0xa9   :  { %v1806_v55 = vadd.f32 %v1678_v62, %v1347_v21  ;;  %v427_v20 = vsel %vm257_vm0, %v2871_v32, 0.0  ;;  %v758_v0 = vsel %vm588_vm1, %v2882_v39, 0.0  ;;  %vm1048_vm2 = vcmp.eq.s32.totalorder %v2710_v38, %v2887_v45 }
  0xaa   :  { %v1344_v28 = vadd.f32 %v1216_v44, %v884_v60  ;;  %v886_v31 = vadd.f32 %v758_v0, %v427_v20  ;;  %v1218_v18 = vsel %vm1048_vm2, %v2891_v46, 0.0  ;;  %vm1507_vm3 = vcmp.eq.s32.totalorder %v2710_v38, %v2897_v50 }
  0xab   :  { %1963 = vmatprep.subr.mxu1 %v1806_v55  ;;  %v1677_v22 = vsel %vm1507_vm3, %v2901_v51, 0.0  ;;  %vm248_vm4 = vcmp.eq.s32.totalorder %v2713_v41, %v2768_v11  ;;  %vm579_vm5 = vcmp.eq.s32.totalorder %v2713_v41, %v2772_v12  ;;  %vm1039_vm6 = vcmp.eq.s32.totalorder %v2713_v41, %v2784_v16 }
  0xac   :  { %v1803_v62 = vadd.f32 %v1675_v24, %v1344_v28  ;;  %v1346_v35 = vadd.f32 %v1218_v18, %v886_v31  ;;  %v418_v21 = vsel %vm248_vm4, %v2722_v57, 0.0  ;;  %v749_v43 = vsel %vm579_vm5, %v2732_v63, 0.0 }
  0xad   :  { %v877_v44 = vadd.f32 %v749_v43, %v418_v21  ;;  %v1209_v60 = vsel %vm1039_vm6, %v2748_v5, 0.0  ;;  %vm1498_vm7 = vcmp.eq.s32.totalorder %v2713_v41, %v2788_v17  ;;  %vm250_vm8 = vcmp.eq.s32.totalorder %v2713_v41, %v2776_v13 }
  0xae   :  { %1893 = vmatpush1.msra.mxu0 %v1803_v62  ;;  %v1805_v55 = vadd.f32 %v1677_v22, %v1346_v35  ;;  %v1668_v20 = vsel %vm1498_vm7, %v2752_v6, 0.0  ;;  %v420_v24 = vsel %vm250_vm8, %v2736_v1, 0.0  ;;  %vm581_vm9 = vcmp.eq.s32.totalorder %v2713_v41, %v2780_v15 }
  0xaf   :  { %v1337_v0 = vadd.f32 %v1209_v60, %v877_v44  ;;  %v751_v28 = vsel %vm581_vm9, %v2740_v2, 0.0  ;;  %vm1041_vm10 = vcmp.eq.s32.totalorder %v2713_v41, %v2792_v19  ;;  %vm1500_vm11 = vcmp.eq.s32.totalorder %v2713_v41, %v2796_v23 }
  0xb0   :  { %1964 = vmatpush1.msra.mxu1 %v1805_v55  ;;  %v879_v31 = vadd.f32 %v751_v28, %v420_v24  ;;  %v1211_v18 = vsel %vm1041_vm10, %v2760_v9, 0.0  ;;  %v1670_v22 = vsel %vm1500_vm11, %v2764_v10, 0.0  ;;  %vm247_vm12 = vcmp.eq.s32.totalorder %v2713_v41, %v2822_v40 }
  0xb1   :  { %v1796_v62 = vadd.f32 %v1668_v20, %v1337_v0  ;;  %v417_v35 = vsel %vm247_vm12, %v2830_v47, 0.0  ;;  %vm578_vm13 = vcmp.eq.s32.totalorder %v2713_v41, %v2834_v48  ;;  %vm1038_vm14 = vcmp.eq.s32.totalorder %v2713_v41, %v2842_v53 }
  0xb2   :  { %v1339_v21 = vadd.f32 %v1211_v18, %v879_v31  ;;  %v748_v43 = vsel %vm578_vm13, %v2838_v49, 0.0  ;;  %v1208_v44 = vsel %vm1038_vm14, %v2846_v54, 0.0  ;;  %vm1497_vm15 = vcmp.eq.s32.totalorder %v2713_v41, %v2853_v56 }
  0xb3   :  { %1894 = vmatprep.subr.mxu0 %v1796_v62  ;;  %v876_v60 = vadd.f32 %v748_v43, %v417_v35  ;;  %v1667_v55 = vsel %vm1497_vm15, %v2857_v59, 0.0  ;;  %vm249_vm0 = vcmp.eq.s32.totalorder %v2713_v41, %v2864_v27  ;;  %vm580_vm1 = vcmp.eq.s32.totalorder %v2713_v41, %v2878_v36 }
  0xb4   :  { %v1798_v20 = vadd.f32 %v1670_v22, %v1339_v21  ;;  %v419_v24 = vsel %vm249_vm0, %v2871_v32, 0.0  ;;  %v750_v0 = vsel %vm580_vm1, %v2882_v39, 0.0  ;;  %vm1040_vm2 = vcmp.eq.s32.totalorder %v2713_v41, %v2887_v45 }
  0xb5   :  { %v1336_v28 = vadd.f32 %v1208_v44, %v876_v60  ;;  %v878_v31 = vadd.f32 %v750_v0, %v419_v24  ;;  %v1210_v18 = vsel %vm1040_vm2, %v2891_v46, 0.0  ;;  %vm1499_vm3 = vcmp.eq.s32.totalorder %v2713_v41, %v2897_v50 }
  0xb6   :  { %1965 = vmatprep.subr.mxu1 %v1798_v20  ;;  %v1669_v62 = vsel %vm1499_vm3, %v2901_v51, 0.0  ;;  %vm240_vm4 = vcmp.eq.s32.totalorder %v2716_v42, %v2768_v11  ;;  %vm571_vm5 = vcmp.eq.s32.totalorder %v2716_v42, %v2772_v12  ;;  %vm1031_vm6 = vcmp.eq.s32.totalorder %v2716_v42, %v2784_v16 }
  0xb7   :  { %v1795_v22 = vadd.f32 %v1667_v55, %v1336_v28  ;;  %v1338_v35 = vadd.f32 %v1210_v18, %v878_v31  ;;  %v410_v21 = vsel %vm240_vm4, %v2722_v57, 0.0  ;;  %v741_v43 = vsel %vm571_vm5, %v2732_v63, 0.0 }
  0xb8   :  { %v869_v44 = vadd.f32 %v741_v43, %v410_v21  ;;  %v1201_v60 = vsel %vm1031_vm6, %v2748_v5, 0.0  ;;  %vm1490_vm7 = vcmp.eq.s32.totalorder %v2716_v42, %v2788_v17  ;;  %vm242_vm8 = vcmp.eq.s32.totalorder %v2716_v42, %v2776_v13 }
  0xb9   :  { %1895 = vmatpush1.msra.mxu0 %v1795_v22  ;;  %v1797_v20 = vadd.f32 %v1669_v62, %v1338_v35  ;;  %v1660_v24 = vsel %vm1490_vm7, %v2752_v6, 0.0  ;;  %v412_v55 = vsel %vm242_vm8, %v2736_v1, 0.0  ;;  %vm573_vm9 = vcmp.eq.s32.totalorder %v2716_v42, %v2780_v15 }
  0xba   :  { %v1329_v0 = vadd.f32 %v1201_v60, %v869_v44  ;;  %v743_v28 = vsel %vm573_vm9, %v2740_v2, 0.0  ;;  %vm1033_vm10 = vcmp.eq.s32.totalorder %v2716_v42, %v2792_v19  ;;  %vm1492_vm11 = vcmp.eq.s32.totalorder %v2716_v42, %v2796_v23 }
  0xbb   :  { %1966 = vmatpush1.msra.mxu1 %v1797_v20  ;;  %v871_v31 = vadd.f32 %v743_v28, %v412_v55  ;;  %v1203_v18 = vsel %vm1033_vm10, %v2760_v9, 0.0  ;;  %v1662_v62 = vsel %vm1492_vm11, %v2764_v10, 0.0  ;;  %vm239_vm12 = vcmp.eq.s32.totalorder %v2716_v42, %v2822_v40 }
  0xbc   :  { %v1788_v22 = vadd.f32 %v1660_v24, %v1329_v0  ;;  %v409_v35 = vsel %vm239_vm12, %v2830_v47, 0.0  ;;  %vm570_vm13 = vcmp.eq.s32.totalorder %v2716_v42, %v2834_v48  ;;  %vm1030_vm14 = vcmp.eq.s32.totalorder %v2716_v42, %v2842_v53 }
  0xbd   :  { %v1331_v21 = vadd.f32 %v1203_v18, %v871_v31  ;;  %v740_v43 = vsel %vm570_vm13, %v2838_v49, 0.0  ;;  %v1200_v44 = vsel %vm1030_vm14, %v2846_v54, 0.0  ;;  %vm1489_vm15 = vcmp.eq.s32.totalorder %v2716_v42, %v2853_v56 }
  0xbe   :  { %1896 = vmatprep.subr.mxu0 %v1788_v22  ;;  %v868_v60 = vadd.f32 %v740_v43, %v409_v35  ;;  %v1659_v20 = vsel %vm1489_vm15, %v2857_v59, 0.0  ;;  %vm241_vm0 = vcmp.eq.s32.totalorder %v2716_v42, %v2864_v27  ;;  %vm572_vm1 = vcmp.eq.s32.totalorder %v2716_v42, %v2878_v36 }
  0xbf   :  { %v1790_v24 = vadd.f32 %v1662_v62, %v1331_v21  ;;  %v411_v55 = vsel %vm241_vm0, %v2871_v32, 0.0  ;;  %v742_v0 = vsel %vm572_vm1, %v2882_v39, 0.0  ;;  %vm1032_vm2 = vcmp.eq.s32.totalorder %v2716_v42, %v2887_v45 }
  0xc0   :  { %v1328_v28 = vadd.f32 %v1200_v44, %v868_v60  ;;  %v870_v31 = vadd.f32 %v742_v0, %v411_v55  ;;  %v1202_v18 = vsel %vm1032_vm2, %v2891_v46, 0.0  ;;  %vm1491_vm3 = vcmp.eq.s32.totalorder %v2716_v42, %v2897_v50 }
  0xc1   :  { %1967 = vmatprep.subr.mxu1 %v1790_v24  ;;  %v1661_v22 = vsel %vm1491_vm3, %v2901_v51, 0.0  ;;  %v3391_v35 = vadd.s32 32, %v2671_v14  ;;  %v3394_v62 = vadd.s32 24, %v2671_v14  ;;  %v3397_v41 = vadd.s32 16, %v2671_v14 }
  0xc2   :  { %v1787_v21 = vadd.f32 %v1659_v20, %v1328_v28  ;;  %v1330_v43 = vadd.f32 %v1202_v18, %v870_v31  ;;  %v3400_v44 = vadd.s32 8, %v2671_v14 }
  0xc3   :  { %vm232_vm4 = vcmp.eq.s32.totalorder %v3391_v35, %v2768_v11  ;;  %vm563_vm5 = vcmp.eq.s32.totalorder %v3391_v35, %v2772_v12  ;;  %vm1023_vm6 = vcmp.eq.s32.totalorder %v3391_v35, %v2784_v16  ;;  %vm1482_vm7 = vcmp.eq.s32.totalorder %v3391_v35, %v2788_v17 }
  0xc4   :  { %1897 = vmatpush1.msra.mxu0 %v1787_v21  ;;  %v1789_v60 = vadd.f32 %v1661_v22, %v1330_v43  ;;  %v402_v20 = vsel %vm232_vm4, %v2722_v57, 0.0  ;;  %v733_v24 = vsel %vm563_vm5, %v2732_v63, 0.0  ;;  %v1193_v55 = vsel %vm1023_vm6, %v2748_v5, 0.0 }
  0xc5   :  { %v861_v0 = vadd.f32 %v733_v24, %v402_v20  ;;  %v1652_v28 = vsel %vm1482_vm7, %v2752_v6, 0.0  ;;  %vm234_vm8 = vcmp.eq.s32.totalorder %v3391_v35, %v2776_v13  ;;  %vm565_vm9 = vcmp.eq.s32.totalorder %v3391_v35, %v2780_v15 }
  0xc6   :  { %1968 = vmatpush1.msra.mxu1 %v1789_v60  ;;  %v404_v31 = vsel %vm234_vm8, %v2736_v1, 0.0  ;;  %v735_v18 = vsel %vm565_vm9, %v2740_v2, 0.0  ;;  %vm1025_vm10 = vcmp.eq.s32.totalorder %v3391_v35, %v2792_v19  ;;  %vm1484_vm11 = vcmp.eq.s32.totalorder %v3391_v35, %v2796_v23 }
  0xc7   :  { %v1321_v22 = vadd.f32 %v1193_v55, %v861_v0  ;;  %v863_v21 = vadd.f32 %v735_v18, %v404_v31  ;;  %v1195_v43 = vsel %vm1025_vm10, %v2760_v9, 0.0  ;;  %v1654_v20 = vsel %vm1484_vm11, %v2764_v10, 0.0 }
  0xc8   :  { %vm231_vm12 = vcmp.eq.s32.totalorder %v3391_v35, %v2822_v40  ;;  %vm562_vm13 = vcmp.eq.s32.totalorder %v3391_v35, %v2834_v48  ;;  %vm1022_vm14 = vcmp.eq.s32.totalorder %v3391_v35, %v2842_v53  ;;  %vm1481_vm15 = vcmp.eq.s32.totalorder %v3391_v35, %v2853_v56 }
  0xc9   :  { %v1780_v60 = vadd.f32 %v1652_v28, %v1321_v22  ;;  %v1323_v24 = vadd.f32 %v1195_v43, %v863_v21  ;;  %v401_v55 = vsel %vm231_vm12, %v2830_v47, 0.0  ;;  %v732_v0 = vsel %vm562_vm13, %v2838_v49, 0.0 }
  0xca   :  { %v860_v31 = vadd.f32 %v732_v0, %v401_v55  ;;  %v1192_v18 = vsel %vm1022_vm14, %v2846_v54, 0.0  ;;  %v1651_v42 = vsel %vm1481_vm15, %v2857_v59, 0.0  ;;  %vm233_vm0 = vcmp.eq.s32.totalorder %v3391_v35, %v2864_v27 }
  0xcb   :  { %1898 = vmatprep.subr.mxu0 %v1780_v60  ;;  %v1782_v38 = vadd.f32 %v1654_v20, %v1323_v24  ;;  %v403_v37 = vsel %vm233_vm0, %v2871_v32, 0.0  ;;  %vm564_vm1 = vcmp.eq.s32.totalorder %v3391_v35, %v2878_v36  ;;  %vm1024_vm2 = vcmp.eq.s32.totalorder %v3391_v35, %v2887_v45 }
  0xcc   :  { %v1320_v28 = vadd.f32 %v1192_v18, %v860_v31  ;;  %v734_v22 = vsel %vm564_vm1, %v2882_v39, 0.0  ;;  %v1194_v21 = vsel %vm1024_vm2, %v2891_v46, 0.0  ;;  %vm1483_vm3 = vcmp.eq.s32.totalorder %v3391_v35, %v2897_v50 }
  0xcd   :  { %1969 = vmatprep.subr.mxu1 %v1782_v38  ;;  %v862_v43 = vadd.f32 %v734_v22, %v403_v37  ;;  %v1653_v20 = vsel %vm1483_vm3, %v2901_v51, 0.0  ;;  %vm224_vm4 = vcmp.eq.s32.totalorder %v3394_v62, %v2768_v11  ;;  %vm555_vm5 = vcmp.eq.s32.totalorder %v3394_v62, %v2772_v12 }
  0xce   :  { %v1779_v60 = vadd.f32 %v1651_v42, %v1320_v28  ;;  %v394_v24 = vsel %vm224_vm4, %v2722_v57, 0.0  ;;  %v725_v55 = vsel %vm555_vm5, %v2732_v63, 0.0  ;;  %vm1015_vm6 = vcmp.eq.s32.totalorder %v3394_v62, %v2784_v16 }
  0xcf   :  { %v1322_v0 = vadd.f32 %v1194_v21, %v862_v43  ;;  %v853_v31 = vadd.f32 %v725_v55, %v394_v24  ;;  %v1185_v37 = vsel %vm1015_vm6, %v2748_v5, 0.0  ;;  %vm1474_vm7 = vcmp.eq.s32.totalorder %v3394_v62, %v2788_v17 }
  0xd0   :  { %1899 = vmatpush1.msra.mxu0 %v1779_v60  ;;  %v1644_v38 = vsel %vm1474_vm7, %v2752_v6, 0.0  ;;  %vm226_vm8 = vcmp.eq.s32.totalorder %v3394_v62, %v2776_v13  ;;  %vm557_vm9 = vcmp.eq.s32.totalorder %v3394_v62, %v2780_v15  ;;  %vm1017_vm10 = vcmp.eq.s32.totalorder %v3394_v62, %v2792_v19 }
  0xd1   :  { %v1781_v42 = vadd.f32 %v1653_v20, %v1322_v0  ;;  %v1313_v18 = vadd.f32 %v1185_v37, %v853_v31  ;;  %v396_v28 = vsel %vm226_vm8, %v2736_v1, 0.0  ;;  %v727_v22 = vsel %vm557_vm9, %v2740_v2, 0.0 }
  0xd2   :  { %v855_v21 = vadd.f32 %v727_v22, %v396_v28  ;;  %v1187_v43 = vsel %vm1017_vm10, %v2760_v9, 0.0  ;;  %vm1476_vm11 = vcmp.eq.s32.totalorder %v3394_v62, %v2796_v23  ;;  %vm223_vm12 = vcmp.eq.s32.totalorder %v3394_v62, %v2822_v40 }
  0xd3   :  { %1970 = vmatpush1.msra.mxu1 %v1781_v42  ;;  %v1772_v60 = vadd.f32 %v1644_v38, %v1313_v18  ;;  %v1646_v24 = vsel %vm1476_vm11, %v2764_v10, 0.0  ;;  %v393_v20 = vsel %vm223_vm12, %v2830_v47, 0.0  ;;  %vm554_vm13 = vcmp.eq.s32.totalorder %v3394_v62, %v2834_v48 }
  0xd4   :  { %v1315_v55 = vadd.f32 %v1187_v43, %v855_v21  ;;  %v724_v0 = vsel %vm554_vm13, %v2838_v49, 0.0  ;;  %vm1014_vm14 = vcmp.eq.s32.totalorder %v3394_v62, %v2842_v53  ;;  %vm1473_vm15 = vcmp.eq.s32.totalorder %v3394_v62, %v2853_v56 }
  0xd5   :  { %1900 = vmatprep.subr.mxu0 %v1772_v60  ;;  %v852_v31 = vadd.f32 %v724_v0, %v393_v20  ;;  %v1184_v37 = vsel %vm1014_vm14, %v2846_v54, 0.0  ;;  %v1643_v38 = vsel %vm1473_vm15, %v2857_v59, 0.0  ;;  %vm225_vm0 = vcmp.eq.s32.totalorder %v3394_v62, %v2864_v27 }
  0xd6   :  { %v1774_v42 = vadd.f32 %v1646_v24, %v1315_v55  ;;  %v395_v18 = vsel %vm225_vm0, %v2871_v32, 0.0  ;;  %vm556_vm1 = vcmp.eq.s32.totalorder %v3394_v62, %v2878_v36  ;;  %vm1016_vm2 = vcmp.eq.s32.totalorder %v3394_v62, %v2887_v45 }
  0xd7   :  { %v1312_v28 = vadd.f32 %v1184_v37, %v852_v31  ;;  %v726_v22 = vsel %vm556_vm1, %v2882_v39, 0.0  ;;  %v1186_v21 = vsel %vm1016_vm2, %v2891_v46, 0.0  ;;  %vm1475_vm3 = vcmp.eq.s32.totalorder %v3394_v62, %v2897_v50 }
  0xd8   :  { %1971 = vmatprep.subr.mxu1 %v1774_v42  ;;  %v854_v43 = vadd.f32 %v726_v22, %v395_v18  ;;  %v1645_v60 = vsel %vm1475_vm3, %v2901_v51, 0.0  ;;  %vm216_vm4 = vcmp.eq.s32.totalorder %v3397_v41, %v2768_v11  ;;  %vm547_vm5 = vcmp.eq.s32.totalorder %v3397_v41, %v2772_v12 }
  0xd9   :  { %v1771_v24 = vadd.f32 %v1643_v38, %v1312_v28  ;;  %v386_v20 = vsel %vm216_vm4, %v2722_v57, 0.0  ;;  %v717_v55 = vsel %vm547_vm5, %v2732_v63, 0.0  ;;  %vm1007_vm6 = vcmp.eq.s32.totalorder %v3397_v41, %v2784_v16 }
  0xda   :  { %v1314_v0 = vadd.f32 %v1186_v21, %v854_v43  ;;  %v845_v31 = vadd.f32 %v717_v55, %v386_v20  ;;  %v1177_v37 = vsel %vm1007_vm6, %v2748_v5, 0.0  ;;  %vm1466_vm7 = vcmp.eq.s32.totalorder %v3397_v41, %v2788_v17 }
  0xdb   :  { %1901 = vmatpush1.msra.mxu0 %v1771_v24  ;;  %v1636_v42 = vsel %vm1466_vm7, %v2752_v6, 0.0  ;;  %vm218_vm8 = vcmp.eq.s32.totalorder %v3397_v41, %v2776_v13  ;;  %vm549_vm9 = vcmp.eq.s32.totalorder %v3397_v41, %v2780_v15  ;;  %vm1009_vm10 = vcmp.eq.s32.totalorder %v3397_v41, %v2792_v19 }
  0xdc   :  { %v1773_v38 = vadd.f32 %v1645_v60, %v1314_v0  ;;  %v1305_v18 = vadd.f32 %v1177_v37, %v845_v31  ;;  %v388_v28 = vsel %vm218_vm8, %v2736_v1, 0.0  ;;  %v719_v22 = vsel %vm549_vm9, %v2740_v2, 0.0 }
  0xdd   :  { %v847_v21 = vadd.f32 %v719_v22, %v388_v28  ;;  %v1179_v43 = vsel %vm1009_vm10, %v2760_v9, 0.0  ;;  %vm1468_vm11 = vcmp.eq.s32.totalorder %v3397_v41, %v2796_v23  ;;  %vm215_vm12 = vcmp.eq.s32.totalorder %v3397_v41, %v2822_v40 }
  0xde   :  { %1972 = vmatpush1.msra.mxu1 %v1773_v38  ;;  %v1764_v24 = vadd.f32 %v1636_v42, %v1305_v18  ;;  %v1638_v20 = vsel %vm1468_vm11, %v2764_v10, 0.0  ;;  %v385_v60 = vsel %vm215_vm12, %v2830_v47, 0.0  ;;  %vm546_vm13 = vcmp.eq.s32.totalorder %v3397_v41, %v2834_v48 }
  0xdf   :  { %v1307_v55 = vadd.f32 %v1179_v43, %v847_v21  ;;  %v716_v0 = vsel %vm546_vm13, %v2838_v49, 0.0  ;;  %vm1006_vm14 = vcmp.eq.s32.totalorder %v3397_v41, %v2842_v53  ;;  %vm1465_vm15 = vcmp.eq.s32.totalorder %v3397_v41, %v2853_v56 }
  0xe0   :  { %1902 = vmatprep.subr.mxu0 %v1764_v24  ;;  %v844_v31 = vadd.f32 %v716_v0, %v385_v60  ;;  %v1176_v37 = vsel %vm1006_vm14, %v2846_v54, 0.0  ;;  %v1635_v42 = vsel %vm1465_vm15, %v2857_v59, 0.0  ;;  %vm217_vm0 = vcmp.eq.s32.totalorder %v3397_v41, %v2864_v27 }
  0xe1   :  { %v1766_v38 = vadd.f32 %v1638_v20, %v1307_v55  ;;  %v387_v18 = vsel %vm217_vm0, %v2871_v32, 0.0  ;;  %vm548_vm1 = vcmp.eq.s32.totalorder %v3397_v41, %v2878_v36  ;;  %vm1008_vm2 = vcmp.eq.s32.totalorder %v3397_v41, %v2887_v45 }
  0xe2   :  { %v1304_v28 = vadd.f32 %v1176_v37, %v844_v31  ;;  %v718_v22 = vsel %vm548_vm1, %v2882_v39, 0.0  ;;  %v1178_v21 = vsel %vm1008_vm2, %v2891_v46, 0.0  ;;  %vm1467_vm3 = vcmp.eq.s32.totalorder %v3397_v41, %v2897_v50 }
  0xe3   :  { %1973 = vmatprep.subr.mxu1 %v1766_v38  ;;  %v846_v43 = vadd.f32 %v718_v22, %v387_v18  ;;  %v1637_v24 = vsel %vm1467_vm3, %v2901_v51, 0.0  ;;  %vm208_vm4 = vcmp.eq.s32.totalorder %v3400_v44, %v2768_v11  ;;  %vm539_vm5 = vcmp.eq.s32.totalorder %v3400_v44, %v2772_v12 }
  0xe4   :  { %vm200_vm6 = vcmp.eq.s32.totalorder %v2671_v14, %v2768_v11  ;;  %v1763_v20 = vadd.f32 %v1635_v42, %v1304_v28  ;;  %v378_v60 = vsel %vm208_vm4, %v2722_v57, 0.0  ;;  %v709_v55 = vsel %vm539_vm5, %v2732_v63, 0.0 }
  0xe5   :  { %vm999_vm7 = vcmp.eq.s32.totalorder %v3400_v44, %v2784_v16  ;;  %v1306_v0 = vadd.f32 %v1178_v21, %v846_v43  ;;  %v837_v31 = vadd.f32 %v709_v55, %v378_v60  ;;  %vm1458_vm8 = vcmp.eq.s32.totalorder %v3400_v44, %v2788_v17 }
  0xe6   :  { %v1169_v37 = vsel %vm999_vm7, %v2748_v5, 0.0  ;;  %1903 = vmatpush1.msra.mxu0 %v1763_v20  ;;  %v1628_v38 = vsel %vm1458_vm8, %v2752_v6, 0.0  ;;  %vm210_vm9 = vcmp.eq.s32.totalorder %v3400_v44, %v2776_v13  ;;  %vm541_vm10 = vcmp.eq.s32.totalorder %v3400_v44, %v2780_v15 }
  0xe7   :  { %vm1001_vm11 = vcmp.eq.s32.totalorder %v3400_v44, %v2792_v19  ;;  %v1765_v42 = vadd.f32 %v1637_v24, %v1306_v0  ;;  %v1297_v18 = vadd.f32 %v1169_v37, %v837_v31  ;;  %v380_v28 = vsel %vm210_vm9, %v2736_v1, 0.0 }
  0xe8   :  { %v711_v22 = vsel %vm541_vm10, %v2740_v2, 0.0  ;;  %v1171_v43 = vsel %vm1001_vm11, %v2760_v9, 0.0  ;;  %vm1460_vm12 = vcmp.eq.s32.totalorder %v3400_v44, %v2796_v23  ;;  %vm207_vm13 = vcmp.eq.s32.totalorder %v3400_v44, %v2822_v40 }
  0xe9   :  { %v839_v21 = vadd.f32 %v711_v22, %v380_v28  ;;  %1974 = vmatpush1.msra.mxu1 %v1765_v42  ;;  %v1756_v20 = vadd.f32 %v1628_v38, %v1297_v18  ;;  %v1630_v60 = vsel %vm1460_vm12, %v2764_v10, 0.0  ;;  %v377_v24 = vsel %vm207_vm13, %v2830_v47, 0.0 }
  0xea   :  { %vm538_vm14 = vcmp.eq.s32.totalorder %v3400_v44, %v2834_v48  ;;  %vm998_vm15 = vcmp.eq.s32.totalorder %v3400_v44, %v2842_v53  ;;  %vm1457_vm0 = vcmp.eq.s32.totalorder %v3400_v44, %v2853_v56  ;;  %vm209_vm1 = vcmp.eq.s32.totalorder %v3400_v44, %v2864_v27 }
  0xeb   :  { %v1299_v55 = vadd.f32 %v1171_v43, %v839_v21  ;;  %v708_v0 = vsel %vm538_vm14, %v2838_v49, 0.0  ;;  %1904 = vmatprep.subr.mxu0 %v1756_v20  ;;  %v1168_v37 = vsel %vm998_vm15, %v2846_v54, 0.0  ;;  %v1627_v38 = vsel %vm1457_vm0, %v2857_v59, 0.0 }
  0xec   :  { %v836_v31 = vadd.f32 %v708_v0, %v377_v24  ;;  %v379_v18 = vsel %vm209_vm1, %v2871_v32, 0.0  ;;  %vm540_vm2 = vcmp.eq.s32.totalorder %v3400_v44, %v2878_v36  ;;  %vm1000_vm3 = vcmp.eq.s32.totalorder %v3400_v44, %v2887_v45 }
  0xed   :  { %v1758_v42 = vadd.f32 %v1630_v60, %v1299_v55  ;;  %v710_v22 = vsel %vm540_vm2, %v2882_v39, 0.0  ;;  %v1170_v21 = vsel %vm1000_vm3, %v2891_v46, 0.0  ;;  %vm1459_vm4 = vcmp.eq.s32.totalorder %v3400_v44, %v2897_v50 }
  0xee   :  { %v1296_v28 = vadd.f32 %v1168_v37, %v836_v31  ;;  %v838_v43 = vadd.f32 %v710_v22, %v379_v18  ;;  %v1629_v20 = vsel %vm1459_vm4, %v2901_v51, 0.0  ;;  %v370_v60 = vsel %vm200_vm6, %v2722_v57, 0.0 }
  0xef   :  { %1975 = vmatprep.subr.mxu1 %v1758_v42  ;;  %vm531_vm5 = vcmp.eq.s32.totalorder %v2671_v14, %v2772_v12  ;;  %vm991_vm7 = vcmp.eq.s32.totalorder %v2671_v14, %v2784_v16  ;;  %vm1450_vm8 = vcmp.eq.s32.totalorder %v2671_v14, %v2788_v17  ;;  %vm202_vm6 = vcmp.eq.s32.totalorder %v2671_v14, %v2776_v13 }
  0xf0   :  { %v1755_v24 = vadd.f32 %v1627_v38, %v1296_v28  ;;  %v701_v55 = vsel %vm531_vm5, %v2732_v63, 0.0  ;;  %v1298_v0 = vadd.f32 %v1170_v21, %v838_v43  ;;  %v1161_v37 = vsel %vm991_vm7, %v2748_v5, 0.0  ;;  %v4760_v43 = vld [vmem:[#allocation14_spill] sm:$0xff] }
  0xf1   :  { %v829_v31 = vadd.f32 %v701_v55, %v370_v60  ;;  %v1620_v42 = vsel %vm1450_vm8, %v2752_v6, 0.0  ;;  %vm533_vm9 = vcmp.eq.s32.totalorder %v2671_v14, %v2780_v15  ;;  %vm993_vm10 = vcmp.eq.s32.totalorder %v2671_v14, %v2792_v19 }
  0xf2   :  { %1905 = vmatpush1.msra.mxu0 %v1755_v24  ;;  %vm1452_vm11 = vcmp.eq.s32.totalorder %v2671_v14, %v2796_v23  ;;  %v1757_v57 = vadd.f32 %v1629_v20, %v1298_v0  ;;  %v372_v11 = vsel %vm202_vm6, %v2736_v1, 0.0  ;;  %v703_v5 = vsel %vm533_vm9, %v2740_v2, 0.0  ;;  %v4761_v20 = vld [vmem:[#allocation23_spill] sm:$0xff] }
  0xf3   :  { %v1289_v63 = vadd.f32 %v1161_v37, %v829_v31  ;;  %v831_v6 = vadd.f32 %v703_v5, %v372_v11  ;;  %v1163_v12 = vsel %vm993_vm10, %v2760_v9, 0.0  ;;  %v1622_v13 = vsel %vm1452_vm11, %v2764_v10, 0.0 }
  0xf4   :  { %vm199_vm12 = vcmp.eq.s32.totalorder %v2671_v14, %v2822_v40  ;;  %1976 = vmatpush1.msra.mxu1 %v1757_v57  ;;  %vm530_vm13 = vcmp.eq.s32.totalorder %v2671_v14, %v2834_v48  ;;  %vm990_vm14 = vcmp.eq.s32.totalorder %v2671_v14, %v2842_v53  ;;  %vm1449_vm15 = vcmp.eq.s32.totalorder %v2671_v14, %v2853_v56 }
  0xf5   :  { %v1748_v15 = vadd.f32 %v1620_v42, %v1289_v63  ;;  %v369_v16 = vsel %vm199_vm12, %v2830_v47, 0.0  ;;  %v1291_v1 = vadd.f32 %v1163_v12, %v831_v6  ;;  %v700_v2 = vsel %vm530_vm13, %v2838_v49, 0.0 }
  0xf6   :  { %v1160_v9 = vsel %vm990_vm14, %v2846_v54, 0.0  ;;  %v828_v10 = vadd.f32 %v700_v2, %v369_v16  ;;  %v1619_v17 = vsel %vm1449_vm15, %v2857_v59, 0.0  ;;  %vm201_vm0 = vcmp.eq.s32.totalorder %v2671_v14, %v2864_v27  ;;  %v1875_v27 = vld [vmem:[#allocation7] sm:$0xff] }
  0xf7   :  { %1906 = vmatprep.subr.mxu0 %v1748_v15  ;;  %v1750_v19 = vadd.f32 %v1622_v13, %v1291_v1  ;;  %v2638_v23 = vmov 0.0   ;;  %v371_v40 = vsel %vm201_vm0, %v2871_v32, 0.0  ;;  %vm532_vm1 = vcmp.eq.s32.totalorder %v2671_v14, %v2878_v36 }
  0xf8   :  { %1940 = vmatprep.mubr.f32.mxu0 %v2638_v23  ;;  %vm992_vm2 = vcmp.eq.s32.totalorder %v2671_v14, %v2887_v45  ;;  %2011 = vmatprep.mubr.f32.mxu1 %v2638_v23  ;;  %v1288_v47 = vadd.f32 %v1160_v9, %v828_v10  ;;  %v702_v48 = vsel %vm532_vm1, %v2882_v39, 0.0  ;;  %vm1451_vm3 = vcmp.eq.s32.totalorder %v2671_v14, %v2897_v50 }
  0xf9   :  { %v1162_v49 = vsel %vm992_vm2, %v2891_v46, 0.0  ;;  %1977 = vmatprep.subr.mxu1 %v1750_v19  ;;  %v830_v53 = vadd.f32 %v702_v48, %v371_v40  ;;  %v1621_v54 = vsel %vm1451_vm3, %v2901_v51, 0.0  ;;  %v3646_v56 = vsub.s32 5, %v2671_v14 }
  0xfa   :  { %v1747_v59 = vadd.f32 %v1619_v17, %v1288_v47  ;;  %v3649_v32 = vsub.s32 7, %v2671_v14  ;;  %v3652_v36 = vsub.s32 4, %v2671_v14  ;;  %v3655_v39 = vsub.s32 6, %v2671_v14 }
  0xfb   :  { %v1290_v45 = vadd.f32 %v1162_v49, %v830_v53  ;;  %v3659_v46 = vrot.slane %v2742_v3, %v3646_v56  ;;  %v3663_v50 = vrot.slane %v2718_v52, %v3646_v56  ;;  %v3667_v51 = vrot.slane %v2744_v4, %v3646_v56 }
  0xfc   :  { %1907 = vmatpush1.msra.mxu0 %v1747_v59  ;;  %v3671_v38 = vrot.slane %v2724_v58, %v3646_v56  ;;  %v3675_v18 = vrot.slane %v2754_v7, %v3646_v56  ;;  %v3679_v28 = vrot.slane %v2726_v61, %v3646_v56  ;;  %v3683_v22 = vrot.slane %v2756_v8, %v3646_v56 }
  0xfd   :  { %v1749_v21 = vadd.f32 %v1621_v54, %v1290_v45  ;;  %1941 = vmatmul.mubr.f32.vlgmr.msra.gmra.mxu0 %v1875_v27  ;;  %vm324_vm4 = vcmp.eq.s32.totalorder %v4760_v43, %v3659_v46  ;;  %vm655_vm5 = vcmp.eq.s32.totalorder %v4760_v43, %v3667_v51  ;;  %v3691_v60 = vrot.slane %v4761_v20, %v3646_v56 }
  0xfe   :  { %v494_v24 = vsel %vm324_vm4, %v3663_v50, 0.0  ;;  %v825_v55 = vsel %vm655_vm5, %v3671_v38, 0.0  ;;  %vm1115_vm7 = vcmp.eq.s32.totalorder %v4760_v43, %v3675_v18  ;;  %vm1574_vm8 = vcmp.eq.s32.totalorder %v4760_v43, %v3683_v22  ;;  %2082 = vmatprep.mubr.f32.mxu0 %v2638_v23 }
  0xff   :  { %1978 = vmatpush1.msra.mxu1 %v1749_v21  ;;  %v953_v0 = vadd.f32 %v825_v55, %v494_v24  ;;  %v1285_v31 = vsel %vm1115_vm7, %v3679_v28, 0.0  ;;  %v1744_v37 = vsel %vm1574_vm8, %v3691_v60, 0.0  ;;  %v3703_v42 = vrot.slane %v2742_v3, %v3649_v32 }
 0x100   :  { %2012 = vmatmul.mubr.f32.vlgmr.msra.gmra.mxu1 %v1875_v27  ;;  %v3707_v57 = vrot.slane %v2718_v52, %v3649_v32  ;;  %v3711_v63 = vrot.slane %v2744_v4, %v3649_v32  ;;  %v3715_v11 = vrot.slane %v2724_v58, %v3649_v32  ;;  %v3719_v5 = vrot.slane %v2754_v7, %v3649_v32 }
 0x101   :  { %v1413_v6 = vadd.f32 %v1285_v31, %v953_v0  ;;  %vm326_vm6 = vcmp.eq.s32.totalorder %v4760_v43, %v3703_v42  ;;  %v3725_v12 = vrot.slane %v2726_v61, %v3649_v32  ;;  %v3729_v13 = vrot.slane %v2756_v8, %v3649_v32  ;;  %2153 = vmatprep.mubr.f32.mxu1 %v2638_v23 }
 0x102   :  { %v496_v15 = vsel %vm326_vm6, %v3707_v57, 0.0  ;;  %vm657_vm9 = vcmp.eq.s32.totalorder %v4760_v43, %v3711_v63  ;;  %vm1117_vm10 = vcmp.eq.s32.totalorder %v4760_v43, %v3719_v5  ;;  %v3738_v16 = vrot.slane %v4761_v20, %v3649_v32 }
 0x103   :  { %v1872_v1 = vadd.f32 %v1744_v37, %v1413_v6  ;;  %v827_v2 = vsel %vm657_vm9, %v3715_v11, 0.0  ;;  %v1287_v9 = vsel %vm1117_vm10, %v3725_v12, 0.0  ;;  %vm1576_vm11 = vcmp.eq.s32.totalorder %v4760_v43, %v3729_v13 }
 0x104   :  { %v955_v10 = vadd.f32 %v827_v2, %v496_v15  ;;  %v1746_v17 = vsel %vm1576_vm11, %v3738_v16, 0.0  ;;  %v3747_v19 = vrot.slane %v2742_v3, %v3652_v36  ;;  %v3751_v23 = vrot.slane %v2718_v52, %v3652_v36 }
 0x105   :  { %2018 = vmatprep.subr.mxu0 %v1872_v1  ;;  %v3755_v40 = vrot.slane %v2744_v4, %v3652_v36  ;;  %v3759_v47 = vrot.slane %v2724_v58, %v3652_v36  ;;  %v3763_v48 = vrot.slane %v2754_v7, %v3652_v36  ;;  %v3767_v49 = vrot.slane %v2726_v61, %v3652_v36 }
 0x106   :  { %v1415_v53 = vadd.f32 %v1287_v9, %v955_v10  ;;  %vm323_vm12 = vcmp.eq.s32.totalorder %v4760_v43, %v3747_v19  ;;  %v3773_v54 = vrot.slane %v2756_v8, %v3652_v36  ;;  %v3777_v59 = vrot.slane %v4761_v20, %v3652_v36 }
 0x107   :  { %v493_v27 = vsel %vm323_vm12, %v3751_v23, 0.0  ;;  %vm654_vm13 = vcmp.eq.s32.totalorder %v4760_v43, %v3755_v40  ;;  %vm1114_vm14 = vcmp.eq.s32.totalorder %v4760_v43, %v3763_v48  ;;  %v3786_v45 = vrot.slane %v2742_v3, %v3655_v39 }
 0x108   :  { %v1874_v21 = vadd.f32 %v1746_v17, %v1415_v53  ;;  %v824_v24 = vsel %vm654_vm13, %v3759_v47, 0.0  ;;  %v1284_v55 = vsel %vm1114_vm14, %v3767_v49, 0.0  ;;  %vm1573_vm15 = vcmp.eq.s32.totalorder %v4760_v43, %v3773_v54 }
 0x109   :  { %v952_v0 = vadd.f32 %v824_v24, %v493_v27  ;;  %v1743_v31 = vsel %vm1573_vm15, %v3777_v59, 0.0  ;;  %vm325_vm0 = vcmp.eq.s32.totalorder %v4760_v43, %v3786_v45  ;;  %v3797_v37 = vrot.slane %v2718_v52, %v3655_v39 }
 0x10a   :  { %2089 = vmatprep.subr.mxu1 %v1874_v21  ;;  %v3801_v3 = vrot.slane %v2744_v4, %v3655_v39  ;;  %v3805_v6 = vrot.slane %v2724_v58, %v3655_v39  ;;  %v3809_v15 = vrot.slane %v2754_v7, %v3655_v39  ;;  %v3813_v1 = vrot.slane %v2726_v61, %v3655_v39 }
 0x10b   :  { %v1412_v2 = vadd.f32 %v1284_v55, %v952_v0  ;;  %v495_v52 = vsel %vm325_vm0, %v3797_v37, 0.0  ;;  %v3818_v9 = vrot.slane %v2756_v8, %v3655_v39  ;;  %v3822_v4 = vrot.slane %v4761_v20, %v3655_v39 }
 0x10c   :  { %vm656_vm1 = vcmp.eq.s32.totalorder %v4760_v43, %v3801_v3  ;;  %vm1116_vm2 = vcmp.eq.s32.totalorder %v4760_v43, %v3809_v15  ;;  %vm316_vm3 = vcmp.eq.s32.totalorder %v2689_v25, %v3659_v46  ;;  %vm647_vm4 = vcmp.eq.s32.totalorder %v2689_v25, %v3667_v51 }
 0x10d   :  { %v1871_v58 = vadd.f32 %v1743_v31, %v1412_v2  ;;  %v826_v61 = vsel %vm656_vm1, %v3805_v6, 0.0  ;;  %v1286_v7 = vsel %vm1116_vm2, %v3813_v1, 0.0  ;;  %vm1575_vm5 = vcmp.eq.s32.totalorder %v4760_v43, %v3818_v9 }
 0x10e   :  { %v954_v8 = vadd.f32 %v826_v61, %v495_v52  ;;  %v1745_v20 = vsel %vm1575_vm5, %v3822_v4, 0.0  ;;  %v486_v10 = vsel %vm316_vm3, %v3663_v50, 0.0  ;;  %v817_v17 = vsel %vm647_vm4, %v3671_v38, 0.0 }
 0x10f   :  { %2019 = vmatpush1.msra.mxu0 %v1871_v58  ;;  %v945_v53 = vadd.f32 %v817_v17, %v486_v10  ;;  %vm1107_vm7 = vcmp.eq.s32.totalorder %v2689_v25, %v3675_v18  ;;  %vm1566_vm8 = vcmp.eq.s32.totalorder %v2689_v25, %v3683_v22  ;;  %vm318_vm6 = vcmp.eq.s32.totalorder %v2689_v25, %v3703_v42 }
 0x110   :  { %v1414_v27 = vadd.f32 %v1286_v7, %v954_v8  ;;  %v1277_v43 = vsel %vm1107_vm7, %v3679_v28, 0.0  ;;  %v1736_v21 = vsel %vm1566_vm8, %v3691_v60, 0.0  ;;  %v488_v24 = vsel %vm318_vm6, %v3707_v57, 0.0 }
 0x111   :  { %v1405_v55 = vadd.f32 %v1277_v43, %v945_v53  ;;  %vm649_vm9 = vcmp.eq.s32.totalorder %v2689_v25, %v3711_v63  ;;  %vm1109_vm10 = vcmp.eq.s32.totalorder %v2689_v25, %v3719_v5  ;;  %vm1568_vm11 = vcmp.eq.s32.totalorder %v2689_v25, %v3729_v13 }
 0x112   :  { %v1873_v0 = vadd.f32 %v1745_v20, %v1414_v27  ;;  %v819_v31 = vsel %vm649_vm9, %v3715_v11, 0.0  ;;  %v1279_v2 = vsel %vm1109_vm10, %v3725_v12, 0.0  ;;  %v1738_v52 = vsel %vm1568_vm11, %v3738_v16, 0.0 }
 0x113   :  { %v1864_v58 = vadd.f32 %v1736_v21, %v1405_v55  ;;  %v947_v61 = vadd.f32 %v819_v31, %v488_v24  ;;  %vm315_vm12 = vcmp.eq.s32.totalorder %v2689_v25, %v3747_v19  ;;  %vm646_vm13 = vcmp.eq.s32.totalorder %v2689_v25, %v3755_v40 }
 0x114   :  { %2090 = vmatpush1.msra.mxu1 %v1873_v0  ;;  %v485_v7 = vsel %vm315_vm12, %v3751_v23, 0.0  ;;  %v816_v8 = vsel %vm646_vm13, %v3759_v47, 0.0  ;;  %vm1106_vm14 = vcmp.eq.s32.totalorder %v2689_v25, %v3763_v48  ;;  %vm1565_vm15 = vcmp.eq.s32.totalorder %v2689_v25, %v3773_v54 }
 0x115   :  { %2020 = vmatprep.subr.mxu0 %v1864_v58  ;;  %v1407_v20 = vadd.f32 %v1279_v2, %v947_v61  ;;  %v944_v10 = vadd.f32 %v816_v8, %v485_v7  ;;  %v1276_v17 = vsel %vm1106_vm14, %v3767_v49, 0.0  ;;  %v1735_v53 = vsel %vm1565_vm15, %v3777_v59, 0.0 }
 0x116   :  { %vm317_vm0 = vcmp.eq.s32.totalorder %v2689_v25, %v3786_v45  ;;  %vm648_vm1 = vcmp.eq.s32.totalorder %v2689_v25, %v3801_v3  ;;  %vm1108_vm2 = vcmp.eq.s32.totalorder %v2689_v25, %v3809_v15  ;;  %vm1567_vm3 = vcmp.eq.s32.totalorder %v2689_v25, %v3818_v9 }
 0x117   :  { %v1866_v27 = vadd.f32 %v1738_v52, %v1407_v20  ;;  %v1404_v43 = vadd.f32 %v1276_v17, %v944_v10  ;;  %v487_v21 = vsel %vm317_vm0, %v3797_v37, 0.0  ;;  %v818_v24 = vsel %vm648_vm1, %v3805_v6, 0.0 }
 0x118   :  { %v946_v55 = vadd.f32 %v818_v24, %v487_v21  ;;  %v1278_v0 = vsel %vm1108_vm2, %v3813_v1, 0.0  ;;  %v1737_v31 = vsel %vm1567_vm3, %v3822_v4, 0.0  ;;  %vm308_vm4 = vcmp.eq.s32.totalorder %v2692_v26, %v3659_v46 }
 0x119   :  { %2091 = vmatprep.subr.mxu1 %v1866_v27  ;;  %v1863_v2 = vadd.f32 %v1735_v53, %v1404_v43  ;;  %v478_v58 = vsel %vm308_vm4, %v3663_v50, 0.0  ;;  %vm639_vm5 = vcmp.eq.s32.totalorder %v2692_v26, %v3667_v51  ;;  %vm1099_vm7 = vcmp.eq.s32.totalorder %v2692_v26, %v3675_v18 }
 0x11a   :  { %v1406_v25 = vadd.f32 %v1278_v0, %v946_v55  ;;  %v809_v52 = vsel %vm639_vm5, %v3671_v38, 0.0  ;;  %v1269_v61 = vsel %vm1099_vm7, %v3679_v28, 0.0  ;;  %vm1558_vm8 = vcmp.eq.s32.totalorder %v2692_v26, %v3683_v22 }
 0x11b   :  { %2021 = vmatpush1.msra.mxu0 %v1863_v2  ;;  %v937_v7 = vadd.f32 %v809_v52, %v478_v58  ;;  %v1728_v8 = vsel %vm1558_vm8, %v3691_v60, 0.0  ;;  %vm310_vm6 = vcmp.eq.s32.totalorder %v2692_v26, %v3703_v42  ;;  %vm641_vm9 = vcmp.eq.s32.totalorder %v2692_v26, %v3711_v63 }
 0x11c   :  { %v1865_v20 = vadd.f32 %v1737_v31, %v1406_v25  ;;  %v480_v10 = vsel %vm310_vm6, %v3707_v57, 0.0  ;;  %v811_v17 = vsel %vm641_vm9, %v3715_v11, 0.0  ;;  %vm1101_vm10 = vcmp.eq.s32.totalorder %v2692_v26, %v3719_v5 }
 0x11d   :  { %v1397_v53 = vadd.f32 %v1269_v61, %v937_v7  ;;  %v939_v27 = vadd.f32 %v811_v17, %v480_v10  ;;  %v1271_v43 = vsel %vm1101_vm10, %v3725_v12, 0.0  ;;  %vm1560_vm11 = vcmp.eq.s32.totalorder %v2692_v26, %v3729_v13 }
 0x11e   :  { %2092 = vmatpush1.msra.mxu1 %v1865_v20  ;;  %v1730_v21 = vsel %vm1560_vm11, %v3738_v16, 0.0  ;;  %vm307_vm12 = vcmp.eq.s32.totalorder %v2692_v26, %v3747_v19  ;;  %vm638_vm13 = vcmp.eq.s32.totalorder %v2692_v26, %v3755_v40  ;;  %vm1098_vm14 = vcmp.eq.s32.totalorder %v2692_v26, %v3763_v48 }
 0x11f   :  { %v1856_v24 = vadd.f32 %v1728_v8, %v1397_v53  ;;  %v1399_v55 = vadd.f32 %v1271_v43, %v939_v27  ;;  %v477_v0 = vsel %vm307_vm12, %v3751_v23, 0.0  ;;  %v808_v31 = vsel %vm638_vm13, %v3759_v47, 0.0 }
 0x120   :  { %v936_v2 = vadd.f32 %v808_v31, %v477_v0  ;;  %v1268_v58 = vsel %vm1098_vm14, %v3767_v49, 0.0  ;;  %vm1557_vm15 = vcmp.eq.s32.totalorder %v2692_v26, %v3773_v54  ;;  %vm309_vm0 = vcmp.eq.s32.totalorder %v2692_v26, %v3786_v45 }
 0x121   :  { %2022 = vmatprep.subr.mxu0 %v1856_v24  ;;  %v1858_v25 = vadd.f32 %v1730_v21, %v1399_v55  ;;  %v1727_v52 = vsel %vm1557_vm15, %v3777_v59, 0.0  ;;  %v479_v61 = vsel %vm309_vm0, %v3797_v37, 0.0  ;;  %vm640_vm1 = vcmp.eq.s32.totalorder %v2692_v26, %v3801_v3 }
 0x122   :  { %v1396_v7 = vadd.f32 %v1268_v58, %v936_v2  ;;  %v810_v8 = vsel %vm640_vm1, %v3805_v6, 0.0  ;;  %vm1100_vm2 = vcmp.eq.s32.totalorder %v2692_v26, %v3809_v15  ;;  %vm1559_vm3 = vcmp.eq.s32.totalorder %v2692_v26, %v3818_v9 }
 0x123   :  { %2093 = vmatprep.subr.mxu1 %v1858_v25  ;;  %v938_v20 = vadd.f32 %v810_v8, %v479_v61  ;;  %v1270_v10 = vsel %vm1100_vm2, %v3813_v1, 0.0  ;;  %v1729_v17 = vsel %vm1559_vm3, %v3822_v4, 0.0  ;;  %vm300_vm4 = vcmp.eq.s32.totalorder %v2695_v29, %v3659_v46 }
 0x124   :  { %v1855_v53 = vadd.f32 %v1727_v52, %v1396_v7  ;;  %v470_v27 = vsel %vm300_vm4, %v3663_v50, 0.0  ;;  %vm631_vm5 = vcmp.eq.s32.totalorder %v2695_v29, %v3667_v51  ;;  %vm1091_vm7 = vcmp.eq.s32.totalorder %v2695_v29, %v3675_v18 }
 0x125   :  { %v1398_v43 = vadd.f32 %v1270_v10, %v938_v20  ;;  %v801_v26 = vsel %vm631_vm5, %v3671_v38, 0.0  ;;  %v1261_v21 = vsel %vm1091_vm7, %v3679_v28, 0.0  ;;  %vm1550_vm8 = vcmp.eq.s32.totalorder %v2695_v29, %v3683_v22 }
 0x126   :  { %2023 = vmatpush1.msra.mxu0 %v1855_v53  ;;  %v929_v24 = vadd.f32 %v801_v26, %v470_v27  ;;  %v1720_v55 = vsel %vm1550_vm8, %v3691_v60, 0.0  ;;  %vm302_vm6 = vcmp.eq.s32.totalorder %v2695_v29, %v3703_v42  ;;  %vm633_vm9 = vcmp.eq.s32.totalorder %v2695_v29, %v3711_v63 }
 0x127   :  { %v1857_v0 = vadd.f32 %v1729_v17, %v1398_v43  ;;  %v472_v31 = vsel %vm302_vm6, %v3707_v57, 0.0  ;;  %v803_v2 = vsel %vm633_vm9, %v3715_v11, 0.0  ;;  %vm1093_vm10 = vcmp.eq.s32.totalorder %v2695_v29, %v3719_v5 }
 0x128   :  { %v1389_v58 = vadd.f32 %v1261_v21, %v929_v24  ;;  %v931_v25 = vadd.f32 %v803_v2, %v472_v31  ;;  %v1263_v52 = vsel %vm1093_vm10, %v3725_v12, 0.0  ;;  %vm1552_vm11 = vcmp.eq.s32.totalorder %v2695_v29, %v3729_v13 }
 0x129   :  { %2094 = vmatpush1.msra.mxu1 %v1857_v0  ;;  %v1722_v61 = vsel %vm1552_vm11, %v3738_v16, 0.0  ;;  %vm299_vm12 = vcmp.eq.s32.totalorder %v2695_v29, %v3747_v19  ;;  %vm630_vm13 = vcmp.eq.s32.totalorder %v2695_v29, %v3755_v40  ;;  %vm1090_vm14 = vcmp.eq.s32.totalorder %v2695_v29, %v3763_v48 }
 0x12a   :  { %v1848_v7 = vadd.f32 %v1720_v55, %v1389_v58  ;;  %v1391_v8 = vadd.f32 %v1263_v52, %v931_v25  ;;  %v469_v20 = vsel %vm299_vm12, %v3751_v23, 0.0  ;;  %v800_v10 = vsel %vm630_vm13, %v3759_v47, 0.0 }
 0x12b   :  { %v928_v17 = vadd.f32 %v800_v10, %v469_v20  ;;  %v1260_v53 = vsel %vm1090_vm14, %v3767_v49, 0.0  ;;  %vm1549_vm15 = vcmp.eq.s32.totalorder %v2695_v29, %v3773_v54  ;;  %vm301_vm0 = vcmp.eq.s32.totalorder %v2695_v29, %v3786_v45 }
 0x12c   :  { %2024 = vmatprep.subr.mxu0 %v1848_v7  ;;  %v1850_v27 = vadd.f32 %v1722_v61, %v1391_v8  ;;  %v1719_v43 = vsel %vm1549_vm15, %v3777_v59, 0.0  ;;  %v471_v26 = vsel %vm301_vm0, %v3797_v37, 0.0  ;;  %vm632_vm1 = vcmp.eq.s32.totalorder %v2695_v29, %v3801_v3 }
 0x12d   :  { %v1388_v21 = vadd.f32 %v1260_v53, %v928_v17  ;;  %v802_v24 = vsel %vm632_vm1, %v3805_v6, 0.0  ;;  %vm1092_vm2 = vcmp.eq.s32.totalorder %v2695_v29, %v3809_v15  ;;  %vm1551_vm3 = vcmp.eq.s32.totalorder %v2695_v29, %v3818_v9 }
 0x12e   :  { %2095 = vmatprep.subr.mxu1 %v1850_v27  ;;  %v930_v55 = vadd.f32 %v802_v24, %v471_v26  ;;  %v1262_v0 = vsel %vm1092_vm2, %v3813_v1, 0.0  ;;  %v1721_v31 = vsel %vm1551_vm3, %v3822_v4, 0.0  ;;  %vm292_vm4 = vcmp.eq.s32.totalorder %v2698_v30, %v3659_v46 }
 0x12f   :  { %v1847_v2 = vadd.f32 %v1719_v43, %v1388_v21  ;;  %v462_v58 = vsel %vm292_vm4, %v3663_v50, 0.0  ;;  %vm623_vm5 = vcmp.eq.s32.totalorder %v2698_v30, %v3667_v51  ;;  %vm1083_vm7 = vcmp.eq.s32.totalorder %v2698_v30, %v3675_v18 }
 0x130   :  { %v1390_v25 = vadd.f32 %v1262_v0, %v930_v55  ;;  %v793_v29 = vsel %vm623_vm5, %v3671_v38, 0.0  ;;  %v1253_v52 = vsel %vm1083_vm7, %v3679_v28, 0.0  ;;  %vm1542_vm8 = vcmp.eq.s32.totalorder %v2698_v30, %v3683_v22 }
 0x131   :  { %2025 = vmatpush1.msra.mxu0 %v1847_v2  ;;  %v921_v61 = vadd.f32 %v793_v29, %v462_v58  ;;  %v1712_v7 = vsel %vm1542_vm8, %v3691_v60, 0.0  ;;  %vm294_vm6 = vcmp.eq.s32.totalorder %v2698_v30, %v3703_v42  ;;  %vm625_vm9 = vcmp.eq.s32.totalorder %v2698_v30, %v3711_v63 }
 0x132   :  { %v1849_v8 = vadd.f32 %v1721_v31, %v1390_v25  ;;  %v464_v20 = vsel %vm294_vm6, %v3707_v57, 0.0  ;;  %v795_v10 = vsel %vm625_vm9, %v3715_v11, 0.0  ;;  %vm1085_vm10 = vcmp.eq.s32.totalorder %v2698_v30, %v3719_v5 }
 0x133   :  { %v1381_v17 = vadd.f32 %v1253_v52, %v921_v61  ;;  %v923_v53 = vadd.f32 %v795_v10, %v464_v20  ;;  %v1255_v27 = vsel %vm1085_vm10, %v3725_v12, 0.0  ;;  %vm1544_vm11 = vcmp.eq.s32.totalorder %v2698_v30, %v3729_v13 }
 0x134   :  { %2096 = vmatpush1.msra.mxu1 %v1849_v8  ;;  %v1714_v43 = vsel %vm1544_vm11, %v3738_v16, 0.0  ;;  %vm291_vm12 = vcmp.eq.s32.totalorder %v2698_v30, %v3747_v19  ;;  %vm622_vm13 = vcmp.eq.s32.totalorder %v2698_v30, %v3755_v40  ;;  %vm1082_vm14 = vcmp.eq.s32.totalorder %v2698_v30, %v3763_v48 }
 0x135   :  { %v1840_v26 = vadd.f32 %v1712_v7, %v1381_v17  ;;  %v1383_v21 = vadd.f32 %v1255_v27, %v923_v53  ;;  %v461_v24 = vsel %vm291_vm12, %v3751_v23, 0.0  ;;  %v792_v55 = vsel %vm622_vm13, %v3759_v47, 0.0 }
 0x136   :  { %v920_v0 = vadd.f32 %v792_v55, %v461_v24  ;;  %v1252_v31 = vsel %vm1082_vm14, %v3767_v49, 0.0  ;;  %vm1541_vm15 = vcmp.eq.s32.totalorder %v2698_v30, %v3773_v54  ;;  %vm293_vm0 = vcmp.eq.s32.totalorder %v2698_v30, %v3786_v45 }
 0x137   :  { %2026 = vmatprep.subr.mxu0 %v1840_v26  ;;  %v1842_v2 = vadd.f32 %v1714_v43, %v1383_v21  ;;  %v1711_v58 = vsel %vm1541_vm15, %v3777_v59, 0.0  ;;  %v463_v25 = vsel %vm293_vm0, %v3797_v37, 0.0  ;;  %vm624_vm1 = vcmp.eq.s32.totalorder %v2698_v30, %v3801_v3 }
 0x138   :  { %v1380_v29 = vadd.f32 %v1252_v31, %v920_v0  ;;  %v794_v52 = vsel %vm624_vm1, %v3805_v6, 0.0  ;;  %vm1084_vm2 = vcmp.eq.s32.totalorder %v2698_v30, %v3809_v15  ;;  %vm1543_vm3 = vcmp.eq.s32.totalorder %v2698_v30, %v3818_v9 }
 0x139   :  { %2097 = vmatprep.subr.mxu1 %v1842_v2  ;;  %v922_v61 = vadd.f32 %v794_v52, %v463_v25  ;;  %v1254_v7 = vsel %vm1084_vm2, %v3813_v1, 0.0  ;;  %v1713_v8 = vsel %vm1543_vm3, %v3822_v4, 0.0  ;;  %vm284_vm4 = vcmp.eq.s32.totalorder %v2701_v33, %v3659_v46 }
 0x13a   :  { %v1839_v20 = vadd.f32 %v1711_v58, %v1380_v29  ;;  %v454_v10 = vsel %vm284_vm4, %v3663_v50, 0.0  ;;  %vm615_vm5 = vcmp.eq.s32.totalorder %v2701_v33, %v3667_v51  ;;  %vm1075_vm7 = vcmp.eq.s32.totalorder %v2701_v33, %v3675_v18 }
 0x13b   :  { %v1382_v17 = vadd.f32 %v1254_v7, %v922_v61  ;;  %v785_v30 = vsel %vm615_vm5, %v3671_v38, 0.0  ;;  %v1245_v53 = vsel %vm1075_vm7, %v3679_v28, 0.0  ;;  %vm1534_vm8 = vcmp.eq.s32.totalorder %v2701_v33, %v3683_v22 }
 0x13c   :  { %2027 = vmatpush1.msra.mxu0 %v1839_v20  ;;  %v913_v27 = vadd.f32 %v785_v30, %v454_v10  ;;  %v1704_v43 = vsel %vm1534_vm8, %v3691_v60, 0.0  ;;  %vm286_vm6 = vcmp.eq.s32.totalorder %v2701_v33, %v3703_v42  ;;  %vm617_vm9 = vcmp.eq.s32.totalorder %v2701_v33, %v3711_v63 }
 0x13d   :  { %v1841_v26 = vadd.f32 %v1713_v8, %v1382_v17  ;;  %v456_v21 = vsel %vm286_vm6, %v3707_v57, 0.0  ;;  %v787_v24 = vsel %vm617_vm9, %v3715_v11, 0.0  ;;  %vm1077_vm10 = vcmp.eq.s32.totalorder %v2701_v33, %v3719_v5 }
 0x13e   :  { %v1373_v55 = vadd.f32 %v1245_v53, %v913_v27  ;;  %v915_v0 = vadd.f32 %v787_v24, %v456_v21  ;;  %v1247_v31 = vsel %vm1077_vm10, %v3725_v12, 0.0  ;;  %vm1536_vm11 = vcmp.eq.s32.totalorder %v2701_v33, %v3729_v13 }
 0x13f   :  { %2098 = vmatpush1.msra.mxu1 %v1841_v26  ;;  %v1706_v2 = vsel %vm1536_vm11, %v3738_v16, 0.0  ;;  %vm283_vm12 = vcmp.eq.s32.totalorder %v2701_v33, %v3747_v19  ;;  %vm614_vm13 = vcmp.eq.s32.totalorder %v2701_v33, %v3755_v40  ;;  %vm1074_vm14 = vcmp.eq.s32.totalorder %v2701_v33, %v3763_v48 }
 0x140   :  { %v1832_v58 = vadd.f32 %v1704_v43, %v1373_v55  ;;  %v1375_v25 = vadd.f32 %v1247_v31, %v915_v0  ;;  %v453_v29 = vsel %vm283_vm12, %v3751_v23, 0.0  ;;  %v784_v52 = vsel %vm614_vm13, %v3759_v47, 0.0 }
 0x141   :  { %v912_v61 = vadd.f32 %v784_v52, %v453_v29  ;;  %v1244_v7 = vsel %vm1074_vm14, %v3767_v49, 0.0  ;;  %vm1533_vm15 = vcmp.eq.s32.totalorder %v2701_v33, %v3773_v54  ;;  %vm285_vm0 = vcmp.eq.s32.totalorder %v2701_v33, %v3786_v45 }
 0x142   :  { %2028 = vmatprep.subr.mxu0 %v1832_v58  ;;  %v1834_v8 = vadd.f32 %v1706_v2, %v1375_v25  ;;  %v1703_v20 = vsel %vm1533_vm15, %v3777_v59, 0.0  ;;  %v455_v10 = vsel %vm285_vm0, %v3797_v37, 0.0  ;;  %vm616_vm1 = vcmp.eq.s32.totalorder %v2701_v33, %v3801_v3 }
 0x143   :  { %v1372_v17 = vadd.f32 %v1244_v7, %v912_v61  ;;  %v786_v30 = vsel %vm616_vm1, %v3805_v6, 0.0  ;;  %vm1076_vm2 = vcmp.eq.s32.totalorder %v2701_v33, %v3809_v15  ;;  %vm1535_vm3 = vcmp.eq.s32.totalorder %v2701_v33, %v3818_v9 }
 0x144   :  { %2099 = vmatprep.subr.mxu1 %v1834_v8  ;;  %v914_v53 = vadd.f32 %v786_v30, %v455_v10  ;;  %v1246_v27 = vsel %vm1076_vm2, %v3813_v1, 0.0  ;;  %v1705_v43 = vsel %vm1535_vm3, %v3822_v4, 0.0  ;;  %vm276_vm4 = vcmp.eq.s32.totalorder %v2704_v34, %v3659_v46 }
 0x145   :  { %v1831_v26 = vadd.f32 %v1703_v20, %v1372_v17  ;;  %v446_v21 = vsel %vm276_vm4, %v3663_v50, 0.0  ;;  %vm607_vm5 = vcmp.eq.s32.totalorder %v2704_v34, %v3667_v51  ;;  %vm1067_vm7 = vcmp.eq.s32.totalorder %v2704_v34, %v3675_v18 }
 0x146   :  { %v1374_v24 = vadd.f32 %v1246_v27, %v914_v53  ;;  %v777_v33 = vsel %vm607_vm5, %v3671_v38, 0.0  ;;  %v1237_v55 = vsel %vm1067_vm7, %v3679_v28, 0.0  ;;  %vm1526_vm8 = vcmp.eq.s32.totalorder %v2704_v34, %v3683_v22 }
 0x147   :  { %2029 = vmatpush1.msra.mxu0 %v1831_v26  ;;  %v905_v0 = vadd.f32 %v777_v33, %v446_v21  ;;  %v1696_v31 = vsel %vm1526_vm8, %v3691_v60, 0.0  ;;  %vm278_vm6 = vcmp.eq.s32.totalorder %v2704_v34, %v3703_v42  ;;  %vm609_vm9 = vcmp.eq.s32.totalorder %v2704_v34, %v3711_v63 }
 0x148   :  { %v1833_v2 = vadd.f32 %v1705_v43, %v1374_v24  ;;  %v448_v58 = vsel %vm278_vm6, %v3707_v57, 0.0  ;;  %v779_v25 = vsel %vm609_vm9, %v3715_v11, 0.0  ;;  %vm1069_vm10 = vcmp.eq.s32.totalorder %v2704_v34, %v3719_v5 }
 0x149   :  { %v1365_v29 = vadd.f32 %v1237_v55, %v905_v0  ;;  %v907_v52 = vadd.f32 %v779_v25, %v448_v58  ;;  %v1239_v61 = vsel %vm1069_vm10, %v3725_v12, 0.0  ;;  %vm1528_vm11 = vcmp.eq.s32.totalorder %v2704_v34, %v3729_v13 }
 0x14a   :  { %2100 = vmatpush1.msra.mxu1 %v1833_v2  ;;  %v1698_v7 = vsel %vm1528_vm11, %v3738_v16, 0.0  ;;  %vm275_vm12 = vcmp.eq.s32.totalorder %v2704_v34, %v3747_v19  ;;  %vm606_vm13 = vcmp.eq.s32.totalorder %v2704_v34, %v3755_v40  ;;  %vm1066_vm14 = vcmp.eq.s32.totalorder %v2704_v34, %v3763_v48 }
 0x14b   :  { %v1824_v8 = vadd.f32 %v1696_v31, %v1365_v29  ;;  %v1367_v20 = vadd.f32 %v1239_v61, %v907_v52  ;;  %v445_v10 = vsel %vm275_vm12, %v3751_v23, 0.0  ;;  %v776_v17 = vsel %vm606_vm13, %v3759_v47, 0.0  ;;  %v4762_v31 = vld [vmem:[#allocation19_spill] sm:$0xff] }
 0x14c   :  { %v904_v30 = vadd.f32 %v776_v17, %v445_v10  ;;  %v1236_v53 = vsel %vm1066_vm14, %v3767_v49, 0.0  ;;  %vm1525_vm15 = vcmp.eq.s32.totalorder %v2704_v34, %v3773_v54  ;;  %vm277_vm0 = vcmp.eq.s32.totalorder %v2704_v34, %v3786_v45 }
 0x14d   :  { %2030 = vmatprep.subr.mxu0 %v1824_v8  ;;  %v1826_v27 = vadd.f32 %v1698_v7, %v1367_v20  ;;  %v1695_v43 = vsel %vm1525_vm15, %v3777_v59, 0.0  ;;  %v447_v26 = vsel %vm277_vm0, %v3797_v37, 0.0  ;;  %vm608_vm1 = vcmp.eq.s32.totalorder %v2704_v34, %v3801_v3 }
 0x14e   :  { %v1364_v21 = vadd.f32 %v1236_v53, %v904_v30  ;;  %v778_v24 = vsel %vm608_vm1, %v3805_v6, 0.0  ;;  %vm1068_vm2 = vcmp.eq.s32.totalorder %v2704_v34, %v3809_v15  ;;  %vm1527_vm3 = vcmp.eq.s32.totalorder %v2704_v34, %v3818_v9 }
 0x14f   :  { %2101 = vmatprep.subr.mxu1 %v1826_v27  ;;  %v906_v33 = vadd.f32 %v778_v24, %v447_v26  ;;  %v1238_v55 = vsel %vm1068_vm2, %v3813_v1, 0.0  ;;  %v1697_v0 = vsel %vm1527_vm3, %v3822_v4, 0.0  ;;  %vm268_vm4 = vcmp.eq.s32.totalorder %v4762_v31, %v3659_v46 }
 0x150   :  { %v1823_v2 = vadd.f32 %v1695_v43, %v1364_v21  ;;  %v438_v58 = vsel %vm268_vm4, %v3663_v50, 0.0  ;;  %vm599_vm5 = vcmp.eq.s32.totalorder %v4762_v31, %v3667_v51  ;;  %vm1059_vm7 = vcmp.eq.s32.totalorder %v4762_v31, %v3675_v18 }
 0x151   :  { %v1366_v25 = vadd.f32 %v1238_v55, %v906_v33  ;;  %v769_v34 = vsel %vm599_vm5, %v3671_v38, 0.0  ;;  %v1229_v29 = vsel %vm1059_vm7, %v3679_v28, 0.0  ;;  %vm1518_vm8 = vcmp.eq.s32.totalorder %v4762_v31, %v3683_v22 }
 0x152   :  { %2031 = vmatpush1.msra.mxu0 %v1823_v2  ;;  %v897_v52 = vadd.f32 %v769_v34, %v438_v58  ;;  %v1688_v61 = vsel %vm1518_vm8, %v3691_v60, 0.0  ;;  %vm270_vm6 = vcmp.eq.s32.totalorder %v4762_v31, %v3703_v42  ;;  %vm601_vm9 = vcmp.eq.s32.totalorder %v4762_v31, %v3711_v63 }
 0x153   :  { %v1825_v7 = vadd.f32 %v1697_v0, %v1366_v25  ;;  %v440_v8 = vsel %vm270_vm6, %v3707_v57, 0.0  ;;  %v771_v20 = vsel %vm601_vm9, %v3715_v11, 0.0  ;;  %vm1061_vm10 = vcmp.eq.s32.totalorder %v4762_v31, %v3719_v5 }
 0x154   :  { %v1357_v10 = vadd.f32 %v1229_v29, %v897_v52  ;;  %v899_v17 = vadd.f32 %v771_v20, %v440_v8  ;;  %v1231_v30 = vsel %vm1061_vm10, %v3725_v12, 0.0  ;;  %vm1520_vm11 = vcmp.eq.s32.totalorder %v4762_v31, %v3729_v13 }
 0x155   :  { %2102 = vmatpush1.msra.mxu1 %v1825_v7  ;;  %v1690_v53 = vsel %vm1520_vm11, %v3738_v16, 0.0  ;;  %vm267_vm12 = vcmp.eq.s32.totalorder %v4762_v31, %v3747_v19  ;;  %vm598_vm13 = vcmp.eq.s32.totalorder %v4762_v31, %v3755_v40  ;;  %vm1058_vm14 = vcmp.eq.s32.totalorder %v4762_v31, %v3763_v48 }
 0x156   :  { %v1816_v27 = vadd.f32 %v1688_v61, %v1357_v10  ;;  %v1359_v43 = vadd.f32 %v1231_v30, %v899_v17  ;;  %v437_v26 = vsel %vm267_vm12, %v3751_v23, 0.0  ;;  %v768_v21 = vsel %vm598_vm13, %v3759_v47, 0.0  ;;  %v4763_v61 = vld [vmem:[#allocation20_spill] sm:$0xff] }
 0x157   :  { %v896_v24 = vadd.f32 %v768_v21, %v437_v26  ;;  %v1228_v33 = vsel %vm1058_vm14, %v3767_v49, 0.0  ;;  %vm1517_vm15 = vcmp.eq.s32.totalorder %v4762_v31, %v3773_v54  ;;  %vm269_vm0 = vcmp.eq.s32.totalorder %v4762_v31, %v3786_v45 }
 0x158   :  { %2032 = vmatprep.subr.mxu0 %v1816_v27  ;;  %v1818_v55 = vadd.f32 %v1690_v53, %v1359_v43  ;;  %v1687_v0 = vsel %vm1517_vm15, %v3777_v59, 0.0  ;;  %v439_v2 = vsel %vm269_vm0, %v3797_v37, 0.0  ;;  %vm600_vm1 = vcmp.eq.s32.totalorder %v4762_v31, %v3801_v3 }
 0x159   :  { %v1356_v58 = vadd.f32 %v1228_v33, %v896_v24  ;;  %v770_v25 = vsel %vm600_vm1, %v3805_v6, 0.0  ;;  %vm1060_vm2 = vcmp.eq.s32.totalorder %v4762_v31, %v3809_v15  ;;  %vm1519_vm3 = vcmp.eq.s32.totalorder %v4762_v31, %v3818_v9 }
 0x15a   :  { %2103 = vmatprep.subr.mxu1 %v1818_v55  ;;  %v898_v34 = vadd.f32 %v770_v25, %v439_v2  ;;  %v1230_v29 = vsel %vm1060_vm2, %v3813_v1, 0.0  ;;  %v1689_v52 = vsel %vm1519_vm3, %v3822_v4, 0.0  ;;  %vm260_vm4 = vcmp.eq.s32.totalorder %v4763_v61, %v3659_v46 }
 0x15b   :  { %v1815_v7 = vadd.f32 %v1687_v0, %v1356_v58  ;;  %v430_v8 = vsel %vm260_vm4, %v3663_v50, 0.0  ;;  %vm591_vm5 = vcmp.eq.s32.totalorder %v4763_v61, %v3667_v51  ;;  %vm1051_vm7 = vcmp.eq.s32.totalorder %v4763_v61, %v3675_v18 }
 0x15c   :  { %v1358_v20 = vadd.f32 %v1230_v29, %v898_v34  ;;  %v761_v31 = vsel %vm591_vm5, %v3671_v38, 0.0  ;;  %v1221_v10 = vsel %vm1051_vm7, %v3679_v28, 0.0  ;;  %vm1510_vm8 = vcmp.eq.s32.totalorder %v4763_v61, %v3683_v22 }
 0x15d   :  { %2033 = vmatpush1.msra.mxu0 %v1815_v7  ;;  %v889_v17 = vadd.f32 %v761_v31, %v430_v8  ;;  %v1680_v30 = vsel %vm1510_vm8, %v3691_v60, 0.0  ;;  %vm262_vm6 = vcmp.eq.s32.totalorder %v4763_v61, %v3703_v42  ;;  %vm593_vm9 = vcmp.eq.s32.totalorder %v4763_v61, %v3711_v63 }
 0x15e   :  { %v1817_v53 = vadd.f32 %v1689_v52, %v1358_v20  ;;  %v432_v27 = vsel %vm262_vm6, %v3707_v57, 0.0  ;;  %v763_v43 = vsel %vm593_vm9, %v3715_v11, 0.0  ;;  %vm1053_vm10 = vcmp.eq.s32.totalorder %v4763_v61, %v3719_v5 }
 0x15f   :  { %v1349_v26 = vadd.f32 %v1221_v10, %v889_v17  ;;  %v891_v21 = vadd.f32 %v763_v43, %v432_v27  ;;  %v1223_v24 = vsel %vm1053_vm10, %v3725_v12, 0.0  ;;  %vm1512_vm11 = vcmp.eq.s32.totalorder %v4763_v61, %v3729_v13 }
 0x160   :  { %2104 = vmatpush1.msra.mxu1 %v1817_v53  ;;  %v1682_v33 = vsel %vm1512_vm11, %v3738_v16, 0.0  ;;  %vm259_vm12 = vcmp.eq.s32.totalorder %v4763_v61, %v3747_v19  ;;  %vm590_vm13 = vcmp.eq.s32.totalorder %v4763_v61, %v3755_v40  ;;  %vm1050_vm14 = vcmp.eq.s32.totalorder %v4763_v61, %v3763_v48 }
 0x161   :  { %v1808_v55 = vadd.f32 %v1680_v30, %v1349_v26  ;;  %v1351_v0 = vadd.f32 %v1223_v24, %v891_v21  ;;  %v429_v2 = vsel %vm259_vm12, %v3751_v23, 0.0  ;;  %v760_v58 = vsel %vm590_vm13, %v3759_v47, 0.0  ;;  %v4764_v30 = vld [vmem:[#allocation21_spill] sm:$0xff] }
 0x162   :  { %v888_v25 = vadd.f32 %v760_v58, %v429_v2  ;;  %v1220_v34 = vsel %vm1050_vm14, %v3767_v49, 0.0  ;;  %vm1509_vm15 = vcmp.eq.s32.totalorder %v4763_v61, %v3773_v54  ;;  %vm261_vm0 = vcmp.eq.s32.totalorder %v4763_v61, %v3786_v45 }
 0x163   :  { %2034 = vmatprep.subr.mxu0 %v1808_v55  ;;  %v1810_v29 = vadd.f32 %v1682_v33, %v1351_v0  ;;  %v1679_v52 = vsel %vm1509_vm15, %v3777_v59, 0.0  ;;  %v431_v7 = vsel %vm261_vm0, %v3797_v37, 0.0  ;;  %vm592_vm1 = vcmp.eq.s32.totalorder %v4763_v61, %v3801_v3 }
 0x164   :  { %v1348_v8 = vadd.f32 %v1220_v34, %v888_v25  ;;  %v762_v20 = vsel %vm592_vm1, %v3805_v6, 0.0  ;;  %vm1052_vm2 = vcmp.eq.s32.totalorder %v4763_v61, %v3809_v15  ;;  %vm1511_vm3 = vcmp.eq.s32.totalorder %v4763_v61, %v3818_v9 }
 0x165   :  { %2105 = vmatprep.subr.mxu1 %v1810_v29  ;;  %v890_v31 = vadd.f32 %v762_v20, %v431_v7  ;;  %v1222_v10 = vsel %vm1052_vm2, %v3813_v1, 0.0  ;;  %v1681_v17 = vsel %vm1511_vm3, %v3822_v4, 0.0  ;;  %vm252_vm4 = vcmp.eq.s32.totalorder %v4764_v30, %v3659_v46 }
 0x166   :  { %v1807_v53 = vadd.f32 %v1679_v52, %v1348_v8  ;;  %v422_v27 = vsel %vm252_vm4, %v3663_v50, 0.0  ;;  %vm583_vm5 = vcmp.eq.s32.totalorder %v4764_v30, %v3667_v51  ;;  %vm1043_vm7 = vcmp.eq.s32.totalorder %v4764_v30, %v3675_v18 }
 0x167   :  { %v1350_v43 = vadd.f32 %v1222_v10, %v890_v31  ;;  %v753_v61 = vsel %vm583_vm5, %v3671_v38, 0.0  ;;  %v1213_v26 = vsel %vm1043_vm7, %v3679_v28, 0.0  ;;  %vm1502_vm8 = vcmp.eq.s32.totalorder %v4764_v30, %v3683_v22 }
 0x168   :  { %2035 = vmatpush1.msra.mxu0 %v1807_v53  ;;  %v881_v21 = vadd.f32 %v753_v61, %v422_v27  ;;  %v1672_v24 = vsel %vm1502_vm8, %v3691_v60, 0.0  ;;  %vm254_vm6 = vcmp.eq.s32.totalorder %v4764_v30, %v3703_v42  ;;  %vm585_vm9 = vcmp.eq.s32.totalorder %v4764_v30, %v3711_v63 }
 0x169   :  { %v1809_v33 = vadd.f32 %v1681_v17, %v1350_v43  ;;  %v424_v55 = vsel %vm254_vm6, %v3707_v57, 0.0  ;;  %v755_v0 = vsel %vm585_vm9, %v3715_v11, 0.0  ;;  %vm1045_vm10 = vcmp.eq.s32.totalorder %v4764_v30, %v3719_v5 }
 0x16a   :  { %v1341_v2 = vadd.f32 %v1213_v26, %v881_v21  ;;  %v883_v58 = vadd.f32 %v755_v0, %v424_v55  ;;  %v1215_v25 = vsel %vm1045_vm10, %v3725_v12, 0.0  ;;  %vm1504_vm11 = vcmp.eq.s32.totalorder %v4764_v30, %v3729_v13 }
 0x16b   :  { %2106 = vmatpush1.msra.mxu1 %v1809_v33  ;;  %v1674_v34 = vsel %vm1504_vm11, %v3738_v16, 0.0  ;;  %vm251_vm12 = vcmp.eq.s32.totalorder %v4764_v30, %v3747_v19  ;;  %vm582_vm13 = vcmp.eq.s32.totalorder %v4764_v30, %v3755_v40  ;;  %vm1042_vm14 = vcmp.eq.s32.totalorder %v4764_v30, %v3763_v48 }
 0x16c   :  { %v1800_v29 = vadd.f32 %v1672_v24, %v1341_v2  ;;  %v1343_v52 = vadd.f32 %v1215_v25, %v883_v58  ;;  %v421_v7 = vsel %vm251_vm12, %v3751_v23, 0.0  ;;  %v752_v8 = vsel %vm582_vm13, %v3759_v47, 0.0  ;;  %v4765_v24 = vld [vmem:[#allocation22_spill] sm:$0xff] }
 0x16d   :  { %v880_v20 = vadd.f32 %v752_v8, %v421_v7  ;;  %v1212_v31 = vsel %vm1042_vm14, %v3767_v49, 0.0  ;;  %vm1501_vm15 = vcmp.eq.s32.totalorder %v4764_v30, %v3773_v54  ;;  %vm253_vm0 = vcmp.eq.s32.totalorder %v4764_v30, %v3786_v45 }
 0x16e   :  { %2036 = vmatprep.subr.mxu0 %v1800_v29  ;;  %v1802_v10 = vadd.f32 %v1674_v34, %v1343_v52  ;;  %v1671_v17 = vsel %vm1501_vm15, %v3777_v59, 0.0  ;;  %v423_v53 = vsel %vm253_vm0, %v3797_v37, 0.0  ;;  %vm584_vm1 = vcmp.eq.s32.totalorder %v4764_v30, %v3801_v3 }
 0x16f   :  { %v1340_v27 = vadd.f32 %v1212_v31, %v880_v20  ;;  %v754_v43 = vsel %vm584_vm1, %v3805_v6, 0.0  ;;  %vm1044_vm2 = vcmp.eq.s32.totalorder %v4764_v30, %v3809_v15  ;;  %vm1503_vm3 = vcmp.eq.s32.totalorder %v4764_v30, %v3818_v9 }
 0x170   :  { %2107 = vmatprep.subr.mxu1 %v1802_v10  ;;  %v882_v61 = vadd.f32 %v754_v43, %v423_v53  ;;  %v1214_v26 = vsel %vm1044_vm2, %v3813_v1, 0.0  ;;  %v1673_v21 = vsel %vm1503_vm3, %v3822_v4, 0.0  ;;  %vm244_vm4 = vcmp.eq.s32.totalorder %v4765_v24, %v3659_v46 }
 0x171   :  { %v1799_v33 = vadd.f32 %v1671_v17, %v1340_v27  ;;  %v414_v55 = vsel %vm244_vm4, %v3663_v50, 0.0  ;;  %vm575_vm5 = vcmp.eq.s32.totalorder %v4765_v24, %v3667_v51  ;;  %vm1035_vm7 = vcmp.eq.s32.totalorder %v4765_v24, %v3675_v18 }
 0x172   :  { %v1342_v0 = vadd.f32 %v1214_v26, %v882_v61  ;;  %v745_v30 = vsel %vm575_vm5, %v3671_v38, 0.0  ;;  %v1205_v2 = vsel %vm1035_vm7, %v3679_v28, 0.0  ;;  %vm1494_vm8 = vcmp.eq.s32.totalorder %v4765_v24, %v3683_v22 }
 0x173   :  { %2037 = vmatpush1.msra.mxu0 %v1799_v33  ;;  %v873_v58 = vadd.f32 %v745_v30, %v414_v55  ;;  %v1664_v25 = vsel %vm1494_vm8, %v3691_v60, 0.0  ;;  %vm246_vm6 = vcmp.eq.s32.totalorder %v4765_v24, %v3703_v42  ;;  %vm577_vm9 = vcmp.eq.s32.totalorder %v4765_v24, %v3711_v63 }
 0x174   :  { %v1801_v34 = vadd.f32 %v1673_v21, %v1342_v0  ;;  %v416_v29 = vsel %vm246_vm6, %v3707_v57, 0.0  ;;  %v747_v52 = vsel %vm577_vm9, %v3715_v11, 0.0  ;;  %vm1037_vm10 = vcmp.eq.s32.totalorder %v4765_v24, %v3719_v5 }
 0x175   :  { %v1333_v7 = vadd.f32 %v1205_v2, %v873_v58  ;;  %v875_v8 = vadd.f32 %v747_v52, %v416_v29  ;;  %v1207_v20 = vsel %vm1037_vm10, %v3725_v12, 0.0  ;;  %vm1496_vm11 = vcmp.eq.s32.totalorder %v4765_v24, %v3729_v13 }
 0x176   :  { %2108 = vmatpush1.msra.mxu1 %v1801_v34  ;;  %v1666_v31 = vsel %vm1496_vm11, %v3738_v16, 0.0  ;;  %vm243_vm12 = vcmp.eq.s32.totalorder %v4765_v24, %v3747_v19  ;;  %vm574_vm13 = vcmp.eq.s32.totalorder %v4765_v24, %v3755_v40  ;;  %vm1034_vm14 = vcmp.eq.s32.totalorder %v4765_v24, %v3763_v48 }
 0x177   :  { %v1792_v10 = vadd.f32 %v1664_v25, %v1333_v7  ;;  %v1335_v17 = vadd.f32 %v1207_v20, %v875_v8  ;;  %v413_v53 = vsel %vm243_vm12, %v3751_v23, 0.0  ;;  %v744_v27 = vsel %vm574_vm13, %v3759_v47, 0.0 }
 0x178   :  { %v872_v43 = vadd.f32 %v744_v27, %v413_v53  ;;  %v1204_v61 = vsel %vm1034_vm14, %v3767_v49, 0.0  ;;  %vm1493_vm15 = vcmp.eq.s32.totalorder %v4765_v24, %v3773_v54  ;;  %vm245_vm0 = vcmp.eq.s32.totalorder %v4765_v24, %v3786_v45 }
 0x179   :  { %2038 = vmatprep.subr.mxu0 %v1792_v10  ;;  %v1794_v26 = vadd.f32 %v1666_v31, %v1335_v17  ;;  %v1663_v21 = vsel %vm1493_vm15, %v3777_v59, 0.0  ;;  %v415_v33 = vsel %vm245_vm0, %v3797_v37, 0.0  ;;  %vm576_vm1 = vcmp.eq.s32.totalorder %v4765_v24, %v3801_v3 }
 0x17a   :  { %v1332_v55 = vadd.f32 %v1204_v61, %v872_v43  ;;  %v746_v0 = vsel %vm576_vm1, %v3805_v6, 0.0  ;;  %vm1036_vm2 = vcmp.eq.s32.totalorder %v4765_v24, %v3809_v15  ;;  %vm1495_vm3 = vcmp.eq.s32.totalorder %v4765_v24, %v3818_v9 }
 0x17b   :  { %2109 = vmatprep.subr.mxu1 %v1794_v26  ;;  %v874_v30 = vadd.f32 %v746_v0, %v415_v33  ;;  %v1206_v2 = vsel %vm1036_vm2, %v3813_v1, 0.0  ;;  %v1665_v58 = vsel %vm1495_vm3, %v3822_v4, 0.0  ;;  %vm236_vm4 = vcmp.eq.s32.totalorder %v3391_v35, %v3659_v46 }
 0x17c   :  { %v1791_v25 = vadd.f32 %v1663_v21, %v1332_v55  ;;  %v406_v34 = vsel %vm236_vm4, %v3663_v50, 0.0  ;;  %vm567_vm5 = vcmp.eq.s32.totalorder %v3391_v35, %v3667_v51  ;;  %vm1027_vm7 = vcmp.eq.s32.totalorder %v3391_v35, %v3675_v18 }
 0x17d   :  { %v1334_v29 = vadd.f32 %v1206_v2, %v874_v30  ;;  %v737_v24 = vsel %vm567_vm5, %v3671_v38, 0.0  ;;  %v1197_v52 = vsel %vm1027_vm7, %v3679_v28, 0.0  ;;  %vm1486_vm8 = vcmp.eq.s32.totalorder %v3391_v35, %v3683_v22 }
 0x17e   :  { %2039 = vmatpush1.msra.mxu0 %v1791_v25  ;;  %v865_v7 = vadd.f32 %v737_v24, %v406_v34  ;;  %v1656_v8 = vsel %vm1486_vm8, %v3691_v60, 0.0  ;;  %vm238_vm6 = vcmp.eq.s32.totalorder %v3391_v35, %v3703_v42  ;;  %vm569_vm9 = vcmp.eq.s32.totalorder %v3391_v35, %v3711_v63 }
 0x17f   :  { %v1793_v20 = vadd.f32 %v1665_v58, %v1334_v29  ;;  %v408_v31 = vsel %vm238_vm6, %v3707_v57, 0.0  ;;  %v739_v10 = vsel %vm569_vm9, %v3715_v11, 0.0  ;;  %vm1029_vm10 = vcmp.eq.s32.totalorder %v3391_v35, %v3719_v5 }
 0x180   :  { %v1325_v17 = vadd.f32 %v1197_v52, %v865_v7  ;;  %v867_v53 = vadd.f32 %v739_v10, %v408_v31  ;;  %v1199_v27 = vsel %vm1029_vm10, %v3725_v12, 0.0  ;;  %vm1488_vm11 = vcmp.eq.s32.totalorder %v3391_v35, %v3729_v13 }
 0x181   :  { %2110 = vmatpush1.msra.mxu1 %v1793_v20  ;;  %v1658_v43 = vsel %vm1488_vm11, %v3738_v16, 0.0  ;;  %vm235_vm12 = vcmp.eq.s32.totalorder %v3391_v35, %v3747_v19  ;;  %vm566_vm13 = vcmp.eq.s32.totalorder %v3391_v35, %v3755_v40  ;;  %vm1026_vm14 = vcmp.eq.s32.totalorder %v3391_v35, %v3763_v48 }
 0x182   :  { %v1784_v61 = vadd.f32 %v1656_v8, %v1325_v17  ;;  %v1327_v26 = vadd.f32 %v1199_v27, %v867_v53  ;;  %v405_v21 = vsel %vm235_vm12, %v3751_v23, 0.0  ;;  %v736_v33 = vsel %vm566_vm13, %v3759_v47, 0.0 }
 0x183   :  { %v864_v55 = vadd.f32 %v736_v33, %v405_v21  ;;  %v1196_v0 = vsel %vm1026_vm14, %v3767_v49, 0.0  ;;  %vm1485_vm15 = vcmp.eq.s32.totalorder %v3391_v35, %v3773_v54  ;;  %vm237_vm0 = vcmp.eq.s32.totalorder %v3391_v35, %v3786_v45 }
 0x184   :  { %2040 = vmatprep.subr.mxu0 %v1784_v61  ;;  %v1786_v30 = vadd.f32 %v1658_v43, %v1327_v26  ;;  %v1655_v2 = vsel %vm1485_vm15, %v3777_v59, 0.0  ;;  %v407_v58 = vsel %vm237_vm0, %v3797_v37, 0.0  ;;  %vm568_vm1 = vcmp.eq.s32.totalorder %v3391_v35, %v3801_v3 }
 0x185   :  { %v1324_v25 = vadd.f32 %v1196_v0, %v864_v55  ;;  %v738_v34 = vsel %vm568_vm1, %v3805_v6, 0.0  ;;  %vm1028_vm2 = vcmp.eq.s32.totalorder %v3391_v35, %v3809_v15  ;;  %vm1487_vm3 = vcmp.eq.s32.totalorder %v3391_v35, %v3818_v9 }
 0x186   :  { %2111 = vmatprep.subr.mxu1 %v1786_v30  ;;  %v866_v29 = vadd.f32 %v738_v34, %v407_v58  ;;  %v1198_v24 = vsel %vm1028_vm2, %v3813_v1, 0.0  ;;  %v1657_v52 = vsel %vm1487_vm3, %v3822_v4, 0.0  ;;  %vm228_vm4 = vcmp.eq.s32.totalorder %v3394_v62, %v3659_v46 }
 0x187   :  { %v1783_v7 = vadd.f32 %v1655_v2, %v1324_v25  ;;  %v398_v8 = vsel %vm228_vm4, %v3663_v50, 0.0  ;;  %vm559_vm5 = vcmp.eq.s32.totalorder %v3394_v62, %v3667_v51  ;;  %vm1019_vm7 = vcmp.eq.s32.totalorder %v3394_v62, %v3675_v18 }
 0x188   :  { %v1326_v20 = vadd.f32 %v1198_v24, %v866_v29  ;;  %v729_v35 = vsel %vm559_vm5, %v3671_v38, 0.0  ;;  %v1189_v31 = vsel %vm1019_vm7, %v3679_v28, 0.0  ;;  %vm1478_vm8 = vcmp.eq.s32.totalorder %v3394_v62, %v3683_v22 }
 0x189   :  { %2041 = vmatpush1.msra.mxu0 %v1783_v7  ;;  %v857_v10 = vadd.f32 %v729_v35, %v398_v8  ;;  %v1648_v17 = vsel %vm1478_vm8, %v3691_v60, 0.0  ;;  %vm230_vm6 = vcmp.eq.s32.totalorder %v3394_v62, %v3703_v42  ;;  %vm561_vm9 = vcmp.eq.s32.totalorder %v3394_v62, %v3711_v63 }
 0x18a   :  { %v1785_v53 = vadd.f32 %v1657_v52, %v1326_v20  ;;  %v400_v27 = vsel %vm230_vm6, %v3707_v57, 0.0  ;;  %v731_v43 = vsel %vm561_vm9, %v3715_v11, 0.0  ;;  %vm1021_vm10 = vcmp.eq.s32.totalorder %v3394_v62, %v3719_v5 }
 0x18b   :  { %v1317_v61 = vadd.f32 %v1189_v31, %v857_v10  ;;  %v859_v26 = vadd.f32 %v731_v43, %v400_v27  ;;  %v1191_v21 = vsel %vm1021_vm10, %v3725_v12, 0.0  ;;  %vm1480_vm11 = vcmp.eq.s32.totalorder %v3394_v62, %v3729_v13 }
 0x18c   :  { %2112 = vmatpush1.msra.mxu1 %v1785_v53  ;;  %v1650_v33 = vsel %vm1480_vm11, %v3738_v16, 0.0  ;;  %vm227_vm12 = vcmp.eq.s32.totalorder %v3394_v62, %v3747_v19  ;;  %vm558_vm13 = vcmp.eq.s32.totalorder %v3394_v62, %v3755_v40  ;;  %vm1018_vm14 = vcmp.eq.s32.totalorder %v3394_v62, %v3763_v48 }
 0x18d   :  { %v1776_v55 = vadd.f32 %v1648_v17, %v1317_v61  ;;  %v1319_v0 = vadd.f32 %v1191_v21, %v859_v26  ;;  %v397_v30 = vsel %vm227_vm12, %v3751_v23, 0.0  ;;  %v728_v2 = vsel %vm558_vm13, %v3759_v47, 0.0 }
 0x18e   :  { %v856_v58 = vadd.f32 %v728_v2, %v397_v30  ;;  %v1188_v25 = vsel %vm1018_vm14, %v3767_v49, 0.0  ;;  %vm1477_vm15 = vcmp.eq.s32.totalorder %v3394_v62, %v3773_v54  ;;  %vm229_vm0 = vcmp.eq.s32.totalorder %v3394_v62, %v3786_v45 }
 0x18f   :  { %2042 = vmatprep.subr.mxu0 %v1776_v55  ;;  %v1778_v34 = vadd.f32 %v1650_v33, %v1319_v0  ;;  %v1647_v29 = vsel %vm1477_vm15, %v3777_v59, 0.0  ;;  %v399_v24 = vsel %vm229_vm0, %v3797_v37, 0.0  ;;  %vm560_vm1 = vcmp.eq.s32.totalorder %v3394_v62, %v3801_v3 }
 0x190   :  { %v1316_v52 = vadd.f32 %v1188_v25, %v856_v58  ;;  %v730_v7 = vsel %vm560_vm1, %v3805_v6, 0.0  ;;  %vm1020_vm2 = vcmp.eq.s32.totalorder %v3394_v62, %v3809_v15  ;;  %vm1479_vm3 = vcmp.eq.s32.totalorder %v3394_v62, %v3818_v9 }
 0x191   :  { %2113 = vmatprep.subr.mxu1 %v1778_v34  ;;  %v858_v8 = vadd.f32 %v730_v7, %v399_v24  ;;  %v1190_v20 = vsel %vm1020_vm2, %v3813_v1, 0.0  ;;  %v1649_v35 = vsel %vm1479_vm3, %v3822_v4, 0.0  ;;  %vm220_vm4 = vcmp.eq.s32.totalorder %v3397_v41, %v3659_v46 }
 0x192   :  { %v1775_v31 = vadd.f32 %v1647_v29, %v1316_v52  ;;  %v390_v10 = vsel %vm220_vm4, %v3663_v50, 0.0  ;;  %vm551_vm5 = vcmp.eq.s32.totalorder %v3397_v41, %v3667_v51  ;;  %vm1011_vm7 = vcmp.eq.s32.totalorder %v3397_v41, %v3675_v18 }
 0x193   :  { %v1318_v17 = vadd.f32 %v1190_v20, %v858_v8  ;;  %v721_v62 = vsel %vm551_vm5, %v3671_v38, 0.0  ;;  %v1181_v53 = vsel %vm1011_vm7, %v3679_v28, 0.0  ;;  %vm1470_vm8 = vcmp.eq.s32.totalorder %v3397_v41, %v3683_v22 }
 0x194   :  { %2043 = vmatpush1.msra.mxu0 %v1775_v31  ;;  %v849_v27 = vadd.f32 %v721_v62, %v390_v10  ;;  %v1640_v43 = vsel %vm1470_vm8, %v3691_v60, 0.0  ;;  %vm222_vm6 = vcmp.eq.s32.totalorder %v3397_v41, %v3703_v42  ;;  %vm553_vm9 = vcmp.eq.s32.totalorder %v3397_v41, %v3711_v63 }
 0x195   :  { %v1777_v61 = vadd.f32 %v1649_v35, %v1318_v17  ;;  %v392_v26 = vsel %vm222_vm6, %v3707_v57, 0.0  ;;  %v723_v21 = vsel %vm553_vm9, %v3715_v11, 0.0  ;;  %vm1013_vm10 = vcmp.eq.s32.totalorder %v3397_v41, %v3719_v5 }
 0x196   :  { %v1309_v33 = vadd.f32 %v1181_v53, %v849_v27  ;;  %v851_v55 = vadd.f32 %v723_v21, %v392_v26  ;;  %v1183_v0 = vsel %vm1013_vm10, %v3725_v12, 0.0  ;;  %vm1472_vm11 = vcmp.eq.s32.totalorder %v3397_v41, %v3729_v13 }
 0x197   :  { %2114 = vmatpush1.msra.mxu1 %v1777_v61  ;;  %v1642_v30 = vsel %vm1472_vm11, %v3738_v16, 0.0  ;;  %vm219_vm12 = vcmp.eq.s32.totalorder %v3397_v41, %v3747_v19  ;;  %vm550_vm13 = vcmp.eq.s32.totalorder %v3397_v41, %v3755_v40  ;;  %vm1010_vm14 = vcmp.eq.s32.totalorder %v3397_v41, %v3763_v48 }
 0x198   :  { %v1768_v2 = vadd.f32 %v1640_v43, %v1309_v33  ;;  %v1311_v58 = vadd.f32 %v1183_v0, %v851_v55  ;;  %v389_v25 = vsel %vm219_vm12, %v3751_v23, 0.0  ;;  %v720_v34 = vsel %vm550_vm13, %v3759_v47, 0.0 }
 0x199   :  { %v848_v29 = vadd.f32 %v720_v34, %v389_v25  ;;  %v1180_v24 = vsel %vm1010_vm14, %v3767_v49, 0.0  ;;  %vm1469_vm15 = vcmp.eq.s32.totalorder %v3397_v41, %v3773_v54  ;;  %vm221_vm0 = vcmp.eq.s32.totalorder %v3397_v41, %v3786_v45 }
 0x19a   :  { %2044 = vmatprep.subr.mxu0 %v1768_v2  ;;  %v1770_v52 = vadd.f32 %v1642_v30, %v1311_v58  ;;  %v1639_v7 = vsel %vm1469_vm15, %v3777_v59, 0.0  ;;  %v391_v8 = vsel %vm221_vm0, %v3797_v37, 0.0  ;;  %vm552_vm1 = vcmp.eq.s32.totalorder %v3397_v41, %v3801_v3 }
 0x19b   :  { %v1308_v20 = vadd.f32 %v1180_v24, %v848_v29  ;;  %v722_v35 = vsel %vm552_vm1, %v3805_v6, 0.0  ;;  %vm1012_vm2 = vcmp.eq.s32.totalorder %v3397_v41, %v3809_v15  ;;  %vm1471_vm3 = vcmp.eq.s32.totalorder %v3397_v41, %v3818_v9 }
 0x19c   :  { %2115 = vmatprep.subr.mxu1 %v1770_v52  ;;  %v850_v31 = vadd.f32 %v722_v35, %v391_v8  ;;  %v1182_v10 = vsel %vm1012_vm2, %v3813_v1, 0.0  ;;  %v1641_v17 = vsel %vm1471_vm3, %v3822_v4, 0.0  ;;  %vm212_vm4 = vcmp.eq.s32.totalorder %v3400_v44, %v3659_v46 }
 0x19d   :  { %v1767_v62 = vadd.f32 %v1639_v7, %v1308_v20  ;;  %v382_v53 = vsel %vm212_vm4, %v3663_v50, 0.0  ;;  %vm543_vm5 = vcmp.eq.s32.totalorder %v3400_v44, %v3667_v51  ;;  %vm1003_vm7 = vcmp.eq.s32.totalorder %v3400_v44, %v3675_v18 }
 0x19e   :  { %v1310_v27 = vadd.f32 %v1182_v10, %v850_v31  ;;  %v713_v41 = vsel %vm543_vm5, %v3671_v38, 0.0  ;;  %v1173_v43 = vsel %vm1003_vm7, %v3679_v28, 0.0  ;;  %vm1462_vm8 = vcmp.eq.s32.totalorder %v3400_v44, %v3683_v22 }
 0x19f   :  { %2045 = vmatpush1.msra.mxu0 %v1767_v62  ;;  %v841_v61 = vadd.f32 %v713_v41, %v382_v53  ;;  %v1632_v26 = vsel %vm1462_vm8, %v3691_v60, 0.0  ;;  %vm214_vm6 = vcmp.eq.s32.totalorder %v3400_v44, %v3703_v42  ;;  %vm545_vm9 = vcmp.eq.s32.totalorder %v3400_v44, %v3711_v63 }
 0x1a0   :  { %v1769_v21 = vadd.f32 %v1641_v17, %v1310_v27  ;;  %v384_v33 = vsel %vm214_vm6, %v3707_v57, 0.0  ;;  %v715_v55 = vsel %vm545_vm9, %v3715_v11, 0.0  ;;  %vm1005_vm10 = vcmp.eq.s32.totalorder %v3400_v44, %v3719_v5 }
 0x1a1   :  { %v1301_v0 = vadd.f32 %v1173_v43, %v841_v61  ;;  %v843_v30 = vadd.f32 %v715_v55, %v384_v33  ;;  %v1175_v2 = vsel %vm1005_vm10, %v3725_v12, 0.0  ;;  %vm1464_vm11 = vcmp.eq.s32.totalorder %v3400_v44, %v3729_v13 }
 0x1a2   :  { %2116 = vmatpush1.msra.mxu1 %v1769_v21  ;;  %v1634_v58 = vsel %vm1464_vm11, %v3738_v16, 0.0  ;;  %vm211_vm12 = vcmp.eq.s32.totalorder %v3400_v44, %v3747_v19  ;;  %vm542_vm13 = vcmp.eq.s32.totalorder %v3400_v44, %v3755_v40  ;;  %vm1002_vm14 = vcmp.eq.s32.totalorder %v3400_v44, %v3763_v48 }
 0x1a3   :  { %v1760_v25 = vadd.f32 %v1632_v26, %v1301_v0  ;;  %v1303_v34 = vadd.f32 %v1175_v2, %v843_v30  ;;  %v381_v29 = vsel %vm211_vm12, %v3751_v23, 0.0  ;;  %v712_v24 = vsel %vm542_vm13, %v3759_v47, 0.0 }
 0x1a4   :  { %v840_v52 = vadd.f32 %v712_v24, %v381_v29  ;;  %v1172_v7 = vsel %vm1002_vm14, %v3767_v49, 0.0  ;;  %vm1461_vm15 = vcmp.eq.s32.totalorder %v3400_v44, %v3773_v54  ;;  %vm213_vm0 = vcmp.eq.s32.totalorder %v3400_v44, %v3786_v45 }
 0x1a5   :  { %2046 = vmatprep.subr.mxu0 %v1760_v25  ;;  %v1762_v8 = vadd.f32 %v1634_v58, %v1303_v34  ;;  %v1631_v20 = vsel %vm1461_vm15, %v3777_v59, 0.0  ;;  %v383_v35 = vsel %vm213_vm0, %v3797_v37, 0.0  ;;  %vm544_vm1 = vcmp.eq.s32.totalorder %v3400_v44, %v3801_v3 }
 0x1a6   :  { %v1300_v31 = vadd.f32 %v1172_v7, %v840_v52  ;;  %v714_v10 = vsel %vm544_vm1, %v3805_v6, 0.0  ;;  %vm1004_vm2 = vcmp.eq.s32.totalorder %v3400_v44, %v3809_v15  ;;  %vm1463_vm3 = vcmp.eq.s32.totalorder %v3400_v44, %v3818_v9 }
 0x1a7   :  { %2117 = vmatprep.subr.mxu1 %v1762_v8  ;;  %v842_v17 = vadd.f32 %v714_v10, %v383_v35  ;;  %v1174_v62 = vsel %vm1004_vm2, %v3813_v1, 0.0  ;;  %v1633_v53 = vsel %vm1463_vm3, %v3822_v4, 0.0  ;;  %vm204_vm4 = vcmp.eq.s32.totalorder %v2671_v14, %v3659_v46  ;;  %v4767_v10 = vld [vmem:[#allocation18_spill] sm:$0xff] }
 0x1a8   :  { %v1759_v27 = vadd.f32 %v1631_v20, %v1300_v31  ;;  %v374_v41 = vsel %vm204_vm4, %v3663_v50, 0.0  ;;  %vm535_vm5 = vcmp.eq.s32.totalorder %v2671_v14, %v3667_v51  ;;  %vm995_vm7 = vcmp.eq.s32.totalorder %v2671_v14, %v3675_v18  ;;  %v4766_v20 = vld [vmem:[#allocation17_spill] sm:$0xff] }
 0x1a9   :  { %v1302_v43 = vadd.f32 %v1174_v62, %v842_v17  ;;  %v705_v44 = vsel %vm535_vm5, %v3671_v38, 0.0  ;;  %v1165_v61 = vsel %vm995_vm7, %v3679_v28, 0.0  ;;  %vm1454_vm8 = vcmp.eq.s32.totalorder %v2671_v14, %v3683_v22 }
 0x1aa   :  { %2047 = vmatpush1.msra.mxu0 %v1759_v27  ;;  %v833_v26 = vadd.f32 %v705_v44, %v374_v41  ;;  %v1624_v46 = vsel %vm1454_vm8, %v3691_v60, 0.0  ;;  %vm206_vm6 = vcmp.eq.s32.totalorder %v2671_v14, %v3703_v42  ;;  %vm537_vm9 = vcmp.eq.s32.totalorder %v2671_v14, %v3711_v63 }
 0x1ab   :  { %v1761_v50 = vadd.f32 %v1633_v53, %v1302_v43  ;;  %v376_v51 = vsel %vm206_vm6, %v3707_v57, 0.0  ;;  %v707_v38 = vsel %vm537_vm9, %v3715_v11, 0.0  ;;  %vm997_vm10 = vcmp.eq.s32.totalorder %v2671_v14, %v3719_v5  ;;  %v4768_v53 = vld [vmem:[#allocation15_spill] sm:$0xff]  ;;  %v4769_v43 = vld [vmem:[#allocation16_spill] sm:$0xff] }
 0x1ac   :  { %v1293_v18 = vadd.f32 %v1165_v61, %v833_v26  ;;  %v835_v28 = vadd.f32 %v707_v38, %v376_v51  ;;  %v1167_v22 = vsel %vm997_vm10, %v3725_v12, 0.0  ;;  %vm1456_vm11 = vcmp.eq.s32.totalorder %v2671_v14, %v3729_v13 }
 0x1ad   :  { %2118 = vmatpush1.msra.mxu1 %v1761_v50  ;;  %v1626_v60 = vsel %vm1456_vm11, %v3738_v16, 0.0  ;;  %vm203_vm12 = vcmp.eq.s32.totalorder %v2671_v14, %v3747_v19  ;;  %vm534_vm13 = vcmp.eq.s32.totalorder %v2671_v14, %v3755_v40  ;;  %vm994_vm14 = vcmp.eq.s32.totalorder %v2671_v14, %v3763_v48 }
 0x1ae   :  { %v1752_v42 = vadd.f32 %v1624_v46, %v1293_v18  ;;  %v1295_v57 = vadd.f32 %v1167_v22, %v835_v28  ;;  %v373_v63 = vsel %vm203_vm12, %v3751_v23, 0.0  ;;  %v704_v11 = vsel %vm534_vm13, %v3759_v47, 0.0 }
 0x1af   :  { %v832_v5 = vadd.f32 %v704_v11, %v373_v63  ;;  %v1164_v12 = vsel %vm994_vm14, %v3767_v49, 0.0  ;;  %vm1453_vm15 = vcmp.eq.s32.totalorder %v2671_v14, %v3773_v54  ;;  %vm205_vm0 = vcmp.eq.s32.totalorder %v2671_v14, %v3786_v45 }
 0x1b0   :  { %2048 = vmatprep.subr.mxu0 %v1752_v42  ;;  %v1754_v13 = vadd.f32 %v1626_v60, %v1295_v57  ;;  %v1623_v16 = vsel %vm1453_vm15, %v3777_v59, 0.0  ;;  %v375_v19 = vsel %vm205_vm0, %v3797_v37, 0.0  ;;  %vm536_vm1 = vcmp.eq.s32.totalorder %v2671_v14, %v3801_v3  ;;  %v2558_v37 = vld [vmem:[#allocation7] sm:$0xff] }
 0x1b1   :  { %v1292_v23 = vadd.f32 %v1164_v12, %v832_v5  ;;  %v706_v40 = vsel %vm536_vm1, %v3805_v6, 0.0  ;;  %vm996_vm2 = vcmp.eq.s32.totalorder %v2671_v14, %v3809_v15  ;;  %vm1455_vm3 = vcmp.eq.s32.totalorder %v2671_v14, %v3818_v9  ;;  %v57_v3 = vld [vmem:[#allocation6] ss:$4 sm:$0xff] }
 0x1b2   :  { %2119 = vmatprep.subr.mxu1 %v1754_v13  ;;  %v834_v47 = vadd.f32 %v706_v40, %v375_v19  ;;  %v1166_v48 = vsel %vm996_vm2, %v3813_v1, 0.0  ;;  %v1625_v54 = vsel %vm1455_vm3, %v3822_v4, 0.0  ;;  %v64_v6 = vstv %s50_s2 }
 0x1b3   :  { %v1751_v49 = vadd.f32 %v1623_v16, %v1292_v23  ;;  %v65_v15 = vsub.f32 %v57_v3, %v64_v6  ;;  %v66_v9 = vstv %s2538_s27 }
 0x1b4   :  { %v1294_v59 = vadd.f32 %v1166_v48, %v834_v47 }
 0x1b5   :  { %2049 = vmatpush1.msra.mxu0 %v1751_v49  ;;  %v67_v21 = vmul.f32 %v66_v9, %v65_v15  ;;  %v63_v9 = vld [vmem:[#allocation6 + $0x3] ss:$4 sm:$0xff] }
 0x1b6   :  { %v1753_v45 = vadd.f32 %v1625_v54, %v1294_v59  ;;  %2083 = vmatmul.mubr.f32.vlgmr.msra.gmra.mxu0 %v2558_v37 }
 0x1b7   :  { %v2542_v33 = vadd.f32 -1.0, %v67_v21 }
 0x1b8   :  { %2120 = vmatpush1.msra.mxu1 %v1753_v45 }
 0x1b9   :  { %2154 = vmatmul.mubr.f32.vlgmr.msra.gmra.mxu1 %v2558_v37  ;;  %v79_v55 = vadd.f32 1.0, %v2542_v33 }
 0x1bb   :  { %v80_v1 = vmul.f32 3.5, %v79_v55 }
 0x1bd   :  { %v85_v0 = vfloor.f32 %v80_v1  ;;  %v1942_v11 = vpop.f32.mrf.mxu0 }
 0x1bf   :  { %v2545_v30 = vtrunc.f32 %v85_v0  ;;  %v88_v58 = vsub.f32 %v80_v1, %v85_v0  ;;  %v1944_v49 = vpop.f32.mrf.mxu0 }
 0x1c0   :  { %v2013_v5 = vpop.f32.mrf.mxu1 }
 0x1c1   :  { %v2546_v4 = vcvt.f32.s32 %v2545_v30  ;;  %v96_v29 = vsub.f32 1.0, %v88_v58 }
 0x1c2   :  { %v2015_v54 = vpop.f32.mrf.mxu1 }
 0x1c3   :  { %v92_v2 = vadd.s32 1, %v2546_v4  ;;  %vm102_vm4 = vcmp.gt.s32.totalorder %v2546_v4, 0  ;;  %vm93_vm7 = vcmp.ge.s32.totalorder %v2546_v4, 0  ;;  %vm94_vm8 = vcmp.lt.s32.totalorder %v2546_v4, 8 }
 0x1c4   :  { %v103_v25 = vsel %vm102_vm4, %v2546_v4, 0  ;;  %vm95_vm12 = vmand %vm93_vm7, %vm94_vm8  ;;  %vm2411_vm7 = vcmp.gt.f32.partialorder %v63_v9, 0.5 }
 0x1c5   :  { %vm106_vm5 = vcmp.gt.s32.totalorder %v92_v2, 0  ;;  %vm98_vm6 = vcmp.ge.s32.totalorder %v92_v2, 0  ;;  %vm99_vm9 = vcmp.lt.s32.totalorder %v92_v2, 8  ;;  %vm104_vm10 = vcmp.lt.s32.totalorder %v103_v25, 7 }
 0x1c6   :  { %v107_v34 = vsel %vm106_vm5, %v92_v2, 0  ;;  %vm100_vm13 = vmand %vm98_vm6, %vm99_vm9  ;;  %v4553_v24 = vsel %vm104_vm10, %v103_v25, 7  ;;  %v4557_v7 = vsel %vm95_vm12, %v96_v29, 0.0 }
 0x1c7   :  { %vm108_vm11 = vcmp.lt.s32.totalorder %v107_v34, 7  ;;  %v4559_v8 = vsel %vm100_vm13, %v88_v58, 0.0  ;;  %v2163_v35 = vrot.slane %v4553_v24, %v4766_v20  ;;  %v2171_v17 = vrot.slane %v4553_v24, %v4767_v10 }
 0x1c8   :  { %v4555_v52 = vsel %vm108_vm11, %v107_v34, 7  ;;  %v2167_v27 = vrot.slane %v4553_v24, %v4768_v53  ;;  %v2175_v44 = vrot.slane %v4553_v24, %v4769_v43  ;;  %v2204_v26 = vrot.slane %v4557_v7, %v4766_v20 }
 0x1c9   :  { %v2252_v31 = vrot.slane %v4555_v52, %v4766_v20  ;;  %v2260_v62 = vrot.slane %v4555_v52, %v4767_v10  ;;  %v2256_v41 = vrot.slane %v4555_v52, %v4768_v53  ;;  %v2264_v61 = vrot.slane %v4555_v52, %v4769_v43 }
 0x1ca   :  { %v2293_v46 = vrot.slane %v4559_v8, %v4766_v20  ;;  %v2212_v50 = vrot.slane %v4557_v7, %v4767_v10  ;;  %v2301_v51 = vrot.slane %v4559_v8, %v4767_v10  ;;  %vm2192_vm14 = vcmp.eq.s32.totalorder %v2671_v14, %v2163_v35 }
 0x1cb   :  { %vm2281_vm15 = vcmp.eq.s32.totalorder %v2671_v14, %v2252_v31  ;;  %vm2194_vm0 = vcmp.eq.s32.totalorder %v2671_v14, %v2171_v17  ;;  %vm2283_vm1 = vcmp.eq.s32.totalorder %v2671_v14, %v2260_v62  ;;  %v2208_v38 = vrot.slane %v4557_v7, %v4768_v53 }
 0x1cc   :  { %v2297_v18 = vrot.slane %v4559_v8, %v4768_v53  ;;  %v2216_v28 = vrot.slane %v4557_v7, %v4769_v43  ;;  %v2305_v22 = vrot.slane %v4559_v8, %v4769_v43  ;;  %vm2193_vm2 = vcmp.eq.s32.totalorder %v2671_v14, %v2167_v27 }
 0x1cd   :  { %vm2282_vm3 = vcmp.eq.s32.totalorder %v2671_v14, %v2256_v41  ;;  %vm2195_vm4 = vcmp.eq.s32.totalorder %v2671_v14, %v2175_v44  ;;  %vm2284_vm5 = vcmp.eq.s32.totalorder %v2671_v14, %v2264_v61  ;;  %v2241_v60 = vsel %vm2192_vm14, %v2204_v26, 0.0 }
 0x1ce   :  { %v2330_v42 = vsel %vm2281_vm15, %v2293_v46, 0.0  ;;  %v2243_v57 = vsel %vm2194_vm0, %v2212_v50, 0.0  ;;  %v2332_v63 = vsel %vm2283_vm1, %v2301_v51, 0.0  ;;  %v2242_v12 = vsel %vm2193_vm2, %v2208_v38, 0.0 }
 0x1cf   :  { %v2331_v13 = vsel %vm2282_vm3, %v2297_v18, 0.0  ;;  %v2244_v16 = vsel %vm2195_vm4, %v2216_v28, 0.0  ;;  %v2333_v19 = vsel %vm2284_vm5, %v2305_v22, 0.0  ;;  %v2338_v23 = vadd.f32 %v2330_v42, %v2241_v60 }
 0x1d0   :  { %v2340_v40 = vadd.f32 %v2332_v63, %v2243_v57  ;;  %v2339_v47 = vadd.f32 %v2331_v13, %v2242_v12  ;;  %v2341_v48 = vadd.f32 %v2333_v19, %v2244_v16  ;;  %v2179_v4 = vrot.slane %v4553_v24, %v3652_v36 }
 0x1d1   :  { %v2346_v59 = vmul.f32 %v2338_v23, %v1942_v11  ;;  %v2268_v2 = vrot.slane %v4555_v52, %v3652_v36  ;;  %v2639_v58 = vmov 0   ;;  %v2183_v35 = vrot.slane %v4553_v24, %v3646_v56 }
 0x1d2   :  { %v2348_v45 = vmul.f32 %v2340_v40, %v2013_v5  ;;  %v2347_v37 = vmul.f32 %v2339_v47, %v1944_v49  ;;  %v2349_v3 = vmul.f32 %v2341_v48, %v2015_v54  ;;  %v4606_v25 = vsel %vm2411_vm7, 1, %v2639_v58 }
 0x1d3   :  { %v2354_v6 = vrot.slane %v2346_v59, 4  ;;  %v2272_v31 = vrot.slane %v4555_v52, %v3646_v56  ;;  %v2220_v17 = vrot.slane %v4557_v7, %v3652_v36  ;;  %v2309_v62 = vrot.slane %v4559_v8, %v3652_v36 }
 0x1d4   :  { %v2366_v15 = vrot.slane %v2348_v45, 4  ;;  %v2360_v21 = vrot.slane %v2347_v37, 4  ;;  %v2372_v33 = vrot.slane %v2349_v3, 4  ;;  %v2187_v27 = vrot.slane %v4553_v24, %v3655_v39 }
 0x1d5   :  { %v2355_v55 = vadd.f32 %v2354_v6, %v2346_v59  ;;  %v2276_v41 = vrot.slane %v4555_v52, %v3655_v39  ;;  %vm2196_vm8 = vcmp.eq.s32.totalorder %v2671_v14, %v2179_v4  ;;  %vm2285_vm6 = vcmp.eq.s32.totalorder %v2671_v14, %v2268_v2 }
 0x1d6   :  { %v2367_v1 = vadd.f32 %v2366_v15, %v2348_v45  ;;  %v2361_v0 = vadd.f32 %v2360_v21, %v2347_v37  ;;  %v2373_v30 = vadd.f32 %v2372_v33, %v2349_v3  ;;  %v2224_v26 = vrot.slane %v4557_v7, %v3646_v56 }
 0x1d7   :  { %v2356_v34 = vrot.slane %v2355_v55, 2  ;;  %v2313_v46 = vrot.slane %v4559_v8, %v3646_v56  ;;  %v2191_v50 = vrot.slane %v4553_v24, %v3649_v32  ;;  %v2280_v51 = vrot.slane %v4555_v52, %v3649_v32 }
 0x1d8   :  { %v2368_v29 = vrot.slane %v2367_v1, 2  ;;  %v2362_v44 = vrot.slane %v2361_v0, 2  ;;  %v2374_v61 = vrot.slane %v2373_v30, 2  ;;  %v2228_v38 = vrot.slane %v4557_v7, %v3655_v39 }
 0x1d9   :  { %v2317_v18 = vrot.slane %v4559_v8, %v3655_v39  ;;  %vm2197_vm9 = vcmp.eq.s32.totalorder %v2671_v14, %v2183_v35  ;;  %vm2286_vm10 = vcmp.eq.s32.totalorder %v2671_v14, %v2272_v31  ;;  %v2245_v28 = vsel %vm2196_vm8, %v2220_v17, 0.0 }
 0x1da   :  { %v2334_v22 = vsel %vm2285_vm6, %v2309_v62, 0.0  ;;  %vm2198_vm11 = vcmp.eq.s32.totalorder %v2671_v14, %v2187_v27  ;;  %vm2287_vm12 = vcmp.eq.s32.totalorder %v2671_v14, %v2276_v41  ;;  %v2363_v24 = vadd.f32 %v2362_v44, %v2361_v0 }
 0x1db   :  { %v2375_v60 = vadd.f32 %v2374_v61, %v2373_v30  ;;  %v2232_v52 = vrot.slane %v4557_v7, %v3649_v32  ;;  %v2321_v42 = vrot.slane %v4559_v8, %v3649_v32  ;;  %v2246_v57 = vsel %vm2197_vm9, %v2224_v26, 0.0 }
 0x1dc   :  { %v2335_v63 = vsel %vm2286_vm10, %v2313_v46, 0.0  ;;  %vm2199_vm13 = vcmp.eq.s32.totalorder %v2671_v14, %v2191_v50  ;;  %vm2288_vm14 = vcmp.eq.s32.totalorder %v2671_v14, %v2280_v51  ;;  %v2357_v11 = vadd.f32 %v2356_v34, %v2355_v55 }
 0x1dd   :  { %v2342_v5 = vadd.f32 %v2334_v22, %v2245_v28  ;;  %v2247_v12 = vsel %vm2198_vm11, %v2228_v38, 0.0  ;;  %v2336_v13 = vsel %vm2287_vm12, %v2317_v18, 0.0  ;;  %v2369_v16 = vadd.f32 %v2368_v29, %v2367_v1 }
 0x1de   :  { %v2364_v19 = vrot.slane %v2363_v24, 1  ;;  %v2343_v23 = vadd.f32 %v2335_v63, %v2246_v57  ;;  %v2248_v40 = vsel %vm2199_vm13, %v2232_v52, 0.0  ;;  %v2337_v47 = vsel %vm2288_vm14, %v2321_v42, 0.0 }
 0x1df   :  { %v2416_v7 = vrot.slane %v4606_v25, %v4766_v20  ;;  %v2376_v48 = vrot.slane %v2375_v60, 1  ;;  %v2344_v49 = vadd.f32 %v2336_v13, %v2247_v12  ;;  %v2358_v54 = vrot.slane %v2357_v11, 1 }
 0x1e0   :  { %v4646_v45 = vstv %s2541_s28  ;;  %v2370_v37 = vrot.slane %v2369_v16, 1  ;;  %v2420_v3 = vrot.slane %v4606_v25, %v4768_v53  ;;  %v2345_v15 = vadd.f32 %v2337_v47, %v2248_v40 }
 0x1e1   :  { %v2365_v9 = vadd.f32 %v2364_v19, %v2363_v24  ;;  %v2428_v21 = vrot.slane %v4606_v25, %v4769_v43  ;;  %vm4652_vm15 = vcmp.ne.s32.totalorder %v2416_v7, 0  ;;  %v2424_v0 = vrot.slane %v4606_v25, %v4767_v10 }
 0x1e2   :  { %v2377_v30 = vadd.f32 %v2376_v48, %v2375_v60  ;;  %v2359_v2 = vadd.f32 %v2358_v54, %v2357_v11  ;;  %v2371_v35 = vadd.f32 %v2370_v37, %v2369_v16  ;;  %vm4658_vm0 = vcmp.ne.s32.totalorder %v2420_v3, 0 }
 0x1e3   :  { %vm2404_vm1 = vcmp.gt.f32.partialorder %v2365_v9, %v4646_v45  ;;  %vm4663_vm2 = vcmp.ne.s32.totalorder %v2428_v21, 0  ;;  %v2640_v61 = vmov 1966171168   ;;  %v2432_v50 = vrot.slane %v4606_v25, %v3652_v36 }
 0x1e4   :  { %vm2406_vm3 = vcmp.gt.f32.partialorder %v2377_v30, %v4646_v45  ;;  %v2474_v26 = vunpack.c.l.s4 %v2640_v61  ;;  %vm2403_vm4 = vcmp.gt.f32.partialorder %v2359_v2, %v4646_v45  ;;  %vm2405_vm5 = vcmp.gt.f32.partialorder %v2371_v35, %v4646_v45  ;;  %vm4676_vm8 = vmand %vm2404_vm1, %vm4658_vm0 }
 0x1e5   :  { %vm2447_vm7 = vcmp.ne.s32.totalorder %v2424_v0, 0  ;;  %vm4682_vm6 = vmand %vm2406_vm3, %vm4663_vm2  ;;  %v2436_v60 = vrot.slane %v4606_v25, %v3646_v56  ;;  %v2440_v57 = vrot.slane %v4606_v25, %v3655_v39  ;;  %vm2449_vm11 = vcmp.ne.s32.totalorder %v2432_v50, 0 }
 0x1e6   :  { %vm4690_vm9 = vmand %vm2403_vm4, %vm4652_vm15  ;;  %v2475_v11 = vunpack.c.0.s8 %v2474_v26  ;;  %v2462_v56 = vsel %vm4676_vm8, 1, %v2639_v58  ;;  %v2464_v39 = vsel %vm4682_vm6, 1, %v2639_v58 }
 0x1e7   :  { %vm4696_vm10 = vmand %vm2405_vm5, %vm2447_vm7  ;;  %vm2450_vm13 = vcmp.ne.s32.totalorder %v2436_v60, 0  ;;  %v2461_v47 = vsel %vm4690_vm9, 1, %v2639_v58  ;;  %vm2451_vm15 = vcmp.ne.s32.totalorder %v2440_v57, 0 }
 0x276   :  { %v2084_v8 = vpop.f32.mrf.mxu0 }
 0x277   :  { %v2350_v59 = vmul.f32 %v2342_v5, %v2084_v8 }
 0x278   :  { %v2086_v6 = vpop.f32.mrf.mxu0 }
 0x279   :  { %v2378_v33 = vrot.slane %v2350_v59, 4  ;;  %v2155_v55 = vpop.f32.mrf.mxu1  ;;  %v2351_v20 = vmul.f32 %v2343_v23, %v2086_v6  ;;  %v2444_v23 = vrot.slane %v4606_v25, %v3649_v32  ;;  %v2463_v32 = vsel %vm4696_vm10, 1, %v2639_v58 }
 0x27a   :  { %v2352_v4 = vmul.f32 %v2344_v49, %v2155_v55  ;;  %v2469_v25 = vcombine.low %v2461_v47, %v2462_v56  ;;  %v2470_v8 = vcombine.low %v2463_v32, %v2464_v39  ;;  %v2478_v49 = vsub.s32 %v2475_v11, %v2671_v14 }
 0x27b   :  { %v2379_v53 = vadd.f32 %v2378_v33, %v2350_v59  ;;  %v2384_v34 = vrot.slane %v2351_v20, 4  ;;  %v2157_v29 = vpop.f32.mrf.mxu1  ;;  %vm2452_vm3 = vcmp.ne.s32.totalorder %v2444_v23, 0 }
 0x27c   :  { %v2390_v43 = vrot.slane %v2352_v4, 4  ;;  %v2353_v17 = vmul.f32 %v2345_v15, %v2157_v29  ;;  %v2479_v6 = vrot.slane %v2469_v25, %v2478_v49  ;;  %v2486_v15 = vrot.slane %v2470_v8, %v2478_v49 }
 0x27d   :  { %v2380_v10 = vrot.slane %v2379_v53, 2  ;;  %v2385_v27 = vadd.f32 %v2384_v34, %v2351_v20 }
 0x27e   :  { %v2391_v41 = vadd.f32 %v2390_v43, %v2352_v4  ;;  %v2396_v44 = vrot.slane %v2353_v17, 4  ;;  %v2501_v20 = vcombine.low %v2479_v6, %v2486_v15 }
 0x27f   :  { %v2381_v46 = vadd.f32 %v2380_v10, %v2379_v53  ;;  %v2386_v51 = vrot.slane %v2385_v27, 2 }
 0x280   :  { %v2392_v18 = vrot.slane %v2391_v41, 2  ;;  %v2397_v28 = vadd.f32 %v2396_v44, %v2353_v17  ;;  %v2509_v0 = vrot.slane %v2501_v20, %v2478_v49 }
 0x281   :  { %v2382_v36 = vrot.slane %v2381_v46, 1  ;;  %v2387_v24 = vadd.f32 %v2386_v51, %v2385_v27 }
 0x282   :  { %v2393_v42 = vadd.f32 %v2392_v18, %v2391_v41  ;;  %v2398_v63 = vrot.slane %v2397_v28, 2 }
 0x283   :  { %v2383_v12 = vadd.f32 %v2382_v36, %v2381_v46  ;;  %v2388_v13 = vrot.slane %v2387_v24, 1 }
 0x284   :  { %v2394_v16 = vrot.slane %v2393_v42, 1  ;;  %v2399_v19 = vadd.f32 %v2398_v63, %v2397_v28 }
 0x285   :  { %vm2407_vm12 = vcmp.gt.f32.partialorder %v2383_v12, %v4646_v45  ;;  %v2389_v40 = vadd.f32 %v2388_v13, %v2387_v24 }
 0x286   :  { %vm2457_vm14 = vmand %vm2407_vm12, %vm2449_vm11  ;;  %v2395_v7 = vadd.f32 %v2394_v16, %v2393_v42  ;;  %v2400_v48 = vrot.slane %v2399_v19, 1 }
 0x287   :  { %vm2408_vm0 = vcmp.gt.f32.partialorder %v2389_v40, %v4646_v45  ;;  %v2465_v59 = vsel %vm2457_vm14, 1, %v2639_v58 }
 0x288   :  { %vm2409_vm1 = vcmp.gt.f32.partialorder %v2395_v7, %v4646_v45  ;;  %vm2458_vm2 = vmand %vm2408_vm0, %vm2450_vm13  ;;  %v2401_v54 = vadd.f32 %v2400_v48, %v2399_v19 }
 0x289   :  { %vm2459_vm4 = vmand %vm2409_vm1, %vm2451_vm15  ;;  %v2466_v37 = vsel %vm2458_vm2, 1, %v2639_v58 }
 0x28a   :  { %vm2410_vm5 = vcmp.gt.f32.partialorder %v2401_v54, %v4646_v45  ;;  %v2471_v3 = vcombine.low %v2465_v59, %v2466_v37  ;;  %v2467_v9 = vsel %vm2459_vm4, 1, %v2639_v58 }
 0x28b   :  { %vm2460_vm7 = vmand %vm2410_vm5, %vm2452_vm3 }
 0x28c   :  { %v2468_v14 = vsel %vm2460_vm7, 1, %v2639_v58  ;;  %v2493_v33 = vrot.slane %v2471_v3, %v2478_v49 }
 0x28d   :  { %v2472_v21 = vcombine.low %v2467_v9, %v2468_v14 }
 0x28f   :  { %v2500_v55 = vrot.slane %v2472_v21, %v2478_v49 }
 0x291   :  { %v2502_v1 = vcombine.low %v2493_v33, %v2500_v55 }
 0x293   :  { %v2516_v30 = vrot.slane %v2502_v1, %v2478_v49 }
 0x295   :  { %v2517_v4 = vcombine.low %v2509_v0, %v2516_v30 }
 0x297   :  { %2518 = vst [vmem:[#allocation9] sm:$0xff] %v2517_v4 }
 0x298   :  { %2618 = shalt.err (!%p2615_p0)
}
 0x299   :  { %2528 = dma.vmem_to_hbm [thread:$0]  %s2526_s30, 128, %s4729_s3, [#allocation4]  }
 0x29a   :  { %2633 = dma.done.wait [#allocation4], 128  }
 0x29b   :  { %2634 = vsyncadd [#allocation4], 4294967168 }
 0x29c   :  { %2532 = vsyncpa [#allocation3], 1 }
 0x29d   :  { %2533 = vsyncpa [#allocation8], 1 }
 0x29e   :  { %2534 = vsyncpa [#allocation4], 1 }
 0x29f   :  { %2535 = vsyncpa [#allocation5], 1 }

// kernel: tpu_custom_call.1
= control target key start
LH: loop header
LB: loop body
LE: loop exit
PB: predicated region body
PF: predicated region fallthrough
CT: control target
= control target key end

     0   :  { %8 = vsyncpa [#allocation5], 0  ;;  %s4726_s0 = inlined_call_operand.hbm [shape: f32[8], index: 0, kind: input, shape index: {}]   ;;  %s4727_s1 = inlined_call_operand.hbm [shape: f32[4,1024], index: 1, kind: input, shape index: {}]   ;;  %s4728_s2 = inlined_call_operand.hbm [shape: f32[8,128], index: 2, kind: input, shape index: {}]   ;;  %s4729_s3 = inlined_call_operand.hbm [shape: s32[1,1024], index: 3, kind: output, shape index: {}]  }
   0x1   :  { %9 = vsyncpa [#allocation3], 0 }
   0x2   :  { %10 = vsyncpa [#allocation8], 0 }
   0x3   :  { %11 = vsyncpa [#allocation4], 0  ;;  %s2635_s12 = smov [#allocation2]   ;;  %s2636_s15 = smov [#allocation6]  }
   0x4   :  { %19 = dma.hbm_to_smem %s4726_s0, 16, %s2635_s12, [#allocation5]  }
   0x5   :  { %s26_s16 = sshll.u32 %s2636_s15, 4  ;;  %s2637_s17 = smov [#allocation7]   ;;  %s27_s16 = int_to_ptr.vmem [resolvable:$true] %s26_s16 }
   0x6   :  { %s36_s18 = sshll.u32 %s2637_s17, 4  ;;  %s2575_s19 = scalar_lea.vmem %s27_s16, 512  ;;  %s37_s18 = int_to_ptr.vmem [resolvable:$true] %s36_s18 }
   0x7   :  { %p2576_p0 = scmp.ne.s32.totalorder %s27_s16, %s2575_s19  ;;  %p2580_p1 = scmp.lt.s32.totalorder %s27_s16, %s27_s16 }
   0x8   :  { %p2581_p2 = scmp.lt.s32.totalorder %s2575_s19, %s2575_s19 }
   0xa   :  { %p2582_p3 = por %p2581_p2, %p2580_p1 }
   0xc   :  { %p2583_p4 = pnand %p2582_p3, %p2576_p0 }
   0xe   :  { %2586 = shalt.err (!%p2583_p4)
}
   0xf   :  { %29 = dma.hbm_to_vmem [thread:$0]  %s4727_s1, 512, %s27_s16, [#allocation3]  }
  0x10   :  { %s2595_s22 = scalar_lea.vmem %s37_s18, 128  ;;  %p2600_p6 = scmp.lt.s32.totalorder %s37_s18, %s37_s18 }
  0x11   :  { %p2596_p5 = scmp.ne.s32.totalorder %s37_s18, %s2595_s22  ;;  %p2601_p7 = scmp.lt.s32.totalorder %s2595_s22, %s2595_s22 }
  0x13   :  { %p2602_p8 = por %p2601_p7, %p2600_p6 }
  0x15   :  { %p2603_p9 = pnand %p2602_p8, %p2596_p5 }
  0x17   :  { %2606 = shalt.err (!%p2603_p9)
}
  0x18   :  { %39 = dma.hbm_to_vmem [thread:$0]  %s4728_s2, 128, %s37_s18, [#allocation8]  }
  0x19   :  { %2627 = dma.done.wait [#allocation5], 16  }
  0x1a   :  { %2628 = vsyncadd [#allocation5], 4294967280 }
  0x1b   :  { %2629 = dma.done.wait [#allocation3], 512  }
  0x1c   :  { %2630 = vsyncadd [#allocation3], 4294966784 }
  0x1d   :  { %2631 = dma.done.wait [#allocation8], 128  }
  0x1e   :  { %2632 = vsyncadd [#allocation8], 4294967168 }
  0x1f   :  { %49 = sfence }
  0x20   :  { %s2536_s1 = sld [smem:[#allocation2 + $0x1]]  ;;  %v59_v0 = vld [vmem:[#allocation6 + $0x1] ss:$4 sm:$0xff]  ;;  %v61_v1 = vld [vmem:[#allocation6 + $0x2] ss:$4 sm:$0xff]  ;;  %v148_v9 = vlaneseq  ;;  %s2641_s29 = smov [#allocation9]  }
  0x21   :  { %s2537_s24 = sld [smem:[#allocation2 + $0x2]]  ;;  %s2525_s30 = sshll.u32 %s2641_s29, 4  ;;  %s2526_s30 = int_to_ptr.vmem [resolvable:$true] %s2525_s30 }
  0x22   :  { %s2539_s25 = sld [smem:[#allocation2 + $0x4]]  ;;  %v2671_v14 = vshrl.u32 %v148_v9, 7  ;;  %s2607_s4 = scalar_lea.vmem %s2526_s30, 128 }
  0x23   :  { %s2540_s26 = sld [smem:[#allocation2 + $0x5]]  ;;  %p2608_p10 = scmp.ne.s32.totalorder %s2526_s30, %s2607_s4 }
  0x24   :  { %v2674_v18 = vadd.s32 120, %v2671_v14  ;;  %v2677_v20 = vsub.s32 1, %v2671_v14  ;;  %v2680_v21 = vsub.s32 3, %v2671_v14  ;;  %v2683_v22 = vsub.s32 0, %v2671_v14  ;;  %s50_s2 = sld [smem:[#allocation2]]  ;;  %p2612_p11 = scmp.lt.s32.totalorder %s2526_s30, %s2526_s30 }
  0x25   :  { %v2686_v24 = vsub.s32 2, %v2671_v14  ;;  %v2689_v25 = vadd.s32 112, %v2671_v14  ;;  %v2692_v26 = vadd.s32 104, %v2671_v14  ;;  %v2695_v29 = vadd.s32 96, %v2671_v14  ;;  %s2538_s27 = sld [smem:[#allocation2 + $0x3]]  ;;  %p2613_p12 = scmp.lt.s32.totalorder %s2607_s4, %s2607_s4 }
  0x26   :  { %v69_v2 = vstv %s2536_s1  ;;  %4750 = vst [vmem:[#allocation14_spill] sm:$0xff] %v2674_v18  ;;  %4751 = vst [vmem:[#allocation15_spill] sm:$0xff] %v2677_v20  ;;  %v2698_v30 = vadd.s32 88, %v2671_v14  ;;  %v2701_v33 = vadd.s32 80, %v2671_v14  ;;  %v2704_v34 = vadd.s32 72, %v2671_v14  ;;  %s2541_s28 = sld [smem:[#allocation2 + $0x6]] }
  0x27   :  { %v70_v3 = vsub.f32 %v59_v0, %v69_v2  ;;  %v74_v4 = vstv %s2537_s24  ;;  %4752 = vst [vmem:[#allocation16_spill] sm:$0xff] %v2680_v21  ;;  %4753 = vst [vmem:[#allocation17_spill] sm:$0xff] %v2683_v22  ;;  %v2707_v37 = vadd.s32 64, %v2671_v14  ;;  %v2710_v38 = vadd.s32 56, %v2671_v14  ;;  %p2614_p13 = por %p2613_p12, %p2612_p11 }
  0x28   :  { %v71_v5 = vstv %s2539_s25  ;;  %v75_v6 = vsub.f32 %v61_v1, %v74_v4  ;;  %4754 = vst [vmem:[#allocation18_spill] sm:$0xff] %v2686_v24  ;;  %v2713_v41 = vadd.s32 48, %v2671_v14  ;;  %v2716_v42 = vadd.s32 40, %v2671_v14 }
  0x29   :  { %v72_v7 = vmul.f32 %v71_v5, %v70_v3  ;;  %v76_v8 = vstv %s2540_s26  ;;  %4755 = vst [vmem:[#allocation19_spill] sm:$0xff] %v2707_v37  ;;  %4756 = vst [vmem:[#allocation20_spill] sm:$0xff] %v2710_v38  ;;  %p2615_p0 = pnand %p2614_p13, %p2608_p10 }
  0x2a   :  { %v77_v10 = vmul.f32 %v76_v8, %v75_v6  ;;  %4757 = vst [vmem:[#allocation21_spill] sm:$0xff] %v2713_v41  ;;  %4758 = vst [vmem:[#allocation22_spill] sm:$0xff] %v2716_v42 }
  0x2b   :  { %v2543_v11 = vadd.f32 -1.0, %v72_v7 }
  0x2c   :  { %v2544_v12 = vadd.f32 -1.0, %v77_v10 }
  0x2d   :  { %v81_v13 = vadd.f32 1.0, %v2543_v11 }
  0x2e   :  { %v83_v15 = vadd.f32 1.0, %v2544_v12 }
  0x2f   :  { %v82_v16 = vmul.f32 3.5, %v81_v13 }
  0x30   :  { %v84_v17 = vmul.f32 3.5, %v83_v15 }
  0x31   :  { %v86_v19 = vfloor.f32 %v82_v16 }
  0x32   :  { %v87_v23 = vfloor.f32 %v84_v17 }
  0x33   :  { %v89_v27 = vsub.f32 %v82_v16, %v86_v19  ;;  %v2547_v28 = vtrunc.f32 %v86_v19 }
  0x34   :  { %v90_v31 = vsub.f32 %v84_v17, %v87_v23  ;;  %v2549_v32 = vtrunc.f32 %v87_v23 }
  0x35   :  { %v2548_v35 = vcvt.f32.s32 %v2547_v28  ;;  %v115_v36 = vsub.f32 1.0, %v89_v27 }
  0x36   :  { %v2550_v39 = vcvt.f32.s32 %v2549_v32  ;;  %v134_v40 = vsub.f32 1.0, %v90_v31 }
  0x37   :  { %v111_v43 = vadd.s32 1, %v2548_v35  ;;  %vm112_vm0 = vcmp.ge.s32.totalorder %v2548_v35, 0  ;;  %vm113_vm1 = vcmp.lt.s32.totalorder %v2548_v35, 8  ;;  %vm121_vm2 = vcmp.gt.s32.totalorder %v2548_v35, 0 }
  0x38   :  { %vm114_vm3 = vmand %vm112_vm0, %vm113_vm1  ;;  %v122_v44 = vsel %vm121_vm2, %v2548_v35, 0  ;;  %v130_v45 = vadd.s32 1, %v2550_v39  ;;  %vm131_vm4 = vcmp.ge.s32.totalorder %v2550_v39, 0  ;;  %vm132_vm5 = vcmp.lt.s32.totalorder %v2550_v39, 8 }
  0x39   :  { %v116_v46 = vsel %vm114_vm3, %v115_v36, 0.0  ;;  %vm117_vm6 = vcmp.ge.s32.totalorder %v111_v43, 0  ;;  %vm118_vm7 = vcmp.lt.s32.totalorder %v111_v43, 8  ;;  %vm123_vm8 = vcmp.lt.s32.totalorder %v122_v44, 7  ;;  %vm133_vm9 = vmand %vm131_vm4, %vm132_vm5 }
  0x3a   :  { %vm119_vm10 = vmand %vm117_vm6, %vm118_vm7  ;;  %v124_v47 = vsel %vm123_vm8, %v122_v44, 7  ;;  %vm125_vm11 = vcmp.gt.s32.totalorder %v111_v43, 0  ;;  %v135_v48 = vsel %vm133_vm9, %v134_v40, 0.0  ;;  %vm136_vm12 = vcmp.ge.s32.totalorder %v130_v45, 0 }
  0x3b   :  { %v120_v49 = vsel %vm119_vm10, %v89_v27, 0.0  ;;  %v126_v50 = vsel %vm125_vm11, %v111_v43, 0  ;;  %vm137_vm13 = vcmp.lt.s32.totalorder %v130_v45, 8  ;;  %vm140_vm14 = vcmp.gt.s32.totalorder %v2550_v39, 0 }
  0x3c   :  { %vm127_vm15 = vcmp.lt.s32.totalorder %v126_v50, 7  ;;  %vm138_vm0 = vmand %vm136_vm12, %vm137_vm13  ;;  %v141_v51 = vsel %vm140_vm14, %v2550_v39, 0  ;;  %vm144_vm1 = vcmp.gt.s32.totalorder %v130_v45, 0  ;;  %v2718_v52 = vmul.f32 %v135_v48, %v116_v46 }
  0x3d   :  { %v128_v53 = vsel %vm127_vm15, %v126_v50, 7  ;;  %v139_v54 = vsel %vm138_vm0, %v90_v31, 0.0  ;;  %vm142_vm2 = vcmp.lt.s32.totalorder %v141_v51, 7  ;;  %v145_v55 = vsel %vm144_vm1, %v130_v45, 0 }
  0x3e   :  { %v143_v56 = vsel %vm142_vm2, %v141_v51, 7  ;;  %vm146_vm3 = vcmp.lt.s32.totalorder %v145_v55, 7  ;;  %v2722_v57 = vrot.slane %v2718_v52, %v2677_v20  ;;  %v2724_v58 = vmul.f32 %v135_v48, %v120_v49 }
  0x3f   :  { %v147_v59 = vsel %vm146_vm3, %v145_v55, 7  ;;  %v165_v60 = vmul.u32 8, %v143_v56  ;;  %v2726_v61 = vmul.f32 %v139_v54, %v116_v46  ;;  %v2728_v62 = vmul.f32 %v139_v54, %v120_v49 }
  0x40   :  { %v2732_v63 = vrot.slane %v2724_v58, %v2677_v20  ;;  %v956_v0 = vmul.u32 8, %v147_v59  ;;  %v2736_v1 = vrot.slane %v2718_v52, %v2680_v21  ;;  %v2740_v2 = vrot.slane %v2724_v58, %v2680_v21 }
  0x41   :  { %4759 = vst [vmem:[#allocation23_spill] sm:$0xff] %v2728_v62  ;;  %v2742_v3 = vadd.s32 %v165_v60, %v124_v47  ;;  %v2744_v4 = vadd.s32 %v165_v60, %v128_v53  ;;  %v2748_v5 = vrot.slane %v2726_v61, %v2677_v20  ;;  %v2752_v6 = vrot.slane %v2728_v62, %v2677_v20 }
  0x42   :  { %v2754_v7 = vadd.s32 %v956_v0, %v124_v47  ;;  %v2756_v8 = vadd.s32 %v956_v0, %v128_v53  ;;  %v2760_v9 = vrot.slane %v2726_v61, %v2680_v21  ;;  %v2764_v10 = vrot.slane %v2728_v62, %v2680_v21 }
  0x43   :  { %v2768_v11 = vrot.slane %v2742_v3, %v2677_v20  ;;  %v2772_v12 = vrot.slane %v2744_v4, %v2677_v20  ;;  %v2776_v13 = vrot.slane %v2742_v3, %v2680_v21  ;;  %v2780_v15 = vrot.slane %v2744_v4, %v2680_v21 }
  0x44   :  { %v2784_v16 = vrot.slane %v2754_v7, %v2677_v20  ;;  %v2788_v17 = vrot.slane %v2756_v8, %v2677_v20  ;;  %v2792_v19 = vrot.slane %v2754_v7, %v2680_v21  ;;  %v2796_v23 = vrot.slane %v2756_v8, %v2680_v21 }
  0x45   :  { %vm320_vm4 = vcmp.eq.s32.totalorder %v2674_v18, %v2768_v11  ;;  %vm651_vm5 = vcmp.eq.s32.totalorder %v2674_v18, %v2772_v12  ;;  %vm322_vm6 = vcmp.eq.s32.totalorder %v2674_v18, %v2776_v13  ;;  %vm653_vm7 = vcmp.eq.s32.totalorder %v2674_v18, %v2780_v15 }
  0x46   :  { %v490_v27 = vsel %vm320_vm4, %v2722_v57, 0.0  ;;  %v821_v28 = vsel %vm651_vm5, %v2732_v63, 0.0  ;;  %vm1111_vm8 = vcmp.eq.s32.totalorder %v2674_v18, %v2784_v16  ;;  %vm1570_vm9 = vcmp.eq.s32.totalorder %v2674_v18, %v2788_v17 }
  0x47   :  { %v949_v31 = vadd.f32 %v821_v28, %v490_v27  ;;  %v1281_v32 = vsel %vm1111_vm8, %v2748_v5, 0.0  ;;  %v1740_v35 = vsel %vm1570_vm9, %v2752_v6, 0.0  ;;  %v492_v36 = vsel %vm322_vm6, %v2736_v1, 0.0 }
  0x48   :  { %v823_v39 = vsel %vm653_vm7, %v2740_v2, 0.0  ;;  %vm1113_vm10 = vcmp.eq.s32.totalorder %v2674_v18, %v2792_v19  ;;  %vm1572_vm11 = vcmp.eq.s32.totalorder %v2674_v18, %v2796_v23  ;;  %v2822_v40 = vrot.slane %v2742_v3, %v2683_v22 }
  0x49   :  { %v1409_v43 = vadd.f32 %v1281_v32, %v949_v31  ;;  %v951_v44 = vadd.f32 %v823_v39, %v492_v36  ;;  %v1283_v45 = vsel %vm1113_vm10, %v2760_v9, 0.0  ;;  %v1742_v46 = vsel %vm1572_vm11, %v2764_v10, 0.0 }
  0x4a   :  { %vm319_vm12 = vcmp.eq.s32.totalorder %v2674_v18, %v2822_v40  ;;  %v2830_v47 = vrot.slane %v2718_v52, %v2683_v22  ;;  %v2834_v48 = vrot.slane %v2744_v4, %v2683_v22  ;;  %v2838_v49 = vrot.slane %v2724_v58, %v2683_v22 }
  0x4b   :  { %v1868_v50 = vadd.f32 %v1740_v35, %v1409_v43  ;;  %v1411_v51 = vadd.f32 %v1283_v45, %v951_v44  ;;  %v2842_v53 = vrot.slane %v2754_v7, %v2683_v22  ;;  %v2846_v54 = vrot.slane %v2726_v61, %v2683_v22 }
  0x4c   :  { %v489_v55 = vsel %vm319_vm12, %v2830_v47, 0.0  ;;  %vm650_vm13 = vcmp.eq.s32.totalorder %v2674_v18, %v2834_v48  ;;  %v2853_v56 = vrot.slane %v2756_v8, %v2683_v22  ;;  %v2857_v59 = vrot.slane %v2728_v62, %v2683_v22 }
  0x4d   :  { %1876 = vmatprep.subr.mxu0 %v1868_v50  ;;  %v1870_v60 = vadd.f32 %v1742_v46, %v1411_v51  ;;  %v820_v0 = vsel %vm650_vm13, %v2838_v49, 0.0  ;;  %vm1110_vm14 = vcmp.eq.s32.totalorder %v2674_v18, %v2842_v53  ;;  %v2864_v27 = vrot.slane %v2742_v3, %v2686_v24 }
  0x4e   :  { %v948_v28 = vadd.f32 %v820_v0, %v489_v55  ;;  %v1280_v31 = vsel %vm1110_vm14, %v2846_v54, 0.0  ;;  %vm1569_vm15 = vcmp.eq.s32.totalorder %v2674_v18, %v2853_v56  ;;  %v2871_v32 = vrot.slane %v2718_v52, %v2686_v24 }
  0x4f   :  { %1947 = vmatprep.subr.mxu1 %v1870_v60  ;;  %v1739_v35 = vsel %vm1569_vm15, %v2857_v59, 0.0  ;;  %vm321_vm0 = vcmp.eq.s32.totalorder %v2674_v18, %v2864_v27  ;;  %v2878_v36 = vrot.slane %v2744_v4, %v2686_v24  ;;  %v2882_v39 = vrot.slane %v2724_v58, %v2686_v24 }
  0x50   :  { %v1408_v43 = vadd.f32 %v1280_v31, %v948_v28  ;;  %v491_v44 = vsel %vm321_vm0, %v2871_v32, 0.0  ;;  %v2887_v45 = vrot.slane %v2754_v7, %v2686_v24  ;;  %v2891_v46 = vrot.slane %v2726_v61, %v2686_v24 }
  0x51   :  { %vm652_vm1 = vcmp.eq.s32.totalorder %v2674_v18, %v2878_v36  ;;  %v2897_v50 = vrot.slane %v2756_v8, %v2686_v24  ;;  %v2901_v51 = vrot.slane %v2728_v62, %v2686_v24  ;;  %vm312_vm2 = vcmp.eq.s32.totalorder %v2689_v25, %v2768_v11 }
  0x52   :  { %v1867_v55 = vadd.f32 %v1739_v35, %v1408_v43  ;;  %v822_v60 = vsel %vm652_vm1, %v2882_v39, 0.0  ;;  %vm1112_vm3 = vcmp.eq.s32.totalorder %v2674_v18, %v2887_v45  ;;  %v482_v0 = vsel %vm312_vm2, %v2722_v57, 0.0 }
  0x53   :  { %v950_v28 = vadd.f32 %v822_v60, %v491_v44  ;;  %v1282_v31 = vsel %vm1112_vm3, %v2891_v46, 0.0  ;;  %vm1571_vm4 = vcmp.eq.s32.totalorder %v2674_v18, %v2897_v50  ;;  %vm643_vm5 = vcmp.eq.s32.totalorder %v2689_v25, %v2772_v12 }
  0x54   :  { %1877 = vmatpush1.msra.mxu0 %v1867_v55  ;;  %v1741_v21 = vsel %vm1571_vm4, %v2901_v51, 0.0  ;;  %v813_v35 = vsel %vm643_vm5, %v2732_v63, 0.0  ;;  %vm1103_vm6 = vcmp.eq.s32.totalorder %v2689_v25, %v2784_v16  ;;  %vm1562_vm7 = vcmp.eq.s32.totalorder %v2689_v25, %v2788_v17 }
  0x55   :  { %v1410_v43 = vadd.f32 %v1282_v31, %v950_v28  ;;  %v941_v44 = vadd.f32 %v813_v35, %v482_v0  ;;  %v1273_v60 = vsel %vm1103_vm6, %v2748_v5, 0.0  ;;  %v1732_v20 = vsel %vm1562_vm7, %v2752_v6, 0.0 }
  0x56   :  { %vm314_vm8 = vcmp.eq.s32.totalorder %v2689_v25, %v2776_v13  ;;  %vm645_vm9 = vcmp.eq.s32.totalorder %v2689_v25, %v2780_v15  ;;  %vm1105_vm10 = vcmp.eq.s32.totalorder %v2689_v25, %v2792_v19  ;;  %vm1564_vm11 = vcmp.eq.s32.totalorder %v2689_v25, %v2796_v23 }
  0x57   :  { %v1869_v55 = vadd.f32 %v1741_v21, %v1410_v43  ;;  %v1401_v24 = vadd.f32 %v1273_v60, %v941_v44  ;;  %v484_v0 = vsel %vm314_vm8, %v2736_v1, 0.0  ;;  %v815_v28 = vsel %vm645_vm9, %v2740_v2, 0.0 }
  0x58   :  { %v943_v31 = vadd.f32 %v815_v28, %v484_v0  ;;  %v1275_v35 = vsel %vm1105_vm10, %v2760_v9, 0.0  ;;  %v1734_v22 = vsel %vm1564_vm11, %v2764_v10, 0.0  ;;  %vm311_vm12 = vcmp.eq.s32.totalorder %v2689_v25, %v2822_v40 }
  0x59   :  { %1948 = vmatpush1.msra.mxu1 %v1869_v55  ;;  %v1860_v62 = vadd.f32 %v1732_v20, %v1401_v24  ;;  %v481_v18 = vsel %vm311_vm12, %v2830_v47, 0.0  ;;  %vm642_vm13 = vcmp.eq.s32.totalorder %v2689_v25, %v2834_v48  ;;  %vm1102_vm14 = vcmp.eq.s32.totalorder %v2689_v25, %v2842_v53 }
  0x5a   :  { %v1403_v21 = vadd.f32 %v1275_v35, %v943_v31  ;;  %v812_v43 = vsel %vm642_vm13, %v2838_v49, 0.0  ;;  %v1272_v44 = vsel %vm1102_vm14, %v2846_v54, 0.0  ;;  %vm1561_vm15 = vcmp.eq.s32.totalorder %v2689_v25, %v2853_v56 }
  0x5b   :  { %1878 = vmatprep.subr.mxu0 %v1860_v62  ;;  %v940_v60 = vadd.f32 %v812_v43, %v481_v18  ;;  %v1731_v20 = vsel %vm1561_vm15, %v2857_v59, 0.0  ;;  %vm313_vm0 = vcmp.eq.s32.totalorder %v2689_v25, %v2864_v27  ;;  %vm644_vm1 = vcmp.eq.s32.totalorder %v2689_v25, %v2878_v36 }
  0x5c   :  { %v1862_v24 = vadd.f32 %v1734_v22, %v1403_v21  ;;  %v483_v55 = vsel %vm313_vm0, %v2871_v32, 0.0  ;;  %v814_v0 = vsel %vm644_vm1, %v2882_v39, 0.0  ;;  %vm1104_vm2 = vcmp.eq.s32.totalorder %v2689_v25, %v2887_v45 }
  0x5d   :  { %v1400_v28 = vadd.f32 %v1272_v44, %v940_v60  ;;  %v942_v31 = vadd.f32 %v814_v0, %v483_v55  ;;  %v1274_v18 = vsel %vm1104_vm2, %v2891_v46, 0.0  ;;  %vm1563_vm3 = vcmp.eq.s32.totalorder %v2689_v25, %v2897_v50 }
  0x5e   :  { %1949 = vmatprep.subr.mxu1 %v1862_v24  ;;  %v1733_v62 = vsel %vm1563_vm3, %v2901_v51, 0.0  ;;  %vm304_vm4 = vcmp.eq.s32.totalorder %v2692_v26, %v2768_v11  ;;  %vm635_vm5 = vcmp.eq.s32.totalorder %v2692_v26, %v2772_v12  ;;  %vm1095_vm6 = vcmp.eq.s32.totalorder %v2692_v26, %v2784_v16 }
  0x5f   :  { %v1859_v22 = vadd.f32 %v1731_v20, %v1400_v28  ;;  %v1402_v35 = vadd.f32 %v1274_v18, %v942_v31  ;;  %v474_v21 = vsel %vm304_vm4, %v2722_v57, 0.0  ;;  %v805_v43 = vsel %vm635_vm5, %v2732_v63, 0.0 }
  0x60   :  { %v933_v44 = vadd.f32 %v805_v43, %v474_v21  ;;  %v1265_v60 = vsel %vm1095_vm6, %v2748_v5, 0.0  ;;  %vm1554_vm7 = vcmp.eq.s32.totalorder %v2692_v26, %v2788_v17  ;;  %vm306_vm8 = vcmp.eq.s32.totalorder %v2692_v26, %v2776_v13 }
  0x61   :  { %1879 = vmatpush1.msra.mxu0 %v1859_v22  ;;  %v1861_v24 = vadd.f32 %v1733_v62, %v1402_v35  ;;  %v1724_v55 = vsel %vm1554_vm7, %v2752_v6, 0.0  ;;  %v476_v20 = vsel %vm306_vm8, %v2736_v1, 0.0  ;;  %vm637_vm9 = vcmp.eq.s32.totalorder %v2692_v26, %v2780_v15 }
  0x62   :  { %v1393_v0 = vadd.f32 %v1265_v60, %v933_v44  ;;  %v807_v28 = vsel %vm637_vm9, %v2740_v2, 0.0  ;;  %vm1097_vm10 = vcmp.eq.s32.totalorder %v2692_v26, %v2792_v19  ;;  %vm1556_vm11 = vcmp.eq.s32.totalorder %v2692_v26, %v2796_v23 }
  0x63   :  { %1950 = vmatpush1.msra.mxu1 %v1861_v24  ;;  %v935_v31 = vadd.f32 %v807_v28, %v476_v20  ;;  %v1267_v18 = vsel %vm1097_vm10, %v2760_v9, 0.0  ;;  %v1726_v62 = vsel %vm1556_vm11, %v2764_v10, 0.0  ;;  %vm303_vm12 = vcmp.eq.s32.totalorder %v2692_v26, %v2822_v40 }
  0x64   :  { %v1852_v22 = vadd.f32 %v1724_v55, %v1393_v0  ;;  %v473_v35 = vsel %vm303_vm12, %v2830_v47, 0.0  ;;  %vm634_vm13 = vcmp.eq.s32.totalorder %v2692_v26, %v2834_v48  ;;  %vm1094_vm14 = vcmp.eq.s32.totalorder %v2692_v26, %v2842_v53 }
  0x65   :  { %v1395_v21 = vadd.f32 %v1267_v18, %v935_v31  ;;  %v804_v43 = vsel %vm634_vm13, %v2838_v49, 0.0  ;;  %v1264_v44 = vsel %vm1094_vm14, %v2846_v54, 0.0  ;;  %vm1553_vm15 = vcmp.eq.s32.totalorder %v2692_v26, %v2853_v56 }
  0x66   :  { %1880 = vmatprep.subr.mxu0 %v1852_v22  ;;  %v932_v60 = vadd.f32 %v804_v43, %v473_v35  ;;  %v1723_v24 = vsel %vm1553_vm15, %v2857_v59, 0.0  ;;  %vm305_vm0 = vcmp.eq.s32.totalorder %v2692_v26, %v2864_v27  ;;  %vm636_vm1 = vcmp.eq.s32.totalorder %v2692_v26, %v2878_v36 }
  0x67   :  { %v1854_v55 = vadd.f32 %v1726_v62, %v1395_v21  ;;  %v475_v20 = vsel %vm305_vm0, %v2871_v32, 0.0  ;;  %v806_v0 = vsel %vm636_vm1, %v2882_v39, 0.0  ;;  %vm1096_vm2 = vcmp.eq.s32.totalorder %v2692_v26, %v2887_v45 }
  0x68   :  { %v1392_v28 = vadd.f32 %v1264_v44, %v932_v60  ;;  %v934_v31 = vadd.f32 %v806_v0, %v475_v20  ;;  %v1266_v18 = vsel %vm1096_vm2, %v2891_v46, 0.0  ;;  %vm1555_vm3 = vcmp.eq.s32.totalorder %v2692_v26, %v2897_v50 }
  0x69   :  { %1951 = vmatprep.subr.mxu1 %v1854_v55  ;;  %v1725_v22 = vsel %vm1555_vm3, %v2901_v51, 0.0  ;;  %vm296_vm4 = vcmp.eq.s32.totalorder %v2695_v29, %v2768_v11  ;;  %vm627_vm5 = vcmp.eq.s32.totalorder %v2695_v29, %v2772_v12  ;;  %vm1087_vm6 = vcmp.eq.s32.totalorder %v2695_v29, %v2784_v16 }
  0x6a   :  { %v1851_v62 = vadd.f32 %v1723_v24, %v1392_v28  ;;  %v1394_v35 = vadd.f32 %v1266_v18, %v934_v31  ;;  %v466_v21 = vsel %vm296_vm4, %v2722_v57, 0.0  ;;  %v797_v43 = vsel %vm627_vm5, %v2732_v63, 0.0 }
  0x6b   :  { %v925_v44 = vadd.f32 %v797_v43, %v466_v21  ;;  %v1257_v60 = vsel %vm1087_vm6, %v2748_v5, 0.0  ;;  %vm1546_vm7 = vcmp.eq.s32.totalorder %v2695_v29, %v2788_v17  ;;  %vm298_vm8 = vcmp.eq.s32.totalorder %v2695_v29, %v2776_v13 }
  0x6c   :  { %1881 = vmatpush1.msra.mxu0 %v1851_v62  ;;  %v1853_v55 = vadd.f32 %v1725_v22, %v1394_v35  ;;  %v1716_v20 = vsel %vm1546_vm7, %v2752_v6, 0.0  ;;  %v468_v24 = vsel %vm298_vm8, %v2736_v1, 0.0  ;;  %vm629_vm9 = vcmp.eq.s32.totalorder %v2695_v29, %v2780_v15 }
  0x6d   :  { %v1385_v0 = vadd.f32 %v1257_v60, %v925_v44  ;;  %v799_v28 = vsel %vm629_vm9, %v2740_v2, 0.0  ;;  %vm1089_vm10 = vcmp.eq.s32.totalorder %v2695_v29, %v2792_v19  ;;  %vm1548_vm11 = vcmp.eq.s32.totalorder %v2695_v29, %v2796_v23 }
  0x6e   :  { %1952 = vmatpush1.msra.mxu1 %v1853_v55  ;;  %v927_v31 = vadd.f32 %v799_v28, %v468_v24  ;;  %v1259_v18 = vsel %vm1089_vm10, %v2760_v9, 0.0  ;;  %v1718_v22 = vsel %vm1548_vm11, %v2764_v10, 0.0  ;;  %vm295_vm12 = vcmp.eq.s32.totalorder %v2695_v29, %v2822_v40 }
  0x6f   :  { %v1844_v62 = vadd.f32 %v1716_v20, %v1385_v0  ;;  %v465_v35 = vsel %vm295_vm12, %v2830_v47, 0.0  ;;  %vm626_vm13 = vcmp.eq.s32.totalorder %v2695_v29, %v2834_v48  ;;  %vm1086_vm14 = vcmp.eq.s32.totalorder %v2695_v29, %v2842_v53 }
  0x70   :  { %v1387_v21 = vadd.f32 %v1259_v18, %v927_v31  ;;  %v796_v43 = vsel %vm626_vm13, %v2838_v49, 0.0  ;;  %v1256_v44 = vsel %vm1086_vm14, %v2846_v54, 0.0  ;;  %vm1545_vm15 = vcmp.eq.s32.totalorder %v2695_v29, %v2853_v56 }
  0x71   :  { %1882 = vmatprep.subr.mxu0 %v1844_v62  ;;  %v924_v60 = vadd.f32 %v796_v43, %v465_v35  ;;  %v1715_v55 = vsel %vm1545_vm15, %v2857_v59, 0.0  ;;  %vm297_vm0 = vcmp.eq.s32.totalorder %v2695_v29, %v2864_v27  ;;  %vm628_vm1 = vcmp.eq.s32.totalorder %v2695_v29, %v2878_v36 }
  0x72   :  { %v1846_v20 = vadd.f32 %v1718_v22, %v1387_v21  ;;  %v467_v24 = vsel %vm297_vm0, %v2871_v32, 0.0  ;;  %v798_v0 = vsel %vm628_vm1, %v2882_v39, 0.0  ;;  %vm1088_vm2 = vcmp.eq.s32.totalorder %v2695_v29, %v2887_v45 }
  0x73   :  { %v1384_v28 = vadd.f32 %v1256_v44, %v924_v60  ;;  %v926_v31 = vadd.f32 %v798_v0, %v467_v24  ;;  %v1258_v18 = vsel %vm1088_vm2, %v2891_v46, 0.0  ;;  %vm1547_vm3 = vcmp.eq.s32.totalorder %v2695_v29, %v2897_v50 }
  0x74   :  { %1953 = vmatprep.subr.mxu1 %v1846_v20  ;;  %v1717_v62 = vsel %vm1547_vm3, %v2901_v51, 0.0  ;;  %vm288_vm4 = vcmp.eq.s32.totalorder %v2698_v30, %v2768_v11  ;;  %vm619_vm5 = vcmp.eq.s32.totalorder %v2698_v30, %v2772_v12  ;;  %vm1079_vm6 = vcmp.eq.s32.totalorder %v2698_v30, %v2784_v16 }
  0x75   :  { %v1843_v22 = vadd.f32 %v1715_v55, %v1384_v28  ;;  %v1386_v35 = vadd.f32 %v1258_v18, %v926_v31  ;;  %v458_v21 = vsel %vm288_vm4, %v2722_v57, 0.0  ;;  %v789_v43 = vsel %vm619_vm5, %v2732_v63, 0.0 }
  0x76   :  { %v917_v44 = vadd.f32 %v789_v43, %v458_v21  ;;  %v1249_v60 = vsel %vm1079_vm6, %v2748_v5, 0.0  ;;  %vm1538_vm7 = vcmp.eq.s32.totalorder %v2698_v30, %v2788_v17  ;;  %vm290_vm8 = vcmp.eq.s32.totalorder %v2698_v30, %v2776_v13 }
  0x77   :  { %1883 = vmatpush1.msra.mxu0 %v1843_v22  ;;  %v1845_v20 = vadd.f32 %v1717_v62, %v1386_v35  ;;  %v1708_v24 = vsel %vm1538_vm7, %v2752_v6, 0.0  ;;  %v460_v55 = vsel %vm290_vm8, %v2736_v1, 0.0  ;;  %vm621_vm9 = vcmp.eq.s32.totalorder %v2698_v30, %v2780_v15 }
  0x78   :  { %v1377_v0 = vadd.f32 %v1249_v60, %v917_v44  ;;  %v791_v28 = vsel %vm621_vm9, %v2740_v2, 0.0  ;;  %vm1081_vm10 = vcmp.eq.s32.totalorder %v2698_v30, %v2792_v19  ;;  %vm1540_vm11 = vcmp.eq.s32.totalorder %v2698_v30, %v2796_v23 }
  0x79   :  { %1954 = vmatpush1.msra.mxu1 %v1845_v20  ;;  %v919_v31 = vadd.f32 %v791_v28, %v460_v55  ;;  %v1251_v18 = vsel %vm1081_vm10, %v2760_v9, 0.0  ;;  %v1710_v62 = vsel %vm1540_vm11, %v2764_v10, 0.0  ;;  %vm287_vm12 = vcmp.eq.s32.totalorder %v2698_v30, %v2822_v40 }
  0x7a   :  { %v1836_v22 = vadd.f32 %v1708_v24, %v1377_v0  ;;  %v457_v35 = vsel %vm287_vm12, %v2830_v47, 0.0  ;;  %vm618_vm13 = vcmp.eq.s32.totalorder %v2698_v30, %v2834_v48  ;;  %vm1078_vm14 = vcmp.eq.s32.totalorder %v2698_v30, %v2842_v53 }
  0x7b   :  { %v1379_v21 = vadd.f32 %v1251_v18, %v919_v31  ;;  %v788_v43 = vsel %vm618_vm13, %v2838_v49, 0.0  ;;  %v1248_v44 = vsel %vm1078_vm14, %v2846_v54, 0.0  ;;  %vm1537_vm15 = vcmp.eq.s32.totalorder %v2698_v30, %v2853_v56 }
  0x7c   :  { %1884 = vmatprep.subr.mxu0 %v1836_v22  ;;  %v916_v60 = vadd.f32 %v788_v43, %v457_v35  ;;  %v1707_v20 = vsel %vm1537_vm15, %v2857_v59, 0.0  ;;  %vm289_vm0 = vcmp.eq.s32.totalorder %v2698_v30, %v2864_v27  ;;  %vm620_vm1 = vcmp.eq.s32.totalorder %v2698_v30, %v2878_v36 }
  0x7d   :  { %v1838_v24 = vadd.f32 %v1710_v62, %v1379_v21  ;;  %v459_v55 = vsel %vm289_vm0, %v2871_v32, 0.0  ;;  %v790_v0 = vsel %vm620_vm1, %v2882_v39, 0.0  ;;  %vm1080_vm2 = vcmp.eq.s32.totalorder %v2698_v30, %v2887_v45 }
  0x7e   :  { %v1376_v28 = vadd.f32 %v1248_v44, %v916_v60  ;;  %v918_v31 = vadd.f32 %v790_v0, %v459_v55  ;;  %v1250_v18 = vsel %vm1080_vm2, %v2891_v46, 0.0  ;;  %vm1539_vm3 = vcmp.eq.s32.totalorder %v2698_v30, %v2897_v50 }
  0x7f   :  { %1955 = vmatprep.subr.mxu1 %v1838_v24  ;;  %v1709_v22 = vsel %vm1539_vm3, %v2901_v51, 0.0  ;;  %vm280_vm4 = vcmp.eq.s32.totalorder %v2701_v33, %v2768_v11  ;;  %vm611_vm5 = vcmp.eq.s32.totalorder %v2701_v33, %v2772_v12  ;;  %vm1071_vm6 = vcmp.eq.s32.totalorder %v2701_v33, %v2784_v16 }
  0x80   :  { %v1835_v62 = vadd.f32 %v1707_v20, %v1376_v28  ;;  %v1378_v35 = vadd.f32 %v1250_v18, %v918_v31  ;;  %v450_v21 = vsel %vm280_vm4, %v2722_v57, 0.0  ;;  %v781_v43 = vsel %vm611_vm5, %v2732_v63, 0.0 }
  0x81   :  { %v909_v44 = vadd.f32 %v781_v43, %v450_v21  ;;  %v1241_v60 = vsel %vm1071_vm6, %v2748_v5, 0.0  ;;  %vm1530_vm7 = vcmp.eq.s32.totalorder %v2701_v33, %v2788_v17  ;;  %vm282_vm8 = vcmp.eq.s32.totalorder %v2701_v33, %v2776_v13 }
  0x82   :  { %1885 = vmatpush1.msra.mxu0 %v1835_v62  ;;  %v1837_v24 = vadd.f32 %v1709_v22, %v1378_v35  ;;  %v1700_v55 = vsel %vm1530_vm7, %v2752_v6, 0.0  ;;  %v452_v20 = vsel %vm282_vm8, %v2736_v1, 0.0  ;;  %vm613_vm9 = vcmp.eq.s32.totalorder %v2701_v33, %v2780_v15 }
  0x83   :  { %v1369_v0 = vadd.f32 %v1241_v60, %v909_v44  ;;  %v783_v28 = vsel %vm613_vm9, %v2740_v2, 0.0  ;;  %vm1073_vm10 = vcmp.eq.s32.totalorder %v2701_v33, %v2792_v19  ;;  %vm1532_vm11 = vcmp.eq.s32.totalorder %v2701_v33, %v2796_v23 }
  0x84   :  { %1956 = vmatpush1.msra.mxu1 %v1837_v24  ;;  %v911_v31 = vadd.f32 %v783_v28, %v452_v20  ;;  %v1243_v18 = vsel %vm1073_vm10, %v2760_v9, 0.0  ;;  %v1702_v22 = vsel %vm1532_vm11, %v2764_v10, 0.0  ;;  %vm279_vm12 = vcmp.eq.s32.totalorder %v2701_v33, %v2822_v40 }
  0x85   :  { %v1828_v62 = vadd.f32 %v1700_v55, %v1369_v0  ;;  %v449_v35 = vsel %vm279_vm12, %v2830_v47, 0.0  ;;  %vm610_vm13 = vcmp.eq.s32.totalorder %v2701_v33, %v2834_v48  ;;  %vm1070_vm14 = vcmp.eq.s32.totalorder %v2701_v33, %v2842_v53 }
  0x86   :  { %v1371_v21 = vadd.f32 %v1243_v18, %v911_v31  ;;  %v780_v43 = vsel %vm610_vm13, %v2838_v49, 0.0  ;;  %v1240_v44 = vsel %vm1070_vm14, %v2846_v54, 0.0  ;;  %vm1529_vm15 = vcmp.eq.s32.totalorder %v2701_v33, %v2853_v56 }
  0x87   :  { %1886 = vmatprep.subr.mxu0 %v1828_v62  ;;  %v908_v60 = vadd.f32 %v780_v43, %v449_v35  ;;  %v1699_v24 = vsel %vm1529_vm15, %v2857_v59, 0.0  ;;  %vm281_vm0 = vcmp.eq.s32.totalorder %v2701_v33, %v2864_v27  ;;  %vm612_vm1 = vcmp.eq.s32.totalorder %v2701_v33, %v2878_v36 }
  0x88   :  { %v1830_v55 = vadd.f32 %v1702_v22, %v1371_v21  ;;  %v451_v20 = vsel %vm281_vm0, %v2871_v32, 0.0  ;;  %v782_v0 = vsel %vm612_vm1, %v2882_v39, 0.0  ;;  %vm1072_vm2 = vcmp.eq.s32.totalorder %v2701_v33, %v2887_v45 }
  0x89   :  { %v1368_v28 = vadd.f32 %v1240_v44, %v908_v60  ;;  %v910_v31 = vadd.f32 %v782_v0, %v451_v20  ;;  %v1242_v18 = vsel %vm1072_vm2, %v2891_v46, 0.0  ;;  %vm1531_vm3 = vcmp.eq.s32.totalorder %v2701_v33, %v2897_v50 }
  0x8a   :  { %1957 = vmatprep.subr.mxu1 %v1830_v55  ;;  %v1701_v62 = vsel %vm1531_vm3, %v2901_v51, 0.0  ;;  %vm272_vm4 = vcmp.eq.s32.totalorder %v2704_v34, %v2768_v11  ;;  %vm603_vm5 = vcmp.eq.s32.totalorder %v2704_v34, %v2772_v12  ;;  %vm1063_vm6 = vcmp.eq.s32.totalorder %v2704_v34, %v2784_v16 }
  0x8b   :  { %v1827_v22 = vadd.f32 %v1699_v24, %v1368_v28  ;;  %v1370_v35 = vadd.f32 %v1242_v18, %v910_v31  ;;  %v442_v21 = vsel %vm272_vm4, %v2722_v57, 0.0  ;;  %v773_v43 = vsel %vm603_vm5, %v2732_v63, 0.0 }
  0x8c   :  { %v901_v44 = vadd.f32 %v773_v43, %v442_v21  ;;  %v1233_v60 = vsel %vm1063_vm6, %v2748_v5, 0.0  ;;  %vm1522_vm7 = vcmp.eq.s32.totalorder %v2704_v34, %v2788_v17  ;;  %vm274_vm8 = vcmp.eq.s32.totalorder %v2704_v34, %v2776_v13 }
  0x8d   :  { %1887 = vmatpush1.msra.mxu0 %v1827_v22  ;;  %v1829_v55 = vadd.f32 %v1701_v62, %v1370_v35  ;;  %v1692_v20 = vsel %vm1522_vm7, %v2752_v6, 0.0  ;;  %v444_v24 = vsel %vm274_vm8, %v2736_v1, 0.0  ;;  %vm605_vm9 = vcmp.eq.s32.totalorder %v2704_v34, %v2780_v15 }
  0x8e   :  { %v1361_v0 = vadd.f32 %v1233_v60, %v901_v44  ;;  %v775_v28 = vsel %vm605_vm9, %v2740_v2, 0.0  ;;  %vm1065_vm10 = vcmp.eq.s32.totalorder %v2704_v34, %v2792_v19  ;;  %vm1524_vm11 = vcmp.eq.s32.totalorder %v2704_v34, %v2796_v23 }
  0x8f   :  { %1958 = vmatpush1.msra.mxu1 %v1829_v55  ;;  %v903_v31 = vadd.f32 %v775_v28, %v444_v24  ;;  %v1235_v18 = vsel %vm1065_vm10, %v2760_v9, 0.0  ;;  %v1694_v62 = vsel %vm1524_vm11, %v2764_v10, 0.0  ;;  %vm271_vm12 = vcmp.eq.s32.totalorder %v2704_v34, %v2822_v40 }
  0x90   :  { %v1820_v22 = vadd.f32 %v1692_v20, %v1361_v0  ;;  %v441_v35 = vsel %vm271_vm12, %v2830_v47, 0.0  ;;  %vm602_vm13 = vcmp.eq.s32.totalorder %v2704_v34, %v2834_v48  ;;  %vm1062_vm14 = vcmp.eq.s32.totalorder %v2704_v34, %v2842_v53 }
  0x91   :  { %v1363_v21 = vadd.f32 %v1235_v18, %v903_v31  ;;  %v772_v43 = vsel %vm602_vm13, %v2838_v49, 0.0  ;;  %v1232_v44 = vsel %vm1062_vm14, %v2846_v54, 0.0  ;;  %vm1521_vm15 = vcmp.eq.s32.totalorder %v2704_v34, %v2853_v56 }
  0x92   :  { %1888 = vmatprep.subr.mxu0 %v1820_v22  ;;  %v900_v60 = vadd.f32 %v772_v43, %v441_v35  ;;  %v1691_v55 = vsel %vm1521_vm15, %v2857_v59, 0.0  ;;  %vm273_vm0 = vcmp.eq.s32.totalorder %v2704_v34, %v2864_v27  ;;  %vm604_vm1 = vcmp.eq.s32.totalorder %v2704_v34, %v2878_v36 }
  0x93   :  { %v1822_v20 = vadd.f32 %v1694_v62, %v1363_v21  ;;  %v443_v24 = vsel %vm273_vm0, %v2871_v32, 0.0  ;;  %v774_v0 = vsel %vm604_vm1, %v2882_v39, 0.0  ;;  %vm1064_vm2 = vcmp.eq.s32.totalorder %v2704_v34, %v2887_v45 }
  0x94   :  { %v1360_v28 = vadd.f32 %v1232_v44, %v900_v60  ;;  %v902_v31 = vadd.f32 %v774_v0, %v443_v24  ;;  %v1234_v18 = vsel %vm1064_vm2, %v2891_v46, 0.0  ;;  %vm1523_vm3 = vcmp.eq.s32.totalorder %v2704_v34, %v2897_v50 }
  0x95   :  { %1959 = vmatprep.subr.mxu1 %v1822_v20  ;;  %v1693_v22 = vsel %vm1523_vm3, %v2901_v51, 0.0  ;;  %vm264_vm4 = vcmp.eq.s32.totalorder %v2707_v37, %v2768_v11  ;;  %vm595_vm5 = vcmp.eq.s32.totalorder %v2707_v37, %v2772_v12  ;;  %vm1055_vm6 = vcmp.eq.s32.totalorder %v2707_v37, %v2784_v16 }
  0x96   :  { %v1819_v62 = vadd.f32 %v1691_v55, %v1360_v28  ;;  %v1362_v35 = vadd.f32 %v1234_v18, %v902_v31  ;;  %v434_v21 = vsel %vm264_vm4, %v2722_v57, 0.0  ;;  %v765_v43 = vsel %vm595_vm5, %v2732_v63, 0.0 }
  0x97   :  { %v893_v44 = vadd.f32 %v765_v43, %v434_v21  ;;  %v1225_v60 = vsel %vm1055_vm6, %v2748_v5, 0.0  ;;  %vm1514_vm7 = vcmp.eq.s32.totalorder %v2707_v37, %v2788_v17  ;;  %vm266_vm8 = vcmp.eq.s32.totalorder %v2707_v37, %v2776_v13 }
  0x98   :  { %1889 = vmatpush1.msra.mxu0 %v1819_v62  ;;  %v1821_v20 = vadd.f32 %v1693_v22, %v1362_v35  ;;  %v1684_v24 = vsel %vm1514_vm7, %v2752_v6, 0.0  ;;  %v436_v55 = vsel %vm266_vm8, %v2736_v1, 0.0  ;;  %vm597_vm9 = vcmp.eq.s32.totalorder %v2707_v37, %v2780_v15 }
  0x99   :  { %v1353_v0 = vadd.f32 %v1225_v60, %v893_v44  ;;  %v767_v28 = vsel %vm597_vm9, %v2740_v2, 0.0  ;;  %vm1057_vm10 = vcmp.eq.s32.totalorder %v2707_v37, %v2792_v19  ;;  %vm1516_vm11 = vcmp.eq.s32.totalorder %v2707_v37, %v2796_v23 }
  0x9a   :  { %1960 = vmatpush1.msra.mxu1 %v1821_v20  ;;  %v895_v31 = vadd.f32 %v767_v28, %v436_v55  ;;  %v1227_v18 = vsel %vm1057_vm10, %v2760_v9, 0.0  ;;  %v1686_v22 = vsel %vm1516_vm11, %v2764_v10, 0.0  ;;  %vm263_vm12 = vcmp.eq.s32.totalorder %v2707_v37, %v2822_v40 }
  0x9b   :  { %v1812_v62 = vadd.f32 %v1684_v24, %v1353_v0  ;;  %v433_v35 = vsel %vm263_vm12, %v2830_v47, 0.0  ;;  %vm594_vm13 = vcmp.eq.s32.totalorder %v2707_v37, %v2834_v48  ;;  %vm1054_vm14 = vcmp.eq.s32.totalorder %v2707_v37, %v2842_v53 }
  0x9c   :  { %v1355_v21 = vadd.f32 %v1227_v18, %v895_v31  ;;  %v764_v43 = vsel %vm594_vm13, %v2838_v49, 0.0  ;;  %v1224_v44 = vsel %vm1054_vm14, %v2846_v54, 0.0  ;;  %vm1513_vm15 = vcmp.eq.s32.totalorder %v2707_v37, %v2853_v56 }
  0x9d   :  { %1890 = vmatprep.subr.mxu0 %v1812_v62  ;;  %v892_v60 = vadd.f32 %v764_v43, %v433_v35  ;;  %v1683_v20 = vsel %vm1513_vm15, %v2857_v59, 0.0  ;;  %vm265_vm0 = vcmp.eq.s32.totalorder %v2707_v37, %v2864_v27  ;;  %vm596_vm1 = vcmp.eq.s32.totalorder %v2707_v37, %v2878_v36 }
  0x9e   :  { %v1814_v24 = vadd.f32 %v1686_v22, %v1355_v21  ;;  %v435_v55 = vsel %vm265_vm0, %v2871_v32, 0.0  ;;  %v766_v0 = vsel %vm596_vm1, %v2882_v39, 0.0  ;;  %vm1056_vm2 = vcmp.eq.s32.totalorder %v2707_v37, %v2887_v45 }
  0x9f   :  { %v1352_v28 = vadd.f32 %v1224_v44, %v892_v60  ;;  %v894_v31 = vadd.f32 %v766_v0, %v435_v55  ;;  %v1226_v18 = vsel %vm1056_vm2, %v2891_v46, 0.0  ;;  %vm1515_vm3 = vcmp.eq.s32.totalorder %v2707_v37, %v2897_v50 }
  0xa0   :  { %1961 = vmatprep.subr.mxu1 %v1814_v24  ;;  %v1685_v62 = vsel %vm1515_vm3, %v2901_v51, 0.0  ;;  %vm256_vm4 = vcmp.eq.s32.totalorder %v2710_v38, %v2768_v11  ;;  %vm587_vm5 = vcmp.eq.s32.totalorder %v2710_v38, %v2772_v12  ;;  %vm1047_vm6 = vcmp.eq.s32.totalorder %v2710_v38, %v2784_v16 }
  0xa1   :  { %v1811_v22 = vadd.f32 %v1683_v20, %v1352_v28  ;;  %v1354_v35 = vadd.f32 %v1226_v18, %v894_v31  ;;  %v426_v21 = vsel %vm256_vm4, %v2722_v57, 0.0  ;;  %v757_v43 = vsel %vm587_vm5, %v2732_v63, 0.0 }
  0xa2   :  { %v885_v44 = vadd.f32 %v757_v43, %v426_v21  ;;  %v1217_v60 = vsel %vm1047_vm6, %v2748_v5, 0.0  ;;  %vm1506_vm7 = vcmp.eq.s32.totalorder %v2710_v38, %v2788_v17  ;;  %vm258_vm8 = vcmp.eq.s32.totalorder %v2710_v38, %v2776_v13 }
  0xa3   :  { %1891 = vmatpush1.msra.mxu0 %v1811_v22  ;;  %v1813_v24 = vadd.f32 %v1685_v62, %v1354_v35  ;;  %v1676_v55 = vsel %vm1506_vm7, %v2752_v6, 0.0  ;;  %v428_v20 = vsel %vm258_vm8, %v2736_v1, 0.0  ;;  %vm589_vm9 = vcmp.eq.s32.totalorder %v2710_v38, %v2780_v15 }
  0xa4   :  { %v1345_v0 = vadd.f32 %v1217_v60, %v885_v44  ;;  %v759_v28 = vsel %vm589_vm9, %v2740_v2, 0.0  ;;  %vm1049_vm10 = vcmp.eq.s32.totalorder %v2710_v38, %v2792_v19  ;;  %vm1508_vm11 = vcmp.eq.s32.totalorder %v2710_v38, %v2796_v23 }
  0xa5   :  { %1962 = vmatpush1.msra.mxu1 %v1813_v24  ;;  %v887_v31 = vadd.f32 %v759_v28, %v428_v20  ;;  %v1219_v18 = vsel %vm1049_vm10, %v2760_v9, 0.0  ;;  %v1678_v62 = vsel %vm1508_vm11, %v2764_v10, 0.0  ;;  %vm255_vm12 = vcmp.eq.s32.totalorder %v2710_v38, %v2822_v40 }
  0xa6   :  { %v1804_v22 = vadd.f32 %v1676_v55, %v1345_v0  ;;  %v425_v35 = vsel %vm255_vm12, %v2830_v47, 0.0  ;;  %vm586_vm13 = vcmp.eq.s32.totalorder %v2710_v38, %v2834_v48  ;;  %vm1046_vm14 = vcmp.eq.s32.totalorder %v2710_v38, %v2842_v53 }
  0xa7   :  { %v1347_v21 = vadd.f32 %v1219_v18, %v887_v31  ;;  %v756_v43 = vsel %vm586_vm13, %v2838_v49, 0.0  ;;  %v1216_v44 = vsel %vm1046_vm14, %v2846_v54, 0.0  ;;  %vm1505_vm15 = vcmp.eq.s32.totalorder %v2710_v38, %v2853_v56 }
  0xa8   :  { %1892 = vmatprep.subr.mxu0 %v1804_v22  ;;  %v884_v60 = vadd.f32 %v756_v43, %v425_v35  ;;  %v1675_v24 = vsel %vm1505_vm15, %v2857_v59, 0.0  ;;  %vm257_vm0 = vcmp.eq.s32.totalorder %v2710_v38, %v2864_v27  ;;  %vm588_vm1 = vcmp.eq.s32.totalorder %v2710_v38, %v2878_v36 }
  0xa9   :  { %v1806_v55 = vadd.f32 %v1678_v62, %v1347_v21  ;;  %v427_v20 = vsel %vm257_vm0, %v2871_v32, 0.0  ;;  %v758_v0 = vsel %vm588_vm1, %v2882_v39, 0.0  ;;  %vm1048_vm2 = vcmp.eq.s32.totalorder %v2710_v38, %v2887_v45 }
  0xaa   :  { %v1344_v28 = vadd.f32 %v1216_v44, %v884_v60  ;;  %v886_v31 = vadd.f32 %v758_v0, %v427_v20  ;;  %v1218_v18 = vsel %vm1048_vm2, %v2891_v46, 0.0  ;;  %vm1507_vm3 = vcmp.eq.s32.totalorder %v2710_v38, %v2897_v50 }
  0xab   :  { %1963 = vmatprep.subr.mxu1 %v1806_v55  ;;  %v1677_v22 = vsel %vm1507_vm3, %v2901_v51, 0.0  ;;  %vm248_vm4 = vcmp.eq.s32.totalorder %v2713_v41, %v2768_v11  ;;  %vm579_vm5 = vcmp.eq.s32.totalorder %v2713_v41, %v2772_v12  ;;  %vm1039_vm6 = vcmp.eq.s32.totalorder %v2713_v41, %v2784_v16 }
  0xac   :  { %v1803_v62 = vadd.f32 %v1675_v24, %v1344_v28  ;;  %v1346_v35 = vadd.f32 %v1218_v18, %v886_v31  ;;  %v418_v21 = vsel %vm248_vm4, %v2722_v57, 0.0  ;;  %v749_v43 = vsel %vm579_vm5, %v2732_v63, 0.0 }
  0xad   :  { %v877_v44 = vadd.f32 %v749_v43, %v418_v21  ;;  %v1209_v60 = vsel %vm1039_vm6, %v2748_v5, 0.0  ;;  %vm1498_vm7 = vcmp.eq.s32.totalorder %v2713_v41, %v2788_v17  ;;  %vm250_vm8 = vcmp.eq.s32.totalorder %v2713_v41, %v2776_v13 }
  0xae   :  { %1893 = vmatpush1.msra.mxu0 %v1803_v62  ;;  %v1805_v55 = vadd.f32 %v1677_v22, %v1346_v35  ;;  %v1668_v20 = vsel %vm1498_vm7, %v2752_v6, 0.0  ;;  %v420_v24 = vsel %vm250_vm8, %v2736_v1, 0.0  ;;  %vm581_vm9 = vcmp.eq.s32.totalorder %v2713_v41, %v2780_v15 }
  0xaf   :  { %v1337_v0 = vadd.f32 %v1209_v60, %v877_v44  ;;  %v751_v28 = vsel %vm581_vm9, %v2740_v2, 0.0  ;;  %vm1041_vm10 = vcmp.eq.s32.totalorder %v2713_v41, %v2792_v19  ;;  %vm1500_vm11 = vcmp.eq.s32.totalorder %v2713_v41, %v2796_v23 }
  0xb0   :  { %1964 = vmatpush1.msra.mxu1 %v1805_v55  ;;  %v879_v31 = vadd.f32 %v751_v28, %v420_v24  ;;  %v1211_v18 = vsel %vm1041_vm10, %v2760_v9, 0.0  ;;  %v1670_v22 = vsel %vm1500_vm11, %v2764_v10, 0.0  ;;  %vm247_vm12 = vcmp.eq.s32.totalorder %v2713_v41, %v2822_v40 }
  0xb1   :  { %v1796_v62 = vadd.f32 %v1668_v20, %v1337_v0  ;;  %v417_v35 = vsel %vm247_vm12, %v2830_v47, 0.0  ;;  %vm578_vm13 = vcmp.eq.s32.totalorder %v2713_v41, %v2834_v48  ;;  %vm1038_vm14 = vcmp.eq.s32.totalorder %v2713_v41, %v2842_v53 }
  0xb2   :  { %v1339_v21 = vadd.f32 %v1211_v18, %v879_v31  ;;  %v748_v43 = vsel %vm578_vm13, %v2838_v49, 0.0  ;;  %v1208_v44 = vsel %vm1038_vm14, %v2846_v54, 0.0  ;;  %vm1497_vm15 = vcmp.eq.s32.totalorder %v2713_v41, %v2853_v56 }
  0xb3   :  { %1894 = vmatprep.subr.mxu0 %v1796_v62  ;;  %v876_v60 = vadd.f32 %v748_v43, %v417_v35  ;;  %v1667_v55 = vsel %vm1497_vm15, %v2857_v59, 0.0  ;;  %vm249_vm0 = vcmp.eq.s32.totalorder %v2713_v41, %v2864_v27  ;;  %vm580_vm1 = vcmp.eq.s32.totalorder %v2713_v41, %v2878_v36 }
  0xb4   :  { %v1798_v20 = vadd.f32 %v1670_v22, %v1339_v21  ;;  %v419_v24 = vsel %vm249_vm0, %v2871_v32, 0.0  ;;  %v750_v0 = vsel %vm580_vm1, %v2882_v39, 0.0  ;;  %vm1040_vm2 = vcmp.eq.s32.totalorder %v2713_v41, %v2887_v45 }
  0xb5   :  { %v1336_v28 = vadd.f32 %v1208_v44, %v876_v60  ;;  %v878_v31 = vadd.f32 %v750_v0, %v419_v24  ;;  %v1210_v18 = vsel %vm1040_vm2, %v2891_v46, 0.0  ;;  %vm1499_vm3 = vcmp.eq.s32.totalorder %v2713_v41, %v2897_v50 }
  0xb6   :  { %1965 = vmatprep.subr.mxu1 %v1798_v20  ;;  %v1669_v62 = vsel %vm1499_vm3, %v2901_v51, 0.0  ;;  %vm240_vm4 = vcmp.eq.s32.totalorder %v2716_v42, %v2768_v11  ;;  %vm571_vm5 = vcmp.eq.s32.totalorder %v2716_v42, %v2772_v12  ;;  %vm1031_vm6 = vcmp.eq.s32.totalorder %v2716_v42, %v2784_v16 }
  0xb7   :  { %v1795_v22 = vadd.f32 %v1667_v55, %v1336_v28  ;;  %v1338_v35 = vadd.f32 %v1210_v18, %v878_v31  ;;  %v410_v21 = vsel %vm240_vm4, %v2722_v57, 0.0  ;;  %v741_v43 = vsel %vm571_vm5, %v2732_v63, 0.0 }
  0xb8   :  { %v869_v44 = vadd.f32 %v741_v43, %v410_v21  ;;  %v1201_v60 = vsel %vm1031_vm6, %v2748_v5, 0.0  ;;  %vm1490_vm7 = vcmp.eq.s32.totalorder %v2716_v42, %v2788_v17  ;;  %vm242_vm8 = vcmp.eq.s32.totalorder %v2716_v42, %v2776_v13 }
  0xb9   :  { %1895 = vmatpush1.msra.mxu0 %v1795_v22  ;;  %v1797_v20 = vadd.f32 %v1669_v62, %v1338_v35  ;;  %v1660_v24 = vsel %vm1490_vm7, %v2752_v6, 0.0  ;;  %v412_v55 = vsel %vm242_vm8, %v2736_v1, 0.0  ;;  %vm573_vm9 = vcmp.eq.s32.totalorder %v2716_v42, %v2780_v15 }
  0xba   :  { %v1329_v0 = vadd.f32 %v1201_v60, %v869_v44  ;;  %v743_v28 = vsel %vm573_vm9, %v2740_v2, 0.0  ;;  %vm1033_vm10 = vcmp.eq.s32.totalorder %v2716_v42, %v2792_v19  ;;  %vm1492_vm11 = vcmp.eq.s32.totalorder %v2716_v42, %v2796_v23 }
  0xbb   :  { %1966 = vmatpush1.msra.mxu1 %v1797_v20  ;;  %v871_v31 = vadd.f32 %v743_v28, %v412_v55  ;;  %v1203_v18 = vsel %vm1033_vm10, %v2760_v9, 0.0  ;;  %v1662_v62 = vsel %vm1492_vm11, %v2764_v10, 0.0  ;;  %vm239_vm12 = vcmp.eq.s32.totalorder %v2716_v42, %v2822_v40 }
  0xbc   :  { %v1788_v22 = vadd.f32 %v1660_v24, %v1329_v0  ;;  %v409_v35 = vsel %vm239_vm12, %v2830_v47, 0.0  ;;  %vm570_vm13 = vcmp.eq.s32.totalorder %v2716_v42, %v2834_v48  ;;  %vm1030_vm14 = vcmp.eq.s32.totalorder %v2716_v42, %v2842_v53 }
  0xbd   :  { %v1331_v21 = vadd.f32 %v1203_v18, %v871_v31  ;;  %v740_v43 = vsel %vm570_vm13, %v2838_v49, 0.0  ;;  %v1200_v44 = vsel %vm1030_vm14, %v2846_v54, 0.0  ;;  %vm1489_vm15 = vcmp.eq.s32.totalorder %v2716_v42, %v2853_v56 }
  0xbe   :  { %1896 = vmatprep.subr.mxu0 %v1788_v22  ;;  %v868_v60 = vadd.f32 %v740_v43, %v409_v35  ;;  %v1659_v20 = vsel %vm1489_vm15, %v2857_v59, 0.0  ;;  %vm241_vm0 = vcmp.eq.s32.totalorder %v2716_v42, %v2864_v27  ;;  %vm572_vm1 = vcmp.eq.s32.totalorder %v2716_v42, %v2878_v36 }
  0xbf   :  { %v1790_v24 = vadd.f32 %v1662_v62, %v1331_v21  ;;  %v411_v55 = vsel %vm241_vm0, %v2871_v32, 0.0  ;;  %v742_v0 = vsel %vm572_vm1, %v2882_v39, 0.0  ;;  %vm1032_vm2 = vcmp.eq.s32.totalorder %v2716_v42, %v2887_v45 }
  0xc0   :  { %v1328_v28 = vadd.f32 %v1200_v44, %v868_v60  ;;  %v870_v31 = vadd.f32 %v742_v0, %v411_v55  ;;  %v1202_v18 = vsel %vm1032_vm2, %v2891_v46, 0.0  ;;  %vm1491_vm3 = vcmp.eq.s32.totalorder %v2716_v42, %v2897_v50 }
  0xc1   :  { %1967 = vmatprep.subr.mxu1 %v1790_v24  ;;  %v1661_v22 = vsel %vm1491_vm3, %v2901_v51, 0.0  ;;  %v3391_v35 = vadd.s32 32, %v2671_v14  ;;  %v3394_v62 = vadd.s32 24, %v2671_v14  ;;  %v3397_v41 = vadd.s32 16, %v2671_v14 }
  0xc2   :  { %v1787_v21 = vadd.f32 %v1659_v20, %v1328_v28  ;;  %v1330_v43 = vadd.f32 %v1202_v18, %v870_v31  ;;  %v3400_v44 = vadd.s32 8, %v2671_v14 }
  0xc3   :  { %vm232_vm4 = vcmp.eq.s32.totalorder %v3391_v35, %v2768_v11  ;;  %vm563_vm5 = vcmp.eq.s32.totalorder %v3391_v35, %v2772_v12  ;;  %vm1023_vm6 = vcmp.eq.s32.totalorder %v3391_v35, %v2784_v16  ;;  %vm1482_vm7 = vcmp.eq.s32.totalorder %v3391_v35, %v2788_v17 }
  0xc4   :  { %1897 = vmatpush1.msra.mxu0 %v1787_v21  ;;  %v1789_v60 = vadd.f32 %v1661_v22, %v1330_v43  ;;  %v402_v20 = vsel %vm232_vm4, %v2722_v57, 0.0  ;;  %v733_v24 = vsel %vm563_vm5, %v2732_v63, 0.0  ;;  %v1193_v55 = vsel %vm1023_vm6, %v2748_v5, 0.0 }
  0xc5   :  { %v861_v0 = vadd.f32 %v733_v24, %v402_v20  ;;  %v1652_v28 = vsel %vm1482_vm7, %v2752_v6, 0.0  ;;  %vm234_vm8 = vcmp.eq.s32.totalorder %v3391_v35, %v2776_v13  ;;  %vm565_vm9 = vcmp.eq.s32.totalorder %v3391_v35, %v2780_v15 }
  0xc6   :  { %1968 = vmatpush1.msra.mxu1 %v1789_v60  ;;  %v404_v31 = vsel %vm234_vm8, %v2736_v1, 0.0  ;;  %v735_v18 = vsel %vm565_vm9, %v2740_v2, 0.0  ;;  %vm1025_vm10 = vcmp.eq.s32.totalorder %v3391_v35, %v2792_v19  ;;  %vm1484_vm11 = vcmp.eq.s32.totalorder %v3391_v35, %v2796_v23 }
  0xc7   :  { %v1321_v22 = vadd.f32 %v1193_v55, %v861_v0  ;;  %v863_v21 = vadd.f32 %v735_v18, %v404_v31  ;;  %v1195_v43 = vsel %vm1025_vm10, %v2760_v9, 0.0  ;;  %v1654_v20 = vsel %vm1484_vm11, %v2764_v10, 0.0 }
  0xc8   :  { %vm231_vm12 = vcmp.eq.s32.totalorder %v3391_v35, %v2822_v40  ;;  %vm562_vm13 = vcmp.eq.s32.totalorder %v3391_v35, %v2834_v48  ;;  %vm1022_vm14 = vcmp.eq.s32.totalorder %v3391_v35, %v2842_v53  ;;  %vm1481_vm15 = vcmp.eq.s32.totalorder %v3391_v35, %v2853_v56 }
  0xc9   :  { %v1780_v60 = vadd.f32 %v1652_v28, %v1321_v22  ;;  %v1323_v24 = vadd.f32 %v1195_v43, %v863_v21  ;;  %v401_v55 = vsel %vm231_vm12, %v2830_v47, 0.0  ;;  %v732_v0 = vsel %vm562_vm13, %v2838_v49, 0.0 }
  0xca   :  { %v860_v31 = vadd.f32 %v732_v0, %v401_v55  ;;  %v1192_v18 = vsel %vm1022_vm14, %v2846_v54, 0.0  ;;  %v1651_v42 = vsel %vm1481_vm15, %v2857_v59, 0.0  ;;  %vm233_vm0 = vcmp.eq.s32.totalorder %v3391_v35, %v2864_v27 }
  0xcb   :  { %1898 = vmatprep.subr.mxu0 %v1780_v60  ;;  %v1782_v38 = vadd.f32 %v1654_v20, %v1323_v24  ;;  %v403_v37 = vsel %vm233_vm0, %v2871_v32, 0.0  ;;  %vm564_vm1 = vcmp.eq.s32.totalorder %v3391_v35, %v2878_v36  ;;  %vm1024_vm2 = vcmp.eq.s32.totalorder %v3391_v35, %v2887_v45 }
  0xcc   :  { %v1320_v28 = vadd.f32 %v1192_v18, %v860_v31  ;;  %v734_v22 = vsel %vm564_vm1, %v2882_v39, 0.0  ;;  %v1194_v21 = vsel %vm1024_vm2, %v2891_v46, 0.0  ;;  %vm1483_vm3 = vcmp.eq.s32.totalorder %v3391_v35, %v2897_v50 }
  0xcd   :  { %1969 = vmatprep.subr.mxu1 %v1782_v38  ;;  %v862_v43 = vadd.f32 %v734_v22, %v403_v37  ;;  %v1653_v20 = vsel %vm1483_vm3, %v2901_v51, 0.0  ;;  %vm224_vm4 = vcmp.eq.s32.totalorder %v3394_v62, %v2768_v11  ;;  %vm555_vm5 = vcmp.eq.s32.totalorder %v3394_v62, %v2772_v12 }
  0xce   :  { %v1779_v60 = vadd.f32 %v1651_v42, %v1320_v28  ;;  %v394_v24 = vsel %vm224_vm4, %v2722_v57, 0.0  ;;  %v725_v55 = vsel %vm555_vm5, %v2732_v63, 0.0  ;;  %vm1015_vm6 = vcmp.eq.s32.totalorder %v3394_v62, %v2784_v16 }
  0xcf   :  { %v1322_v0 = vadd.f32 %v1194_v21, %v862_v43  ;;  %v853_v31 = vadd.f32 %v725_v55, %v394_v24  ;;  %v1185_v37 = vsel %vm1015_vm6, %v2748_v5, 0.0  ;;  %vm1474_vm7 = vcmp.eq.s32.totalorder %v3394_v62, %v2788_v17 }
  0xd0   :  { %1899 = vmatpush1.msra.mxu0 %v1779_v60  ;;  %v1644_v38 = vsel %vm1474_vm7, %v2752_v6, 0.0  ;;  %vm226_vm8 = vcmp.eq.s32.totalorder %v3394_v62, %v2776_v13  ;;  %vm557_vm9 = vcmp.eq.s32.totalorder %v3394_v62, %v2780_v15  ;;  %vm1017_vm10 = vcmp.eq.s32.totalorder %v3394_v62, %v2792_v19 }
  0xd1   :  { %v1781_v42 = vadd.f32 %v1653_v20, %v1322_v0  ;;  %v1313_v18 = vadd.f32 %v1185_v37, %v853_v31  ;;  %v396_v28 = vsel %vm226_vm8, %v2736_v1, 0.0  ;;  %v727_v22 = vsel %vm557_vm9, %v2740_v2, 0.0 }
  0xd2   :  { %v855_v21 = vadd.f32 %v727_v22, %v396_v28  ;;  %v1187_v43 = vsel %vm1017_vm10, %v2760_v9, 0.0  ;;  %vm1476_vm11 = vcmp.eq.s32.totalorder %v3394_v62, %v2796_v23  ;;  %vm223_vm12 = vcmp.eq.s32.totalorder %v3394_v62, %v2822_v40 }
  0xd3   :  { %1970 = vmatpush1.msra.mxu1 %v1781_v42  ;;  %v1772_v60 = vadd.f32 %v1644_v38, %v1313_v18  ;;  %v1646_v24 = vsel %vm1476_vm11, %v2764_v10, 0.0  ;;  %v393_v20 = vsel %vm223_vm12, %v2830_v47, 0.0  ;;  %vm554_vm13 = vcmp.eq.s32.totalorder %v3394_v62, %v2834_v48 }
  0xd4   :  { %v1315_v55 = vadd.f32 %v1187_v43, %v855_v21  ;;  %v724_v0 = vsel %vm554_vm13, %v2838_v49, 0.0  ;;  %vm1014_vm14 = vcmp.eq.s32.totalorder %v3394_v62, %v2842_v53  ;;  %vm1473_vm15 = vcmp.eq.s32.totalorder %v3394_v62, %v2853_v56 }
  0xd5   :  { %1900 = vmatprep.subr.mxu0 %v1772_v60  ;;  %v852_v31 = vadd.f32 %v724_v0, %v393_v20  ;;  %v1184_v37 = vsel %vm1014_vm14, %v2846_v54, 0.0  ;;  %v1643_v38 = vsel %vm1473_vm15, %v2857_v59, 0.0  ;;  %vm225_vm0 = vcmp.eq.s32.totalorder %v3394_v62, %v2864_v27 }
  0xd6   :  { %v1774_v42 = vadd.f32 %v1646_v24, %v1315_v55  ;;  %v395_v18 = vsel %vm225_vm0, %v2871_v32, 0.0  ;;  %vm556_vm1 = vcmp.eq.s32.totalorder %v3394_v62, %v2878_v36  ;;  %vm1016_vm2 = vcmp.eq.s32.totalorder %v3394_v62, %v2887_v45 }
  0xd7   :  { %v1312_v28 = vadd.f32 %v1184_v37, %v852_v31  ;;  %v726_v22 = vsel %vm556_vm1, %v2882_v39, 0.0  ;;  %v1186_v21 = vsel %vm1016_vm2, %v2891_v46, 0.0  ;;  %vm1475_vm3 = vcmp.eq.s32.totalorder %v3394_v62, %v2897_v50 }
  0xd8   :  { %1971 = vmatprep.subr.mxu1 %v1774_v42  ;;  %v854_v43 = vadd.f32 %v726_v22, %v395_v18  ;;  %v1645_v60 = vsel %vm1475_vm3, %v2901_v51, 0.0  ;;  %vm216_vm4 = vcmp.eq.s32.totalorder %v3397_v41, %v2768_v11  ;;  %vm547_vm5 = vcmp.eq.s32.totalorder %v3397_v41, %v2772_v12 }
  0xd9   :  { %v1771_v24 = vadd.f32 %v1643_v38, %v1312_v28  ;;  %v386_v20 = vsel %vm216_vm4, %v2722_v57, 0.0  ;;  %v717_v55 = vsel %vm547_vm5, %v2732_v63, 0.0  ;;  %vm1007_vm6 = vcmp.eq.s32.totalorder %v3397_v41, %v2784_v16 }
  0xda   :  { %v1314_v0 = vadd.f32 %v1186_v21, %v854_v43  ;;  %v845_v31 = vadd.f32 %v717_v55, %v386_v20  ;;  %v1177_v37 = vsel %vm1007_vm6, %v2748_v5, 0.0  ;;  %vm1466_vm7 = vcmp.eq.s32.totalorder %v3397_v41, %v2788_v17 }
  0xdb   :  { %1901 = vmatpush1.msra.mxu0 %v1771_v24  ;;  %v1636_v42 = vsel %vm1466_vm7, %v2752_v6, 0.0  ;;  %vm218_vm8 = vcmp.eq.s32.totalorder %v3397_v41, %v2776_v13  ;;  %vm549_vm9 = vcmp.eq.s32.totalorder %v3397_v41, %v2780_v15  ;;  %vm1009_vm10 = vcmp.eq.s32.totalorder %v3397_v41, %v2792_v19 }
  0xdc   :  { %v1773_v38 = vadd.f32 %v1645_v60, %v1314_v0  ;;  %v1305_v18 = vadd.f32 %v1177_v37, %v845_v31  ;;  %v388_v28 = vsel %vm218_vm8, %v2736_v1, 0.0  ;;  %v719_v22 = vsel %vm549_vm9, %v2740_v2, 0.0 }
  0xdd   :  { %v847_v21 = vadd.f32 %v719_v22, %v388_v28  ;;  %v1179_v43 = vsel %vm1009_vm10, %v2760_v9, 0.0  ;;  %vm1468_vm11 = vcmp.eq.s32.totalorder %v3397_v41, %v2796_v23  ;;  %vm215_vm12 = vcmp.eq.s32.totalorder %v3397_v41, %v2822_v40 }
  0xde   :  { %1972 = vmatpush1.msra.mxu1 %v1773_v38  ;;  %v1764_v24 = vadd.f32 %v1636_v42, %v1305_v18  ;;  %v1638_v20 = vsel %vm1468_vm11, %v2764_v10, 0.0  ;;  %v385_v60 = vsel %vm215_vm12, %v2830_v47, 0.0  ;;  %vm546_vm13 = vcmp.eq.s32.totalorder %v3397_v41, %v2834_v48 }
  0xdf   :  { %v1307_v55 = vadd.f32 %v1179_v43, %v847_v21  ;;  %v716_v0 = vsel %vm546_vm13, %v2838_v49, 0.0  ;;  %vm1006_vm14 = vcmp.eq.s32.totalorder %v3397_v41, %v2842_v53  ;;  %vm1465_vm15 = vcmp.eq.s32.totalorder %v3397_v41, %v2853_v56 }
  0xe0   :  { %1902 = vmatprep.subr.mxu0 %v1764_v24  ;;  %v844_v31 = vadd.f32 %v716_v0, %v385_v60  ;;  %v1176_v37 = vsel %vm1006_vm14, %v2846_v54, 0.0  ;;  %v1635_v42 = vsel %vm1465_vm15, %v2857_v59, 0.0  ;;  %vm217_vm0 = vcmp.eq.s32.totalorder %v3397_v41, %v2864_v27 }
  0xe1   :  { %v1766_v38 = vadd.f32 %v1638_v20, %v1307_v55  ;;  %v387_v18 = vsel %vm217_vm0, %v2871_v32, 0.0  ;;  %vm548_vm1 = vcmp.eq.s32.totalorder %v3397_v41, %v2878_v36  ;;  %vm1008_vm2 = vcmp.eq.s32.totalorder %v3397_v41, %v2887_v45 }
  0xe2   :  { %v1304_v28 = vadd.f32 %v1176_v37, %v844_v31  ;;  %v718_v22 = vsel %vm548_vm1, %v2882_v39, 0.0  ;;  %v1178_v21 = vsel %vm1008_vm2, %v2891_v46, 0.0  ;;  %vm1467_vm3 = vcmp.eq.s32.totalorder %v3397_v41, %v2897_v50 }
  0xe3   :  { %1973 = vmatprep.subr.mxu1 %v1766_v38  ;;  %v846_v43 = vadd.f32 %v718_v22, %v387_v18  ;;  %v1637_v24 = vsel %vm1467_vm3, %v2901_v51, 0.0  ;;  %vm208_vm4 = vcmp.eq.s32.totalorder %v3400_v44, %v2768_v11  ;;  %vm539_vm5 = vcmp.eq.s32.totalorder %v3400_v44, %v2772_v12 }
  0xe4   :  { %vm200_vm6 = vcmp.eq.s32.totalorder %v2671_v14, %v2768_v11  ;;  %v1763_v20 = vadd.f32 %v1635_v42, %v1304_v28  ;;  %v378_v60 = vsel %vm208_vm4, %v2722_v57, 0.0  ;;  %v709_v55 = vsel %vm539_vm5, %v2732_v63, 0.0 }
  0xe5   :  { %vm999_vm7 = vcmp.eq.s32.totalorder %v3400_v44, %v2784_v16  ;;  %v1306_v0 = vadd.f32 %v1178_v21, %v846_v43  ;;  %v837_v31 = vadd.f32 %v709_v55, %v378_v60  ;;  %vm1458_vm8 = vcmp.eq.s32.totalorder %v3400_v44, %v2788_v17 }
  0xe6   :  { %v1169_v37 = vsel %vm999_vm7, %v2748_v5, 0.0  ;;  %1903 = vmatpush1.msra.mxu0 %v1763_v20  ;;  %v1628_v38 = vsel %vm1458_vm8, %v2752_v6, 0.0  ;;  %vm210_vm9 = vcmp.eq.s32.totalorder %v3400_v44, %v2776_v13  ;;  %vm541_vm10 = vcmp.eq.s32.totalorder %v3400_v44, %v2780_v15 }
  0xe7   :  { %vm1001_vm11 = vcmp.eq.s32.totalorder %v3400_v44, %v2792_v19  ;;  %v1765_v42 = vadd.f32 %v1637_v24, %v1306_v0  ;;  %v1297_v18 = vadd.f32 %v1169_v37, %v837_v31  ;;  %v380_v28 = vsel %vm210_vm9, %v2736_v1, 0.0 }
  0xe8   :  { %v711_v22 = vsel %vm541_vm10, %v2740_v2, 0.0  ;;  %v1171_v43 = vsel %vm1001_vm11, %v2760_v9, 0.0  ;;  %vm1460_vm12 = vcmp.eq.s32.totalorder %v3400_v44, %v2796_v23  ;;  %vm207_vm13 = vcmp.eq.s32.totalorder %v3400_v44, %v2822_v40 }
  0xe9   :  { %v839_v21 = vadd.f32 %v711_v22, %v380_v28  ;;  %1974 = vmatpush1.msra.mxu1 %v1765_v42  ;;  %v1756_v20 = vadd.f32 %v1628_v38, %v1297_v18  ;;  %v1630_v60 = vsel %vm1460_vm12, %v2764_v10, 0.0  ;;  %v377_v24 = vsel %vm207_vm13, %v2830_v47, 0.0 }
  0xea   :  { %vm538_vm14 = vcmp.eq.s32.totalorder %v3400_v44, %v2834_v48  ;;  %vm998_vm15 = vcmp.eq.s32.totalorder %v3400_v44, %v2842_v53  ;;  %vm1457_vm0 = vcmp.eq.s32.totalorder %v3400_v44, %v2853_v56  ;;  %vm209_vm1 = vcmp.eq.s32.totalorder %v3400_v44, %v2864_v27 }
  0xeb   :  { %v1299_v55 = vadd.f32 %v1171_v43, %v839_v21  ;;  %v708_v0 = vsel %vm538_vm14, %v2838_v49, 0.0  ;;  %1904 = vmatprep.subr.mxu0 %v1756_v20  ;;  %v1168_v37 = vsel %vm998_vm15, %v2846_v54, 0.0  ;;  %v1627_v38 = vsel %vm1457_vm0, %v2857_v59, 0.0 }
  0xec   :  { %v836_v31 = vadd.f32 %v708_v0, %v377_v24  ;;  %v379_v18 = vsel %vm209_vm1, %v2871_v32, 0.0  ;;  %vm540_vm2 = vcmp.eq.s32.totalorder %v3400_v44, %v2878_v36  ;;  %vm1000_vm3 = vcmp.eq.s32.totalorder %v3400_v44, %v2887_v45 }
  0xed   :  { %v1758_v42 = vadd.f32 %v1630_v60, %v1299_v55  ;;  %v710_v22 = vsel %vm540_vm2, %v2882_v39, 0.0  ;;  %v1170_v21 = vsel %vm1000_vm3, %v2891_v46, 0.0  ;;  %vm1459_vm4 = vcmp.eq.s32.totalorder %v3400_v44, %v2897_v50 }
  0xee   :  { %v1296_v28 = vadd.f32 %v1168_v37, %v836_v31  ;;  %v838_v43 = vadd.f32 %v710_v22, %v379_v18  ;;  %v1629_v20 = vsel %vm1459_vm4, %v2901_v51, 0.0  ;;  %v370_v60 = vsel %vm200_vm6, %v2722_v57, 0.0 }
  0xef   :  { %1975 = vmatprep.subr.mxu1 %v1758_v42  ;;  %vm531_vm5 = vcmp.eq.s32.totalorder %v2671_v14, %v2772_v12  ;;  %vm991_vm7 = vcmp.eq.s32.totalorder %v2671_v14, %v2784_v16  ;;  %vm1450_vm8 = vcmp.eq.s32.totalorder %v2671_v14, %v2788_v17  ;;  %vm202_vm6 = vcmp.eq.s32.totalorder %v2671_v14, %v2776_v13 }
  0xf0   :  { %v1755_v24 = vadd.f32 %v1627_v38, %v1296_v28  ;;  %v701_v55 = vsel %vm531_vm5, %v2732_v63, 0.0  ;;  %v1298_v0 = vadd.f32 %v1170_v21, %v838_v43  ;;  %v1161_v37 = vsel %vm991_vm7, %v2748_v5, 0.0  ;;  %v4760_v43 = vld [vmem:[#allocation14_spill] sm:$0xff] }
  0xf1   :  { %v829_v31 = vadd.f32 %v701_v55, %v370_v60  ;;  %v1620_v42 = vsel %vm1450_vm8, %v2752_v6, 0.0  ;;  %vm533_vm9 = vcmp.eq.s32.totalorder %v2671_v14, %v2780_v15  ;;  %vm993_vm10 = vcmp.eq.s32.totalorder %v2671_v14, %v2792_v19 }
  0xf2   :  { %1905 = vmatpush1.msra.mxu0 %v1755_v24  ;;  %vm1452_vm11 = vcmp.eq.s32.totalorder %v2671_v14, %v2796_v23  ;;  %v1757_v57 = vadd.f32 %v1629_v20, %v1298_v0  ;;  %v372_v11 = vsel %vm202_vm6, %v2736_v1, 0.0  ;;  %v703_v5 = vsel %vm533_vm9, %v2740_v2, 0.0  ;;  %v4761_v20 = vld [vmem:[#allocation23_spill] sm:$0xff] }
  0xf3   :  { %v1289_v63 = vadd.f32 %v1161_v37, %v829_v31  ;;  %v831_v6 = vadd.f32 %v703_v5, %v372_v11  ;;  %v1163_v12 = vsel %vm993_vm10, %v2760_v9, 0.0  ;;  %v1622_v13 = vsel %vm1452_vm11, %v2764_v10, 0.0 }
  0xf4   :  { %vm199_vm12 = vcmp.eq.s32.totalorder %v2671_v14, %v2822_v40  ;;  %1976 = vmatpush1.msra.mxu1 %v1757_v57  ;;  %vm530_vm13 = vcmp.eq.s32.totalorder %v2671_v14, %v2834_v48  ;;  %vm990_vm14 = vcmp.eq.s32.totalorder %v2671_v14, %v2842_v53  ;;  %vm1449_vm15 = vcmp.eq.s32.totalorder %v2671_v14, %v2853_v56 }
  0xf5   :  { %v1748_v15 = vadd.f32 %v1620_v42, %v1289_v63  ;;  %v369_v16 = vsel %vm199_vm12, %v2830_v47, 0.0  ;;  %v1291_v1 = vadd.f32 %v1163_v12, %v831_v6  ;;  %v700_v2 = vsel %vm530_vm13, %v2838_v49, 0.0 }
  0xf6   :  { %v1160_v9 = vsel %vm990_vm14, %v2846_v54, 0.0  ;;  %v828_v10 = vadd.f32 %v700_v2, %v369_v16  ;;  %v1619_v17 = vsel %vm1449_vm15, %v2857_v59, 0.0  ;;  %vm201_vm0 = vcmp.eq.s32.totalorder %v2671_v14, %v2864_v27  ;;  %v1875_v27 = vld [vmem:[#allocation7] sm:$0xff] }
  0xf7   :  { %1906 = vmatprep.subr.mxu0 %v1748_v15  ;;  %v1750_v19 = vadd.f32 %v1622_v13, %v1291_v1  ;;  %v2638_v23 = vmov 0.0   ;;  %v371_v40 = vsel %vm201_vm0, %v2871_v32, 0.0  ;;  %vm532_vm1 = vcmp.eq.s32.totalorder %v2671_v14, %v2878_v36 }
  0xf8   :  { %1940 = vmatprep.mubr.f32.mxu0 %v2638_v23  ;;  %vm992_vm2 = vcmp.eq.s32.totalorder %v2671_v14, %v2887_v45  ;;  %2011 = vmatprep.mubr.f32.mxu1 %v2638_v23  ;;  %v1288_v47 = vadd.f32 %v1160_v9, %v828_v10  ;;  %v702_v48 = vsel %vm532_vm1, %v2882_v39, 0.0  ;;  %vm1451_vm3 = vcmp.eq.s32.totalorder %v2671_v14, %v2897_v50 }
  0xf9   :  { %v1162_v49 = vsel %vm992_vm2, %v2891_v46, 0.0  ;;  %1977 = vmatprep.subr.mxu1 %v1750_v19  ;;  %v830_v53 = vadd.f32 %v702_v48, %v371_v40  ;;  %v1621_v54 = vsel %vm1451_vm3, %v2901_v51, 0.0  ;;  %v3646_v56 = vsub.s32 5, %v2671_v14 }
  0xfa   :  { %v1747_v59 = vadd.f32 %v1619_v17, %v1288_v47  ;;  %v3649_v32 = vsub.s32 7, %v2671_v14  ;;  %v3652_v36 = vsub.s32 4, %v2671_v14  ;;  %v3655_v39 = vsub.s32 6, %v2671_v14 }
  0xfb   :  { %v1290_v45 = vadd.f32 %v1162_v49, %v830_v53  ;;  %v3659_v46 = vrot.slane %v2742_v3, %v3646_v56  ;;  %v3663_v50 = vrot.slane %v2718_v52, %v3646_v56  ;;  %v3667_v51 = vrot.slane %v2744_v4, %v3646_v56 }
  0xfc   :  { %1907 = vmatpush1.msra.mxu0 %v1747_v59  ;;  %v3671_v38 = vrot.slane %v2724_v58, %v3646_v56  ;;  %v3675_v18 = vrot.slane %v2754_v7, %v3646_v56  ;;  %v3679_v28 = vrot.slane %v2726_v61, %v3646_v56  ;;  %v3683_v22 = vrot.slane %v2756_v8, %v3646_v56 }
  0xfd   :  { %v1749_v21 = vadd.f32 %v1621_v54, %v1290_v45  ;;  %1941 = vmatmul.mubr.f32.vlgmr.msra.gmra.mxu0 %v1875_v27  ;;  %vm324_vm4 = vcmp.eq.s32.totalorder %v4760_v43, %v3659_v46  ;;  %vm655_vm5 = vcmp.eq.s32.totalorder %v4760_v43, %v3667_v51  ;;  %v3691_v60 = vrot.slane %v4761_v20, %v3646_v56 }
  0xfe   :  { %v494_v24 = vsel %vm324_vm4, %v3663_v50, 0.0  ;;  %v825_v55 = vsel %vm655_vm5, %v3671_v38, 0.0  ;;  %vm1115_vm7 = vcmp.eq.s32.totalorder %v4760_v43, %v3675_v18  ;;  %vm1574_vm8 = vcmp.eq.s32.totalorder %v4760_v43, %v3683_v22  ;;  %2082 = vmatprep.mubr.f32.mxu0 %v2638_v23 }
  0xff   :  { %1978 = vmatpush1.msra.mxu1 %v1749_v21  ;;  %v953_v0 = vadd.f32 %v825_v55, %v494_v24  ;;  %v1285_v31 = vsel %vm1115_vm7, %v3679_v28, 0.0  ;;  %v1744_v37 = vsel %vm1574_vm8, %v3691_v60, 0.0  ;;  %v3703_v42 = vrot.slane %v2742_v3, %v3649_v32 }
 0x100   :  { %2012 = vmatmul.mubr.f32.vlgmr.msra.gmra.mxu1 %v1875_v27  ;;  %v3707_v57 = vrot.slane %v2718_v52, %v3649_v32  ;;  %v3711_v63 = vrot.slane %v2744_v4, %v3649_v32  ;;  %v3715_v11 = vrot.slane %v2724_v58, %v3649_v32  ;;  %v3719_v5 = vrot.slane %v2754_v7, %v3649_v32 }
 0x101   :  { %v1413_v6 = vadd.f32 %v1285_v31, %v953_v0  ;;  %vm326_vm6 = vcmp.eq.s32.totalorder %v4760_v43, %v3703_v42  ;;  %v3725_v12 = vrot.slane %v2726_v61, %v3649_v32  ;;  %v3729_v13 = vrot.slane %v2756_v8, %v3649_v32  ;;  %2153 = vmatprep.mubr.f32.mxu1 %v2638_v23 }
 0x102   :  { %v496_v15 = vsel %vm326_vm6, %v3707_v57, 0.0  ;;  %vm657_vm9 = vcmp.eq.s32.totalorder %v4760_v43, %v3711_v63  ;;  %vm1117_vm10 = vcmp.eq.s32.totalorder %v4760_v43, %v3719_v5  ;;  %v3738_v16 = vrot.slane %v4761_v20, %v3649_v32 }
 0x103   :  { %v1872_v1 = vadd.f32 %v1744_v37, %v1413_v6  ;;  %v827_v2 = vsel %vm657_vm9, %v3715_v11, 0.0  ;;  %v1287_v9 = vsel %vm1117_vm10, %v3725_v12, 0.0  ;;  %vm1576_vm11 = vcmp.eq.s32.totalorder %v4760_v43, %v3729_v13 }
 0x104   :  { %v955_v10 = vadd.f32 %v827_v2, %v496_v15  ;;  %v1746_v17 = vsel %vm1576_vm11, %v3738_v16, 0.0  ;;  %v3747_v19 = vrot.slane %v2742_v3, %v3652_v36  ;;  %v3751_v23 = vrot.slane %v2718_v52, %v3652_v36 }
 0x105   :  { %2018 = vmatprep.subr.mxu0 %v1872_v1  ;;  %v3755_v40 = vrot.slane %v2744_v4, %v3652_v36  ;;  %v3759_v47 = vrot.slane %v2724_v58, %v3652_v36  ;;  %v3763_v48 = vrot.slane %v2754_v7, %v3652_v36  ;;  %v3767_v49 = vrot.slane %v2726_v61, %v3652_v36 }
 0x106   :  { %v1415_v53 = vadd.f32 %v1287_v9, %v955_v10  ;;  %vm323_vm12 = vcmp.eq.s32.totalorder %v4760_v43, %v3747_v19  ;;  %v3773_v54 = vrot.slane %v2756_v8, %v3652_v36  ;;  %v3777_v59 = vrot.slane %v4761_v20, %v3652_v36 }
 0x107   :  { %v493_v27 = vsel %vm323_vm12, %v3751_v23, 0.0  ;;  %vm654_vm13 = vcmp.eq.s32.totalorder %v4760_v43, %v3755_v40  ;;  %vm1114_vm14 = vcmp.eq.s32.totalorder %v4760_v43, %v3763_v48  ;;  %v3786_v45 = vrot.slane %v2742_v3, %v3655_v39 }
 0x108   :  { %v1874_v21 = vadd.f32 %v1746_v17, %v1415_v53  ;;  %v824_v24 = vsel %vm654_vm13, %v3759_v47, 0.0  ;;  %v1284_v55 = vsel %vm1114_vm14, %v3767_v49, 0.0  ;;  %vm1573_vm15 = vcmp.eq.s32.totalorder %v4760_v43, %v3773_v54 }
 0x109   :  { %v952_v0 = vadd.f32 %v824_v24, %v493_v27  ;;  %v1743_v31 = vsel %vm1573_vm15, %v3777_v59, 0.0  ;;  %vm325_vm0 = vcmp.eq.s32.totalorder %v4760_v43, %v3786_v45  ;;  %v3797_v37 = vrot.slane %v2718_v52, %v3655_v39 }
 0x10a   :  { %2089 = vmatprep.subr.mxu1 %v1874_v21  ;;  %v3801_v3 = vrot.slane %v2744_v4, %v3655_v39  ;;  %v3805_v6 = vrot.slane %v2724_v58, %v3655_v39  ;;  %v3809_v15 = vrot.slane %v2754_v7, %v3655_v39  ;;  %v3813_v1 = vrot.slane %v2726_v61, %v3655_v39 }
 0x10b   :  { %v1412_v2 = vadd.f32 %v1284_v55, %v952_v0  ;;  %v495_v52 = vsel %vm325_vm0, %v3797_v37, 0.0  ;;  %v3818_v9 = vrot.slane %v2756_v8, %v3655_v39  ;;  %v3822_v4 = vrot.slane %v4761_v20, %v3655_v39 }
 0x10c   :  { %vm656_vm1 = vcmp.eq.s32.totalorder %v4760_v43, %v3801_v3  ;;  %vm1116_vm2 = vcmp.eq.s32.totalorder %v4760_v43, %v3809_v15  ;;  %vm316_vm3 = vcmp.eq.s32.totalorder %v2689_v25, %v3659_v46  ;;  %vm647_vm4 = vcmp.eq.s32.totalorder %v2689_v25, %v3667_v51 }
 0x10d   :  { %v1871_v58 = vadd.f32 %v1743_v31, %v1412_v2  ;;  %v826_v61 = vsel %vm656_vm1, %v3805_v6, 0.0  ;;  %v1286_v7 = vsel %vm1116_vm2, %v3813_v1, 0.0  ;;  %vm1575_vm5 = vcmp.eq.s32.totalorder %v4760_v43, %v3818_v9 }
 0x10e   :  { %v954_v8 = vadd.f32 %v826_v61, %v495_v52  ;;  %v1745_v20 = vsel %vm1575_vm5, %v3822_v4, 0.0  ;;  %v486_v10 = vsel %vm316_vm3, %v3663_v50, 0.0  ;;  %v817_v17 = vsel %vm647_vm4, %v3671_v38, 0.0 }
 0x10f   :  { %2019 = vmatpush1.msra.mxu0 %v1871_v58  ;;  %v945_v53 = vadd.f32 %v817_v17, %v486_v10  ;;  %vm1107_vm7 = vcmp.eq.s32.totalorder %v2689_v25, %v3675_v18  ;;  %vm1566_vm8 = vcmp.eq.s32.totalorder %v2689_v25, %v3683_v22  ;;  %vm318_vm6 = vcmp.eq.s32.totalorder %v2689_v25, %v3703_v42 }
 0x110   :  { %v1414_v27 = vadd.f32 %v1286_v7, %v954_v8  ;;  %v1277_v43 = vsel %vm1107_vm7, %v3679_v28, 0.0  ;;  %v1736_v21 = vsel %vm1566_vm8, %v3691_v60, 0.0  ;;  %v488_v24 = vsel %vm318_vm6, %v3707_v57, 0.0 }
 0x111   :  { %v1405_v55 = vadd.f32 %v1277_v43, %v945_v53  ;;  %vm649_vm9 = vcmp.eq.s32.totalorder %v2689_v25, %v3711_v63  ;;  %vm1109_vm10 = vcmp.eq.s32.totalorder %v2689_v25, %v3719_v5  ;;  %vm1568_vm11 = vcmp.eq.s32.totalorder %v2689_v25, %v3729_v13 }
 0x112   :  { %v1873_v0 = vadd.f32 %v1745_v20, %v1414_v27  ;;  %v819_v31 = vsel %vm649_vm9, %v3715_v11, 0.0  ;;  %v1279_v2 = vsel %vm1109_vm10, %v3725_v12, 0.0  ;;  %v1738_v52 = vsel %vm1568_vm11, %v3738_v16, 0.0 }
 0x113   :  { %v1864_v58 = vadd.f32 %v1736_v21, %v1405_v55  ;;  %v947_v61 = vadd.f32 %v819_v31, %v488_v24  ;;  %vm315_vm12 = vcmp.eq.s32.totalorder %v2689_v25, %v3747_v19  ;;  %vm646_vm13 = vcmp.eq.s32.totalorder %v2689_v25, %v3755_v40 }
 0x114   :  { %2090 = vmatpush1.msra.mxu1 %v1873_v0  ;;  %v485_v7 = vsel %vm315_vm12, %v3751_v23, 0.0  ;;  %v816_v8 = vsel %vm646_vm13, %v3759_v47, 0.0  ;;  %vm1106_vm14 = vcmp.eq.s32.totalorder %v2689_v25, %v3763_v48  ;;  %vm1565_vm15 = vcmp.eq.s32.totalorder %v2689_v25, %v3773_v54 }
 0x115   :  { %2020 = vmatprep.subr.mxu0 %v1864_v58  ;;  %v1407_v20 = vadd.f32 %v1279_v2, %v947_v61  ;;  %v944_v10 = vadd.f32 %v816_v8, %v485_v7  ;;  %v1276_v17 = vsel %vm1106_vm14, %v3767_v49, 0.0  ;;  %v1735_v53 = vsel %vm1565_vm15, %v3777_v59, 0.0 }
 0x116   :  { %vm317_vm0 = vcmp.eq.s32.totalorder %v2689_v25, %v3786_v45  ;;  %vm648_vm1 = vcmp.eq.s32.totalorder %v2689_v25, %v3801_v3  ;;  %vm1108_vm2 = vcmp.eq.s32.totalorder %v2689_v25, %v3809_v15  ;;  %vm1567_vm3 = vcmp.eq.s32.totalorder %v2689_v25, %v3818_v9 }
 0x117   :  { %v1866_v27 = vadd.f32 %v1738_v52, %v1407_v20  ;;  %v1404_v43 = vadd.f32 %v1276_v17, %v944_v10  ;;  %v487_v21 = vsel %vm317_vm0, %v3797_v37, 0.0  ;;  %v818_v24 = vsel %vm648_vm1, %v3805_v6, 0.0 }
 0x118   :  { %v946_v55 = vadd.f32 %v818_v24, %v487_v21  ;;  %v1278_v0 = vsel %vm1108_vm2, %v3813_v1, 0.0  ;;  %v1737_v31 = vsel %vm1567_vm3, %v3822_v4, 0.0  ;;  %vm308_vm4 = vcmp.eq.s32.totalorder %v2692_v26, %v3659_v46 }
 0x119   :  { %2091 = vmatprep.subr.mxu1 %v1866_v27  ;;  %v1863_v2 = vadd.f32 %v1735_v53, %v1404_v43  ;;  %v478_v58 = vsel %vm308_vm4, %v3663_v50, 0.0  ;;  %vm639_vm5 = vcmp.eq.s32.totalorder %v2692_v26, %v3667_v51  ;;  %vm1099_vm7 = vcmp.eq.s32.totalorder %v2692_v26, %v3675_v18 }
 0x11a   :  { %v1406_v25 = vadd.f32 %v1278_v0, %v946_v55  ;;  %v809_v52 = vsel %vm639_vm5, %v3671_v38, 0.0  ;;  %v1269_v61 = vsel %vm1099_vm7, %v3679_v28, 0.0  ;;  %vm1558_vm8 = vcmp.eq.s32.totalorder %v2692_v26, %v3683_v22 }
 0x11b   :  { %2021 = vmatpush1.msra.mxu0 %v1863_v2  ;;  %v937_v7 = vadd.f32 %v809_v52, %v478_v58  ;;  %v1728_v8 = vsel %vm1558_vm8, %v3691_v60, 0.0  ;;  %vm310_vm6 = vcmp.eq.s32.totalorder %v2692_v26, %v3703_v42  ;;  %vm641_vm9 = vcmp.eq.s32.totalorder %v2692_v26, %v3711_v63 }
 0x11c   :  { %v1865_v20 = vadd.f32 %v1737_v31, %v1406_v25  ;;  %v480_v10 = vsel %vm310_vm6, %v3707_v57, 0.0  ;;  %v811_v17 = vsel %vm641_vm9, %v3715_v11, 0.0  ;;  %vm1101_vm10 = vcmp.eq.s32.totalorder %v2692_v26, %v3719_v5 }
 0x11d   :  { %v1397_v53 = vadd.f32 %v1269_v61, %v937_v7  ;;  %v939_v27 = vadd.f32 %v811_v17, %v480_v10  ;;  %v1271_v43 = vsel %vm1101_vm10, %v3725_v12, 0.0  ;;  %vm1560_vm11 = vcmp.eq.s32.totalorder %v2692_v26, %v3729_v13 }
 0x11e   :  { %2092 = vmatpush1.msra.mxu1 %v1865_v20  ;;  %v1730_v21 = vsel %vm1560_vm11, %v3738_v16, 0.0  ;;  %vm307_vm12 = vcmp.eq.s32.totalorder %v2692_v26, %v3747_v19  ;;  %vm638_vm13 = vcmp.eq.s32.totalorder %v2692_v26, %v3755_v40  ;;  %vm1098_vm14 = vcmp.eq.s32.totalorder %v2692_v26, %v3763_v48 }
 0x11f   :  { %v1856_v24 = vadd.f32 %v1728_v8, %v1397_v53  ;;  %v1399_v55 = vadd.f32 %v1271_v43, %v939_v27  ;;  %v477_v0 = vsel %vm307_vm12, %v3751_v23, 0.0  ;;  %v808_v31 = vsel %vm638_vm13, %v3759_v47, 0.0 }
 0x120   :  { %v936_v2 = vadd.f32 %v808_v31, %v477_v0  ;;  %v1268_v58 = vsel %vm1098_vm14, %v3767_v49, 0.0  ;;  %vm1557_vm15 = vcmp.eq.s32.totalorder %v2692_v26, %v3773_v54  ;;  %vm309_vm0 = vcmp.eq.s32.totalorder %v2692_v26, %v3786_v45 }
 0x121   :  { %2022 = vmatprep.subr.mxu0 %v1856_v24  ;;  %v1858_v25 = vadd.f32 %v1730_v21, %v1399_v55  ;;  %v1727_v52 = vsel %vm1557_vm15, %v3777_v59, 0.0  ;;  %v479_v61 = vsel %vm309_vm0, %v3797_v37, 0.0  ;;  %vm640_vm1 = vcmp.eq.s32.totalorder %v2692_v26, %v3801_v3 }
 0x122   :  { %v1396_v7 = vadd.f32 %v1268_v58, %v936_v2  ;;  %v810_v8 = vsel %vm640_vm1, %v3805_v6, 0.0  ;;  %vm1100_vm2 = vcmp.eq.s32.totalorder %v2692_v26, %v3809_v15  ;;  %vm1559_vm3 = vcmp.eq.s32.totalorder %v2692_v26, %v3818_v9 }
 0x123   :  { %2093 = vmatprep.subr.mxu1 %v1858_v25  ;;  %v938_v20 = vadd.f32 %v810_v8, %v479_v61  ;;  %v1270_v10 = vsel %vm1100_vm2, %v3813_v1, 0.0  ;;  %v1729_v17 = vsel %vm1559_vm3, %v3822_v4, 0.0  ;;  %vm300_vm4 = vcmp.eq.s32.totalorder %v2695_v29, %v3659_v46 }
 0x124   :  { %v1855_v53 = vadd.f32 %v1727_v52, %v1396_v7  ;;  %v470_v27 = vsel %vm300_vm4, %v3663_v50, 0.0  ;;  %vm631_vm5 = vcmp.eq.s32.totalorder %v2695_v29, %v3667_v51  ;;  %vm1091_vm7 = vcmp.eq.s32.totalorder %v2695_v29, %v3675_v18 }
 0x125   :  { %v1398_v43 = vadd.f32 %v1270_v10, %v938_v20  ;;  %v801_v26 = vsel %vm631_vm5, %v3671_v38, 0.0  ;;  %v1261_v21 = vsel %vm1091_vm7, %v3679_v28, 0.0  ;;  %vm1550_vm8 = vcmp.eq.s32.totalorder %v2695_v29, %v3683_v22 }
 0x126   :  { %2023 = vmatpush1.msra.mxu0 %v1855_v53  ;;  %v929_v24 = vadd.f32 %v801_v26, %v470_v27  ;;  %v1720_v55 = vsel %vm1550_vm8, %v3691_v60, 0.0  ;;  %vm302_vm6 = vcmp.eq.s32.totalorder %v2695_v29, %v3703_v42  ;;  %vm633_vm9 = vcmp.eq.s32.totalorder %v2695_v29, %v3711_v63 }
 0x127   :  { %v1857_v0 = vadd.f32 %v1729_v17, %v1398_v43  ;;  %v472_v31 = vsel %vm302_vm6, %v3707_v57, 0.0  ;;  %v803_v2 = vsel %vm633_vm9, %v3715_v11, 0.0  ;;  %vm1093_vm10 = vcmp.eq.s32.totalorder %v2695_v29, %v3719_v5 }
 0x128   :  { %v1389_v58 = vadd.f32 %v1261_v21, %v929_v24  ;;  %v931_v25 = vadd.f32 %v803_v2, %v472_v31  ;;  %v1263_v52 = vsel %vm1093_vm10, %v3725_v12, 0.0  ;;  %vm1552_vm11 = vcmp.eq.s32.totalorder %v2695_v29, %v3729_v13 }
 0x129   :  { %2094 = vmatpush1.msra.mxu1 %v1857_v0  ;;  %v1722_v61 = vsel %vm1552_vm11, %v3738_v16, 0.0  ;;  %vm299_vm12 = vcmp.eq.s32.totalorder %v2695_v29, %v3747_v19  ;;  %vm630_vm13 = vcmp.eq.s32.totalorder %v2695_v29, %v3755_v40  ;;  %vm1090_vm14 = vcmp.eq.s32.totalorder %v2695_v29, %v3763_v48 }
 0x12a   :  { %v1848_v7 = vadd.f32 %v1720_v55, %v1389_v58  ;;  %v1391_v8 = vadd.f32 %v1263_v52, %v931_v25  ;;  %v469_v20 = vsel %vm299_vm12, %v3751_v23, 0.0  ;;  %v800_v10 = vsel %vm630_vm13, %v3759_v47, 0.0 }
 0x12b   :  { %v928_v17 = vadd.f32 %v800_v10, %v469_v20  ;;  %v1260_v53 = vsel %vm1090_vm14, %v3767_v49, 0.0  ;;  %vm1549_vm15 = vcmp.eq.s32.totalorder %v2695_v29, %v3773_v54  ;;  %vm301_vm0 = vcmp.eq.s32.totalorder %v2695_v29, %v3786_v45 }
 0x12c   :  { %2024 = vmatprep.subr.mxu0 %v1848_v7  ;;  %v1850_v27 = vadd.f32 %v1722_v61, %v1391_v8  ;;  %v1719_v43 = vsel %vm1549_vm15, %v3777_v59, 0.0  ;;  %v471_v26 = vsel %vm301_vm0, %v3797_v37, 0.0  ;;  %vm632_vm1 = vcmp.eq.s32.totalorder %v2695_v29, %v3801_v3 }
 0x12d   :  { %v1388_v21 = vadd.f32 %v1260_v53, %v928_v17  ;;  %v802_v24 = vsel %vm632_vm1, %v3805_v6, 0.0  ;;  %vm1092_vm2 = vcmp.eq.s32.totalorder %v2695_v29, %v3809_v15  ;;  %vm1551_vm3 = vcmp.eq.s32.totalorder %v2695_v29, %v3818_v9 }
 0x12e   :  { %2095 = vmatprep.subr.mxu1 %v1850_v27  ;;  %v930_v55 = vadd.f32 %v802_v24, %v471_v26  ;;  %v1262_v0 = vsel %vm1092_vm2, %v3813_v1, 0.0  ;;  %v1721_v31 = vsel %vm1551_vm3, %v3822_v4, 0.0  ;;  %vm292_vm4 = vcmp.eq.s32.totalorder %v2698_v30, %v3659_v46 }
 0x12f   :  { %v1847_v2 = vadd.f32 %v1719_v43, %v1388_v21  ;;  %v462_v58 = vsel %vm292_vm4, %v3663_v50, 0.0  ;;  %vm623_vm5 = vcmp.eq.s32.totalorder %v2698_v30, %v3667_v51  ;;  %vm1083_vm7 = vcmp.eq.s32.totalorder %v2698_v30, %v3675_v18 }
 0x130   :  { %v1390_v25 = vadd.f32 %v1262_v0, %v930_v55  ;;  %v793_v29 = vsel %vm623_vm5, %v3671_v38, 0.0  ;;  %v1253_v52 = vsel %vm1083_vm7, %v3679_v28, 0.0  ;;  %vm1542_vm8 = vcmp.eq.s32.totalorder %v2698_v30, %v3683_v22 }
 0x131   :  { %2025 = vmatpush1.msra.mxu0 %v1847_v2  ;;  %v921_v61 = vadd.f32 %v793_v29, %v462_v58  ;;  %v1712_v7 = vsel %vm1542_vm8, %v3691_v60, 0.0  ;;  %vm294_vm6 = vcmp.eq.s32.totalorder %v2698_v30, %v3703_v42  ;;  %vm625_vm9 = vcmp.eq.s32.totalorder %v2698_v30, %v3711_v63 }
 0x132   :  { %v1849_v8 = vadd.f32 %v1721_v31, %v1390_v25  ;;  %v464_v20 = vsel %vm294_vm6, %v3707_v57, 0.0  ;;  %v795_v10 = vsel %vm625_vm9, %v3715_v11, 0.0  ;;  %vm1085_vm10 = vcmp.eq.s32.totalorder %v2698_v30, %v3719_v5 }
 0x133   :  { %v1381_v17 = vadd.f32 %v1253_v52, %v921_v61  ;;  %v923_v53 = vadd.f32 %v795_v10, %v464_v20  ;;  %v1255_v27 = vsel %vm1085_vm10, %v3725_v12, 0.0  ;;  %vm1544_vm11 = vcmp.eq.s32.totalorder %v2698_v30, %v3729_v13 }
 0x134   :  { %2096 = vmatpush1.msra.mxu1 %v1849_v8  ;;  %v1714_v43 = vsel %vm1544_vm11, %v3738_v16, 0.0  ;;  %vm291_vm12 = vcmp.eq.s32.totalorder %v2698_v30, %v3747_v19  ;;  %vm622_vm13 = vcmp.eq.s32.totalorder %v2698_v30, %v3755_v40  ;;  %vm1082_vm14 = vcmp.eq.s32.totalorder %v2698_v30, %v3763_v48 }
 0x135   :  { %v1840_v26 = vadd.f32 %v1712_v7, %v1381_v17  ;;  %v1383_v21 = vadd.f32 %v1255_v27, %v923_v53  ;;  %v461_v24 = vsel %vm291_vm12, %v3751_v23, 0.0  ;;  %v792_v55 = vsel %vm622_vm13, %v3759_v47, 0.0 }
 0x136   :  { %v920_v0 = vadd.f32 %v792_v55, %v461_v24  ;;  %v1252_v31 = vsel %vm1082_vm14, %v3767_v49, 0.0  ;;  %vm1541_vm15 = vcmp.eq.s32.totalorder %v2698_v30, %v3773_v54  ;;  %vm293_vm0 = vcmp.eq.s32.totalorder %v2698_v30, %v3786_v45 }
 0x137   :  { %2026 = vmatprep.subr.mxu0 %v1840_v26  ;;  %v1842_v2 = vadd.f32 %v1714_v43, %v1383_v21  ;;  %v1711_v58 = vsel %vm1541_vm15, %v3777_v59, 0.0  ;;  %v463_v25 = vsel %vm293_vm0, %v3797_v37, 0.0  ;;  %vm624_vm1 = vcmp.eq.s32.totalorder %v2698_v30, %v3801_v3 }
 0x138   :  { %v1380_v29 = vadd.f32 %v1252_v31, %v920_v0  ;;  %v794_v52 = vsel %vm624_vm1, %v3805_v6, 0.0  ;;  %vm1084_vm2 = vcmp.eq.s32.totalorder %v2698_v30, %v3809_v15  ;;  %vm1543_vm3 = vcmp.eq.s32.totalorder %v2698_v30, %v3818_v9 }
 0x139   :  { %2097 = vmatprep.subr.mxu1 %v1842_v2  ;;  %v922_v61 = vadd.f32 %v794_v52, %v463_v25  ;;  %v1254_v7 = vsel %vm1084_vm2, %v3813_v1, 0.0  ;;  %v1713_v8 = vsel %vm1543_vm3, %v3822_v4, 0.0  ;;  %vm284_vm4 = vcmp.eq.s32.totalorder %v2701_v33, %v3659_v46 }
 0x13a   :  { %v1839_v20 = vadd.f32 %v1711_v58, %v1380_v29  ;;  %v454_v10 = vsel %vm284_vm4, %v3663_v50, 0.0  ;;  %vm615_vm5 = vcmp.eq.s32.totalorder %v2701_v33, %v3667_v51  ;;  %vm1075_vm7 = vcmp.eq.s32.totalorder %v2701_v33, %v3675_v18 }
 0x13b   :  { %v1382_v17 = vadd.f32 %v1254_v7, %v922_v61  ;;  %v785_v30 = vsel %vm615_vm5, %v3671_v38, 0.0  ;;  %v1245_v53 = vsel %vm1075_vm7, %v3679_v28, 0.0  ;;  %vm1534_vm8 = vcmp.eq.s32.totalorder %v2701_v33, %v3683_v22 }
 0x13c   :  { %2027 = vmatpush1.msra.mxu0 %v1839_v20  ;;  %v913_v27 = vadd.f32 %v785_v30, %v454_v10  ;;  %v1704_v43 = vsel %vm1534_vm8, %v3691_v60, 0.0  ;;  %vm286_vm6 = vcmp.eq.s32.totalorder %v2701_v33, %v3703_v42  ;;  %vm617_vm9 = vcmp.eq.s32.totalorder %v2701_v33, %v3711_v63 }
 0x13d   :  { %v1841_v26 = vadd.f32 %v1713_v8, %v1382_v17  ;;  %v456_v21 = vsel %vm286_vm6, %v3707_v57, 0.0  ;;  %v787_v24 = vsel %vm617_vm9, %v3715_v11, 0.0  ;;  %vm1077_vm10 = vcmp.eq.s32.totalorder %v2701_v33, %v3719_v5 }
 0x13e   :  { %v1373_v55 = vadd.f32 %v1245_v53, %v913_v27  ;;  %v915_v0 = vadd.f32 %v787_v24, %v456_v21  ;;  %v1247_v31 = vsel %vm1077_vm10, %v3725_v12, 0.0  ;;  %vm1536_vm11 = vcmp.eq.s32.totalorder %v2701_v33, %v3729_v13 }
 0x13f   :  { %2098 = vmatpush1.msra.mxu1 %v1841_v26  ;;  %v1706_v2 = vsel %vm1536_vm11, %v3738_v16, 0.0  ;;  %vm283_vm12 = vcmp.eq.s32.totalorder %v2701_v33, %v3747_v19  ;;  %vm614_vm13 = vcmp.eq.s32.totalorder %v2701_v33, %v3755_v40  ;;  %vm1074_vm14 = vcmp.eq.s32.totalorder %v2701_v33, %v3763_v48 }
 0x140   :  { %v1832_v58 = vadd.f32 %v1704_v43, %v1373_v55  ;;  %v1375_v25 = vadd.f32 %v1247_v31, %v915_v0  ;;  %v453_v29 = vsel %vm283_vm12, %v3751_v23, 0.0  ;;  %v784_v52 = vsel %vm614_vm13, %v3759_v47, 0.0 }
 0x141   :  { %v912_v61 = vadd.f32 %v784_v52, %v453_v29  ;;  %v1244_v7 = vsel %vm1074_vm14, %v3767_v49, 0.0  ;;  %vm1533_vm15 = vcmp.eq.s32.totalorder %v2701_v33, %v3773_v54  ;;  %vm285_vm0 = vcmp.eq.s32.totalorder %v2701_v33, %v3786_v45 }
 0x142   :  { %2028 = vmatprep.subr.mxu0 %v1832_v58  ;;  %v1834_v8 = vadd.f32 %v1706_v2, %v1375_v25  ;;  %v1703_v20 = vsel %vm1533_vm15, %v3777_v59, 0.0  ;;  %v455_v10 = vsel %vm285_vm0, %v3797_v37, 0.0  ;;  %vm616_vm1 = vcmp.eq.s32.totalorder %v2701_v33, %v3801_v3 }
 0x143   :  { %v1372_v17 = vadd.f32 %v1244_v7, %v912_v61  ;;  %v786_v30 = vsel %vm616_vm1, %v3805_v6, 0.0  ;;  %vm1076_vm2 = vcmp.eq.s32.totalorder %v2701_v33, %v3809_v15  ;;  %vm1535_vm3 = vcmp.eq.s32.totalorder %v2701_v33, %v3818_v9 }
 0x144   :  { %2099 = vmatprep.subr.mxu1 %v1834_v8  ;;  %v914_v53 = vadd.f32 %v786_v30, %v455_v10  ;;  %v1246_v27 = vsel %vm1076_vm2, %v3813_v1, 0.0  ;;  %v1705_v43 = vsel %vm1535_vm3, %v3822_v4, 0.0  ;;  %vm276_vm4 = vcmp.eq.s32.totalorder %v2704_v34, %v3659_v46 }
 0x145   :  { %v1831_v26 = vadd.f32 %v1703_v20, %v1372_v17  ;;  %v446_v21 = vsel %vm276_vm4, %v3663_v50, 0.0  ;;  %vm607_vm5 = vcmp.eq.s32.totalorder %v2704_v34, %v3667_v51  ;;  %vm1067_vm7 = vcmp.eq.s32.totalorder %v2704_v34, %v3675_v18 }
 0x146   :  { %v1374_v24 = vadd.f32 %v1246_v27, %v914_v53  ;;  %v777_v33 = vsel %vm607_vm5, %v3671_v38, 0.0  ;;  %v1237_v55 = vsel %vm1067_vm7, %v3679_v28, 0.0  ;;  %vm1526_vm8 = vcmp.eq.s32.totalorder %v2704_v34, %v3683_v22 }
 0x147   :  { %2029 = vmatpush1.msra.mxu0 %v1831_v26  ;;  %v905_v0 = vadd.f32 %v777_v33, %v446_v21  ;;  %v1696_v31 = vsel %vm1526_vm8, %v3691_v60, 0.0  ;;  %vm278_vm6 = vcmp.eq.s32.totalorder %v2704_v34, %v3703_v42  ;;  %vm609_vm9 = vcmp.eq.s32.totalorder %v2704_v34, %v3711_v63 }
 0x148   :  { %v1833_v2 = vadd.f32 %v1705_v43, %v1374_v24  ;;  %v448_v58 = vsel %vm278_vm6, %v3707_v57, 0.0  ;;  %v779_v25 = vsel %vm609_vm9, %v3715_v11, 0.0  ;;  %vm1069_vm10 = vcmp.eq.s32.totalorder %v2704_v34, %v3719_v5 }
 0x149   :  { %v1365_v29 = vadd.f32 %v1237_v55, %v905_v0  ;;  %v907_v52 = vadd.f32 %v779_v25, %v448_v58  ;;  %v1239_v61 = vsel %vm1069_vm10, %v3725_v12, 0.0  ;;  %vm1528_vm11 = vcmp.eq.s32.totalorder %v2704_v34, %v3729_v13 }
 0x14a   :  { %2100 = vmatpush1.msra.mxu1 %v1833_v2  ;;  %v1698_v7 = vsel %vm1528_vm11, %v3738_v16, 0.0  ;;  %vm275_vm12 = vcmp.eq.s32.totalorder %v2704_v34, %v3747_v19  ;;  %vm606_vm13 = vcmp.eq.s32.totalorder %v2704_v34, %v3755_v40  ;;  %vm1066_vm14 = vcmp.eq.s32.totalorder %v2704_v34, %v3763_v48 }
 0x14b   :  { %v1824_v8 = vadd.f32 %v1696_v31, %v1365_v29  ;;  %v1367_v20 = vadd.f32 %v1239_v61, %v907_v52  ;;  %v445_v10 = vsel %vm275_vm12, %v3751_v23, 0.0  ;;  %v776_v17 = vsel %vm606_vm13, %v3759_v47, 0.0  ;;  %v4762_v31 = vld [vmem:[#allocation19_spill] sm:$0xff] }
 0x14c   :  { %v904_v30 = vadd.f32 %v776_v17, %v445_v10  ;;  %v1236_v53 = vsel %vm1066_vm14, %v3767_v49, 0.0  ;;  %vm1525_vm15 = vcmp.eq.s32.totalorder %v2704_v34, %v3773_v54  ;;  %vm277_vm0 = vcmp.eq.s32.totalorder %v2704_v34, %v3786_v45 }
 0x14d   :  { %2030 = vmatprep.subr.mxu0 %v1824_v8  ;;  %v1826_v27 = vadd.f32 %v1698_v7, %v1367_v20  ;;  %v1695_v43 = vsel %vm1525_vm15, %v3777_v59, 0.0  ;;  %v447_v26 = vsel %vm277_vm0, %v3797_v37, 0.0  ;;  %vm608_vm1 = vcmp.eq.s32.totalorder %v2704_v34, %v3801_v3 }
 0x14e   :  { %v1364_v21 = vadd.f32 %v1236_v53, %v904_v30  ;;  %v778_v24 = vsel %vm608_vm1, %v3805_v6, 0.0  ;;  %vm1068_vm2 = vcmp.eq.s32.totalorder %v2704_v34, %v3809_v15  ;;  %vm1527_vm3 = vcmp.eq.s32.totalorder %v2704_v34, %v3818_v9 }
 0x14f   :  { %2101 = vmatprep.subr.mxu1 %v1826_v27  ;;  %v906_v33 = vadd.f32 %v778_v24, %v447_v26  ;;  %v1238_v55 = vsel %vm1068_vm2, %v3813_v1, 0.0  ;;  %v1697_v0 = vsel %vm1527_vm3, %v3822_v4, 0.0  ;;  %vm268_vm4 = vcmp.eq.s32.totalorder %v4762_v31, %v3659_v46 }
 0x150   :  { %v1823_v2 = vadd.f32 %v1695_v43, %v1364_v21  ;;  %v438_v58 = vsel %vm268_vm4, %v3663_v50, 0.0  ;;  %vm599_vm5 = vcmp.eq.s32.totalorder %v4762_v31, %v3667_v51  ;;  %vm1059_vm7 = vcmp.eq.s32.totalorder %v4762_v31, %v3675_v18 }
 0x151   :  { %v1366_v25 = vadd.f32 %v1238_v55, %v906_v33  ;;  %v769_v34 = vsel %vm599_vm5, %v3671_v38, 0.0  ;;  %v1229_v29 = vsel %vm1059_vm7, %v3679_v28, 0.0  ;;  %vm1518_vm8 = vcmp.eq.s32.totalorder %v4762_v31, %v3683_v22 }
 0x152   :  { %2031 = vmatpush1.msra.mxu0 %v1823_v2  ;;  %v897_v52 = vadd.f32 %v769_v34, %v438_v58  ;;  %v1688_v61 = vsel %vm1518_vm8, %v3691_v60, 0.0  ;;  %vm270_vm6 = vcmp.eq.s32.totalorder %v4762_v31, %v3703_v42  ;;  %vm601_vm9 = vcmp.eq.s32.totalorder %v4762_v31, %v3711_v63 }
 0x153   :  { %v1825_v7 = vadd.f32 %v1697_v0, %v1366_v25  ;;  %v440_v8 = vsel %vm270_vm6, %v3707_v57, 0.0  ;;  %v771_v20 = vsel %vm601_vm9, %v3715_v11, 0.0  ;;  %vm1061_vm10 = vcmp.eq.s32.totalorder %v4762_v31, %v3719_v5 }
 0x154   :  { %v1357_v10 = vadd.f32 %v1229_v29, %v897_v52  ;;  %v899_v17 = vadd.f32 %v771_v20, %v440_v8  ;;  %v1231_v30 = vsel %vm1061_vm10, %v3725_v12, 0.0  ;;  %vm1520_vm11 = vcmp.eq.s32.totalorder %v4762_v31, %v3729_v13 }
 0x155   :  { %2102 = vmatpush1.msra.mxu1 %v1825_v7  ;;  %v1690_v53 = vsel %vm1520_vm11, %v3738_v16, 0.0  ;;  %vm267_vm12 = vcmp.eq.s32.totalorder %v4762_v31, %v3747_v19  ;;  %vm598_vm13 = vcmp.eq.s32.totalorder %v4762_v31, %v3755_v40  ;;  %vm1058_vm14 = vcmp.eq.s32.totalorder %v4762_v31, %v3763_v48 }
 0x156   :  { %v1816_v27 = vadd.f32 %v1688_v61, %v1357_v10  ;;  %v1359_v43 = vadd.f32 %v1231_v30, %v899_v17  ;;  %v437_v26 = vsel %vm267_vm12, %v3751_v23, 0.0  ;;  %v768_v21 = vsel %vm598_vm13, %v3759_v47, 0.0  ;;  %v4763_v61 = vld [vmem:[#allocation20_spill] sm:$0xff] }
 0x157   :  { %v896_v24 = vadd.f32 %v768_v21, %v437_v26  ;;  %v1228_v33 = vsel %vm1058_vm14, %v3767_v49, 0.0  ;;  %vm1517_vm15 = vcmp.eq.s32.totalorder %v4762_v31, %v3773_v54  ;;  %vm269_vm0 = vcmp.eq.s32.totalorder %v4762_v31, %v3786_v45 }
 0x158   :  { %2032 = vmatprep.subr.mxu0 %v1816_v27  ;;  %v1818_v55 = vadd.f32 %v1690_v53, %v1359_v43  ;;  %v1687_v0 = vsel %vm1517_vm15, %v3777_v59, 0.0  ;;  %v439_v2 = vsel %vm269_vm0, %v3797_v37, 0.0  ;;  %vm600_vm1 = vcmp.eq.s32.totalorder %v4762_v31, %v3801_v3 }
 0x159   :  { %v1356_v58 = vadd.f32 %v1228_v33, %v896_v24  ;;  %v770_v25 = vsel %vm600_vm1, %v3805_v6, 0.0  ;;  %vm1060_vm2 = vcmp.eq.s32.totalorder %v4762_v31, %v3809_v15  ;;  %vm1519_vm3 = vcmp.eq.s32.totalorder %v4762_v31, %v3818_v9 }
 0x15a   :  { %2103 = vmatprep.subr.mxu1 %v1818_v55  ;;  %v898_v34 = vadd.f32 %v770_v25, %v439_v2  ;;  %v1230_v29 = vsel %vm1060_vm2, %v3813_v1, 0.0  ;;  %v1689_v52 = vsel %vm1519_vm3, %v3822_v4, 0.0  ;;  %vm260_vm4 = vcmp.eq.s32.totalorder %v4763_v61, %v3659_v46 }
 0x15b   :  { %v1815_v7 = vadd.f32 %v1687_v0, %v1356_v58  ;;  %v430_v8 = vsel %vm260_vm4, %v3663_v50, 0.0  ;;  %vm591_vm5 = vcmp.eq.s32.totalorder %v4763_v61, %v3667_v51  ;;  %vm1051_vm7 = vcmp.eq.s32.totalorder %v4763_v61, %v3675_v18 }
 0x15c   :  { %v1358_v20 = vadd.f32 %v1230_v29, %v898_v34  ;;  %v761_v31 = vsel %vm591_vm5, %v3671_v38, 0.0  ;;  %v1221_v10 = vsel %vm1051_vm7, %v3679_v28, 0.0  ;;  %vm1510_vm8 = vcmp.eq.s32.totalorder %v4763_v61, %v3683_v22 }
 0x15d   :  { %2033 = vmatpush1.msra.mxu0 %v1815_v7  ;;  %v889_v17 = vadd.f32 %v761_v31, %v430_v8  ;;  %v1680_v30 = vsel %vm1510_vm8, %v3691_v60, 0.0  ;;  %vm262_vm6 = vcmp.eq.s32.totalorder %v4763_v61, %v3703_v42  ;;  %vm593_vm9 = vcmp.eq.s32.totalorder %v4763_v61, %v3711_v63 }
 0x15e   :  { %v1817_v53 = vadd.f32 %v1689_v52, %v1358_v20  ;;  %v432_v27 = vsel %vm262_vm6, %v3707_v57, 0.0  ;;  %v763_v43 = vsel %vm593_vm9, %v3715_v11, 0.0  ;;  %vm1053_vm10 = vcmp.eq.s32.totalorder %v4763_v61, %v3719_v5 }
 0x15f   :  { %v1349_v26 = vadd.f32 %v1221_v10, %v889_v17  ;;  %v891_v21 = vadd.f32 %v763_v43, %v432_v27  ;;  %v1223_v24 = vsel %vm1053_vm10, %v3725_v12, 0.0  ;;  %vm1512_vm11 = vcmp.eq.s32.totalorder %v4763_v61, %v3729_v13 }
 0x160   :  { %2104 = vmatpush1.msra.mxu1 %v1817_v53  ;;  %v1682_v33 = vsel %vm1512_vm11, %v3738_v16, 0.0  ;;  %vm259_vm12 = vcmp.eq.s32.totalorder %v4763_v61, %v3747_v19  ;;  %vm590_vm13 = vcmp.eq.s32.totalorder %v4763_v61, %v3755_v40  ;;  %vm1050_vm14 = vcmp.eq.s32.totalorder %v4763_v61, %v3763_v48 }
 0x161   :  { %v1808_v55 = vadd.f32 %v1680_v30, %v1349_v26  ;;  %v1351_v0 = vadd.f32 %v1223_v24, %v891_v21  ;;  %v429_v2 = vsel %vm259_vm12, %v3751_v23, 0.0  ;;  %v760_v58 = vsel %vm590_vm13, %v3759_v47, 0.0  ;;  %v4764_v30 = vld [vmem:[#allocation21_spill] sm:$0xff] }
 0x162   :  { %v888_v25 = vadd.f32 %v760_v58, %v429_v2  ;;  %v1220_v34 = vsel %vm1050_vm14, %v3767_v49, 0.0  ;;  %vm1509_vm15 = vcmp.eq.s32.totalorder %v4763_v61, %v3773_v54  ;;  %vm261_vm0 = vcmp.eq.s32.totalorder %v4763_v61, %v3786_v45 }
 0x163   :  { %2034 = vmatprep.subr.mxu0 %v1808_v55  ;;  %v1810_v29 = vadd.f32 %v1682_v33, %v1351_v0  ;;  %v1679_v52 = vsel %vm1509_vm15, %v3777_v59, 0.0  ;;  %v431_v7 = vsel %vm261_vm0, %v3797_v37, 0.0  ;;  %vm592_vm1 = vcmp.eq.s32.totalorder %v4763_v61, %v3801_v3 }
 0x164   :  { %v1348_v8 = vadd.f32 %v1220_v34, %v888_v25  ;;  %v762_v20 = vsel %vm592_vm1, %v3805_v6, 0.0  ;;  %vm1052_vm2 = vcmp.eq.s32.totalorder %v4763_v61, %v3809_v15  ;;  %vm1511_vm3 = vcmp.eq.s32.totalorder %v4763_v61, %v3818_v9 }
 0x165   :  { %2105 = vmatprep.subr.mxu1 %v1810_v29  ;;  %v890_v31 = vadd.f32 %v762_v20, %v431_v7  ;;  %v1222_v10 = vsel %vm1052_vm2, %v3813_v1, 0.0  ;;  %v1681_v17 = vsel %vm1511_vm3, %v3822_v4, 0.0  ;;  %vm252_vm4 = vcmp.eq.s32.totalorder %v4764_v30, %v3659_v46 }
 0x166   :  { %v1807_v53 = vadd.f32 %v1679_v52, %v1348_v8  ;;  %v422_v27 = vsel %vm252_vm4, %v3663_v50, 0.0  ;;  %vm583_vm5 = vcmp.eq.s32.totalorder %v4764_v30, %v3667_v51  ;;  %vm1043_vm7 = vcmp.eq.s32.totalorder %v4764_v30, %v3675_v18 }
 0x167   :  { %v1350_v43 = vadd.f32 %v1222_v10, %v890_v31  ;;  %v753_v61 = vsel %vm583_vm5, %v3671_v38, 0.0  ;;  %v1213_v26 = vsel %vm1043_vm7, %v3679_v28, 0.0  ;;  %vm1502_vm8 = vcmp.eq.s32.totalorder %v4764_v30, %v3683_v22 }
 0x168   :  { %2035 = vmatpush1.msra.mxu0 %v1807_v53  ;;  %v881_v21 = vadd.f32 %v753_v61, %v422_v27  ;;  %v1672_v24 = vsel %vm1502_vm8, %v3691_v60, 0.0  ;;  %vm254_vm6 = vcmp.eq.s32.totalorder %v4764_v30, %v3703_v42  ;;  %vm585_vm9 = vcmp.eq.s32.totalorder %v4764_v30, %v3711_v63 }
 0x169   :  { %v1809_v33 = vadd.f32 %v1681_v17, %v1350_v43  ;;  %v424_v55 = vsel %vm254_vm6, %v3707_v57, 0.0  ;;  %v755_v0 = vsel %vm585_vm9, %v3715_v11, 0.0  ;;  %vm1045_vm10 = vcmp.eq.s32.totalorder %v4764_v30, %v3719_v5 }
 0x16a   :  { %v1341_v2 = vadd.f32 %v1213_v26, %v881_v21  ;;  %v883_v58 = vadd.f32 %v755_v0, %v424_v55  ;;  %v1215_v25 = vsel %vm1045_vm10, %v3725_v12, 0.0  ;;  %vm1504_vm11 = vcmp.eq.s32.totalorder %v4764_v30, %v3729_v13 }
 0x16b   :  { %2106 = vmatpush1.msra.mxu1 %v1809_v33  ;;  %v1674_v34 = vsel %vm1504_vm11, %v3738_v16, 0.0  ;;  %vm251_vm12 = vcmp.eq.s32.totalorder %v4764_v30, %v3747_v19  ;;  %vm582_vm13 = vcmp.eq.s32.totalorder %v4764_v30, %v3755_v40  ;;  %vm1042_vm14 = vcmp.eq.s32.totalorder %v4764_v30, %v3763_v48 }
 0x16c   :  { %v1800_v29 = vadd.f32 %v1672_v24, %v1341_v2  ;;  %v1343_v52 = vadd.f32 %v1215_v25, %v883_v58  ;;  %v421_v7 = vsel %vm251_vm12, %v3751_v23, 0.0  ;;  %v752_v8 = vsel %vm582_vm13, %v3759_v47, 0.0  ;;  %v4765_v24 = vld [vmem:[#allocation22_spill] sm:$0xff] }
 0x16d   :  { %v880_v20 = vadd.f32 %v752_v8, %v421_v7  ;;  %v1212_v31 = vsel %vm1042_vm14, %v3767_v49, 0.0  ;;  %vm1501_vm15 = vcmp.eq.s32.totalorder %v4764_v30, %v3773_v54  ;;  %vm253_vm0 = vcmp.eq.s32.totalorder %v4764_v30, %v3786_v45 }
 0x16e   :  { %2036 = vmatprep.subr.mxu0 %v1800_v29  ;;  %v1802_v10 = vadd.f32 %v1674_v34, %v1343_v52  ;;  %v1671_v17 = vsel %vm1501_vm15, %v3777_v59, 0.0  ;;  %v423_v53 = vsel %vm253_vm0, %v3797_v37, 0.0  ;;  %vm584_vm1 = vcmp.eq.s32.totalorder %v4764_v30, %v3801_v3 }
 0x16f   :  { %v1340_v27 = vadd.f32 %v1212_v31, %v880_v20  ;;  %v754_v43 = vsel %vm584_vm1, %v3805_v6, 0.0  ;;  %vm1044_vm2 = vcmp.eq.s32.totalorder %v4764_v30, %v3809_v15  ;;  %vm1503_vm3 = vcmp.eq.s32.totalorder %v4764_v30, %v3818_v9 }
 0x170   :  { %2107 = vmatprep.subr.mxu1 %v1802_v10  ;;  %v882_v61 = vadd.f32 %v754_v43, %v423_v53  ;;  %v1214_v26 = vsel %vm1044_vm2, %v3813_v1, 0.0  ;;  %v1673_v21 = vsel %vm1503_vm3, %v3822_v4, 0.0  ;;  %vm244_vm4 = vcmp.eq.s32.totalorder %v4765_v24, %v3659_v46 }
 0x171   :  { %v1799_v33 = vadd.f32 %v1671_v17, %v1340_v27  ;;  %v414_v55 = vsel %vm244_vm4, %v3663_v50, 0.0  ;;  %vm575_vm5 = vcmp.eq.s32.totalorder %v4765_v24, %v3667_v51  ;;  %vm1035_vm7 = vcmp.eq.s32.totalorder %v4765_v24, %v3675_v18 }
 0x172   :  { %v1342_v0 = vadd.f32 %v1214_v26, %v882_v61  ;;  %v745_v30 = vsel %vm575_vm5, %v3671_v38, 0.0  ;;  %v1205_v2 = vsel %vm1035_vm7, %v3679_v28, 0.0  ;;  %vm1494_vm8 = vcmp.eq.s32.totalorder %v4765_v24, %v3683_v22 }
 0x173   :  { %2037 = vmatpush1.msra.mxu0 %v1799_v33  ;;  %v873_v58 = vadd.f32 %v745_v30, %v414_v55  ;;  %v1664_v25 = vsel %vm1494_vm8, %v3691_v60, 0.0  ;;  %vm246_vm6 = vcmp.eq.s32.totalorder %v4765_v24, %v3703_v42  ;;  %vm577_vm9 = vcmp.eq.s32.totalorder %v4765_v24, %v3711_v63 }
 0x174   :  { %v1801_v34 = vadd.f32 %v1673_v21, %v1342_v0  ;;  %v416_v29 = vsel %vm246_vm6, %v3707_v57, 0.0  ;;  %v747_v52 = vsel %vm577_vm9, %v3715_v11, 0.0  ;;  %vm1037_vm10 = vcmp.eq.s32.totalorder %v4765_v24, %v3719_v5 }
 0x175   :  { %v1333_v7 = vadd.f32 %v1205_v2, %v873_v58  ;;  %v875_v8 = vadd.f32 %v747_v52, %v416_v29  ;;  %v1207_v20 = vsel %vm1037_vm10, %v3725_v12, 0.0  ;;  %vm1496_vm11 = vcmp.eq.s32.totalorder %v4765_v24, %v3729_v13 }
 0x176   :  { %2108 = vmatpush1.msra.mxu1 %v1801_v34  ;;  %v1666_v31 = vsel %vm1496_vm11, %v3738_v16, 0.0  ;;  %vm243_vm12 = vcmp.eq.s32.totalorder %v4765_v24, %v3747_v19  ;;  %vm574_vm13 = vcmp.eq.s32.totalorder %v4765_v24, %v3755_v40  ;;  %vm1034_vm14 = vcmp.eq.s32.totalorder %v4765_v24, %v3763_v48 }
 0x177   :  { %v1792_v10 = vadd.f32 %v1664_v25, %v1333_v7  ;;  %v1335_v17 = vadd.f32 %v1207_v20, %v875_v8  ;;  %v413_v53 = vsel %vm243_vm12, %v3751_v23, 0.0  ;;  %v744_v27 = vsel %vm574_vm13, %v3759_v47, 0.0 }
 0x178   :  { %v872_v43 = vadd.f32 %v744_v27, %v413_v53  ;;  %v1204_v61 = vsel %vm1034_vm14, %v3767_v49, 0.0  ;;  %vm1493_vm15 = vcmp.eq.s32.totalorder %v4765_v24, %v3773_v54  ;;  %vm245_vm0 = vcmp.eq.s32.totalorder %v4765_v24, %v3786_v45 }
 0x179   :  { %2038 = vmatprep.subr.mxu0 %v1792_v10  ;;  %v1794_v26 = vadd.f32 %v1666_v31, %v1335_v17  ;;  %v1663_v21 = vsel %vm1493_vm15, %v3777_v59, 0.0  ;;  %v415_v33 = vsel %vm245_vm0, %v3797_v37, 0.0  ;;  %vm576_vm1 = vcmp.eq.s32.totalorder %v4765_v24, %v3801_v3 }
 0x17a   :  { %v1332_v55 = vadd.f32 %v1204_v61, %v872_v43  ;;  %v746_v0 = vsel %vm576_vm1, %v3805_v6, 0.0  ;;  %vm1036_vm2 = vcmp.eq.s32.totalorder %v4765_v24, %v3809_v15  ;;  %vm1495_vm3 = vcmp.eq.s32.totalorder %v4765_v24, %v3818_v9 }
 0x17b   :  { %2109 = vmatprep.subr.mxu1 %v1794_v26  ;;  %v874_v30 = vadd.f32 %v746_v0, %v415_v33  ;;  %v1206_v2 = vsel %vm1036_vm2, %v3813_v1, 0.0  ;;  %v1665_v58 = vsel %vm1495_vm3, %v3822_v4, 0.0  ;;  %vm236_vm4 = vcmp.eq.s32.totalorder %v3391_v35, %v3659_v46 }
 0x17c   :  { %v1791_v25 = vadd.f32 %v1663_v21, %v1332_v55  ;;  %v406_v34 = vsel %vm236_vm4, %v3663_v50, 0.0  ;;  %vm567_vm5 = vcmp.eq.s32.totalorder %v3391_v35, %v3667_v51  ;;  %vm1027_vm7 = vcmp.eq.s32.totalorder %v3391_v35, %v3675_v18 }
 0x17d   :  { %v1334_v29 = vadd.f32 %v1206_v2, %v874_v30  ;;  %v737_v24 = vsel %vm567_vm5, %v3671_v38, 0.0  ;;  %v1197_v52 = vsel %vm1027_vm7, %v3679_v28, 0.0  ;;  %vm1486_vm8 = vcmp.eq.s32.totalorder %v3391_v35, %v3683_v22 }
 0x17e   :  { %2039 = vmatpush1.msra.mxu0 %v1791_v25  ;;  %v865_v7 = vadd.f32 %v737_v24, %v406_v34  ;;  %v1656_v8 = vsel %vm1486_vm8, %v3691_v60, 0.0  ;;  %vm238_vm6 = vcmp.eq.s32.totalorder %v3391_v35, %v3703_v42  ;;  %vm569_vm9 = vcmp.eq.s32.totalorder %v3391_v35, %v3711_v63 }
 0x17f   :  { %v1793_v20 = vadd.f32 %v1665_v58, %v1334_v29  ;;  %v408_v31 = vsel %vm238_vm6, %v3707_v57, 0.0  ;;  %v739_v10 = vsel %vm569_vm9, %v3715_v11, 0.0  ;;  %vm1029_vm10 = vcmp.eq.s32.totalorder %v3391_v35, %v3719_v5 }
 0x180   :  { %v1325_v17 = vadd.f32 %v1197_v52, %v865_v7  ;;  %v867_v53 = vadd.f32 %v739_v10, %v408_v31  ;;  %v1199_v27 = vsel %vm1029_vm10, %v3725_v12, 0.0  ;;  %vm1488_vm11 = vcmp.eq.s32.totalorder %v3391_v35, %v3729_v13 }
 0x181   :  { %2110 = vmatpush1.msra.mxu1 %v1793_v20  ;;  %v1658_v43 = vsel %vm1488_vm11, %v3738_v16, 0.0  ;;  %vm235_vm12 = vcmp.eq.s32.totalorder %v3391_v35, %v3747_v19  ;;  %vm566_vm13 = vcmp.eq.s32.totalorder %v3391_v35, %v3755_v40  ;;  %vm1026_vm14 = vcmp.eq.s32.totalorder %v3391_v35, %v3763_v48 }
 0x182   :  { %v1784_v61 = vadd.f32 %v1656_v8, %v1325_v17  ;;  %v1327_v26 = vadd.f32 %v1199_v27, %v867_v53  ;;  %v405_v21 = vsel %vm235_vm12, %v3751_v23, 0.0  ;;  %v736_v33 = vsel %vm566_vm13, %v3759_v47, 0.0 }
 0x183   :  { %v864_v55 = vadd.f32 %v736_v33, %v405_v21  ;;  %v1196_v0 = vsel %vm1026_vm14, %v3767_v49, 0.0  ;;  %vm1485_vm15 = vcmp.eq.s32.totalorder %v3391_v35, %v3773_v54  ;;  %vm237_vm0 = vcmp.eq.s32.totalorder %v3391_v35, %v3786_v45 }
 0x184   :  { %2040 = vmatprep.subr.mxu0 %v1784_v61  ;;  %v1786_v30 = vadd.f32 %v1658_v43, %v1327_v26  ;;  %v1655_v2 = vsel %vm1485_vm15, %v3777_v59, 0.0  ;;  %v407_v58 = vsel %vm237_vm0, %v3797_v37, 0.0  ;;  %vm568_vm1 = vcmp.eq.s32.totalorder %v3391_v35, %v3801_v3 }
 0x185   :  { %v1324_v25 = vadd.f32 %v1196_v0, %v864_v55  ;;  %v738_v34 = vsel %vm568_vm1, %v3805_v6, 0.0  ;;  %vm1028_vm2 = vcmp.eq.s32.totalorder %v3391_v35, %v3809_v15  ;;  %vm1487_vm3 = vcmp.eq.s32.totalorder %v3391_v35, %v3818_v9 }
 0x186   :  { %2111 = vmatprep.subr.mxu1 %v1786_v30  ;;  %v866_v29 = vadd.f32 %v738_v34, %v407_v58  ;;  %v1198_v24 = vsel %vm1028_vm2, %v3813_v1, 0.0  ;;  %v1657_v52 = vsel %vm1487_vm3, %v3822_v4, 0.0  ;;  %vm228_vm4 = vcmp.eq.s32.totalorder %v3394_v62, %v3659_v46 }
 0x187   :  { %v1783_v7 = vadd.f32 %v1655_v2, %v1324_v25  ;;  %v398_v8 = vsel %vm228_vm4, %v3663_v50, 0.0  ;;  %vm559_vm5 = vcmp.eq.s32.totalorder %v3394_v62, %v3667_v51  ;;  %vm1019_vm7 = vcmp.eq.s32.totalorder %v3394_v62, %v3675_v18 }
 0x188   :  { %v1326_v20 = vadd.f32 %v1198_v24, %v866_v29  ;;  %v729_v35 = vsel %vm559_vm5, %v3671_v38, 0.0  ;;  %v1189_v31 = vsel %vm1019_vm7, %v3679_v28, 0.0  ;;  %vm1478_vm8 = vcmp.eq.s32.totalorder %v3394_v62, %v3683_v22 }
 0x189   :  { %2041 = vmatpush1.msra.mxu0 %v1783_v7  ;;  %v857_v10 = vadd.f32 %v729_v35, %v398_v8  ;;  %v1648_v17 = vsel %vm1478_vm8, %v3691_v60, 0.0  ;;  %vm230_vm6 = vcmp.eq.s32.totalorder %v3394_v62, %v3703_v42  ;;  %vm561_vm9 = vcmp.eq.s32.totalorder %v3394_v62, %v3711_v63 }
 0x18a   :  { %v1785_v53 = vadd.f32 %v1657_v52, %v1326_v20  ;;  %v400_v27 = vsel %vm230_vm6, %v3707_v57, 0.0  ;;  %v731_v43 = vsel %vm561_vm9, %v3715_v11, 0.0  ;;  %vm1021_vm10 = vcmp.eq.s32.totalorder %v3394_v62, %v3719_v5 }
 0x18b   :  { %v1317_v61 = vadd.f32 %v1189_v31, %v857_v10  ;;  %v859_v26 = vadd.f32 %v731_v43, %v400_v27  ;;  %v1191_v21 = vsel %vm1021_vm10, %v3725_v12, 0.0  ;;  %vm1480_vm11 = vcmp.eq.s32.totalorder %v3394_v62, %v3729_v13 }
 0x18c   :  { %2112 = vmatpush1.msra.mxu1 %v1785_v53  ;;  %v1650_v33 = vsel %vm1480_vm11, %v3738_v16, 0.0  ;;  %vm227_vm12 = vcmp.eq.s32.totalorder %v3394_v62, %v3747_v19  ;;  %vm558_vm13 = vcmp.eq.s32.totalorder %v3394_v62, %v3755_v40  ;;  %vm1018_vm14 = vcmp.eq.s32.totalorder %v3394_v62, %v3763_v48 }
 0x18d   :  { %v1776_v55 = vadd.f32 %v1648_v17, %v1317_v61  ;;  %v1319_v0 = vadd.f32 %v1191_v21, %v859_v26  ;;  %v397_v30 = vsel %vm227_vm12, %v3751_v23, 0.0  ;;  %v728_v2 = vsel %vm558_vm13, %v3759_v47, 0.0 }
 0x18e   :  { %v856_v58 = vadd.f32 %v728_v2, %v397_v30  ;;  %v1188_v25 = vsel %vm1018_vm14, %v3767_v49, 0.0  ;;  %vm1477_vm15 = vcmp.eq.s32.totalorder %v3394_v62, %v3773_v54  ;;  %vm229_vm0 = vcmp.eq.s32.totalorder %v3394_v62, %v3786_v45 }
 0x18f   :  { %2042 = vmatprep.subr.mxu0 %v1776_v55  ;;  %v1778_v34 = vadd.f32 %v1650_v33, %v1319_v0  ;;  %v1647_v29 = vsel %vm1477_vm15, %v3777_v59, 0.0  ;;  %v399_v24 = vsel %vm229_vm0, %v3797_v37, 0.0  ;;  %vm560_vm1 = vcmp.eq.s32.totalorder %v3394_v62, %v3801_v3 }
 0x190   :  { %v1316_v52 = vadd.f32 %v1188_v25, %v856_v58  ;;  %v730_v7 = vsel %vm560_vm1, %v3805_v6, 0.0  ;;  %vm1020_vm2 = vcmp.eq.s32.totalorder %v3394_v62, %v3809_v15  ;;  %vm1479_vm3 = vcmp.eq.s32.totalorder %v3394_v62, %v3818_v9 }
 0x191   :  { %2113 = vmatprep.subr.mxu1 %v1778_v34  ;;  %v858_v8 = vadd.f32 %v730_v7, %v399_v24  ;;  %v1190_v20 = vsel %vm1020_vm2, %v3813_v1, 0.0  ;;  %v1649_v35 = vsel %vm1479_vm3, %v3822_v4, 0.0  ;;  %vm220_vm4 = vcmp.eq.s32.totalorder %v3397_v41, %v3659_v46 }
 0x192   :  { %v1775_v31 = vadd.f32 %v1647_v29, %v1316_v52  ;;  %v390_v10 = vsel %vm220_vm4, %v3663_v50, 0.0  ;;  %vm551_vm5 = vcmp.eq.s32.totalorder %v3397_v41, %v3667_v51  ;;  %vm1011_vm7 = vcmp.eq.s32.totalorder %v3397_v41, %v3675_v18 }
 0x193   :  { %v1318_v17 = vadd.f32 %v1190_v20, %v858_v8  ;;  %v721_v62 = vsel %vm551_vm5, %v3671_v38, 0.0  ;;  %v1181_v53 = vsel %vm1011_vm7, %v3679_v28, 0.0  ;;  %vm1470_vm8 = vcmp.eq.s32.totalorder %v3397_v41, %v3683_v22 }
 0x194   :  { %2043 = vmatpush1.msra.mxu0 %v1775_v31  ;;  %v849_v27 = vadd.f32 %v721_v62, %v390_v10  ;;  %v1640_v43 = vsel %vm1470_vm8, %v3691_v60, 0.0  ;;  %vm222_vm6 = vcmp.eq.s32.totalorder %v3397_v41, %v3703_v42  ;;  %vm553_vm9 = vcmp.eq.s32.totalorder %v3397_v41, %v3711_v63 }
 0x195   :  { %v1777_v61 = vadd.f32 %v1649_v35, %v1318_v17  ;;  %v392_v26 = vsel %vm222_vm6, %v3707_v57, 0.0  ;;  %v723_v21 = vsel %vm553_vm9, %v3715_v11, 0.0  ;;  %vm1013_vm10 = vcmp.eq.s32.totalorder %v3397_v41, %v3719_v5 }
 0x196   :  { %v1309_v33 = vadd.f32 %v1181_v53, %v849_v27  ;;  %v851_v55 = vadd.f32 %v723_v21, %v392_v26  ;;  %v1183_v0 = vsel %vm1013_vm10, %v3725_v12, 0.0  ;;  %vm1472_vm11 = vcmp.eq.s32.totalorder %v3397_v41, %v3729_v13 }
 0x197   :  { %2114 = vmatpush1.msra.mxu1 %v1777_v61  ;;  %v1642_v30 = vsel %vm1472_vm11, %v3738_v16, 0.0  ;;  %vm219_vm12 = vcmp.eq.s32.totalorder %v3397_v41, %v3747_v19  ;;  %vm550_vm13 = vcmp.eq.s32.totalorder %v3397_v41, %v3755_v40  ;;  %vm1010_vm14 = vcmp.eq.s32.totalorder %v3397_v41, %v3763_v48 }
 0x198   :  { %v1768_v2 = vadd.f32 %v1640_v43, %v1309_v33  ;;  %v1311_v58 = vadd.f32 %v1183_v0, %v851_v55  ;;  %v389_v25 = vsel %vm219_vm12, %v3751_v23, 0.0  ;;  %v720_v34 = vsel %vm550_vm13, %v3759_v47, 0.0 }
 0x199   :  { %v848_v29 = vadd.f32 %v720_v34, %v389_v25  ;;  %v1180_v24 = vsel %vm1010_vm14, %v3767_v49, 0.0  ;;  %vm1469_vm15 = vcmp.eq.s32.totalorder %v3397_v41, %v3773_v54  ;;  %vm221_vm0 = vcmp.eq.s32.totalorder %v3397_v41, %v3786_v45 }
 0x19a   :  { %2044 = vmatprep.subr.mxu0 %v1768_v2  ;;  %v1770_v52 = vadd.f32 %v1642_v30, %v1311_v58  ;;  %v1639_v7 = vsel %vm1469_vm15, %v3777_v59, 0.0  ;;  %v391_v8 = vsel %vm221_vm0, %v3797_v37, 0.0  ;;  %vm552_vm1 = vcmp.eq.s32.totalorder %v3397_v41, %v3801_v3 }
 0x19b   :  { %v1308_v20 = vadd.f32 %v1180_v24, %v848_v29  ;;  %v722_v35 = vsel %vm552_vm1, %v3805_v6, 0.0  ;;  %vm1012_vm2 = vcmp.eq.s32.totalorder %v3397_v41, %v3809_v15  ;;  %vm1471_vm3 = vcmp.eq.s32.totalorder %v3397_v41, %v3818_v9 }
 0x19c   :  { %2115 = vmatprep.subr.mxu1 %v1770_v52  ;;  %v850_v31 = vadd.f32 %v722_v35, %v391_v8  ;;  %v1182_v10 = vsel %vm1012_vm2, %v3813_v1, 0.0  ;;  %v1641_v17 = vsel %vm1471_vm3, %v3822_v4, 0.0  ;;  %vm212_vm4 = vcmp.eq.s32.totalorder %v3400_v44, %v3659_v46 }
 0x19d   :  { %v1767_v62 = vadd.f32 %v1639_v7, %v1308_v20  ;;  %v382_v53 = vsel %vm212_vm4, %v3663_v50, 0.0  ;;  %vm543_vm5 = vcmp.eq.s32.totalorder %v3400_v44, %v3667_v51  ;;  %vm1003_vm7 = vcmp.eq.s32.totalorder %v3400_v44, %v3675_v18 }
 0x19e   :  { %v1310_v27 = vadd.f32 %v1182_v10, %v850_v31  ;;  %v713_v41 = vsel %vm543_vm5, %v3671_v38, 0.0  ;;  %v1173_v43 = vsel %vm1003_vm7, %v3679_v28, 0.0  ;;  %vm1462_vm8 = vcmp.eq.s32.totalorder %v3400_v44, %v3683_v22 }
 0x19f   :  { %2045 = vmatpush1.msra.mxu0 %v1767_v62  ;;  %v841_v61 = vadd.f32 %v713_v41, %v382_v53  ;;  %v1632_v26 = vsel %vm1462_vm8, %v3691_v60, 0.0  ;;  %vm214_vm6 = vcmp.eq.s32.totalorder %v3400_v44, %v3703_v42  ;;  %vm545_vm9 = vcmp.eq.s32.totalorder %v3400_v44, %v3711_v63 }
 0x1a0   :  { %v1769_v21 = vadd.f32 %v1641_v17, %v1310_v27  ;;  %v384_v33 = vsel %vm214_vm6, %v3707_v57, 0.0  ;;  %v715_v55 = vsel %vm545_vm9, %v3715_v11, 0.0  ;;  %vm1005_vm10 = vcmp.eq.s32.totalorder %v3400_v44, %v3719_v5 }
 0x1a1   :  { %v1301_v0 = vadd.f32 %v1173_v43, %v841_v61  ;;  %v843_v30 = vadd.f32 %v715_v55, %v384_v33  ;;  %v1175_v2 = vsel %vm1005_vm10, %v3725_v12, 0.0  ;;  %vm1464_vm11 = vcmp.eq.s32.totalorder %v3400_v44, %v3729_v13 }
 0x1a2   :  { %2116 = vmatpush1.msra.mxu1 %v1769_v21  ;;  %v1634_v58 = vsel %vm1464_vm11, %v3738_v16, 0.0  ;;  %vm211_vm12 = vcmp.eq.s32.totalorder %v3400_v44, %v3747_v19  ;;  %vm542_vm13 = vcmp.eq.s32.totalorder %v3400_v44, %v3755_v40  ;;  %vm1002_vm14 = vcmp.eq.s32.totalorder %v3400_v44, %v3763_v48 }
 0x1a3   :  { %v1760_v25 = vadd.f32 %v1632_v26, %v1301_v0  ;;  %v1303_v34 = vadd.f32 %v1175_v2, %v843_v30  ;;  %v381_v29 = vsel %vm211_vm12, %v3751_v23, 0.0  ;;  %v712_v24 = vsel %vm542_vm13, %v3759_v47, 0.0 }
 0x1a4   :  { %v840_v52 = vadd.f32 %v712_v24, %v381_v29  ;;  %v1172_v7 = vsel %vm1002_vm14, %v3767_v49, 0.0  ;;  %vm1461_vm15 = vcmp.eq.s32.totalorder %v3400_v44, %v3773_v54  ;;  %vm213_vm0 = vcmp.eq.s32.totalorder %v3400_v44, %v3786_v45 }
 0x1a5   :  { %2046 = vmatprep.subr.mxu0 %v1760_v25  ;;  %v1762_v8 = vadd.f32 %v1634_v58, %v1303_v34  ;;  %v1631_v20 = vsel %vm1461_vm15, %v3777_v59, 0.0  ;;  %v383_v35 = vsel %vm213_vm0, %v3797_v37, 0.0  ;;  %vm544_vm1 = vcmp.eq.s32.totalorder %v3400_v44, %v3801_v3 }
 0x1a6   :  { %v1300_v31 = vadd.f32 %v1172_v7, %v840_v52  ;;  %v714_v10 = vsel %vm544_vm1, %v3805_v6, 0.0  ;;  %vm1004_vm2 = vcmp.eq.s32.totalorder %v3400_v44, %v3809_v15  ;;  %vm1463_vm3 = vcmp.eq.s32.totalorder %v3400_v44, %v3818_v9 }
 0x1a7   :  { %2117 = vmatprep.subr.mxu1 %v1762_v8  ;;  %v842_v17 = vadd.f32 %v714_v10, %v383_v35  ;;  %v1174_v62 = vsel %vm1004_vm2, %v3813_v1, 0.0  ;;  %v1633_v53 = vsel %vm1463_vm3, %v3822_v4, 0.0  ;;  %vm204_vm4 = vcmp.eq.s32.totalorder %v2671_v14, %v3659_v46  ;;  %v4767_v10 = vld [vmem:[#allocation18_spill] sm:$0xff] }
 0x1a8   :  { %v1759_v27 = vadd.f32 %v1631_v20, %v1300_v31  ;;  %v374_v41 = vsel %vm204_vm4, %v3663_v50, 0.0  ;;  %vm535_vm5 = vcmp.eq.s32.totalorder %v2671_v14, %v3667_v51  ;;  %vm995_vm7 = vcmp.eq.s32.totalorder %v2671_v14, %v3675_v18  ;;  %v4766_v20 = vld [vmem:[#allocation17_spill] sm:$0xff] }
 0x1a9   :  { %v1302_v43 = vadd.f32 %v1174_v62, %v842_v17  ;;  %v705_v44 = vsel %vm535_vm5, %v3671_v38, 0.0  ;;  %v1165_v61 = vsel %vm995_vm7, %v3679_v28, 0.0  ;;  %vm1454_vm8 = vcmp.eq.s32.totalorder %v2671_v14, %v3683_v22 }
 0x1aa   :  { %2047 = vmatpush1.msra.mxu0 %v1759_v27  ;;  %v833_v26 = vadd.f32 %v705_v44, %v374_v41  ;;  %v1624_v46 = vsel %vm1454_vm8, %v3691_v60, 0.0  ;;  %vm206_vm6 = vcmp.eq.s32.totalorder %v2671_v14, %v3703_v42  ;;  %vm537_vm9 = vcmp.eq.s32.totalorder %v2671_v14, %v3711_v63 }
 0x1ab   :  { %v1761_v50 = vadd.f32 %v1633_v53, %v1302_v43  ;;  %v376_v51 = vsel %vm206_vm6, %v3707_v57, 0.0  ;;  %v707_v38 = vsel %vm537_vm9, %v3715_v11, 0.0  ;;  %vm997_vm10 = vcmp.eq.s32.totalorder %v2671_v14, %v3719_v5  ;;  %v4768_v53 = vld [vmem:[#allocation15_spill] sm:$0xff]  ;;  %v4769_v43 = vld [vmem:[#allocation16_spill] sm:$0xff] }
 0x1ac   :  { %v1293_v18 = vadd.f32 %v1165_v61, %v833_v26  ;;  %v835_v28 = vadd.f32 %v707_v38, %v376_v51  ;;  %v1167_v22 = vsel %vm997_vm10, %v3725_v12, 0.0  ;;  %vm1456_vm11 = vcmp.eq.s32.totalorder %v2671_v14, %v3729_v13 }
 0x1ad   :  { %2118 = vmatpush1.msra.mxu1 %v1761_v50  ;;  %v1626_v60 = vsel %vm1456_vm11, %v3738_v16, 0.0  ;;  %vm203_vm12 = vcmp.eq.s32.totalorder %v2671_v14, %v3747_v19  ;;  %vm534_vm13 = vcmp.eq.s32.totalorder %v2671_v14, %v3755_v40  ;;  %vm994_vm14 = vcmp.eq.s32.totalorder %v2671_v14, %v3763_v48 }
 0x1ae   :  { %v1752_v42 = vadd.f32 %v1624_v46, %v1293_v18  ;;  %v1295_v57 = vadd.f32 %v1167_v22, %v835_v28  ;;  %v373_v63 = vsel %vm203_vm12, %v3751_v23, 0.0  ;;  %v704_v11 = vsel %vm534_vm13, %v3759_v47, 0.0 }
 0x1af   :  { %v832_v5 = vadd.f32 %v704_v11, %v373_v63  ;;  %v1164_v12 = vsel %vm994_vm14, %v3767_v49, 0.0  ;;  %vm1453_vm15 = vcmp.eq.s32.totalorder %v2671_v14, %v3773_v54  ;;  %vm205_vm0 = vcmp.eq.s32.totalorder %v2671_v14, %v3786_v45 }
 0x1b0   :  { %2048 = vmatprep.subr.mxu0 %v1752_v42  ;;  %v1754_v13 = vadd.f32 %v1626_v60, %v1295_v57  ;;  %v1623_v16 = vsel %vm1453_vm15, %v3777_v59, 0.0  ;;  %v375_v19 = vsel %vm205_vm0, %v3797_v37, 0.0  ;;  %vm536_vm1 = vcmp.eq.s32.totalorder %v2671_v14, %v3801_v3  ;;  %v2558_v37 = vld [vmem:[#allocation7] sm:$0xff] }
 0x1b1   :  { %v1292_v23 = vadd.f32 %v1164_v12, %v832_v5  ;;  %v706_v40 = vsel %vm536_vm1, %v3805_v6, 0.0  ;;  %vm996_vm2 = vcmp.eq.s32.totalorder %v2671_v14, %v3809_v15  ;;  %vm1455_vm3 = vcmp.eq.s32.totalorder %v2671_v14, %v3818_v9  ;;  %v57_v3 = vld [vmem:[#allocation6] ss:$4 sm:$0xff] }
 0x1b2   :  { %2119 = vmatprep.subr.mxu1 %v1754_v13  ;;  %v834_v47 = vadd.f32 %v706_v40, %v375_v19  ;;  %v1166_v48 = vsel %vm996_vm2, %v3813_v1, 0.0  ;;  %v1625_v54 = vsel %vm1455_vm3, %v3822_v4, 0.0  ;;  %v64_v6 = vstv %s50_s2 }
 0x1b3   :  { %v1751_v49 = vadd.f32 %v1623_v16, %v1292_v23  ;;  %v65_v15 = vsub.f32 %v57_v3, %v64_v6  ;;  %v66_v9 = vstv %s2538_s27 }
 0x1b4   :  { %v1294_v59 = vadd.f32 %v1166_v48, %v834_v47 }
 0x1b5   :  { %2049 = vmatpush1.msra.mxu0 %v1751_v49  ;;  %v67_v21 = vmul.f32 %v66_v9, %v65_v15  ;;  %v63_v9 = vld [vmem:[#allocation6 + $0x3] ss:$4 sm:$0xff] }
 0x1b6   :  { %v1753_v45 = vadd.f32 %v1625_v54, %v1294_v59  ;;  %2083 = vmatmul.mubr.f32.vlgmr.msra.gmra.mxu0 %v2558_v37 }
 0x1b7   :  { %v2542_v33 = vadd.f32 -1.0, %v67_v21 }
 0x1b8   :  { %2120 = vmatpush1.msra.mxu1 %v1753_v45 }
 0x1b9   :  { %2154 = vmatmul.mubr.f32.vlgmr.msra.gmra.mxu1 %v2558_v37  ;;  %v79_v55 = vadd.f32 1.0, %v2542_v33 }
 0x1bb   :  { %v80_v1 = vmul.f32 3.5, %v79_v55 }
 0x1bd   :  { %v85_v0 = vfloor.f32 %v80_v1  ;;  %v1942_v11 = vpop.f32.mrf.mxu0 }
 0x1bf   :  { %v2545_v30 = vtrunc.f32 %v85_v0  ;;  %v88_v58 = vsub.f32 %v80_v1, %v85_v0  ;;  %v1944_v49 = vpop.f32.mrf.mxu0 }
 0x1c0   :  { %v2013_v5 = vpop.f32.mrf.mxu1 }
 0x1c1   :  { %v2546_v4 = vcvt.f32.s32 %v2545_v30  ;;  %v96_v29 = vsub.f32 1.0, %v88_v58 }
 0x1c2   :  { %v2015_v54 = vpop.f32.mrf.mxu1 }
 0x1c3   :  { %v92_v2 = vadd.s32 1, %v2546_v4  ;;  %vm102_vm4 = vcmp.gt.s32.totalorder %v2546_v4, 0  ;;  %vm93_vm7 = vcmp.ge.s32.totalorder %v2546_v4, 0  ;;  %vm94_vm8 = vcmp.lt.s32.totalorder %v2546_v4, 8 }
 0x1c4   :  { %v103_v25 = vsel %vm102_vm4, %v2546_v4, 0  ;;  %vm95_vm12 = vmand %vm93_vm7, %vm94_vm8  ;;  %vm2411_vm7 = vcmp.gt.f32.partialorder %v63_v9, 0.5 }
 0x1c5   :  { %vm106_vm5 = vcmp.gt.s32.totalorder %v92_v2, 0  ;;  %vm98_vm6 = vcmp.ge.s32.totalorder %v92_v2, 0  ;;  %vm99_vm9 = vcmp.lt.s32.totalorder %v92_v2, 8  ;;  %vm104_vm10 = vcmp.lt.s32.totalorder %v103_v25, 7 }
 0x1c6   :  { %v107_v34 = vsel %vm106_vm5, %v92_v2, 0  ;;  %vm100_vm13 = vmand %vm98_vm6, %vm99_vm9  ;;  %v4553_v24 = vsel %vm104_vm10, %v103_v25, 7  ;;  %v4557_v7 = vsel %vm95_vm12, %v96_v29, 0.0 }
 0x1c7   :  { %vm108_vm11 = vcmp.lt.s32.totalorder %v107_v34, 7  ;;  %v4559_v8 = vsel %vm100_vm13, %v88_v58, 0.0  ;;  %v2163_v35 = vrot.slane %v4553_v24, %v4766_v20  ;;  %v2171_v17 = vrot.slane %v4553_v24, %v4767_v10 }
 0x1c8   :  { %v4555_v52 = vsel %vm108_vm11, %v107_v34, 7  ;;  %v2167_v27 = vrot.slane %v4553_v24, %v4768_v53  ;;  %v2175_v44 = vrot.slane %v4553_v24, %v4769_v43  ;;  %v2204_v26 = vrot.slane %v4557_v7, %v4766_v20 }
 0x1c9   :  { %v2252_v31 = vrot.slane %v4555_v52, %v4766_v20  ;;  %v2260_v62 = vrot.slane %v4555_v52, %v4767_v10  ;;  %v2256_v41 = vrot.slane %v4555_v52, %v4768_v53  ;;  %v2264_v61 = vrot.slane %v4555_v52, %v4769_v43 }
 0x1ca   :  { %v2293_v46 = vrot.slane %v4559_v8, %v4766_v20  ;;  %v2212_v50 = vrot.slane %v4557_v7, %v4767_v10  ;;  %v2301_v51 = vrot.slane %v4559_v8, %v4767_v10  ;;  %vm2192_vm14 = vcmp.eq.s32.totalorder %v2671_v14, %v2163_v35 }
 0x1cb   :  { %vm2281_vm15 = vcmp.eq.s32.totalorder %v2671_v14, %v2252_v31  ;;  %vm2194_vm0 = vcmp.eq.s32.totalorder %v2671_v14, %v2171_v17  ;;  %vm2283_vm1 = vcmp.eq.s32.totalorder %v2671_v14, %v2260_v62  ;;  %v2208_v38 = vrot.slane %v4557_v7, %v4768_v53 }
 0x1cc   :  { %v2297_v18 = vrot.slane %v4559_v8, %v4768_v53  ;;  %v2216_v28 = vrot.slane %v4557_v7, %v4769_v43  ;;  %v2305_v22 = vrot.slane %v4559_v8, %v4769_v43  ;;  %vm2193_vm2 = vcmp.eq.s32.totalorder %v2671_v14, %v2167_v27 }
 0x1cd   :  { %vm2282_vm3 = vcmp.eq.s32.totalorder %v2671_v14, %v2256_v41  ;;  %vm2195_vm4 = vcmp.eq.s32.totalorder %v2671_v14, %v2175_v44  ;;  %vm2284_vm5 = vcmp.eq.s32.totalorder %v2671_v14, %v2264_v61  ;;  %v2241_v60 = vsel %vm2192_vm14, %v2204_v26, 0.0 }
 0x1ce   :  { %v2330_v42 = vsel %vm2281_vm15, %v2293_v46, 0.0  ;;  %v2243_v57 = vsel %vm2194_vm0, %v2212_v50, 0.0  ;;  %v2332_v63 = vsel %vm2283_vm1, %v2301_v51, 0.0  ;;  %v2242_v12 = vsel %vm2193_vm2, %v2208_v38, 0.0 }
 0x1cf   :  { %v2331_v13 = vsel %vm2282_vm3, %v2297_v18, 0.0  ;;  %v2244_v16 = vsel %vm2195_vm4, %v2216_v28, 0.0  ;;  %v2333_v19 = vsel %vm2284_vm5, %v2305_v22, 0.0  ;;  %v2338_v23 = vadd.f32 %v2330_v42, %v2241_v60 }
 0x1d0   :  { %v2340_v40 = vadd.f32 %v2332_v63, %v2243_v57  ;;  %v2339_v47 = vadd.f32 %v2331_v13, %v2242_v12  ;;  %v2341_v48 = vadd.f32 %v2333_v19, %v2244_v16  ;;  %v2179_v4 = vrot.slane %v4553_v24, %v3652_v36 }
 0x1d1   :  { %v2346_v59 = vmul.f32 %v2338_v23, %v1942_v11  ;;  %v2268_v2 = vrot.slane %v4555_v52, %v3652_v36  ;;  %v2639_v58 = vmov 0   ;;  %v2183_v35 = vrot.slane %v4553_v24, %v3646_v56 }
 0x1d2   :  { %v2348_v45 = vmul.f32 %v2340_v40, %v2013_v5  ;;  %v2347_v37 = vmul.f32 %v2339_v47, %v1944_v49  ;;  %v2349_v3 = vmul.f32 %v2341_v48, %v2015_v54  ;;  %v4606_v25 = vsel %vm2411_vm7, 1, %v2639_v58 }
 0x1d3   :  { %v2354_v6 = vrot.slane %v2346_v59, 4  ;;  %v2272_v31 = vrot.slane %v4555_v52, %v3646_v56  ;;  %v2220_v17 = vrot.slane %v4557_v7, %v3652_v36  ;;  %v2309_v62 = vrot.slane %v4559_v8, %v3652_v36 }
 0x1d4   :  { %v2366_v15 = vrot.slane %v2348_v45, 4  ;;  %v2360_v21 = vrot.slane %v2347_v37, 4  ;;  %v2372_v33 = vrot.slane %v2349_v3, 4  ;;  %v2187_v27 = vrot.slane %v4553_v24, %v3655_v39 }
 0x1d5   :  { %v2355_v55 = vadd.f32 %v2354_v6, %v2346_v59  ;;  %v2276_v41 = vrot.slane %v4555_v52, %v3655_v39  ;;  %vm2196_vm8 = vcmp.eq.s32.totalorder %v2671_v14, %v2179_v4  ;;  %vm2285_vm6 = vcmp.eq.s32.totalorder %v2671_v14, %v2268_v2 }
 0x1d6   :  { %v2367_v1 = vadd.f32 %v2366_v15, %v2348_v45  ;;  %v2361_v0 = vadd.f32 %v2360_v21, %v2347_v37  ;;  %v2373_v30 = vadd.f32 %v2372_v33, %v2349_v3  ;;  %v2224_v26 = vrot.slane %v4557_v7, %v3646_v56 }
 0x1d7   :  { %v2356_v34 = vrot.slane %v2355_v55, 2  ;;  %v2313_v46 = vrot.slane %v4559_v8, %v3646_v56  ;;  %v2191_v50 = vrot.slane %v4553_v24, %v3649_v32  ;;  %v2280_v51 = vrot.slane %v4555_v52, %v3649_v32 }
 0x1d8   :  { %v2368_v29 = vrot.slane %v2367_v1, 2  ;;  %v2362_v44 = vrot.slane %v2361_v0, 2  ;;  %v2374_v61 = vrot.slane %v2373_v30, 2  ;;  %v2228_v38 = vrot.slane %v4557_v7, %v3655_v39 }
 0x1d9   :  { %v2317_v18 = vrot.slane %v4559_v8, %v3655_v39  ;;  %vm2197_vm9 = vcmp.eq.s32.totalorder %v2671_v14, %v2183_v35  ;;  %vm2286_vm10 = vcmp.eq.s32.totalorder %v2671_v14, %v2272_v31  ;;  %v2245_v28 = vsel %vm2196_vm8, %v2220_v17, 0.0 }
 0x1da   :  { %v2334_v22 = vsel %vm2285_vm6, %v2309_v62, 0.0  ;;  %vm2198_vm11 = vcmp.eq.s32.totalorder %v2671_v14, %v2187_v27  ;;  %vm2287_vm12 = vcmp.eq.s32.totalorder %v2671_v14, %v2276_v41  ;;  %v2363_v24 = vadd.f32 %v2362_v44, %v2361_v0 }
 0x1db   :  { %v2375_v60 = vadd.f32 %v2374_v61, %v2373_v30  ;;  %v2232_v52 = vrot.slane %v4557_v7, %v3649_v32  ;;  %v2321_v42 = vrot.slane %v4559_v8, %v3649_v32  ;;  %v2246_v57 = vsel %vm2197_vm9, %v2224_v26, 0.0 }
 0x1dc   :  { %v2335_v63 = vsel %vm2286_vm10, %v2313_v46, 0.0  ;;  %vm2199_vm13 = vcmp.eq.s32.totalorder %v2671_v14, %v2191_v50  ;;  %vm2288_vm14 = vcmp.eq.s32.totalorder %v2671_v14, %v2280_v51  ;;  %v2357_v11 = vadd.f32 %v2356_v34, %v2355_v55 }
 0x1dd   :  { %v2342_v5 = vadd.f32 %v2334_v22, %v2245_v28  ;;  %v2247_v12 = vsel %vm2198_vm11, %v2228_v38, 0.0  ;;  %v2336_v13 = vsel %vm2287_vm12, %v2317_v18, 0.0  ;;  %v2369_v16 = vadd.f32 %v2368_v29, %v2367_v1 }
 0x1de   :  { %v2364_v19 = vrot.slane %v2363_v24, 1  ;;  %v2343_v23 = vadd.f32 %v2335_v63, %v2246_v57  ;;  %v2248_v40 = vsel %vm2199_vm13, %v2232_v52, 0.0  ;;  %v2337_v47 = vsel %vm2288_vm14, %v2321_v42, 0.0 }
 0x1df   :  { %v2416_v7 = vrot.slane %v4606_v25, %v4766_v20  ;;  %v2376_v48 = vrot.slane %v2375_v60, 1  ;;  %v2344_v49 = vadd.f32 %v2336_v13, %v2247_v12  ;;  %v2358_v54 = vrot.slane %v2357_v11, 1 }
 0x1e0   :  { %v4646_v45 = vstv %s2541_s28  ;;  %v2370_v37 = vrot.slane %v2369_v16, 1  ;;  %v2420_v3 = vrot.slane %v4606_v25, %v4768_v53  ;;  %v2345_v15 = vadd.f32 %v2337_v47, %v2248_v40 }
 0x1e1   :  { %v2365_v9 = vadd.f32 %v2364_v19, %v2363_v24  ;;  %v2428_v21 = vrot.slane %v4606_v25, %v4769_v43  ;;  %vm4652_vm15 = vcmp.ne.s32.totalorder %v2416_v7, 0  ;;  %v2424_v0 = vrot.slane %v4606_v25, %v4767_v10 }
 0x1e2   :  { %v2377_v30 = vadd.f32 %v2376_v48, %v2375_v60  ;;  %v2359_v2 = vadd.f32 %v2358_v54, %v2357_v11  ;;  %v2371_v35 = vadd.f32 %v2370_v37, %v2369_v16  ;;  %vm4658_vm0 = vcmp.ne.s32.totalorder %v2420_v3, 0 }
 0x1e3   :  { %vm2404_vm1 = vcmp.gt.f32.partialorder %v2365_v9, %v4646_v45  ;;  %vm4663_vm2 = vcmp.ne.s32.totalorder %v2428_v21, 0  ;;  %v2640_v61 = vmov 1966171168   ;;  %v2432_v50 = vrot.slane %v4606_v25, %v3652_v36 }
 0x1e4   :  { %vm2406_vm3 = vcmp.gt.f32.partialorder %v2377_v30, %v4646_v45  ;;  %v2474_v26 = vunpack.c.l.s4 %v2640_v61  ;;  %vm2403_vm4 = vcmp.gt.f32.partialorder %v2359_v2, %v4646_v45  ;;  %vm2405_vm5 = vcmp.gt.f32.partialorder %v2371_v35, %v4646_v45  ;;  %vm4676_vm8 = vmand %vm2404_vm1, %vm4658_vm0 }
 0x1e5   :  { %vm2447_vm7 = vcmp.ne.s32.totalorder %v2424_v0, 0  ;;  %vm4682_vm6 = vmand %vm2406_vm3, %vm4663_vm2  ;;  %v2436_v60 = vrot.slane %v4606_v25, %v3646_v56  ;;  %v2440_v57 = vrot.slane %v4606_v25, %v3655_v39  ;;  %vm2449_vm11 = vcmp.ne.s32.totalorder %v2432_v50, 0 }
 0x1e6   :  { %vm4690_vm9 = vmand %vm2403_vm4, %vm4652_vm15  ;;  %v2475_v11 = vunpack.c.0.s8 %v2474_v26  ;;  %v2462_v56 = vsel %vm4676_vm8, 1, %v2639_v58  ;;  %v2464_v39 = vsel %vm4682_vm6, 1, %v2639_v58 }
 0x1e7   :  { %vm4696_vm10 = vmand %vm2405_vm5, %vm2447_vm7  ;;  %vm2450_vm13 = vcmp.ne.s32.totalorder %v2436_v60, 0  ;;  %v2461_v47 = vsel %vm4690_vm9, 1, %v2639_v58  ;;  %vm2451_vm15 = vcmp.ne.s32.totalorder %v2440_v57, 0 }
 0x276   :  { %v2084_v8 = vpop.f32.mrf.mxu0 }
 0x277   :  { %v2350_v59 = vmul.f32 %v2342_v5, %v2084_v8 }
 0x278   :  { %v2086_v6 = vpop.f32.mrf.mxu0 }
 0x279   :  { %v2378_v33 = vrot.slane %v2350_v59, 4  ;;  %v2155_v55 = vpop.f32.mrf.mxu1  ;;  %v2351_v20 = vmul.f32 %v2343_v23, %v2086_v6  ;;  %v2444_v23 = vrot.slane %v4606_v25, %v3649_v32  ;;  %v2463_v32 = vsel %vm4696_vm10, 1, %v2639_v58 }
 0x27a   :  { %v2352_v4 = vmul.f32 %v2344_v49, %v2155_v55  ;;  %v2469_v25 = vcombine.low %v2461_v47, %v2462_v56  ;;  %v2470_v8 = vcombine.low %v2463_v32, %v2464_v39  ;;  %v2478_v49 = vsub.s32 %v2475_v11, %v2671_v14 }
 0x27b   :  { %v2379_v53 = vadd.f32 %v2378_v33, %v2350_v59  ;;  %v2384_v34 = vrot.slane %v2351_v20, 4  ;;  %v2157_v29 = vpop.f32.mrf.mxu1  ;;  %vm2452_vm3 = vcmp.ne.s32.totalorder %v2444_v23, 0 }
 0x27c   :  { %v2390_v43 = vrot.slane %v2352_v4, 4  ;;  %v2353_v17 = vmul.f32 %v2345_v15, %v2157_v29  ;;  %v2479_v6 = vrot.slane %v2469_v25, %v2478_v49  ;;  %v2486_v15 = vrot.slane %v2470_v8, %v2478_v49 }
 0x27d   :  { %v2380_v10 = vrot.slane %v2379_v53, 2  ;;  %v2385_v27 = vadd.f32 %v2384_v34, %v2351_v20 }
 0x27e   :  { %v2391_v41 = vadd.f32 %v2390_v43, %v2352_v4  ;;  %v2396_v44 = vrot.slane %v2353_v17, 4  ;;  %v2501_v20 = vcombine.low %v2479_v6, %v2486_v15 }
 0x27f   :  { %v2381_v46 = vadd.f32 %v2380_v10, %v2379_v53  ;;  %v2386_v51 = vrot.slane %v2385_v27, 2 }
 0x280   :  { %v2392_v18 = vrot.slane %v2391_v41, 2  ;;  %v2397_v28 = vadd.f32 %v2396_v44, %v2353_v17  ;;  %v2509_v0 = vrot.slane %v2501_v20, %v2478_v49 }
 0x281   :  { %v2382_v36 = vrot.slane %v2381_v46, 1  ;;  %v2387_v24 = vadd.f32 %v2386_v51, %v2385_v27 }
 0x282   :  { %v2393_v42 = vadd.f32 %v2392_v18, %v2391_v41  ;;  %v2398_v63 = vrot.slane %v2397_v28, 2 }
 0x283   :  { %v2383_v12 = vadd.f32 %v2382_v36, %v2381_v46  ;;  %v2388_v13 = vrot.slane %v2387_v24, 1 }
 0x284   :  { %v2394_v16 = vrot.slane %v2393_v42, 1  ;;  %v2399_v19 = vadd.f32 %v2398_v63, %v2397_v28 }
 0x285   :  { %vm2407_vm12 = vcmp.gt.f32.partialorder %v2383_v12, %v4646_v45  ;;  %v2389_v40 = vadd.f32 %v2388_v13, %v2387_v24 }
 0x286   :  { %vm2457_vm14 = vmand %vm2407_vm12, %vm2449_vm11  ;;  %v2395_v7 = vadd.f32 %v2394_v16, %v2393_v42  ;;  %v2400_v48 = vrot.slane %v2399_v19, 1 }
 0x287   :  { %vm2408_vm0 = vcmp.gt.f32.partialorder %v2389_v40, %v4646_v45  ;;  %v2465_v59 = vsel %vm2457_vm14, 1, %v2639_v58 }
 0x288   :  { %vm2409_vm1 = vcmp.gt.f32.partialorder %v2395_v7, %v4646_v45  ;;  %vm2458_vm2 = vmand %vm2408_vm0, %vm2450_vm13  ;;  %v2401_v54 = vadd.f32 %v2400_v48, %v2399_v19 }
 0x289   :  { %vm2459_vm4 = vmand %vm2409_vm1, %vm2451_vm15  ;;  %v2466_v37 = vsel %vm2458_vm2, 1, %v2639_v58 }
 0x28a   :  { %vm2410_vm5 = vcmp.gt.f32.partialorder %v2401_v54, %v4646_v45  ;;  %v2471_v3 = vcombine.low %v2465_v59, %v2466_v37  ;;  %v2467_v9 = vsel %vm2459_vm4, 1, %v2639_v58 }
 0x28b   :  { %vm2460_vm7 = vmand %vm2410_vm5, %vm2452_vm3 }
 0x28c   :  { %v2468_v14 = vsel %vm2460_vm7, 1, %v2639_v58  ;;  %v2493_v33 = vrot.slane %v2471_v3, %v2478_v49 }
 0x28d   :  { %v2472_v21 = vcombine.low %v2467_v9, %v2468_v14 }
 0x28f   :  { %v2500_v55 = vrot.slane %v2472_v21, %v2478_v49 }
 0x291   :  { %v2502_v1 = vcombine.low %v2493_v33, %v2500_v55 }
 0x293   :  { %v2516_v30 = vrot.slane %v2502_v1, %v2478_v49 }
 0x295   :  { %v2517_v4 = vcombine.low %v2509_v0, %v2516_v30 }
 0x297   :  { %2518 = vst [vmem:[#allocation9] sm:$0xff] %v2517_v4 }
 0x298   :  { %2618 = shalt.err (!%p2615_p0)
}
 0x299   :  { %2528 = dma.vmem_to_hbm [thread:$0]  %s2526_s30, 128, %s4729_s3, [#allocation4]  }
 0x29a   :  { %2633 = dma.done.wait [#allocation4], 128  }
 0x29b   :  { %2634 = vsyncadd [#allocation4], 4294967168 }
 0x29c   :  { %2532 = vsyncpa [#allocation3], 1 }
 0x29d   :  { %2533 = vsyncpa [#allocation8], 1 }
 0x29e   :  { %2534 = vsyncpa [#allocation4], 1 }
 0x29f   :  { %2535 = vsyncpa [#allocation5], 1 }

</bundles_post_ra>
